<compile_context>
chip_gen: v6e
topology: v6e:2x2x1
jax: 0.10.0
libtpu: 0.0.40
codegen_flags: <defaults>
</compile_context>

<pallas_src>
import functools
import math

import jax
import jax.numpy as jnp
from jax import lax
from jax.experimental import pallas as pl
from jax.experimental.pallas import tpu as pltpu

EPS = 1e-5
V_TH = 1.0
V_RESET = 0.0

_ROW_TILE_CAP = 256                 # target row-tile (multiple of 8) for pipelining
_VMEM_LIMIT = 32 * 1024 * 1024      # safe on v5e/v6e (128 MiB) and v7x (64 MiB)


# ------------------------------ tiling helpers -------------------------------

def _row_tile(m, cap=_ROW_TILE_CAP):
    """Largest row tile <= cap that divides m and is a multiple of 8 (else full)."""
    if m <= cap:
        return m
    for t in range(cap, 7, -1):
        if m % t == 0 and t % 8 == 0:
            return t
    return m


def _dense_layout(m, c):
    """(rows, lanes, channel-repeat) for a lane-dense re-view of an (m, c) slab."""
    if c < 128 and 128 % c == 0 and (m * c) % 128 == 0:
        return (m * c) // 128, 128, 128 // c
    return m, c, 1


# ----------------------------- Pallas kernels ------------------------------

def _make_conv_bn_stats_kernel(inv_m):
    """MXU matmul per row tile + cross-tile BN batch-stats accumulation."""
    def kernel(x_ref, w_ref, gb_ref, y_ref, so_ref, sum_ref, sq_ref):
        i = pl.program_id(0)
        y = jnp.dot(x_ref[...], w_ref[...], preferred_element_type=jnp.float32)
        y_ref[...] = y

        @pl.when(i == 0)
        def _():
            sum_ref[...] = jnp.zeros_like(sum_ref)
            sq_ref[...] = jnp.zeros_like(sq_ref)

        sum_ref[...] += jnp.sum(y, axis=0, keepdims=True)
        sq_ref[...] += jnp.sum(y * y, axis=0, keepdims=True)

        @pl.when(i == pl.num_programs(0) - 1)
        def _():
            mean = sum_ref[...] * inv_m
            var = jnp.maximum(sq_ref[...] * inv_m - mean * mean, 0.0)  # biased var
            scale = gb_ref[0:1, :] * lax.rsqrt(var + EPS)
            so_ref[0:1, :] = scale
            so_ref[1:2, :] = gb_ref[1:2, :] - mean * scale

    return kernel


def _bn_if_kernel(y_ref, so_ref, v_ref, s_ref, vout_ref):
    # BN-apply (y*scale + offset) + IF charge / fire / hard reset, in place on v.
    v = v_ref[...] + y_ref[...] * so_ref[0:1, :] + so_ref[1:2, :]
    spike = v >= V_TH
    s_ref[...] = spike.astype(s_ref.dtype)
    vout_ref[...] = jnp.where(spike, V_RESET, v)


def _bn_if_res_kernel(y_ref, so_ref, yd_ref, sod_ref, v_ref, s_ref, vout_ref):
    # Two BN-applies (main path + 1x1 downsample), residual add, IF, hard reset.
    yn = y_ref[...] * so_ref[0:1, :] + so_ref[1:2, :]
    yd = yd_ref[...] * sod_ref[0:1, :] + sod_ref[1:2, :]
    v = v_ref[...] + yn + yd
    spike = v >= V_TH
    s_ref[...] = spike.astype(s_ref.dtype)
    vout_ref[...] = jnp.where(spike, V_RESET, v)


def _make_maxpool_kernel(c):
    def kernel(x_ref, o_ref):
        x = x_ref[...]                                     # (t, 2, Wo, 2C)
        r = jnp.maximum(x[:, 0, :, :], x[:, 1, :, :])      # max over H pair
        o_ref[...] = jnp.maximum(r[:, :, 0:c], r[:, :, c:2 * c])  # max over W pair
    return kernel


# ------------------------------ kernel wrappers -----------------------------

def conv_bn_stats(x, w, gamma, beta):
    """conv-as-matmul (tiled over rows) + BN batch stats -> (y (M,C) f32, (2,C) scale/offset)."""
    M, K = x.shape
    C = w.shape[1]
    tm = _row_tile(M)
    gb = jnp.stack([gamma, beta]).astype(jnp.float32)      # (2, C)
    y, so = pl.pallas_call(
        _make_conv_bn_stats_kernel(1.0 / M),
        out_shape=(jax.ShapeDtypeStruct((M, C), jnp.float32),
                   jax.ShapeDtypeStruct((2, C), jnp.float32)),
        grid=(M // tm,),
        in_specs=[pl.BlockSpec((tm, K), lambda i: (i, 0)),
                  pl.BlockSpec((K, C), lambda i: (0, 0)),
                  pl.BlockSpec((2, C), lambda i: (0, 0))],
        out_specs=(pl.BlockSpec((tm, C), lambda i: (i, 0)),
                   pl.BlockSpec((2, C), lambda i: (0, 0))),
        scratch_shapes=[pltpu.VMEM((1, C), jnp.float32),
                        pltpu.VMEM((1, C), jnp.float32)],
        compiler_params=pltpu.CompilerParams(
            dimension_semantics=("arbitrary",),            # sequential: stats accumulate
            vmem_limit_bytes=_VMEM_LIMIT),
    )(x, w.astype(x.dtype), gb)
    return y, so


def bn_if(y, so, v_dense, c):
    """Fused BN-apply + IF. Lane-dense layout; v aliased in place; spikes in bf16."""
    m = y.shape[0]
    r, l, rep = _dense_layout(m, c)
    y_d = y.reshape(r, l)
    so_d = jnp.tile(so, (1, rep)) if rep > 1 else so
    tr = _row_tile(r)
    spike, v_out = pl.pallas_call(
        _bn_if_kernel,
        out_shape=(jax.ShapeDtypeStruct((r, l), jnp.bfloat16),
                   jax.ShapeDtypeStruct((r, l), jnp.float32)),
        grid=(r // tr,),
        in_specs=[pl.BlockSpec((tr, l), lambda i: (i, 0)),
                  pl.BlockSpec((2, l), lambda i: (0, 0)),
                  pl.BlockSpec((tr, l), lambda i: (i, 0))],
        out_specs=(pl.BlockSpec((tr, l), lambda i: (i, 0)),
                   pl.BlockSpec((tr, l), lambda i: (i, 0))),
        input_output_aliases={2: 1},                       # v updated in place
        compiler_params=pltpu.CompilerParams(dimension_semantics=("parallel",)),
    )(y_d, so_d, v_dense)
    return spike.reshape(m, c), v_out


def bn_if_res(y, so, yd, sod, v_dense, c):
    """Fused BN-apply (main + downsample) + residual add + IF."""
    m = y.shape[0]
    r, l, rep = _dense_layout(m, c)
    y_d = y.reshape(r, l)
    yd_d = yd.reshape(r, l)
    so_d = jnp.tile(so, (1, rep)) if rep > 1 else so
    sod_d = jnp.tile(sod, (1, rep)) if rep > 1 else sod
    tr = _row_tile(r)
    spike, v_out = pl.pallas_call(
        _bn_if_res_kernel,
        out_shape=(jax.ShapeDtypeStruct((r, l), jnp.bfloat16),
                   jax.ShapeDtypeStruct((r, l), jnp.float32)),
        grid=(r // tr,),
        in_specs=[pl.BlockSpec((tr, l), lambda i: (i, 0)),
                  pl.BlockSpec((2, l), lambda i: (0, 0)),
                  pl.BlockSpec((tr, l), lambda i: (i, 0)),
                  pl.BlockSpec((2, l), lambda i: (0, 0)),
                  pl.BlockSpec((tr, l), lambda i: (i, 0))],
        out_specs=(pl.BlockSpec((tr, l), lambda i: (i, 0)),
                   pl.BlockSpec((tr, l), lambda i: (i, 0))),
        input_output_aliases={4: 1},                       # v updated in place
        compiler_params=pltpu.CompilerParams(dimension_semantics=("parallel",)),
    )(y_d, so_d, yd_d, sod_d, v_dense)
    return spike.reshape(m, c), v_out


def maxpool2x2(x):
    """MaxPool2d(2). x: (N, H, W, C) spikes; window gather done by a free re-view."""
    N, H, W, C = x.shape
    Ho, Wo = H // 2, W // 2
    xv = x.reshape(N * Ho, 2, Wo, 2 * C)                   # free row-major re-view
    tr = _row_tile(N * Ho)
    out = pl.pallas_call(
        _make_maxpool_kernel(C),
        out_shape=jax.ShapeDtypeStruct((N * Ho, Wo, C), x.dtype),
        grid=((N * Ho) // tr,),
        in_specs=[pl.BlockSpec((tr, 2, Wo, 2 * C), lambda i: (i, 0, 0, 0))],
        out_specs=pl.BlockSpec((tr, Wo, C), lambda i: (i, 0, 0)),
        compiler_params=pltpu.CompilerParams(dimension_semantics=("parallel",)),
    )(xv)
    return out.reshape(N, Ho, Wo, C)


# ------------------------------ plain-JAX glue -------------------------------

def im2col_3x3(x):
    # (N, H, W, C) -> (N*H*W, 9*C), patch features ordered (ky, kx, cin).
    N, H, W, C = x.shape
    xp = jnp.pad(x, ((0, 0), (1, 1), (1, 1), (0, 0)))
    cols = [xp[:, dy:dy + H, dx:dx + W, :] for dy in range(3) for dx in range(3)]
    return jnp.concatenate(cols, axis=-1).reshape(N * H * W, 9 * C)


# ---------------------------- parameters / state -----------------------------

def kaiming_conv(key, kh, kw, cin, cout):
    # nn.init.kaiming_normal_(w, mode='fan_out', nonlinearity='leaky_relu')
    fan_out = cout * kh * kw
    gain = math.sqrt(2.0 / (1.0 + 0.01 ** 2))
    std = gain / math.sqrt(fan_out)
    w = jax.random.normal(key, (kh, kw, cin, cout), jnp.float32) * std
    return w.reshape(kh * kw * cin, cout)   # rows ordered (ky, kx, cin) to match im2col


def bn_params(c):
    return jnp.ones((c,), jnp.float32), jnp.zeros((c,), jnp.float32)


def init_block_params(key, cin, planes):
    k1, k2, k3, kd = jax.random.split(key, 4)
    g, b = bn_params(planes)
    return {
        'w1': kaiming_conv(k1, 3, 3, cin, planes), 'g1': g, 'b1': b,
        'w2': kaiming_conv(k2, 3, 3, planes, planes), 'g2': g, 'b2': b,
        'w3': kaiming_conv(k3, 3, 3, planes, planes), 'g3': g, 'b3': b,
        'wd': kaiming_conv(kd, 1, 1, cin, planes), 'gd': g, 'bd': b,
    }


def init_params(key, img_channel, channels):
    keys = jax.random.split(key, 1 + len(channels))
    g0, b0 = bn_params(3)
    params = {'conv1': kaiming_conv(keys[0], 3, 3, img_channel, 3), 'g0': g0, 'b0': b0}
    inplanes = 3
    for i, c in enumerate(channels):
        params[f'block{i + 1}'] = init_block_params(keys[i + 1], inplanes, c)
        inplanes = c
    return params


def init_state(N, H, W, channels):
    def vz(m, c):
        r, l, _ = _dense_layout(m, c)
        return jnp.zeros((r, l), jnp.float32)
    state = {'v0': vz(N * H * W, 3)}
    h, w = H, W
    for i, c in enumerate(channels):
        state[f'block{i + 1}'] = {
            'v1': vz(N * h * w, c), 'v2': vz(N * h * w, c), 'v3': vz(N * h * w, c),
        }
        h //= 2
        w //= 2
    return state


# --------------------------------- forward ----------------------------------

def block_forward(x, bp, st):
    # x: (N, H, W, Cin) bf16 spikes.
    N, H, W, Cin = x.shape
    planes = bp['w1'].shape[1]
    M = N * H * W
    y1, so1 = conv_bn_stats(im2col_3x3(x), bp['w1'], bp['g1'], bp['b1'])
    s1, v1 = bn_if(y1, so1, st['v1'], planes)
    y2, so2 = conv_bn_stats(im2col_3x3(s1.reshape(N, H, W, planes)),
                            bp['w2'], bp['g2'], bp['b2'])
    s2, v2 = bn_if(y2, so2, st['v2'], planes)
    y3, so3 = conv_bn_stats(im2col_3x3(s2.reshape(N, H, W, planes)),
                            bp['w3'], bp['g3'], bp['b3'])
    yd, sod = conv_bn_stats(x.reshape(M, Cin), bp['wd'], bp['gd'], bp['bd'])
    s3, v3 = bn_if_res(y3, so3, yd, sod, st['v3'], planes)
    out = maxpool2x2(s3.reshape(N, H, W, planes))
    return out, {'v1': v1, 'v2': v2, 'v3': v3}


@functools.partial(jax.jit, static_argnames=('channels', 'T'))
def jelly_resnet12_forward(x_nchw, params, channels, T):
    # x_nchw: (N, C, H, W) — same convention as the PyTorch module.
    x = jnp.transpose(x_nchw, (0, 2, 3, 1)).astype(jnp.float32)
    N, H, W, _ = x.shape
    # conv1 + bn1 computed ONCE (f32); the stateful top IF neuron sees it every step.
    y0, so0 = conv_bn_stats(im2col_3x3(x), params['conv1'], params['g0'], params['b0'])

    state0 = init_state(N, H, W, channels)
    counter0 = jnp.zeros((N, H // 16, W // 16, channels[-1]), jnp.float32)

    def step(carry, _):
        state, counter = carry
        s0, v0 = bn_if(y0, so0, state['v0'], 3)
        new_state = {'v0': v0}
        a = s0.reshape(N, H, W, 3).astype(jnp.bfloat16)    # spikes are exact in bf16
        for i in range(len(channels)):
            name = f'block{i + 1}'
            a, new_state[name] = block_forward(a, params[name], state[name])
        counter = counter + a.astype(jnp.float32)
        return (new_state, counter), None

    (_, counter), _ = lax.scan(step, (state0, counter0), xs=None, length=T)
    out = counter / T                       # (N, H/16, W/16, channels[-1]), NHWC
    return jnp.transpose(out, (0, 3, 1, 2))  # back to NCHW


if __name__ == "__main__":
    key = jax.random.PRNGKey(0)
    k_x, k_p = jax.random.split(key)

    channels = (4, 8, 16, 32)
    T = 4
    N, img_channel, img_size = 2, 3, 16

    x = jax.random.normal(k_x, (N, img_channel, img_size, img_size), jnp.float32)
    params = init_params(k_p, img_channel, channels)

    out = jelly_resnet12_forward(x, params, channels, T)
    out = jax.block_until_ready(out)

    assert out.shape == (N, channels[-1], img_size // 16, img_size // 16), out.shape
    assert bool(jnp.all(jnp.isfinite(out)))
    print("KERNEL_OK")
</pallas_src>

<mosaic_0001>
module attributes {stable_mosaic.version = 11 : i64} {
  func.func @kernel(%arg0: i32, %arg1: memref<256x27xf32, #tpu.memory_space<vmem>>, %arg2: memref<27x3xf32, #tpu.memory_space<vmem>>, %arg3: memref<2x3xf32, #tpu.memory_space<vmem>>, %arg4: memref<256x3xf32, #tpu.memory_space<vmem>>, %arg5: memref<2x3xf32, #tpu.memory_space<vmem>>, %arg6: memref<1x3xf32, #tpu.memory_space<vmem>>, %arg7: memref<1x3xf32, #tpu.memory_space<vmem>>) attributes {dimension_semantics = [#tpu.dimension_semantics<arbitrary>], iteration_bounds = array<i64: 2>, scalar_prefetch = 0 : i64, scratch_operands = 2 : i64, tpu.core_type = #tpu.core_type<tc>, window_params = [{transform_indices = @transform_0, window_bounds = array<i64: 256, 27>}, {pipeline_mode = #tpu.pipeline_mode<synchronous>, transform_indices = @transform_1, window_bounds = array<i64: 27, 3>}, {pipeline_mode = #tpu.pipeline_mode<synchronous>, transform_indices = @transform_2, window_bounds = array<i64: 2, 3>}, {transform_indices = @transform_3, window_bounds = array<i64: 256, 3>}, {pipeline_mode = #tpu.pipeline_mode<synchronous>, transform_indices = @transform_4, window_bounds = array<i64: 2, 3>}]} {
    %c0 = arith.constant 0 : index
    %c0_0 = arith.constant 0 : index
    %0 = vector.load %arg1[%c0, %c0_0] : memref<256x27xf32, #tpu.memory_space<vmem>>, vector<256x27xf32>
    %c0_1 = arith.constant 0 : index
    %c0_2 = arith.constant 0 : index
    %1 = vector.load %arg2[%c0_1, %c0_2] : memref<27x3xf32, #tpu.memory_space<vmem>>, vector<27x3xf32>
    %cst = arith.constant dense<0.000000e+00> : vector<256x3xf32>
    %2 = tpu.matmul %0, %1, %cst {dimension_numbers = #tpu.dot_dimension_numbers<[1], [0], [0], [1], [0, 0, 1, 1], [], []>} : vector<256x27xf32>, vector<27x3xf32>, vector<256x3xf32> -> vector<256x3xf32>
    %c0_3 = arith.constant 0 : index
    %c0_4 = arith.constant 0 : index
    %3 = vector.load %arg4[%c0_3, %c0_4] : memref<256x3xf32, #tpu.memory_space<vmem>>, vector<256x3xf32>
    tpu.vector_store %arg4[%c0_3, %c0_4], %2 {strides = array<i32>} : memref<256x3xf32, #tpu.memory_space<vmem>>, vector<256x3xf32>,
    %c0_i32 = arith.constant 0 : i32
    %4 = arith.cmpi eq, %arg0, %c0_i32 : i32
    %5 = arith.extui %4 : i1 to i32
    %c0_i32_5 = arith.constant 0 : i32
    %6 = arith.cmpi ne, %5, %c0_i32_5 : i32
    scf.if %6 {
      %cst_17 = arith.constant 0.000000e+00 : f32
      %21 = vector.broadcast %cst_17 : f32 to vector<1x3xf32>
      %c0_18 = arith.constant 0 : index
      %c0_19 = arith.constant 0 : index
      %22 = vector.load %arg6[%c0_18, %c0_19] : memref<1x3xf32, #tpu.memory_space<vmem>>, vector<1x3xf32>
      tpu.vector_store %arg6[%c0_18, %c0_19], %21 {strides = array<i32>} : memref<1x3xf32, #tpu.memory_space<vmem>>, vector<1x3xf32>,
      %cst_20 = arith.constant 0.000000e+00 : f32
      %23 = vector.broadcast %cst_20 : f32 to vector<1x3xf32>
      %c0_21 = arith.constant 0 : index
      %c0_22 = arith.constant 0 : index
      %24 = vector.load %arg7[%c0_21, %c0_22] : memref<1x3xf32, #tpu.memory_space<vmem>>, vector<1x3xf32>
      tpu.vector_store %arg7[%c0_21, %c0_22], %23 {strides = array<i32>} : memref<1x3xf32, #tpu.memory_space<vmem>>, vector<1x3xf32>,
    } else {
    }
    %c0_6 = arith.constant 0 : index
    %c0_7 = arith.constant 0 : index
    %7 = vector.load %arg6[%c0_6, %c0_7] : memref<1x3xf32, #tpu.memory_space<vmem>>, vector<1x3xf32>
    %cst_8 = arith.constant dense<0.000000e+00> : vector<3xf32>
    %8 = vector.multi_reduction <add>, %2, %cst_8 [0] : vector<256x3xf32> to vector<3xf32>
    %9 = vector.shape_cast %8 : vector<3xf32> to vector<1x3xf32>
    %10 = arith.addf %7, %9 : vector<1x3xf32>
    %c0_9 = arith.constant 0 : index
    %c0_10 = arith.constant 0 : index
    %11 = vector.load %arg6[%c0_9, %c0_10] : memref<1x3xf32, #tpu.memory_space<vmem>>, vector<1x3xf32>
    tpu.vector_store %arg6[%c0_9, %c0_10], %10 {strides = array<i32>} : memref<1x3xf32, #tpu.memory_space<vmem>>, vector<1x3xf32>,
    %c0_11 = arith.constant 0 : index
    %c0_12 = arith.constant 0 : index
    %12 = vector.load %arg7[%c0_11, %c0_12] : memref<1x3xf32, #tpu.memory_space<vmem>>, vector<1x3xf32>
    %13 = arith.mulf %2, %2 : vector<256x3xf32>
    %cst_13 = arith.constant dense<0.000000e+00> : vector<3xf32>
    %14 = vector.multi_reduction <add>, %13, %cst_13 [0] : vector<256x3xf32> to vector<3xf32>
    %15 = vector.shape_cast %14 : vector<3xf32> to vector<1x3xf32>
    %16 = arith.addf %12, %15 : vector<1x3xf32>
    %c0_14 = arith.constant 0 : index
    %c0_15 = arith.constant 0 : index
    %17 = vector.load %arg7[%c0_14, %c0_15] : memref<1x3xf32, #tpu.memory_space<vmem>>, vector<1x3xf32>
    tpu.vector_store %arg7[%c0_14, %c0_15], %16 {strides = array<i32>} : memref<1x3xf32, #tpu.memory_space<vmem>>, vector<1x3xf32>,
    %c1_i32 = arith.constant 1 : i32
    %18 = arith.cmpi eq, %arg0, %c1_i32 : i32
    %19 = arith.extui %18 : i1 to i32
    %c0_i32_16 = arith.constant 0 : i32
    %20 = arith.cmpi ne, %19, %c0_i32_16 : i32
    scf.if %20 {
      %c0_17 = arith.constant 0 : index
      %c0_18 = arith.constant 0 : index
      %21 = vector.load %arg6[%c0_17, %c0_18] : memref<1x3xf32, #tpu.memory_space<vmem>>, vector<1x3xf32>
      %cst_19 = arith.constant 0.001953125 : f32
      %22 = vector.broadcast %cst_19 : f32 to vector<1x3xf32>
      %23 = arith.mulf %21, %22 : vector<1x3xf32>
      %c0_20 = arith.constant 0 : index
      %c0_21 = arith.constant 0 : index
      %24 = vector.load %arg7[%c0_20, %c0_21] : memref<1x3xf32, #tpu.memory_space<vmem>>, vector<1x3xf32>
      %cst_22 = arith.constant 0.001953125 : f32
      %25 = vector.broadcast %cst_22 : f32 to vector<1x3xf32>
      %26 = arith.mulf %24, %25 : vector<1x3xf32>
      %27 = arith.mulf %23, %23 : vector<1x3xf32>
      %28 = arith.subf %26, %27 : vector<1x3xf32>
      %cst_23 = arith.constant 0.000000e+00 : f32
      %29 = vector.broadcast %cst_23 : f32 to vector<1x3xf32>
      %30 = arith.maximumf %28, %29 : vector<1x3xf32>
      %c0_24 = arith.constant 0 : index
      %c0_25 = arith.constant 0 : index
      %31 = vector.load %arg3[%c0_24, %c0_25] : memref<2x3xf32, #tpu.memory_space<vmem>>, vector<1x3xf32>
      %cst_26 = arith.constant 9.99999974E-6 : f32
      %32 = vector.broadcast %cst_26 : f32 to vector<1x3xf32>
      %33 = arith.addf %30, %32 : vector<1x3xf32>
      %34 = math.rsqrt %33 : vector<1x3xf32>
      %35 = arith.mulf %31, %34 : vector<1x3xf32>
      %c0_27 = arith.constant 0 : index
      %c0_28 = arith.constant 0 : index
      %36 = vector.load %arg5[%c0_27, %c0_28] : memref<2x3xf32, #tpu.memory_space<vmem>>, vector<1x3xf32>
      tpu.vector_store %arg5[%c0_27, %c0_28], %35 {strides = array<i32>} : memref<2x3xf32, #tpu.memory_space<vmem>>, vector<1x3xf32>,
      %c1 = arith.constant 1 : index
      %c0_29 = arith.constant 0 : index
      %37 = vector.load %arg3[%c1, %c0_29] : memref<2x3xf32, #tpu.memory_space<vmem>>, vector<1x3xf32>
      %38 = arith.mulf %23, %35 : vector<1x3xf32>
      %39 = arith.subf %37, %38 : vector<1x3xf32>
      %c1_30 = arith.constant 1 : index
      %c0_31 = arith.constant 0 : index
      %40 = vector.load %arg5[%c1_30, %c0_31] : memref<2x3xf32, #tpu.memory_space<vmem>>, vector<1x3xf32>
      tpu.vector_store %arg5[%c1_30, %c0_31], %39 {strides = array<i32>} : memref<2x3xf32, #tpu.memory_space<vmem>>, vector<1x3xf32>,
    } else {
    }
    return
  }
  func.func @transform_0(%arg0: i32) -> (i32, i32) {
    %c0_i32 = arith.constant 0 : i32
    %c0_i32_0 = arith.constant 0 : i32
    return %arg0, %c0_i32 : i32, i32
  }
  func.func @transform_1(%arg0: i32) -> (i32, i32) {
    %c0_i32 = arith.constant 0 : i32
    %c0_i32_0 = arith.constant 0 : i32
    %c0_i32_1 = arith.constant 0 : i32
    return %c0_i32, %c0_i32_0 : i32, i32
  }
  func.func @transform_2(%arg0: i32) -> (i32, i32) {
    %c0_i32 = arith.constant 0 : i32
    %c0_i32_0 = arith.constant 0 : i32
    %c0_i32_1 = arith.constant 0 : i32
    return %c0_i32, %c0_i32_0 : i32, i32
  }
  func.func @transform_3(%arg0: i32) -> (i32, i32) {
    %c0_i32 = arith.constant 0 : i32
    %c0_i32_0 = arith.constant 0 : i32
    return %arg0, %c0_i32 : i32, i32
  }
  func.func @transform_4(%arg0: i32) -> (i32, i32) {
    %c0_i32 = arith.constant 0 : i32
    %c0_i32_0 = arith.constant 0 : i32
    %c0_i32_1 = arith.constant 0 : i32
    return %c0_i32, %c0_i32_0 : i32, i32
  }
}

module attributes {stable_mosaic.version = 11 : i64} {
  func.func @_bn_if_kernel(%arg0: i32, %arg1: memref<256x3xf32, #tpu.memory_space<vmem>>, %arg2: memref<2x3xf32, #tpu.memory_space<vmem>>, %arg3: memref<256x3xf32, #tpu.memory_space<vmem>>, %arg4: memref<256x3xbf16, #tpu.memory_space<vmem>>, %arg5: memref<256x3xf32, #tpu.memory_space<vmem>>) attributes {dimension_semantics = [#tpu.dimension_semantics<parallel>], iteration_bounds = array<i64: 2>, scalar_prefetch = 0 : i64, scratch_operands = 0 : i64, tpu.core_type = #tpu.core_type<tc>, window_params = [{transform_indices = @transform_0, window_bounds = array<i64: 256, 3>}, {pipeline_mode = #tpu.pipeline_mode<synchronous>, transform_indices = @transform_1, window_bounds = array<i64: 2, 3>}, {transform_indices = @transform_2, window_bounds = array<i64: 256, 3>}, {transform_indices = @transform_3, window_bounds = array<i64: 256, 3>}, {transform_indices = @transform_4, window_bounds = array<i64: 256, 3>}]} {
    %c0 = arith.constant 0 : index
    %c0_0 = arith.constant 0 : index
    %0 = vector.load %arg3[%c0, %c0_0] : memref<256x3xf32, #tpu.memory_space<vmem>>, vector<256x3xf32>
    %c0_1 = arith.constant 0 : index
    %c0_2 = arith.constant 0 : index
    %1 = vector.load %arg1[%c0_1, %c0_2] : memref<256x3xf32, #tpu.memory_space<vmem>>, vector<256x3xf32>
    %c0_3 = arith.constant 0 : index
    %c0_4 = arith.constant 0 : index
    %2 = vector.load %arg2[%c0_3, %c0_4] : memref<2x3xf32, #tpu.memory_space<vmem>>, vector<1x3xf32>
    %3 = vector.broadcast %2 : vector<1x3xf32> to vector<256x3xf32>
    %4 = arith.mulf %1, %3 : vector<256x3xf32>
    %5 = arith.addf %0, %4 : vector<256x3xf32>
    %c1 = arith.constant 1 : index
    %c0_5 = arith.constant 0 : index
    %6 = vector.load %arg2[%c1, %c0_5] : memref<2x3xf32, #tpu.memory_space<vmem>>, vector<1x3xf32>
    %7 = vector.broadcast %6 : vector<1x3xf32> to vector<256x3xf32>
    %8 = arith.addf %5, %7 : vector<256x3xf32>
    %cst = arith.constant 1.000000e+00 : f32
    %9 = vector.broadcast %cst : f32 to vector<256x3xf32>
    %10 = arith.cmpf oge, %8, %9 : vector<256x3xf32>
    %11 = arith.extui %10 : vector<256x3xi1> to vector<256x3xi32>
    %12 = arith.sitofp %11 : vector<256x3xi32> to vector<256x3xf32>
    %13 = arith.truncf %12 : vector<256x3xf32> to vector<256x3xbf16>
    %c0_6 = arith.constant 0 : index
    %c0_7 = arith.constant 0 : index
    %14 = vector.load %arg4[%c0_6, %c0_7] : memref<256x3xbf16, #tpu.memory_space<vmem>>, vector<256x3xbf16>
    tpu.vector_store %arg4[%c0_6, %c0_7], %13 {strides = array<i32>} : memref<256x3xbf16, #tpu.memory_space<vmem>>, vector<256x3xbf16>,
    %cst_8 = arith.constant 0.000000e+00 : f32
    %15 = vector.broadcast %cst_8 : f32 to vector<256x3xf32>
    %16 = arith.select %10, %15, %8 : vector<256x3xi1>, vector<256x3xf32>
    %c0_9 = arith.constant 0 : index
    %c0_10 = arith.constant 0 : index
    %17 = vector.load %arg5[%c0_9, %c0_10] : memref<256x3xf32, #tpu.memory_space<vmem>>, vector<256x3xf32>
    tpu.vector_store %arg5[%c0_9, %c0_10], %16 {strides = array<i32>} : memref<256x3xf32, #tpu.memory_space<vmem>>, vector<256x3xf32>,
    return
  }
  func.func @transform_0(%arg0: i32) -> (i32, i32) {
    %c0_i32 = arith.constant 0 : i32
    %c0_i32_0 = arith.constant 0 : i32
    return %arg0, %c0_i32 : i32, i32
  }
  func.func @transform_1(%arg0: i32) -> (i32, i32) {
    %c0_i32 = arith.constant 0 : i32
    %c0_i32_0 = arith.constant 0 : i32
    %c0_i32_1 = arith.constant 0 : i32
    return %c0_i32, %c0_i32_0 : i32, i32
  }
  func.func @transform_2(%arg0: i32) -> (i32, i32) {
    %c0_i32 = arith.constant 0 : i32
    %c0_i32_0 = arith.constant 0 : i32
    return %arg0, %c0_i32 : i32, i32
  }
  func.func @transform_3(%arg0: i32) -> (i32, i32) {
    %c0_i32 = arith.constant 0 : i32
    %c0_i32_0 = arith.constant 0 : i32
    return %arg0, %c0_i32 : i32, i32
  }
  func.func @transform_4(%arg0: i32) -> (i32, i32) {
    %c0_i32 = arith.constant 0 : i32
    %c0_i32_0 = arith.constant 0 : i32
    return %arg0, %c0_i32 : i32, i32
  }
}

module attributes {stable_mosaic.version = 11 : i64} {
  func.func @kernel(%arg0: i32, %arg1: memref<256x3xbf16, #tpu.memory_space<vmem>>, %arg2: memref<3x4xbf16, #tpu.memory_space<vmem>>, %arg3: memref<2x4xf32, #tpu.memory_space<vmem>>, %arg4: memref<256x4xf32, #tpu.memory_space<vmem>>, %arg5: memref<2x4xf32, #tpu.memory_space<vmem>>, %arg6: memref<1x4xf32, #tpu.memory_space<vmem>>, %arg7: memref<1x4xf32, #tpu.memory_space<vmem>>) attributes {dimension_semantics = [#tpu.dimension_semantics<arbitrary>], iteration_bounds = array<i64: 2>, scalar_prefetch = 0 : i64, scratch_operands = 2 : i64, tpu.core_type = #tpu.core_type<tc>, window_params = [{transform_indices = @transform_0, window_bounds = array<i64: 256, 3>}, {pipeline_mode = #tpu.pipeline_mode<synchronous>, transform_indices = @transform_1, window_bounds = array<i64: 3, 4>}, {pipeline_mode = #tpu.pipeline_mode<synchronous>, transform_indices = @transform_2, window_bounds = array<i64: 2, 4>}, {transform_indices = @transform_3, window_bounds = array<i64: 256, 4>}, {pipeline_mode = #tpu.pipeline_mode<synchronous>, transform_indices = @transform_4, window_bounds = array<i64: 2, 4>}]} {
    %c0 = arith.constant 0 : index
    %c0_0 = arith.constant 0 : index
    %0 = vector.load %arg1[%c0, %c0_0] : memref<256x3xbf16, #tpu.memory_space<vmem>>, vector<256x3xbf16>
    %c0_1 = arith.constant 0 : index
    %c0_2 = arith.constant 0 : index
    %1 = vector.load %arg2[%c0_1, %c0_2] : memref<3x4xbf16, #tpu.memory_space<vmem>>, vector<3x4xbf16>
    %cst = arith.constant dense<0.000000e+00> : vector<256x4xf32>
    %2 = tpu.matmul %0, %1, %cst {dimension_numbers = #tpu.dot_dimension_numbers<[1], [0], [0], [1], [0, 0, 1, 1], [], []>} : vector<256x3xbf16>, vector<3x4xbf16>, vector<256x4xf32> -> vector<256x4xf32>
    %c0_3 = arith.constant 0 : index
    %c0_4 = arith.constant 0 : index
    %3 = vector.load %arg4[%c0_3, %c0_4] : memref<256x4xf32, #tpu.memory_space<vmem>>, vector<256x4xf32>
    tpu.vector_store %arg4[%c0_3, %c0_4], %2 {strides = array<i32>} : memref<256x4xf32, #tpu.memory_space<vmem>>, vector<256x4xf32>,
    %c0_i32 = arith.constant 0 : i32
    %4 = arith.cmpi eq, %arg0, %c0_i32 : i32
    %5 = arith.extui %4 : i1 to i32
    %c0_i32_5 = arith.constant 0 : i32
    %6 = arith.cmpi ne, %5, %c0_i32_5 : i32
    scf.if %6 {
      %cst_17 = arith.constant 0.000000e+00 : f32
      %21 = vector.broadcast %cst_17 : f32 to vector<1x4xf32>
      %c0_18 = arith.constant 0 : index
      %c0_19 = arith.constant 0 : index
      %22 = vector.load %arg6[%c0_18, %c0_19] : memref<1x4xf32, #tpu.memory_space<vmem>>, vector<1x4xf32>
      tpu.vector_store %arg6[%c0_18, %c0_19], %21 {strides = array<i32>} : memref<1x4xf32, #tpu.memory_space<vmem>>, vector<1x4xf32>,
      %cst_20 = arith.constant 0.000000e+00 : f32
      %23 = vector.broadcast %cst_20 : f32 to vector<1x4xf32>
      %c0_21 = arith.constant 0 : index
      %c0_22 = arith.constant 0 : index
      %24 = vector.load %arg7[%c0_21, %c0_22] : memref<1x4xf32, #tpu.memory_space<vmem>>, vector<1x4xf32>
      tpu.vector_store %arg7[%c0_21, %c0_22], %23 {strides = array<i32>} : memref<1x4xf32, #tpu.memory_space<vmem>>, vector<1x4xf32>,
    } else {
    }
    %c0_6 = arith.constant 0 : index
    %c0_7 = arith.constant 0 : index
    %7 = vector.load %arg6[%c0_6, %c0_7] : memref<1x4xf32, #tpu.memory_space<vmem>>, vector<1x4xf32>
    %cst_8 = arith.constant dense<0.000000e+00> : vector<4xf32>
    %8 = vector.multi_reduction <add>, %2, %cst_8 [0] : vector<256x4xf32> to vector<4xf32>
    %9 = vector.shape_cast %8 : vector<4xf32> to vector<1x4xf32>
    %10 = arith.addf %7, %9 : vector<1x4xf32>
    %c0_9 = arith.constant 0 : index
    %c0_10 = arith.constant 0 : index
    %11 = vector.load %arg6[%c0_9, %c0_10] : memref<1x4xf32, #tpu.memory_space<vmem>>, vector<1x4xf32>
    tpu.vector_store %arg6[%c0_9, %c0_10], %10 {strides = array<i32>} : memref<1x4xf32, #tpu.memory_space<vmem>>, vector<1x4xf32>,
    %c0_11 = arith.constant 0 : index
    %c0_12 = arith.constant 0 : index
    %12 = vector.load %arg7[%c0_11, %c0_12] : memref<1x4xf32, #tpu.memory_space<vmem>>, vector<1x4xf32>
    %13 = arith.mulf %2, %2 : vector<256x4xf32>
    %cst_13 = arith.constant dense<0.000000e+00> : vector<4xf32>
    %14 = vector.multi_reduction <add>, %13, %cst_13 [0] : vector<256x4xf32> to vector<4xf32>
    %15 = vector.shape_cast %14 : vector<4xf32> to vector<1x4xf32>
    %16 = arith.addf %12, %15 : vector<1x4xf32>
    %c0_14 = arith.constant 0 : index
    %c0_15 = arith.constant 0 : index
    %17 = vector.load %arg7[%c0_14, %c0_15] : memref<1x4xf32, #tpu.memory_space<vmem>>, vector<1x4xf32>
    tpu.vector_store %arg7[%c0_14, %c0_15], %16 {strides = array<i32>} : memref<1x4xf32, #tpu.memory_space<vmem>>, vector<1x4xf32>,
    %c1_i32 = arith.constant 1 : i32
    %18 = arith.cmpi eq, %arg0, %c1_i32 : i32
    %19 = arith.extui %18 : i1 to i32
    %c0_i32_16 = arith.constant 0 : i32
    %20 = arith.cmpi ne, %19, %c0_i32_16 : i32
    scf.if %20 {
      %c0_17 = arith.constant 0 : index
      %c0_18 = arith.constant 0 : index
      %21 = vector.load %arg6[%c0_17, %c0_18] : memref<1x4xf32, #tpu.memory_space<vmem>>, vector<1x4xf32>
      %cst_19 = arith.constant 0.001953125 : f32
      %22 = vector.broadcast %cst_19 : f32 to vector<1x4xf32>
      %23 = arith.mulf %21, %22 : vector<1x4xf32>
      %c0_20 = arith.constant 0 : index
      %c0_21 = arith.constant 0 : index
      %24 = vector.load %arg7[%c0_20, %c0_21] : memref<1x4xf32, #tpu.memory_space<vmem>>, vector<1x4xf32>
      %cst_22 = arith.constant 0.001953125 : f32
      %25 = vector.broadcast %cst_22 : f32 to vector<1x4xf32>
      %26 = arith.mulf %24, %25 : vector<1x4xf32>
      %27 = arith.mulf %23, %23 : vector<1x4xf32>
      %28 = arith.subf %26, %27 : vector<1x4xf32>
      %cst_23 = arith.constant 0.000000e+00 : f32
      %29 = vector.broadcast %cst_23 : f32 to vector<1x4xf32>
      %30 = arith.maximumf %28, %29 : vector<1x4xf32>
      %c0_24 = arith.constant 0 : index
      %c0_25 = arith.constant 0 : index
      %31 = vector.load %arg3[%c0_24, %c0_25] : memref<2x4xf32, #tpu.memory_space<vmem>>, vector<1x4xf32>
      %cst_26 = arith.constant 9.99999974E-6 : f32
      %32 = vector.broadcast %cst_26 : f32 to vector<1x4xf32>
      %33 = arith.addf %30, %32 : vector<1x4xf32>
      %34 = math.rsqrt %33 : vector<1x4xf32>
      %35 = arith.mulf %31, %34 : vector<1x4xf32>
      %c0_27 = arith.constant 0 : index
      %c0_28 = arith.constant 0 : index
      %36 = vector.load %arg5[%c0_27, %c0_28] : memref<2x4xf32, #tpu.memory_space<vmem>>, vector<1x4xf32>
      tpu.vector_store %arg5[%c0_27, %c0_28], %35 {strides = array<i32>} : memref<2x4xf32, #tpu.memory_space<vmem>>, vector<1x4xf32>,
      %c1 = arith.constant 1 : index
      %c0_29 = arith.constant 0 : index
      %37 = vector.load %arg3[%c1, %c0_29] : memref<2x4xf32, #tpu.memory_space<vmem>>, vector<1x4xf32>
      %38 = arith.mulf %23, %35 : vector<1x4xf32>
      %39 = arith.subf %37, %38 : vector<1x4xf32>
      %c1_30 = arith.constant 1 : index
      %c0_31 = arith.constant 0 : index
      %40 = vector.load %arg5[%c1_30, %c0_31] : memref<2x4xf32, #tpu.memory_space<vmem>>, vector<1x4xf32>
      tpu.vector_store %arg5[%c1_30, %c0_31], %39 {strides = array<i32>} : memref<2x4xf32, #tpu.memory_space<vmem>>, vector<1x4xf32>,
    } else {
    }
    return
  }
  func.func @transform_0(%arg0: i32) -> (i32, i32) {
    %c0_i32 = arith.constant 0 : i32
    %c0_i32_0 = arith.constant 0 : i32
    return %arg0, %c0_i32 : i32, i32
  }
  func.func @transform_1(%arg0: i32) -> (i32, i32) {
    %c0_i32 = arith.constant 0 : i32
    %c0_i32_0 = arith.constant 0 : i32
    %c0_i32_1 = arith.constant 0 : i32
    return %c0_i32, %c0_i32_0 : i32, i32
  }
  func.func @transform_2(%arg0: i32) -> (i32, i32) {
    %c0_i32 = arith.constant 0 : i32
    %c0_i32_0 = arith.constant 0 : i32
    %c0_i32_1 = arith.constant 0 : i32
    return %c0_i32, %c0_i32_0 : i32, i32
  }
  func.func @transform_3(%arg0: i32) -> (i32, i32) {
    %c0_i32 = arith.constant 0 : i32
    %c0_i32_0 = arith.constant 0 : i32
    return %arg0, %c0_i32 : i32, i32
  }
  func.func @transform_4(%arg0: i32) -> (i32, i32) {
    %c0_i32 = arith.constant 0 : i32
    %c0_i32_0 = arith.constant 0 : i32
    %c0_i32_1 = arith.constant 0 : i32
    return %c0_i32, %c0_i32_0 : i32, i32
  }
}

module attributes {stable_mosaic.version = 11 : i64} {
  func.func @kernel(%arg0: i32, %arg1: memref<256x27xbf16, #tpu.memory_space<vmem>>, %arg2: memref<27x4xbf16, #tpu.memory_space<vmem>>, %arg3: memref<2x4xf32, #tpu.memory_space<vmem>>, %arg4: memref<256x4xf32, #tpu.memory_space<vmem>>, %arg5: memref<2x4xf32, #tpu.memory_space<vmem>>, %arg6: memref<1x4xf32, #tpu.memory_space<vmem>>, %arg7: memref<1x4xf32, #tpu.memory_space<vmem>>) attributes {dimension_semantics = [#tpu.dimension_semantics<arbitrary>], iteration_bounds = array<i64: 2>, scalar_prefetch = 0 : i64, scratch_operands = 2 : i64, tpu.core_type = #tpu.core_type<tc>, window_params = [{transform_indices = @transform_0, window_bounds = array<i64: 256, 27>}, {pipeline_mode = #tpu.pipeline_mode<synchronous>, transform_indices = @transform_1, window_bounds = array<i64: 27, 4>}, {pipeline_mode = #tpu.pipeline_mode<synchronous>, transform_indices = @transform_2, window_bounds = array<i64: 2, 4>}, {transform_indices = @transform_3, window_bounds = array<i64: 256, 4>}, {pipeline_mode = #tpu.pipeline_mode<synchronous>, transform_indices = @transform_4, window_bounds = array<i64: 2, 4>}]} {
    %c0 = arith.constant 0 : index
    %c0_0 = arith.constant 0 : index
    %0 = vector.load %arg1[%c0, %c0_0] : memref<256x27xbf16, #tpu.memory_space<vmem>>, vector<256x27xbf16>
    %c0_1 = arith.constant 0 : index
    %c0_2 = arith.constant 0 : index
    %1 = vector.load %arg2[%c0_1, %c0_2] : memref<27x4xbf16, #tpu.memory_space<vmem>>, vector<27x4xbf16>
    %cst = arith.constant dense<0.000000e+00> : vector<256x4xf32>
    %2 = tpu.matmul %0, %1, %cst {dimension_numbers = #tpu.dot_dimension_numbers<[1], [0], [0], [1], [0, 0, 1, 1], [], []>} : vector<256x27xbf16>, vector<27x4xbf16>, vector<256x4xf32> -> vector<256x4xf32>
    %c0_3 = arith.constant 0 : index
    %c0_4 = arith.constant 0 : index
    %3 = vector.load %arg4[%c0_3, %c0_4] : memref<256x4xf32, #tpu.memory_space<vmem>>, vector<256x4xf32>
    tpu.vector_store %arg4[%c0_3, %c0_4], %2 {strides = array<i32>} : memref<256x4xf32, #tpu.memory_space<vmem>>, vector<256x4xf32>,
    %c0_i32 = arith.constant 0 : i32
    %4 = arith.cmpi eq, %arg0, %c0_i32 : i32
    %5 = arith.extui %4 : i1 to i32
    %c0_i32_5 = arith.constant 0 : i32
    %6 = arith.cmpi ne, %5, %c0_i32_5 : i32
    scf.if %6 {
      %cst_17 = arith.constant 0.000000e+00 : f32
      %21 = vector.broadcast %cst_17 : f32 to vector<1x4xf32>
      %c0_18 = arith.constant 0 : index
      %c0_19 = arith.constant 0 : index
      %22 = vector.load %arg6[%c0_18, %c0_19] : memref<1x4xf32, #tpu.memory_space<vmem>>, vector<1x4xf32>
      tpu.vector_store %arg6[%c0_18, %c0_19], %21 {strides = array<i32>} : memref<1x4xf32, #tpu.memory_space<vmem>>, vector<1x4xf32>,
      %cst_20 = arith.constant 0.000000e+00 : f32
      %23 = vector.broadcast %cst_20 : f32 to vector<1x4xf32>
      %c0_21 = arith.constant 0 : index
      %c0_22 = arith.constant 0 : index
      %24 = vector.load %arg7[%c0_21, %c0_22] : memref<1x4xf32, #tpu.memory_space<vmem>>, vector<1x4xf32>
      tpu.vector_store %arg7[%c0_21, %c0_22], %23 {strides = array<i32>} : memref<1x4xf32, #tpu.memory_space<vmem>>, vector<1x4xf32>,
    } else {
    }
    %c0_6 = arith.constant 0 : index
    %c0_7 = arith.constant 0 : index
    %7 = vector.load %arg6[%c0_6, %c0_7] : memref<1x4xf32, #tpu.memory_space<vmem>>, vector<1x4xf32>
    %cst_8 = arith.constant dense<0.000000e+00> : vector<4xf32>
    %8 = vector.multi_reduction <add>, %2, %cst_8 [0] : vector<256x4xf32> to vector<4xf32>
    %9 = vector.shape_cast %8 : vector<4xf32> to vector<1x4xf32>
    %10 = arith.addf %7, %9 : vector<1x4xf32>
    %c0_9 = arith.constant 0 : index
    %c0_10 = arith.constant 0 : index
    %11 = vector.load %arg6[%c0_9, %c0_10] : memref<1x4xf32, #tpu.memory_space<vmem>>, vector<1x4xf32>
    tpu.vector_store %arg6[%c0_9, %c0_10], %10 {strides = array<i32>} : memref<1x4xf32, #tpu.memory_space<vmem>>, vector<1x4xf32>,
    %c0_11 = arith.constant 0 : index
    %c0_12 = arith.constant 0 : index
    %12 = vector.load %arg7[%c0_11, %c0_12] : memref<1x4xf32, #tpu.memory_space<vmem>>, vector<1x4xf32>
    %13 = arith.mulf %2, %2 : vector<256x4xf32>
    %cst_13 = arith.constant dense<0.000000e+00> : vector<4xf32>
    %14 = vector.multi_reduction <add>, %13, %cst_13 [0] : vector<256x4xf32> to vector<4xf32>
    %15 = vector.shape_cast %14 : vector<4xf32> to vector<1x4xf32>
    %16 = arith.addf %12, %15 : vector<1x4xf32>
    %c0_14 = arith.constant 0 : index
    %c0_15 = arith.constant 0 : index
    %17 = vector.load %arg7[%c0_14, %c0_15] : memref<1x4xf32, #tpu.memory_space<vmem>>, vector<1x4xf32>
    tpu.vector_store %arg7[%c0_14, %c0_15], %16 {strides = array<i32>} : memref<1x4xf32, #tpu.memory_space<vmem>>, vector<1x4xf32>,
    %c1_i32 = arith.constant 1 : i32
    %18 = arith.cmpi eq, %arg0, %c1_i32 : i32
    %19 = arith.extui %18 : i1 to i32
    %c0_i32_16 = arith.constant 0 : i32
    %20 = arith.cmpi ne, %19, %c0_i32_16 : i32
    scf.if %20 {
      %c0_17 = arith.constant 0 : index
      %c0_18 = arith.constant 0 : index
      %21 = vector.load %arg6[%c0_17, %c0_18] : memref<1x4xf32, #tpu.memory_space<vmem>>, vector<1x4xf32>
      %cst_19 = arith.constant 0.001953125 : f32
      %22 = vector.broadcast %cst_19 : f32 to vector<1x4xf32>
      %23 = arith.mulf %21, %22 : vector<1x4xf32>
      %c0_20 = arith.constant 0 : index
      %c0_21 = arith.constant 0 : index
      %24 = vector.load %arg7[%c0_20, %c0_21] : memref<1x4xf32, #tpu.memory_space<vmem>>, vector<1x4xf32>
      %cst_22 = arith.constant 0.001953125 : f32
      %25 = vector.broadcast %cst_22 : f32 to vector<1x4xf32>
      %26 = arith.mulf %24, %25 : vector<1x4xf32>
      %27 = arith.mulf %23, %23 : vector<1x4xf32>
      %28 = arith.subf %26, %27 : vector<1x4xf32>
      %cst_23 = arith.constant 0.000000e+00 : f32
      %29 = vector.broadcast %cst_23 : f32 to vector<1x4xf32>
      %30 = arith.maximumf %28, %29 : vector<1x4xf32>
      %c0_24 = arith.constant 0 : index
      %c0_25 = arith.constant 0 : index
      %31 = vector.load %arg3[%c0_24, %c0_25] : memref<2x4xf32, #tpu.memory_space<vmem>>, vector<1x4xf32>
      %cst_26 = arith.constant 9.99999974E-6 : f32
      %32 = vector.broadcast %cst_26 : f32 to vector<1x4xf32>
      %33 = arith.addf %30, %32 : vector<1x4xf32>
      %34 = math.rsqrt %33 : vector<1x4xf32>
      %35 = arith.mulf %31, %34 : vector<1x4xf32>
      %c0_27 = arith.constant 0 : index
      %c0_28 = arith.constant 0 : index
      %36 = vector.load %arg5[%c0_27, %c0_28] : memref<2x4xf32, #tpu.memory_space<vmem>>, vector<1x4xf32>
      tpu.vector_store %arg5[%c0_27, %c0_28], %35 {strides = array<i32>} : memref<2x4xf32, #tpu.memory_space<vmem>>, vector<1x4xf32>,
      %c1 = arith.constant 1 : index
      %c0_29 = arith.constant 0 : index
      %37 = vector.load %arg3[%c1, %c0_29] : memref<2x4xf32, #tpu.memory_space<vmem>>, vector<1x4xf32>
      %38 = arith.mulf %23, %35 : vector<1x4xf32>
      %39 = arith.subf %37, %38 : vector<1x4xf32>
      %c1_30 = arith.constant 1 : index
      %c0_31 = arith.constant 0 : index
      %40 = vector.load %arg5[%c1_30, %c0_31] : memref<2x4xf32, #tpu.memory_space<vmem>>, vector<1x4xf32>
      tpu.vector_store %arg5[%c1_30, %c0_31], %39 {strides = array<i32>} : memref<2x4xf32, #tpu.memory_space<vmem>>, vector<1x4xf32>,
    } else {
    }
    return
  }
  func.func @transform_0(%arg0: i32) -> (i32, i32) {
    %c0_i32 = arith.constant 0 : i32
    %c0_i32_0 = arith.constant 0 : i32
    return %arg0, %c0_i32 : i32, i32
  }
  func.func @transform_1(%arg0: i32) -> (i32, i32) {
    %c0_i32 = arith.constant 0 : i32
    %c0_i32_0 = arith.constant 0 : i32
    %c0_i32_1 = arith.constant 0 : i32
    return %c0_i32, %c0_i32_0 : i32, i32
  }
  func.func @transform_2(%arg0: i32) -> (i32, i32) {
    %c0_i32 = arith.constant 0 : i32
    %c0_i32_0 = arith.constant 0 : i32
    %c0_i32_1 = arith.constant 0 : i32
    return %c0_i32, %c0_i32_0 : i32, i32
  }
  func.func @transform_3(%arg0: i32) -> (i32, i32) {
    %c0_i32 = arith.constant 0 : i32
    %c0_i32_0 = arith.constant 0 : i32
    return %arg0, %c0_i32 : i32, i32
  }
  func.func @transform_4(%arg0: i32) -> (i32, i32) {
    %c0_i32 = arith.constant 0 : i32
    %c0_i32_0 = arith.constant 0 : i32
    %c0_i32_1 = arith.constant 0 : i32
    return %c0_i32, %c0_i32_0 : i32, i32
  }
}

module attributes {stable_mosaic.version = 11 : i64} {
  func.func @_bn_if_kernel(%arg0: i32, %arg1: memref<16x128xf32, #tpu.memory_space<vmem>>, %arg2: memref<2x128xf32, #tpu.memory_space<vmem>>, %arg3: memref<16x128xf32, #tpu.memory_space<vmem>>, %arg4: memref<16x128xbf16, #tpu.memory_space<vmem>>, %arg5: memref<16x128xf32, #tpu.memory_space<vmem>>) attributes {dimension_semantics = [#tpu.dimension_semantics<parallel>], iteration_bounds = array<i64: 1>, scalar_prefetch = 0 : i64, scratch_operands = 0 : i64, tpu.core_type = #tpu.core_type<tc>, window_params = [{transform_indices = @transform_0, window_bounds = array<i64: 16, 128>}, {pipeline_mode = #tpu.pipeline_mode<synchronous>, transform_indices = @transform_1, window_bounds = array<i64: 2, 128>}, {transform_indices = @transform_2, window_bounds = array<i64: 16, 128>}, {transform_indices = @transform_3, window_bounds = array<i64: 16, 128>}, {transform_indices = @transform_4, window_bounds = array<i64: 16, 128>}]} {
    %c0 = arith.constant 0 : index
    %c0_0 = arith.constant 0 : index
    %0 = vector.load %arg3[%c0, %c0_0] : memref<16x128xf32, #tpu.memory_space<vmem>>, vector<16x128xf32>
    %c0_1 = arith.constant 0 : index
    %c0_2 = arith.constant 0 : index
    %1 = vector.load %arg1[%c0_1, %c0_2] : memref<16x128xf32, #tpu.memory_space<vmem>>, vector<16x128xf32>
    %c0_3 = arith.constant 0 : index
    %c0_4 = arith.constant 0 : index
    %2 = vector.load %arg2[%c0_3, %c0_4] : memref<2x128xf32, #tpu.memory_space<vmem>>, vector<1x128xf32>
    %3 = vector.broadcast %2 : vector<1x128xf32> to vector<16x128xf32>
    %4 = arith.mulf %1, %3 : vector<16x128xf32>
    %5 = arith.addf %0, %4 : vector<16x128xf32>
    %c1 = arith.constant 1 : index
    %c0_5 = arith.constant 0 : index
    %6 = vector.load %arg2[%c1, %c0_5] : memref<2x128xf32, #tpu.memory_space<vmem>>, vector<1x128xf32>
    %7 = vector.broadcast %6 : vector<1x128xf32> to vector<16x128xf32>
    %8 = arith.addf %5, %7 : vector<16x128xf32>
    %cst = arith.constant 1.000000e+00 : f32
    %9 = vector.broadcast %cst : f32 to vector<16x128xf32>
    %10 = arith.cmpf oge, %8, %9 : vector<16x128xf32>
    %11 = arith.extui %10 : vector<16x128xi1> to vector<16x128xi32>
    %12 = arith.sitofp %11 : vector<16x128xi32> to vector<16x128xf32>
    %13 = arith.truncf %12 : vector<16x128xf32> to vector<16x128xbf16>
    %c0_6 = arith.constant 0 : index
    %c0_7 = arith.constant 0 : index
    %14 = vector.load %arg4[%c0_6, %c0_7] : memref<16x128xbf16, #tpu.memory_space<vmem>>, vector<16x128xbf16>
    tpu.vector_store %arg4[%c0_6, %c0_7], %13 {strides = array<i32>} : memref<16x128xbf16, #tpu.memory_space<vmem>>, vector<16x128xbf16>,
    %cst_8 = arith.constant 0.000000e+00 : f32
    %15 = vector.broadcast %cst_8 : f32 to vector<16x128xf32>
    %16 = arith.select %10, %15, %8 : vector<16x128xi1>, vector<16x128xf32>
    %c0_9 = arith.constant 0 : index
    %c0_10 = arith.constant 0 : index
    %17 = vector.load %arg5[%c0_9, %c0_10] : memref<16x128xf32, #tpu.memory_space<vmem>>, vector<16x128xf32>
    tpu.vector_store %arg5[%c0_9, %c0_10], %16 {strides = array<i32>} : memref<16x128xf32, #tpu.memory_space<vmem>>, vector<16x128xf32>,
    return
  }
  func.func @transform_0(%arg0: i32) -> (i32, i32) {
    %c0_i32 = arith.constant 0 : i32
    %c0_i32_0 = arith.constant 0 : i32
    return %arg0, %c0_i32 : i32, i32
  }
  func.func @transform_1(%arg0: i32) -> (i32, i32) {
    %c0_i32 = arith.constant 0 : i32
    %c0_i32_0 = arith.constant 0 : i32
    %c0_i32_1 = arith.constant 0 : i32
    return %c0_i32, %c0_i32_0 : i32, i32
  }
  func.func @transform_2(%arg0: i32) -> (i32, i32) {
    %c0_i32 = arith.constant 0 : i32
    %c0_i32_0 = arith.constant 0 : i32
    return %arg0, %c0_i32 : i32, i32
  }
  func.func @transform_3(%arg0: i32) -> (i32, i32) {
    %c0_i32 = arith.constant 0 : i32
    %c0_i32_0 = arith.constant 0 : i32
    return %arg0, %c0_i32 : i32, i32
  }
  func.func @transform_4(%arg0: i32) -> (i32, i32) {
    %c0_i32 = arith.constant 0 : i32
    %c0_i32_0 = arith.constant 0 : i32
    return %arg0, %c0_i32 : i32, i32
  }
}

module attributes {stable_mosaic.version = 11 : i64} {
  func.func @kernel(%arg0: i32, %arg1: memref<256x36xbf16, #tpu.memory_space<vmem>>, %arg2: memref<36x4xbf16, #tpu.memory_space<vmem>>, %arg3: memref<2x4xf32, #tpu.memory_space<vmem>>, %arg4: memref<256x4xf32, #tpu.memory_space<vmem>>, %arg5: memref<2x4xf32, #tpu.memory_space<vmem>>, %arg6: memref<1x4xf32, #tpu.memory_space<vmem>>, %arg7: memref<1x4xf32, #tpu.memory_space<vmem>>) attributes {dimension_semantics = [#tpu.dimension_semantics<arbitrary>], iteration_bounds = array<i64: 2>, scalar_prefetch = 0 : i64, scratch_operands = 2 : i64, tpu.core_type = #tpu.core_type<tc>, window_params = [{transform_indices = @transform_0, window_bounds = array<i64: 256, 36>}, {pipeline_mode = #tpu.pipeline_mode<synchronous>, transform_indices = @transform_1, window_bounds = array<i64: 36, 4>}, {pipeline_mode = #tpu.pipeline_mode<synchronous>, transform_indices = @transform_2, window_bounds = array<i64: 2, 4>}, {transform_indices = @transform_3, window_bounds = array<i64: 256, 4>}, {pipeline_mode = #tpu.pipeline_mode<synchronous>, transform_indices = @transform_4, window_bounds = array<i64: 2, 4>}]} {
    %c0 = arith.constant 0 : index
    %c0_0 = arith.constant 0 : index
    %0 = vector.load %arg1[%c0, %c0_0] : memref<256x36xbf16, #tpu.memory_space<vmem>>, vector<256x36xbf16>
    %c0_1 = arith.constant 0 : index
    %c0_2 = arith.constant 0 : index
    %1 = vector.load %arg2[%c0_1, %c0_2] : memref<36x4xbf16, #tpu.memory_space<vmem>>, vector<36x4xbf16>
    %cst = arith.constant dense<0.000000e+00> : vector<256x4xf32>
    %2 = tpu.matmul %0, %1, %cst {dimension_numbers = #tpu.dot_dimension_numbers<[1], [0], [0], [1], [0, 0, 1, 1], [], []>} : vector<256x36xbf16>, vector<36x4xbf16>, vector<256x4xf32> -> vector<256x4xf32>
    %c0_3 = arith.constant 0 : index
    %c0_4 = arith.constant 0 : index
    %3 = vector.load %arg4[%c0_3, %c0_4] : memref<256x4xf32, #tpu.memory_space<vmem>>, vector<256x4xf32>
    tpu.vector_store %arg4[%c0_3, %c0_4], %2 {strides = array<i32>} : memref<256x4xf32, #tpu.memory_space<vmem>>, vector<256x4xf32>,
    %c0_i32 = arith.constant 0 : i32
    %4 = arith.cmpi eq, %arg0, %c0_i32 : i32
    %5 = arith.extui %4 : i1 to i32
    %c0_i32_5 = arith.constant 0 : i32
    %6 = arith.cmpi ne, %5, %c0_i32_5 : i32
    scf.if %6 {
      %cst_17 = arith.constant 0.000000e+00 : f32
      %21 = vector.broadcast %cst_17 : f32 to vector<1x4xf32>
      %c0_18 = arith.constant 0 : index
      %c0_19 = arith.constant 0 : index
      %22 = vector.load %arg6[%c0_18, %c0_19] : memref<1x4xf32, #tpu.memory_space<vmem>>, vector<1x4xf32>
      tpu.vector_store %arg6[%c0_18, %c0_19], %21 {strides = array<i32>} : memref<1x4xf32, #tpu.memory_space<vmem>>, vector<1x4xf32>,
      %cst_20 = arith.constant 0.000000e+00 : f32
      %23 = vector.broadcast %cst_20 : f32 to vector<1x4xf32>
      %c0_21 = arith.constant 0 : index
      %c0_22 = arith.constant 0 : index
      %24 = vector.load %arg7[%c0_21, %c0_22] : memref<1x4xf32, #tpu.memory_space<vmem>>, vector<1x4xf32>
      tpu.vector_store %arg7[%c0_21, %c0_22], %23 {strides = array<i32>} : memref<1x4xf32, #tpu.memory_space<vmem>>, vector<1x4xf32>,
    } else {
    }
    %c0_6 = arith.constant 0 : index
    %c0_7 = arith.constant 0 : index
    %7 = vector.load %arg6[%c0_6, %c0_7] : memref<1x4xf32, #tpu.memory_space<vmem>>, vector<1x4xf32>
    %cst_8 = arith.constant dense<0.000000e+00> : vector<4xf32>
    %8 = vector.multi_reduction <add>, %2, %cst_8 [0] : vector<256x4xf32> to vector<4xf32>
    %9 = vector.shape_cast %8 : vector<4xf32> to vector<1x4xf32>
    %10 = arith.addf %7, %9 : vector<1x4xf32>
    %c0_9 = arith.constant 0 : index
    %c0_10 = arith.constant 0 : index
    %11 = vector.load %arg6[%c0_9, %c0_10] : memref<1x4xf32, #tpu.memory_space<vmem>>, vector<1x4xf32>
    tpu.vector_store %arg6[%c0_9, %c0_10], %10 {strides = array<i32>} : memref<1x4xf32, #tpu.memory_space<vmem>>, vector<1x4xf32>,
    %c0_11 = arith.constant 0 : index
    %c0_12 = arith.constant 0 : index
    %12 = vector.load %arg7[%c0_11, %c0_12] : memref<1x4xf32, #tpu.memory_space<vmem>>, vector<1x4xf32>
    %13 = arith.mulf %2, %2 : vector<256x4xf32>
    %cst_13 = arith.constant dense<0.000000e+00> : vector<4xf32>
    %14 = vector.multi_reduction <add>, %13, %cst_13 [0] : vector<256x4xf32> to vector<4xf32>
    %15 = vector.shape_cast %14 : vector<4xf32> to vector<1x4xf32>
    %16 = arith.addf %12, %15 : vector<1x4xf32>
    %c0_14 = arith.constant 0 : index
    %c0_15 = arith.constant 0 : index
    %17 = vector.load %arg7[%c0_14, %c0_15] : memref<1x4xf32, #tpu.memory_space<vmem>>, vector<1x4xf32>
    tpu.vector_store %arg7[%c0_14, %c0_15], %16 {strides = array<i32>} : memref<1x4xf32, #tpu.memory_space<vmem>>, vector<1x4xf32>,
    %c1_i32 = arith.constant 1 : i32
    %18 = arith.cmpi eq, %arg0, %c1_i32 : i32
    %19 = arith.extui %18 : i1 to i32
    %c0_i32_16 = arith.constant 0 : i32
    %20 = arith.cmpi ne, %19, %c0_i32_16 : i32
    scf.if %20 {
      %c0_17 = arith.constant 0 : index
      %c0_18 = arith.constant 0 : index
      %21 = vector.load %arg6[%c0_17, %c0_18] : memref<1x4xf32, #tpu.memory_space<vmem>>, vector<1x4xf32>
      %cst_19 = arith.constant 0.001953125 : f32
      %22 = vector.broadcast %cst_19 : f32 to vector<1x4xf32>
      %23 = arith.mulf %21, %22 : vector<1x4xf32>
      %c0_20 = arith.constant 0 : index
      %c0_21 = arith.constant 0 : index
      %24 = vector.load %arg7[%c0_20, %c0_21] : memref<1x4xf32, #tpu.memory_space<vmem>>, vector<1x4xf32>
      %cst_22 = arith.constant 0.001953125 : f32
      %25 = vector.broadcast %cst_22 : f32 to vector<1x4xf32>
      %26 = arith.mulf %24, %25 : vector<1x4xf32>
      %27 = arith.mulf %23, %23 : vector<1x4xf32>
      %28 = arith.subf %26, %27 : vector<1x4xf32>
      %cst_23 = arith.constant 0.000000e+00 : f32
      %29 = vector.broadcast %cst_23 : f32 to vector<1x4xf32>
      %30 = arith.maximumf %28, %29 : vector<1x4xf32>
      %c0_24 = arith.constant 0 : index
      %c0_25 = arith.constant 0 : index
      %31 = vector.load %arg3[%c0_24, %c0_25] : memref<2x4xf32, #tpu.memory_space<vmem>>, vector<1x4xf32>
      %cst_26 = arith.constant 9.99999974E-6 : f32
      %32 = vector.broadcast %cst_26 : f32 to vector<1x4xf32>
      %33 = arith.addf %30, %32 : vector<1x4xf32>
      %34 = math.rsqrt %33 : vector<1x4xf32>
      %35 = arith.mulf %31, %34 : vector<1x4xf32>
      %c0_27 = arith.constant 0 : index
      %c0_28 = arith.constant 0 : index
      %36 = vector.load %arg5[%c0_27, %c0_28] : memref<2x4xf32, #tpu.memory_space<vmem>>, vector<1x4xf32>
      tpu.vector_store %arg5[%c0_27, %c0_28], %35 {strides = array<i32>} : memref<2x4xf32, #tpu.memory_space<vmem>>, vector<1x4xf32>,
      %c1 = arith.constant 1 : index
      %c0_29 = arith.constant 0 : index
      %37 = vector.load %arg3[%c1, %c0_29] : memref<2x4xf32, #tpu.memory_space<vmem>>, vector<1x4xf32>
      %38 = arith.mulf %23, %35 : vector<1x4xf32>
      %39 = arith.subf %37, %38 : vector<1x4xf32>
      %c1_30 = arith.constant 1 : index
      %c0_31 = arith.constant 0 : index
      %40 = vector.load %arg5[%c1_30, %c0_31] : memref<2x4xf32, #tpu.memory_space<vmem>>, vector<1x4xf32>
      tpu.vector_store %arg5[%c1_30, %c0_31], %39 {strides = array<i32>} : memref<2x4xf32, #tpu.memory_space<vmem>>, vector<1x4xf32>,
    } else {
    }
    return
  }
  func.func @transform_0(%arg0: i32) -> (i32, i32) {
    %c0_i32 = arith.constant 0 : i32
    %c0_i32_0 = arith.constant 0 : i32
    return %arg0, %c0_i32 : i32, i32
  }
  func.func @transform_1(%arg0: i32) -> (i32, i32) {
    %c0_i32 = arith.constant 0 : i32
    %c0_i32_0 = arith.constant 0 : i32
    %c0_i32_1 = arith.constant 0 : i32
    return %c0_i32, %c0_i32_0 : i32, i32
  }
  func.func @transform_2(%arg0: i32) -> (i32, i32) {
    %c0_i32 = arith.constant 0 : i32
    %c0_i32_0 = arith.constant 0 : i32
    %c0_i32_1 = arith.constant 0 : i32
    return %c0_i32, %c0_i32_0 : i32, i32
  }
  func.func @transform_3(%arg0: i32) -> (i32, i32) {
    %c0_i32 = arith.constant 0 : i32
    %c0_i32_0 = arith.constant 0 : i32
    return %arg0, %c0_i32 : i32, i32
  }
  func.func @transform_4(%arg0: i32) -> (i32, i32) {
    %c0_i32 = arith.constant 0 : i32
    %c0_i32_0 = arith.constant 0 : i32
    %c0_i32_1 = arith.constant 0 : i32
    return %c0_i32, %c0_i32_0 : i32, i32
  }
}

module attributes {stable_mosaic.version = 11 : i64} {
  func.func @_bn_if_res_kernel(%arg0: i32, %arg1: memref<16x128xf32, #tpu.memory_space<vmem>>, %arg2: memref<2x128xf32, #tpu.memory_space<vmem>>, %arg3: memref<16x128xf32, #tpu.memory_space<vmem>>, %arg4: memref<2x128xf32, #tpu.memory_space<vmem>>, %arg5: memref<16x128xf32, #tpu.memory_space<vmem>>, %arg6: memref<16x128xbf16, #tpu.memory_space<vmem>>, %arg7: memref<16x128xf32, #tpu.memory_space<vmem>>) attributes {dimension_semantics = [#tpu.dimension_semantics<parallel>], iteration_bounds = array<i64: 1>, scalar_prefetch = 0 : i64, scratch_operands = 0 : i64, tpu.core_type = #tpu.core_type<tc>, window_params = [{transform_indices = @transform_0, window_bounds = array<i64: 16, 128>}, {pipeline_mode = #tpu.pipeline_mode<synchronous>, transform_indices = @transform_1, window_bounds = array<i64: 2, 128>}, {transform_indices = @transform_2, window_bounds = array<i64: 16, 128>}, {pipeline_mode = #tpu.pipeline_mode<synchronous>, transform_indices = @transform_3, window_bounds = array<i64: 2, 128>}, {transform_indices = @transform_4, window_bounds = array<i64: 16, 128>}, {transform_indices = @transform_5, window_bounds = array<i64: 16, 128>}, {transform_indices = @transform_6, window_bounds = array<i64: 16, 128>}]} {
    %c0 = arith.constant 0 : index
    %c0_0 = arith.constant 0 : index
    %0 = vector.load %arg1[%c0, %c0_0] : memref<16x128xf32, #tpu.memory_space<vmem>>, vector<16x128xf32>
    %c0_1 = arith.constant 0 : index
    %c0_2 = arith.constant 0 : index
    %1 = vector.load %arg2[%c0_1, %c0_2] : memref<2x128xf32, #tpu.memory_space<vmem>>, vector<1x128xf32>
    %2 = vector.broadcast %1 : vector<1x128xf32> to vector<16x128xf32>
    %3 = arith.mulf %0, %2 : vector<16x128xf32>
    %c1 = arith.constant 1 : index
    %c0_3 = arith.constant 0 : index
    %4 = vector.load %arg2[%c1, %c0_3] : memref<2x128xf32, #tpu.memory_space<vmem>>, vector<1x128xf32>
    %5 = vector.broadcast %4 : vector<1x128xf32> to vector<16x128xf32>
    %6 = arith.addf %3, %5 : vector<16x128xf32>
    %c0_4 = arith.constant 0 : index
    %c0_5 = arith.constant 0 : index
    %7 = vector.load %arg3[%c0_4, %c0_5] : memref<16x128xf32, #tpu.memory_space<vmem>>, vector<16x128xf32>
    %c0_6 = arith.constant 0 : index
    %c0_7 = arith.constant 0 : index
    %8 = vector.load %arg4[%c0_6, %c0_7] : memref<2x128xf32, #tpu.memory_space<vmem>>, vector<1x128xf32>
    %9 = vector.broadcast %8 : vector<1x128xf32> to vector<16x128xf32>
    %10 = arith.mulf %7, %9 : vector<16x128xf32>
    %c1_8 = arith.constant 1 : index
    %c0_9 = arith.constant 0 : index
    %11 = vector.load %arg4[%c1_8, %c0_9] : memref<2x128xf32, #tpu.memory_space<vmem>>, vector<1x128xf32>
    %12 = vector.broadcast %11 : vector<1x128xf32> to vector<16x128xf32>
    %13 = arith.addf %10, %12 : vector<16x128xf32>
    %c0_10 = arith.constant 0 : index
    %c0_11 = arith.constant 0 : index
    %14 = vector.load %arg5[%c0_10, %c0_11] : memref<16x128xf32, #tpu.memory_space<vmem>>, vector<16x128xf32>
    %15 = arith.addf %14, %6 : vector<16x128xf32>
    %16 = arith.addf %15, %13 : vector<16x128xf32>
    %cst = arith.constant 1.000000e+00 : f32
    %17 = vector.broadcast %cst : f32 to vector<16x128xf32>
    %18 = arith.cmpf oge, %16, %17 : vector<16x128xf32>
    %19 = arith.extui %18 : vector<16x128xi1> to vector<16x128xi32>
    %20 = arith.sitofp %19 : vector<16x128xi32> to vector<16x128xf32>
    %21 = arith.truncf %20 : vector<16x128xf32> to vector<16x128xbf16>
    %c0_12 = arith.constant 0 : index
    %c0_13 = arith.constant 0 : index
    %22 = vector.load %arg6[%c0_12, %c0_13] : memref<16x128xbf16, #tpu.memory_space<vmem>>, vector<16x128xbf16>
    tpu.vector_store %arg6[%c0_12, %c0_13], %21 {strides = array<i32>} : memref<16x128xbf16, #tpu.memory_space<vmem>>, vector<16x128xbf16>,
    %cst_14 = arith.constant 0.000000e+00 : f32
    %23 = vector.broadcast %cst_14 : f32 to vector<16x128xf32>
    %24 = arith.select %18, %23, %16 : vector<16x128xi1>, vector<16x128xf32>
    %c0_15 = arith.constant 0 : index
    %c0_16 = arith.constant 0 : index
    %25 = vector.load %arg7[%c0_15, %c0_16] : memref<16x128xf32, #tpu.memory_space<vmem>>, vector<16x128xf32>
    tpu.vector_store %arg7[%c0_15, %c0_16], %24 {strides = array<i32>} : memref<16x128xf32, #tpu.memory_space<vmem>>, vector<16x128xf32>,
    return
  }
  func.func @transform_0(%arg0: i32) -> (i32, i32) {
    %c0_i32 = arith.constant 0 : i32
    %c0_i32_0 = arith.constant 0 : i32
    return %arg0, %c0_i32 : i32, i32
  }
  func.func @transform_1(%arg0: i32) -> (i32, i32) {
    %c0_i32 = arith.constant 0 : i32
    %c0_i32_0 = arith.constant 0 : i32
    %c0_i32_1 = arith.constant 0 : i32
    return %c0_i32, %c0_i32_0 : i32, i32
  }
  func.func @transform_2(%arg0: i32) -> (i32, i32) {
    %c0_i32 = arith.constant 0 : i32
    %c0_i32_0 = arith.constant 0 : i32
    return %arg0, %c0_i32 : i32, i32
  }
  func.func @transform_3(%arg0: i32) -> (i32, i32) {
    %c0_i32 = arith.constant 0 : i32
    %c0_i32_0 = arith.constant 0 : i32
    %c0_i32_1 = arith.constant 0 : i32
    return %c0_i32, %c0_i32_0 : i32, i32
  }
  func.func @transform_4(%arg0: i32) -> (i32, i32) {
    %c0_i32 = arith.constant 0 : i32
    %c0_i32_0 = arith.constant 0 : i32
    return %arg0, %c0_i32 : i32, i32
  }
  func.func @transform_5(%arg0: i32) -> (i32, i32) {
    %c0_i32 = arith.constant 0 : i32
    %c0_i32_0 = arith.constant 0 : i32
    return %arg0, %c0_i32 : i32, i32
  }
  func.func @transform_6(%arg0: i32) -> (i32, i32) {
    %c0_i32 = arith.constant 0 : i32
    %c0_i32_0 = arith.constant 0 : i32
    return %arg0, %c0_i32 : i32, i32
  }
}

module attributes {stable_mosaic.version = 11 : i64} {
  func.func @kernel(%arg0: i32, %arg1: memref<16x2x8x8xbf16, #tpu.memory_space<vmem>>, %arg2: memref<16x8x4xbf16, #tpu.memory_space<vmem>>) attributes {dimension_semantics = [#tpu.dimension_semantics<parallel>], iteration_bounds = array<i64: 1>, scalar_prefetch = 0 : i64, scratch_operands = 0 : i64, tpu.core_type = #tpu.core_type<tc>, window_params = [{transform_indices = @transform_0, window_bounds = array<i64: 16, 2, 8, 8>}, {transform_indices = @transform_1, window_bounds = array<i64: 16, 8, 4>}]} {
    %c0 = arith.constant 0 : index
    %c0_0 = arith.constant 0 : index
    %c0_1 = arith.constant 0 : index
    %c0_2 = arith.constant 0 : index
    %0 = vector.load %arg1[%c0, %c0_0, %c0_1, %c0_2] : memref<16x2x8x8xbf16, #tpu.memory_space<vmem>>, vector<16x2x8x8xbf16>
    %1 = vector.extract_strided_slice %0 {offsets = [0, 0, 0, 0], sizes = [16, 1, 8, 8], strides = [1, 1, 1, 1]} : vector<16x2x8x8xbf16> to vector<16x1x8x8xbf16>
    %2 = vector.shape_cast %1 : vector<16x1x8x8xbf16> to vector<16x8x8xbf16>
    %3 = vector.extract_strided_slice %0 {offsets = [0, 1, 0, 0], sizes = [16, 1, 8, 8], strides = [1, 1, 1, 1]} : vector<16x2x8x8xbf16> to vector<16x1x8x8xbf16>
    %4 = vector.shape_cast %3 : vector<16x1x8x8xbf16> to vector<16x8x8xbf16>
    %5 = arith.maximumf %2, %4 : vector<16x8x8xbf16>
    %6 = vector.extract_strided_slice %5 {offsets = [0, 0, 0], sizes = [16, 8, 4], strides = [1, 1, 1]} : vector<16x8x8xbf16> to vector<16x8x4xbf16>
    %7 = vector.extract_strided_slice %5 {offsets = [0, 0, 4], sizes = [16, 8, 4], strides = [1, 1, 1]} : vector<16x8x8xbf16> to vector<16x8x4xbf16>
    %8 = arith.maximumf %6, %7 : vector<16x8x4xbf16>
    %c0_3 = arith.constant 0 : index
    %c0_4 = arith.constant 0 : index
    %c0_5 = arith.constant 0 : index
    %9 = vector.load %arg2[%c0_3, %c0_4, %c0_5] : memref<16x8x4xbf16, #tpu.memory_space<vmem>>, vector<16x8x4xbf16>
    tpu.vector_store %arg2[%c0_3, %c0_4, %c0_5], %8 {strides = array<i32>} : memref<16x8x4xbf16, #tpu.memory_space<vmem>>, vector<16x8x4xbf16>,
    return
  }
  func.func @transform_0(%arg0: i32) -> (i32, i32, i32, i32) {
    %c0_i32 = arith.constant 0 : i32
    %c0_i32_0 = arith.constant 0 : i32
    %c0_i32_1 = arith.constant 0 : i32
    %c0_i32_2 = arith.constant 0 : i32
    return %arg0, %c0_i32, %c0_i32_0, %c0_i32_1 : i32, i32, i32, i32
  }
  func.func @transform_1(%arg0: i32) -> (i32, i32, i32) {
    %c0_i32 = arith.constant 0 : i32
    %c0_i32_0 = arith.constant 0 : i32
    %c0_i32_1 = arith.constant 0 : i32
    return %arg0, %c0_i32, %c0_i32_0 : i32, i32, i32
  }
}

module attributes {stable_mosaic.version = 11 : i64} {
  func.func @kernel(%arg0: i32, %arg1: memref<128x4xbf16, #tpu.memory_space<vmem>>, %arg2: memref<4x8xbf16, #tpu.memory_space<vmem>>, %arg3: memref<2x8xf32, #tpu.memory_space<vmem>>, %arg4: memref<128x8xf32, #tpu.memory_space<vmem>>, %arg5: memref<2x8xf32, #tpu.memory_space<vmem>>, %arg6: memref<1x8xf32, #tpu.memory_space<vmem>>, %arg7: memref<1x8xf32, #tpu.memory_space<vmem>>) attributes {dimension_semantics = [#tpu.dimension_semantics<arbitrary>], iteration_bounds = array<i64: 1>, scalar_prefetch = 0 : i64, scratch_operands = 2 : i64, tpu.core_type = #tpu.core_type<tc>, window_params = [{transform_indices = @transform_0, window_bounds = array<i64: 128, 4>}, {pipeline_mode = #tpu.pipeline_mode<synchronous>, transform_indices = @transform_1, window_bounds = array<i64: 4, 8>}, {pipeline_mode = #tpu.pipeline_mode<synchronous>, transform_indices = @transform_2, window_bounds = array<i64: 2, 8>}, {transform_indices = @transform_3, window_bounds = array<i64: 128, 8>}, {pipeline_mode = #tpu.pipeline_mode<synchronous>, transform_indices = @transform_4, window_bounds = array<i64: 2, 8>}]} {
    %c0 = arith.constant 0 : index
    %c0_0 = arith.constant 0 : index
    %0 = vector.load %arg1[%c0, %c0_0] : memref<128x4xbf16, #tpu.memory_space<vmem>>, vector<128x4xbf16>
    %c0_1 = arith.constant 0 : index
    %c0_2 = arith.constant 0 : index
    %1 = vector.load %arg2[%c0_1, %c0_2] : memref<4x8xbf16, #tpu.memory_space<vmem>>, vector<4x8xbf16>
    %cst = arith.constant dense<0.000000e+00> : vector<128x8xf32>
    %2 = tpu.matmul %0, %1, %cst {dimension_numbers = #tpu.dot_dimension_numbers<[1], [0], [0], [1], [0, 0, 1, 1], [], []>} : vector<128x4xbf16>, vector<4x8xbf16>, vector<128x8xf32> -> vector<128x8xf32>
    %c0_3 = arith.constant 0 : index
    %c0_4 = arith.constant 0 : index
    %3 = vector.load %arg4[%c0_3, %c0_4] : memref<128x8xf32, #tpu.memory_space<vmem>>, vector<128x8xf32>
    tpu.vector_store %arg4[%c0_3, %c0_4], %2 {strides = array<i32>} : memref<128x8xf32, #tpu.memory_space<vmem>>, vector<128x8xf32>,
    %c0_i32 = arith.constant 0 : i32
    %4 = arith.cmpi eq, %arg0, %c0_i32 : i32
    %5 = arith.extui %4 : i1 to i32
    %c0_i32_5 = arith.constant 0 : i32
    %6 = arith.cmpi ne, %5, %c0_i32_5 : i32
    scf.if %6 {
      %cst_18 = arith.constant 0.000000e+00 : f32
      %21 = vector.broadcast %cst_18 : f32 to vector<1x8xf32>
      %c0_19 = arith.constant 0 : index
      %c0_20 = arith.constant 0 : index
      %22 = vector.load %arg6[%c0_19, %c0_20] : memref<1x8xf32, #tpu.memory_space<vmem>>, vector<1x8xf32>
      tpu.vector_store %arg6[%c0_19, %c0_20], %21 {strides = array<i32>} : memref<1x8xf32, #tpu.memory_space<vmem>>, vector<1x8xf32>,
      %cst_21 = arith.constant 0.000000e+00 : f32
      %23 = vector.broadcast %cst_21 : f32 to vector<1x8xf32>
      %c0_22 = arith.constant 0 : index
      %c0_23 = arith.constant 0 : index
      %24 = vector.load %arg7[%c0_22, %c0_23] : memref<1x8xf32, #tpu.memory_space<vmem>>, vector<1x8xf32>
      tpu.vector_store %arg7[%c0_22, %c0_23], %23 {strides = array<i32>} : memref<1x8xf32, #tpu.memory_space<vmem>>, vector<1x8xf32>,
    } else {
    }
    %c0_6 = arith.constant 0 : index
    %c0_7 = arith.constant 0 : index
    %7 = vector.load %arg6[%c0_6, %c0_7] : memref<1x8xf32, #tpu.memory_space<vmem>>, vector<1x8xf32>
    %cst_8 = arith.constant dense<0.000000e+00> : vector<8xf32>
    %8 = vector.multi_reduction <add>, %2, %cst_8 [0] : vector<128x8xf32> to vector<8xf32>
    %9 = vector.shape_cast %8 : vector<8xf32> to vector<1x8xf32>
    %10 = arith.addf %7, %9 : vector<1x8xf32>
    %c0_9 = arith.constant 0 : index
    %c0_10 = arith.constant 0 : index
    %11 = vector.load %arg6[%c0_9, %c0_10] : memref<1x8xf32, #tpu.memory_space<vmem>>, vector<1x8xf32>
    tpu.vector_store %arg6[%c0_9, %c0_10], %10 {strides = array<i32>} : memref<1x8xf32, #tpu.memory_space<vmem>>, vector<1x8xf32>,
    %c0_11 = arith.constant 0 : index
    %c0_12 = arith.constant 0 : index
    %12 = vector.load %arg7[%c0_11, %c0_12] : memref<1x8xf32, #tpu.memory_space<vmem>>, vector<1x8xf32>
    %13 = arith.mulf %2, %2 : vector<128x8xf32>
    %cst_13 = arith.constant dense<0.000000e+00> : vector<8xf32>
    %14 = vector.multi_reduction <add>, %13, %cst_13 [0] : vector<128x8xf32> to vector<8xf32>
    %15 = vector.shape_cast %14 : vector<8xf32> to vector<1x8xf32>
    %16 = arith.addf %12, %15 : vector<1x8xf32>
    %c0_14 = arith.constant 0 : index
    %c0_15 = arith.constant 0 : index
    %17 = vector.load %arg7[%c0_14, %c0_15] : memref<1x8xf32, #tpu.memory_space<vmem>>, vector<1x8xf32>
    tpu.vector_store %arg7[%c0_14, %c0_15], %16 {strides = array<i32>} : memref<1x8xf32, #tpu.memory_space<vmem>>, vector<1x8xf32>,
    %c0_i32_16 = arith.constant 0 : i32
    %18 = arith.cmpi eq, %arg0, %c0_i32_16 : i32
    %19 = arith.extui %18 : i1 to i32
    %c0_i32_17 = arith.constant 0 : i32
    %20 = arith.cmpi ne, %19, %c0_i32_17 : i32
    scf.if %20 {
      %c0_18 = arith.constant 0 : index
      %c0_19 = arith.constant 0 : index
      %21 = vector.load %arg6[%c0_18, %c0_19] : memref<1x8xf32, #tpu.memory_space<vmem>>, vector<1x8xf32>
      %cst_20 = arith.constant 7.812500e-03 : f32
      %22 = vector.broadcast %cst_20 : f32 to vector<1x8xf32>
      %23 = arith.mulf %21, %22 : vector<1x8xf32>
      %c0_21 = arith.constant 0 : index
      %c0_22 = arith.constant 0 : index
      %24 = vector.load %arg7[%c0_21, %c0_22] : memref<1x8xf32, #tpu.memory_space<vmem>>, vector<1x8xf32>
      %cst_23 = arith.constant 7.812500e-03 : f32
      %25 = vector.broadcast %cst_23 : f32 to vector<1x8xf32>
      %26 = arith.mulf %24, %25 : vector<1x8xf32>
      %27 = arith.mulf %23, %23 : vector<1x8xf32>
      %28 = arith.subf %26, %27 : vector<1x8xf32>
      %cst_24 = arith.constant 0.000000e+00 : f32
      %29 = vector.broadcast %cst_24 : f32 to vector<1x8xf32>
      %30 = arith.maximumf %28, %29 : vector<1x8xf32>
      %c0_25 = arith.constant 0 : index
      %c0_26 = arith.constant 0 : index
      %31 = vector.load %arg3[%c0_25, %c0_26] : memref<2x8xf32, #tpu.memory_space<vmem>>, vector<1x8xf32>
      %cst_27 = arith.constant 9.99999974E-6 : f32
      %32 = vector.broadcast %cst_27 : f32 to vector<1x8xf32>
      %33 = arith.addf %30, %32 : vector<1x8xf32>
      %34 = math.rsqrt %33 : vector<1x8xf32>
      %35 = arith.mulf %31, %34 : vector<1x8xf32>
      %c0_28 = arith.constant 0 : index
      %c0_29 = arith.constant 0 : index
      %36 = vector.load %arg5[%c0_28, %c0_29] : memref<2x8xf32, #tpu.memory_space<vmem>>, vector<1x8xf32>
      tpu.vector_store %arg5[%c0_28, %c0_29], %35 {strides = array<i32>} : memref<2x8xf32, #tpu.memory_space<vmem>>, vector<1x8xf32>,
      %c1 = arith.constant 1 : index
      %c0_30 = arith.constant 0 : index
      %37 = vector.load %arg3[%c1, %c0_30] : memref<2x8xf32, #tpu.memory_space<vmem>>, vector<1x8xf32>
      %38 = arith.mulf %23, %35 : vector<1x8xf32>
      %39 = arith.subf %37, %38 : vector<1x8xf32>
      %c1_31 = arith.constant 1 : index
      %c0_32 = arith.constant 0 : index
      %40 = vector.load %arg5[%c1_31, %c0_32] : memref<2x8xf32, #tpu.memory_space<vmem>>, vector<1x8xf32>
      tpu.vector_store %arg5[%c1_31, %c0_32], %39 {strides = array<i32>} : memref<2x8xf32, #tpu.memory_space<vmem>>, vector<1x8xf32>,
    } else {
    }
    return
  }
  func.func @transform_0(%arg0: i32) -> (i32, i32) {
    %c0_i32 = arith.constant 0 : i32
    %c0_i32_0 = arith.constant 0 : i32
    return %arg0, %c0_i32 : i32, i32
  }
  func.func @transform_1(%arg0: i32) -> (i32, i32) {
    %c0_i32 = arith.constant 0 : i32
    %c0_i32_0 = arith.constant 0 : i32
    %c0_i32_1 = arith.constant 0 : i32
    return %c0_i32, %c0_i32_0 : i32, i32
  }
  func.func @transform_2(%arg0: i32) -> (i32, i32) {
    %c0_i32 = arith.constant 0 : i32
    %c0_i32_0 = arith.constant 0 : i32
    %c0_i32_1 = arith.constant 0 : i32
    return %c0_i32, %c0_i32_0 : i32, i32
  }
  func.func @transform_3(%arg0: i32) -> (i32, i32) {
    %c0_i32 = arith.constant 0 : i32
    %c0_i32_0 = arith.constant 0 : i32
    return %arg0, %c0_i32 : i32, i32
  }
  func.func @transform_4(%arg0: i32) -> (i32, i32) {
    %c0_i32 = arith.constant 0 : i32
    %c0_i32_0 = arith.constant 0 : i32
    %c0_i32_1 = arith.constant 0 : i32
    return %c0_i32, %c0_i32_0 : i32, i32
  }
}

module attributes {stable_mosaic.version = 11 : i64} {
  func.func @kernel(%arg0: i32, %arg1: memref<128x36xbf16, #tpu.memory_space<vmem>>, %arg2: memref<36x8xbf16, #tpu.memory_space<vmem>>, %arg3: memref<2x8xf32, #tpu.memory_space<vmem>>, %arg4: memref<128x8xf32, #tpu.memory_space<vmem>>, %arg5: memref<2x8xf32, #tpu.memory_space<vmem>>, %arg6: memref<1x8xf32, #tpu.memory_space<vmem>>, %arg7: memref<1x8xf32, #tpu.memory_space<vmem>>) attributes {dimension_semantics = [#tpu.dimension_semantics<arbitrary>], iteration_bounds = array<i64: 1>, scalar_prefetch = 0 : i64, scratch_operands = 2 : i64, tpu.core_type = #tpu.core_type<tc>, window_params = [{transform_indices = @transform_0, window_bounds = array<i64: 128, 36>}, {pipeline_mode = #tpu.pipeline_mode<synchronous>, transform_indices = @transform_1, window_bounds = array<i64: 36, 8>}, {pipeline_mode = #tpu.pipeline_mode<synchronous>, transform_indices = @transform_2, window_bounds = array<i64: 2, 8>}, {transform_indices = @transform_3, window_bounds = array<i64: 128, 8>}, {pipeline_mode = #tpu.pipeline_mode<synchronous>, transform_indices = @transform_4, window_bounds = array<i64: 2, 8>}]} {
    %c0 = arith.constant 0 : index
    %c0_0 = arith.constant 0 : index
    %0 = vector.load %arg1[%c0, %c0_0] : memref<128x36xbf16, #tpu.memory_space<vmem>>, vector<128x36xbf16>
    %c0_1 = arith.constant 0 : index
    %c0_2 = arith.constant 0 : index
    %1 = vector.load %arg2[%c0_1, %c0_2] : memref<36x8xbf16, #tpu.memory_space<vmem>>, vector<36x8xbf16>
    %cst = arith.constant dense<0.000000e+00> : vector<128x8xf32>
    %2 = tpu.matmul %0, %1, %cst {dimension_numbers = #tpu.dot_dimension_numbers<[1], [0], [0], [1], [0, 0, 1, 1], [], []>} : vector<128x36xbf16>, vector<36x8xbf16>, vector<128x8xf32> -> vector<128x8xf32>
    %c0_3 = arith.constant 0 : index
    %c0_4 = arith.constant 0 : index
    %3 = vector.load %arg4[%c0_3, %c0_4] : memref<128x8xf32, #tpu.memory_space<vmem>>, vector<128x8xf32>
    tpu.vector_store %arg4[%c0_3, %c0_4], %2 {strides = array<i32>} : memref<128x8xf32, #tpu.memory_space<vmem>>, vector<128x8xf32>,
    %c0_i32 = arith.constant 0 : i32
    %4 = arith.cmpi eq, %arg0, %c0_i32 : i32
    %5 = arith.extui %4 : i1 to i32
    %c0_i32_5 = arith.constant 0 : i32
    %6 = arith.cmpi ne, %5, %c0_i32_5 : i32
    scf.if %6 {
      %cst_18 = arith.constant 0.000000e+00 : f32
      %21 = vector.broadcast %cst_18 : f32 to vector<1x8xf32>
      %c0_19 = arith.constant 0 : index
      %c0_20 = arith.constant 0 : index
      %22 = vector.load %arg6[%c0_19, %c0_20] : memref<1x8xf32, #tpu.memory_space<vmem>>, vector<1x8xf32>
      tpu.vector_store %arg6[%c0_19, %c0_20], %21 {strides = array<i32>} : memref<1x8xf32, #tpu.memory_space<vmem>>, vector<1x8xf32>,
      %cst_21 = arith.constant 0.000000e+00 : f32
      %23 = vector.broadcast %cst_21 : f32 to vector<1x8xf32>
      %c0_22 = arith.constant 0 : index
      %c0_23 = arith.constant 0 : index
      %24 = vector.load %arg7[%c0_22, %c0_23] : memref<1x8xf32, #tpu.memory_space<vmem>>, vector<1x8xf32>
      tpu.vector_store %arg7[%c0_22, %c0_23], %23 {strides = array<i32>} : memref<1x8xf32, #tpu.memory_space<vmem>>, vector<1x8xf32>,
    } else {
    }
    %c0_6 = arith.constant 0 : index
    %c0_7 = arith.constant 0 : index
    %7 = vector.load %arg6[%c0_6, %c0_7] : memref<1x8xf32, #tpu.memory_space<vmem>>, vector<1x8xf32>
    %cst_8 = arith.constant dense<0.000000e+00> : vector<8xf32>
    %8 = vector.multi_reduction <add>, %2, %cst_8 [0] : vector<128x8xf32> to vector<8xf32>
    %9 = vector.shape_cast %8 : vector<8xf32> to vector<1x8xf32>
    %10 = arith.addf %7, %9 : vector<1x8xf32>
    %c0_9 = arith.constant 0 : index
    %c0_10 = arith.constant 0 : index
    %11 = vector.load %arg6[%c0_9, %c0_10] : memref<1x8xf32, #tpu.memory_space<vmem>>, vector<1x8xf32>
    tpu.vector_store %arg6[%c0_9, %c0_10], %10 {strides = array<i32>} : memref<1x8xf32, #tpu.memory_space<vmem>>, vector<1x8xf32>,
    %c0_11 = arith.constant 0 : index
    %c0_12 = arith.constant 0 : index
    %12 = vector.load %arg7[%c0_11, %c0_12] : memref<1x8xf32, #tpu.memory_space<vmem>>, vector<1x8xf32>
    %13 = arith.mulf %2, %2 : vector<128x8xf32>
    %cst_13 = arith.constant dense<0.000000e+00> : vector<8xf32>
    %14 = vector.multi_reduction <add>, %13, %cst_13 [0] : vector<128x8xf32> to vector<8xf32>
    %15 = vector.shape_cast %14 : vector<8xf32> to vector<1x8xf32>
    %16 = arith.addf %12, %15 : vector<1x8xf32>
    %c0_14 = arith.constant 0 : index
    %c0_15 = arith.constant 0 : index
    %17 = vector.load %arg7[%c0_14, %c0_15] : memref<1x8xf32, #tpu.memory_space<vmem>>, vector<1x8xf32>
    tpu.vector_store %arg7[%c0_14, %c0_15], %16 {strides = array<i32>} : memref<1x8xf32, #tpu.memory_space<vmem>>, vector<1x8xf32>,
    %c0_i32_16 = arith.constant 0 : i32
    %18 = arith.cmpi eq, %arg0, %c0_i32_16 : i32
    %19 = arith.extui %18 : i1 to i32
    %c0_i32_17 = arith.constant 0 : i32
    %20 = arith.cmpi ne, %19, %c0_i32_17 : i32
    scf.if %20 {
      %c0_18 = arith.constant 0 : index
      %c0_19 = arith.constant 0 : index
      %21 = vector.load %arg6[%c0_18, %c0_19] : memref<1x8xf32, #tpu.memory_space<vmem>>, vector<1x8xf32>
      %cst_20 = arith.constant 7.812500e-03 : f32
      %22 = vector.broadcast %cst_20 : f32 to vector<1x8xf32>
      %23 = arith.mulf %21, %22 : vector<1x8xf32>
      %c0_21 = arith.constant 0 : index
      %c0_22 = arith.constant 0 : index
      %24 = vector.load %arg7[%c0_21, %c0_22] : memref<1x8xf32, #tpu.memory_space<vmem>>, vector<1x8xf32>
      %cst_23 = arith.constant 7.812500e-03 : f32
      %25 = vector.broadcast %cst_23 : f32 to vector<1x8xf32>
      %26 = arith.mulf %24, %25 : vector<1x8xf32>
      %27 = arith.mulf %23, %23 : vector<1x8xf32>
      %28 = arith.subf %26, %27 : vector<1x8xf32>
      %cst_24 = arith.constant 0.000000e+00 : f32
      %29 = vector.broadcast %cst_24 : f32 to vector<1x8xf32>
      %30 = arith.maximumf %28, %29 : vector<1x8xf32>
      %c0_25 = arith.constant 0 : index
      %c0_26 = arith.constant 0 : index
      %31 = vector.load %arg3[%c0_25, %c0_26] : memref<2x8xf32, #tpu.memory_space<vmem>>, vector<1x8xf32>
      %cst_27 = arith.constant 9.99999974E-6 : f32
      %32 = vector.broadcast %cst_27 : f32 to vector<1x8xf32>
      %33 = arith.addf %30, %32 : vector<1x8xf32>
      %34 = math.rsqrt %33 : vector<1x8xf32>
      %35 = arith.mulf %31, %34 : vector<1x8xf32>
      %c0_28 = arith.constant 0 : index
      %c0_29 = arith.constant 0 : index
      %36 = vector.load %arg5[%c0_28, %c0_29] : memref<2x8xf32, #tpu.memory_space<vmem>>, vector<1x8xf32>
      tpu.vector_store %arg5[%c0_28, %c0_29], %35 {strides = array<i32>} : memref<2x8xf32, #tpu.memory_space<vmem>>, vector<1x8xf32>,
      %c1 = arith.constant 1 : index
      %c0_30 = arith.constant 0 : index
      %37 = vector.load %arg3[%c1, %c0_30] : memref<2x8xf32, #tpu.memory_space<vmem>>, vector<1x8xf32>
      %38 = arith.mulf %23, %35 : vector<1x8xf32>
      %39 = arith.subf %37, %38 : vector<1x8xf32>
      %c1_31 = arith.constant 1 : index
      %c0_32 = arith.constant 0 : index
      %40 = vector.load %arg5[%c1_31, %c0_32] : memref<2x8xf32, #tpu.memory_space<vmem>>, vector<1x8xf32>
      tpu.vector_store %arg5[%c1_31, %c0_32], %39 {strides = array<i32>} : memref<2x8xf32, #tpu.memory_space<vmem>>, vector<1x8xf32>,
    } else {
    }
    return
  }
  func.func @transform_0(%arg0: i32) -> (i32, i32) {
    %c0_i32 = arith.constant 0 : i32
    %c0_i32_0 = arith.constant 0 : i32
    return %arg0, %c0_i32 : i32, i32
  }
  func.func @transform_1(%arg0: i32) -> (i32, i32) {
    %c0_i32 = arith.constant 0 : i32
    %c0_i32_0 = arith.constant 0 : i32
    %c0_i32_1 = arith.constant 0 : i32
    return %c0_i32, %c0_i32_0 : i32, i32
  }
  func.func @transform_2(%arg0: i32) -> (i32, i32) {
    %c0_i32 = arith.constant 0 : i32
    %c0_i32_0 = arith.constant 0 : i32
    %c0_i32_1 = arith.constant 0 : i32
    return %c0_i32, %c0_i32_0 : i32, i32
  }
  func.func @transform_3(%arg0: i32) -> (i32, i32) {
    %c0_i32 = arith.constant 0 : i32
    %c0_i32_0 = arith.constant 0 : i32
    return %arg0, %c0_i32 : i32, i32
  }
  func.func @transform_4(%arg0: i32) -> (i32, i32) {
    %c0_i32 = arith.constant 0 : i32
    %c0_i32_0 = arith.constant 0 : i32
    %c0_i32_1 = arith.constant 0 : i32
    return %c0_i32, %c0_i32_0 : i32, i32
  }
}

module attributes {stable_mosaic.version = 11 : i64} {
  func.func @_bn_if_kernel(%arg0: i32, %arg1: memref<8x128xf32, #tpu.memory_space<vmem>>, %arg2: memref<2x128xf32, #tpu.memory_space<vmem>>, %arg3: memref<8x128xf32, #tpu.memory_space<vmem>>, %arg4: memref<8x128xbf16, #tpu.memory_space<vmem>>, %arg5: memref<8x128xf32, #tpu.memory_space<vmem>>) attributes {dimension_semantics = [#tpu.dimension_semantics<parallel>], iteration_bounds = array<i64: 1>, scalar_prefetch = 0 : i64, scratch_operands = 0 : i64, tpu.core_type = #tpu.core_type<tc>, window_params = [{transform_indices = @transform_0, window_bounds = array<i64: 8, 128>}, {pipeline_mode = #tpu.pipeline_mode<synchronous>, transform_indices = @transform_1, window_bounds = array<i64: 2, 128>}, {transform_indices = @transform_2, window_bounds = array<i64: 8, 128>}, {transform_indices = @transform_3, window_bounds = array<i64: 8, 128>}, {transform_indices = @transform_4, window_bounds = array<i64: 8, 128>}]} {
    %c0 = arith.constant 0 : index
    %c0_0 = arith.constant 0 : index
    %0 = vector.load %arg3[%c0, %c0_0] : memref<8x128xf32, #tpu.memory_space<vmem>>, vector<8x128xf32>
    %c0_1 = arith.constant 0 : index
    %c0_2 = arith.constant 0 : index
    %1 = vector.load %arg1[%c0_1, %c0_2] : memref<8x128xf32, #tpu.memory_space<vmem>>, vector<8x128xf32>
    %c0_3 = arith.constant 0 : index
    %c0_4 = arith.constant 0 : index
    %2 = vector.load %arg2[%c0_3, %c0_4] : memref<2x128xf32, #tpu.memory_space<vmem>>, vector<1x128xf32>
    %3 = vector.broadcast %2 : vector<1x128xf32> to vector<8x128xf32>
    %4 = arith.mulf %1, %3 : vector<8x128xf32>
    %5 = arith.addf %0, %4 : vector<8x128xf32>
    %c1 = arith.constant 1 : index
    %c0_5 = arith.constant 0 : index
    %6 = vector.load %arg2[%c1, %c0_5] : memref<2x128xf32, #tpu.memory_space<vmem>>, vector<1x128xf32>
    %7 = vector.broadcast %6 : vector<1x128xf32> to vector<8x128xf32>
    %8 = arith.addf %5, %7 : vector<8x128xf32>
    %cst = arith.constant 1.000000e+00 : f32
    %9 = vector.broadcast %cst : f32 to vector<8x128xf32>
    %10 = arith.cmpf oge, %8, %9 : vector<8x128xf32>
    %11 = arith.extui %10 : vector<8x128xi1> to vector<8x128xi32>
    %12 = arith.sitofp %11 : vector<8x128xi32> to vector<8x128xf32>
    %13 = arith.truncf %12 : vector<8x128xf32> to vector<8x128xbf16>
    %c0_6 = arith.constant 0 : index
    %c0_7 = arith.constant 0 : index
    %14 = vector.load %arg4[%c0_6, %c0_7] : memref<8x128xbf16, #tpu.memory_space<vmem>>, vector<8x128xbf16>
    tpu.vector_store %arg4[%c0_6, %c0_7], %13 {strides = array<i32>} : memref<8x128xbf16, #tpu.memory_space<vmem>>, vector<8x128xbf16>,
    %cst_8 = arith.constant 0.000000e+00 : f32
    %15 = vector.broadcast %cst_8 : f32 to vector<8x128xf32>
    %16 = arith.select %10, %15, %8 : vector<8x128xi1>, vector<8x128xf32>
    %c0_9 = arith.constant 0 : index
    %c0_10 = arith.constant 0 : index
    %17 = vector.load %arg5[%c0_9, %c0_10] : memref<8x128xf32, #tpu.memory_space<vmem>>, vector<8x128xf32>
    tpu.vector_store %arg5[%c0_9, %c0_10], %16 {strides = array<i32>} : memref<8x128xf32, #tpu.memory_space<vmem>>, vector<8x128xf32>,
    return
  }
  func.func @transform_0(%arg0: i32) -> (i32, i32) {
    %c0_i32 = arith.constant 0 : i32
    %c0_i32_0 = arith.constant 0 : i32
    return %arg0, %c0_i32 : i32, i32
  }
  func.func @transform_1(%arg0: i32) -> (i32, i32) {
    %c0_i32 = arith.constant 0 : i32
    %c0_i32_0 = arith.constant 0 : i32
    %c0_i32_1 = arith.constant 0 : i32
    return %c0_i32, %c0_i32_0 : i32, i32
  }
  func.func @transform_2(%arg0: i32) -> (i32, i32) {
    %c0_i32 = arith.constant 0 : i32
    %c0_i32_0 = arith.constant 0 : i32
    return %arg0, %c0_i32 : i32, i32
  }
  func.func @transform_3(%arg0: i32) -> (i32, i32) {
    %c0_i32 = arith.constant 0 : i32
    %c0_i32_0 = arith.constant 0 : i32
    return %arg0, %c0_i32 : i32, i32
  }
  func.func @transform_4(%arg0: i32) -> (i32, i32) {
    %c0_i32 = arith.constant 0 : i32
    %c0_i32_0 = arith.constant 0 : i32
    return %arg0, %c0_i32 : i32, i32
  }
}

module attributes {stable_mosaic.version = 11 : i64} {
  func.func @kernel(%arg0: i32, %arg1: memref<128x72xbf16, #tpu.memory_space<vmem>>, %arg2: memref<72x8xbf16, #tpu.memory_space<vmem>>, %arg3: memref<2x8xf32, #tpu.memory_space<vmem>>, %arg4: memref<128x8xf32, #tpu.memory_space<vmem>>, %arg5: memref<2x8xf32, #tpu.memory_space<vmem>>, %arg6: memref<1x8xf32, #tpu.memory_space<vmem>>, %arg7: memref<1x8xf32, #tpu.memory_space<vmem>>) attributes {dimension_semantics = [#tpu.dimension_semantics<arbitrary>], iteration_bounds = array<i64: 1>, scalar_prefetch = 0 : i64, scratch_operands = 2 : i64, tpu.core_type = #tpu.core_type<tc>, window_params = [{transform_indices = @transform_0, window_bounds = array<i64: 128, 72>}, {pipeline_mode = #tpu.pipeline_mode<synchronous>, transform_indices = @transform_1, window_bounds = array<i64: 72, 8>}, {pipeline_mode = #tpu.pipeline_mode<synchronous>, transform_indices = @transform_2, window_bounds = array<i64: 2, 8>}, {transform_indices = @transform_3, window_bounds = array<i64: 128, 8>}, {pipeline_mode = #tpu.pipeline_mode<synchronous>, transform_indices = @transform_4, window_bounds = array<i64: 2, 8>}]} {
    %c0 = arith.constant 0 : index
    %c0_0 = arith.constant 0 : index
    %0 = vector.load %arg1[%c0, %c0_0] : memref<128x72xbf16, #tpu.memory_space<vmem>>, vector<128x72xbf16>
    %c0_1 = arith.constant 0 : index
    %c0_2 = arith.constant 0 : index
    %1 = vector.load %arg2[%c0_1, %c0_2] : memref<72x8xbf16, #tpu.memory_space<vmem>>, vector<72x8xbf16>
    %cst = arith.constant dense<0.000000e+00> : vector<128x8xf32>
    %2 = tpu.matmul %0, %1, %cst {dimension_numbers = #tpu.dot_dimension_numbers<[1], [0], [0], [1], [0, 0, 1, 1], [], []>} : vector<128x72xbf16>, vector<72x8xbf16>, vector<128x8xf32> -> vector<128x8xf32>
    %c0_3 = arith.constant 0 : index
    %c0_4 = arith.constant 0 : index
    %3 = vector.load %arg4[%c0_3, %c0_4] : memref<128x8xf32, #tpu.memory_space<vmem>>, vector<128x8xf32>
    tpu.vector_store %arg4[%c0_3, %c0_4], %2 {strides = array<i32>} : memref<128x8xf32, #tpu.memory_space<vmem>>, vector<128x8xf32>,
    %c0_i32 = arith.constant 0 : i32
    %4 = arith.cmpi eq, %arg0, %c0_i32 : i32
    %5 = arith.extui %4 : i1 to i32
    %c0_i32_5 = arith.constant 0 : i32
    %6 = arith.cmpi ne, %5, %c0_i32_5 : i32
    scf.if %6 {
      %cst_18 = arith.constant 0.000000e+00 : f32
      %21 = vector.broadcast %cst_18 : f32 to vector<1x8xf32>
      %c0_19 = arith.constant 0 : index
      %c0_20 = arith.constant 0 : index
      %22 = vector.load %arg6[%c0_19, %c0_20] : memref<1x8xf32, #tpu.memory_space<vmem>>, vector<1x8xf32>
      tpu.vector_store %arg6[%c0_19, %c0_20], %21 {strides = array<i32>} : memref<1x8xf32, #tpu.memory_space<vmem>>, vector<1x8xf32>,
      %cst_21 = arith.constant 0.000000e+00 : f32
      %23 = vector.broadcast %cst_21 : f32 to vector<1x8xf32>
      %c0_22 = arith.constant 0 : index
      %c0_23 = arith.constant 0 : index
      %24 = vector.load %arg7[%c0_22, %c0_23] : memref<1x8xf32, #tpu.memory_space<vmem>>, vector<1x8xf32>
      tpu.vector_store %arg7[%c0_22, %c0_23], %23 {strides = array<i32>} : memref<1x8xf32, #tpu.memory_space<vmem>>, vector<1x8xf32>,
    } else {
    }
    %c0_6 = arith.constant 0 : index
    %c0_7 = arith.constant 0 : index
    %7 = vector.load %arg6[%c0_6, %c0_7] : memref<1x8xf32, #tpu.memory_space<vmem>>, vector<1x8xf32>
    %cst_8 = arith.constant dense<0.000000e+00> : vector<8xf32>
    %8 = vector.multi_reduction <add>, %2, %cst_8 [0] : vector<128x8xf32> to vector<8xf32>
    %9 = vector.shape_cast %8 : vector<8xf32> to vector<1x8xf32>
    %10 = arith.addf %7, %9 : vector<1x8xf32>
    %c0_9 = arith.constant 0 : index
    %c0_10 = arith.constant 0 : index
    %11 = vector.load %arg6[%c0_9, %c0_10] : memref<1x8xf32, #tpu.memory_space<vmem>>, vector<1x8xf32>
    tpu.vector_store %arg6[%c0_9, %c0_10], %10 {strides = array<i32>} : memref<1x8xf32, #tpu.memory_space<vmem>>, vector<1x8xf32>,
    %c0_11 = arith.constant 0 : index
    %c0_12 = arith.constant 0 : index
    %12 = vector.load %arg7[%c0_11, %c0_12] : memref<1x8xf32, #tpu.memory_space<vmem>>, vector<1x8xf32>
    %13 = arith.mulf %2, %2 : vector<128x8xf32>
    %cst_13 = arith.constant dense<0.000000e+00> : vector<8xf32>
    %14 = vector.multi_reduction <add>, %13, %cst_13 [0] : vector<128x8xf32> to vector<8xf32>
    %15 = vector.shape_cast %14 : vector<8xf32> to vector<1x8xf32>
    %16 = arith.addf %12, %15 : vector<1x8xf32>
    %c0_14 = arith.constant 0 : index
    %c0_15 = arith.constant 0 : index
    %17 = vector.load %arg7[%c0_14, %c0_15] : memref<1x8xf32, #tpu.memory_space<vmem>>, vector<1x8xf32>
    tpu.vector_store %arg7[%c0_14, %c0_15], %16 {strides = array<i32>} : memref<1x8xf32, #tpu.memory_space<vmem>>, vector<1x8xf32>,
    %c0_i32_16 = arith.constant 0 : i32
    %18 = arith.cmpi eq, %arg0, %c0_i32_16 : i32
    %19 = arith.extui %18 : i1 to i32
    %c0_i32_17 = arith.constant 0 : i32
    %20 = arith.cmpi ne, %19, %c0_i32_17 : i32
    scf.if %20 {
      %c0_18 = arith.constant 0 : index
      %c0_19 = arith.constant 0 : index
      %21 = vector.load %arg6[%c0_18, %c0_19] : memref<1x8xf32, #tpu.memory_space<vmem>>, vector<1x8xf32>
      %cst_20 = arith.constant 7.812500e-03 : f32
      %22 = vector.broadcast %cst_20 : f32 to vector<1x8xf32>
      %23 = arith.mulf %21, %22 : vector<1x8xf32>
      %c0_21 = arith.constant 0 : index
      %c0_22 = arith.constant 0 : index
      %24 = vector.load %arg7[%c0_21, %c0_22] : memref<1x8xf32, #tpu.memory_space<vmem>>, vector<1x8xf32>
      %cst_23 = arith.constant 7.812500e-03 : f32
      %25 = vector.broadcast %cst_23 : f32 to vector<1x8xf32>
      %26 = arith.mulf %24, %25 : vector<1x8xf32>
      %27 = arith.mulf %23, %23 : vector<1x8xf32>
      %28 = arith.subf %26, %27 : vector<1x8xf32>
      %cst_24 = arith.constant 0.000000e+00 : f32
      %29 = vector.broadcast %cst_24 : f32 to vector<1x8xf32>
      %30 = arith.maximumf %28, %29 : vector<1x8xf32>
      %c0_25 = arith.constant 0 : index
      %c0_26 = arith.constant 0 : index
      %31 = vector.load %arg3[%c0_25, %c0_26] : memref<2x8xf32, #tpu.memory_space<vmem>>, vector<1x8xf32>
      %cst_27 = arith.constant 9.99999974E-6 : f32
      %32 = vector.broadcast %cst_27 : f32 to vector<1x8xf32>
      %33 = arith.addf %30, %32 : vector<1x8xf32>
      %34 = math.rsqrt %33 : vector<1x8xf32>
      %35 = arith.mulf %31, %34 : vector<1x8xf32>
      %c0_28 = arith.constant 0 : index
      %c0_29 = arith.constant 0 : index
      %36 = vector.load %arg5[%c0_28, %c0_29] : memref<2x8xf32, #tpu.memory_space<vmem>>, vector<1x8xf32>
      tpu.vector_store %arg5[%c0_28, %c0_29], %35 {strides = array<i32>} : memref<2x8xf32, #tpu.memory_space<vmem>>, vector<1x8xf32>,
      %c1 = arith.constant 1 : index
      %c0_30 = arith.constant 0 : index
      %37 = vector.load %arg3[%c1, %c0_30] : memref<2x8xf32, #tpu.memory_space<vmem>>, vector<1x8xf32>
      %38 = arith.mulf %23, %35 : vector<1x8xf32>
      %39 = arith.subf %37, %38 : vector<1x8xf32>
      %c1_31 = arith.constant 1 : index
      %c0_32 = arith.constant 0 : index
      %40 = vector.load %arg5[%c1_31, %c0_32] : memref<2x8xf32, #tpu.memory_space<vmem>>, vector<1x8xf32>
      tpu.vector_store %arg5[%c1_31, %c0_32], %39 {strides = array<i32>} : memref<2x8xf32, #tpu.memory_space<vmem>>, vector<1x8xf32>,
    } else {
    }
    return
  }
  func.func @transform_0(%arg0: i32) -> (i32, i32) {
    %c0_i32 = arith.constant 0 : i32
    %c0_i32_0 = arith.constant 0 : i32
    return %arg0, %c0_i32 : i32, i32
  }
  func.func @transform_1(%arg0: i32) -> (i32, i32) {
    %c0_i32 = arith.constant 0 : i32
    %c0_i32_0 = arith.constant 0 : i32
    %c0_i32_1 = arith.constant 0 : i32
    return %c0_i32, %c0_i32_0 : i32, i32
  }
  func.func @transform_2(%arg0: i32) -> (i32, i32) {
    %c0_i32 = arith.constant 0 : i32
    %c0_i32_0 = arith.constant 0 : i32
    %c0_i32_1 = arith.constant 0 : i32
    return %c0_i32, %c0_i32_0 : i32, i32
  }
  func.func @transform_3(%arg0: i32) -> (i32, i32) {
    %c0_i32 = arith.constant 0 : i32
    %c0_i32_0 = arith.constant 0 : i32
    return %arg0, %c0_i32 : i32, i32
  }
  func.func @transform_4(%arg0: i32) -> (i32, i32) {
    %c0_i32 = arith.constant 0 : i32
    %c0_i32_0 = arith.constant 0 : i32
    %c0_i32_1 = arith.constant 0 : i32
    return %c0_i32, %c0_i32_0 : i32, i32
  }
}

module attributes {stable_mosaic.version = 11 : i64} {
  func.func @_bn_if_res_kernel(%arg0: i32, %arg1: memref<8x128xf32, #tpu.memory_space<vmem>>, %arg2: memref<2x128xf32, #tpu.memory_space<vmem>>, %arg3: memref<8x128xf32, #tpu.memory_space<vmem>>, %arg4: memref<2x128xf32, #tpu.memory_space<vmem>>, %arg5: memref<8x128xf32, #tpu.memory_space<vmem>>, %arg6: memref<8x128xbf16, #tpu.memory_space<vmem>>, %arg7: memref<8x128xf32, #tpu.memory_space<vmem>>) attributes {dimension_semantics = [#tpu.dimension_semantics<parallel>], iteration_bounds = array<i64: 1>, scalar_prefetch = 0 : i64, scratch_operands = 0 : i64, tpu.core_type = #tpu.core_type<tc>, window_params = [{transform_indices = @transform_0, window_bounds = array<i64: 8, 128>}, {pipeline_mode = #tpu.pipeline_mode<synchronous>, transform_indices = @transform_1, window_bounds = array<i64: 2, 128>}, {transform_indices = @transform_2, window_bounds = array<i64: 8, 128>}, {pipeline_mode = #tpu.pipeline_mode<synchronous>, transform_indices = @transform_3, window_bounds = array<i64: 2, 128>}, {transform_indices = @transform_4, window_bounds = array<i64: 8, 128>}, {transform_indices = @transform_5, window_bounds = array<i64: 8, 128>}, {transform_indices = @transform_6, window_bounds = array<i64: 8, 128>}]} {
    %c0 = arith.constant 0 : index
    %c0_0 = arith.constant 0 : index
    %0 = vector.load %arg1[%c0, %c0_0] : memref<8x128xf32, #tpu.memory_space<vmem>>, vector<8x128xf32>
    %c0_1 = arith.constant 0 : index
    %c0_2 = arith.constant 0 : index
    %1 = vector.load %arg2[%c0_1, %c0_2] : memref<2x128xf32, #tpu.memory_space<vmem>>, vector<1x128xf32>
    %2 = vector.broadcast %1 : vector<1x128xf32> to vector<8x128xf32>
    %3 = arith.mulf %0, %2 : vector<8x128xf32>
    %c1 = arith.constant 1 : index
    %c0_3 = arith.constant 0 : index
    %4 = vector.load %arg2[%c1, %c0_3] : memref<2x128xf32, #tpu.memory_space<vmem>>, vector<1x128xf32>
    %5 = vector.broadcast %4 : vector<1x128xf32> to vector<8x128xf32>
    %6 = arith.addf %3, %5 : vector<8x128xf32>
    %c0_4 = arith.constant 0 : index
    %c0_5 = arith.constant 0 : index
    %7 = vector.load %arg3[%c0_4, %c0_5] : memref<8x128xf32, #tpu.memory_space<vmem>>, vector<8x128xf32>
    %c0_6 = arith.constant 0 : index
    %c0_7 = arith.constant 0 : index
    %8 = vector.load %arg4[%c0_6, %c0_7] : memref<2x128xf32, #tpu.memory_space<vmem>>, vector<1x128xf32>
    %9 = vector.broadcast %8 : vector<1x128xf32> to vector<8x128xf32>
    %10 = arith.mulf %7, %9 : vector<8x128xf32>
    %c1_8 = arith.constant 1 : index
    %c0_9 = arith.constant 0 : index
    %11 = vector.load %arg4[%c1_8, %c0_9] : memref<2x128xf32, #tpu.memory_space<vmem>>, vector<1x128xf32>
    %12 = vector.broadcast %11 : vector<1x128xf32> to vector<8x128xf32>
    %13 = arith.addf %10, %12 : vector<8x128xf32>
    %c0_10 = arith.constant 0 : index
    %c0_11 = arith.constant 0 : index
    %14 = vector.load %arg5[%c0_10, %c0_11] : memref<8x128xf32, #tpu.memory_space<vmem>>, vector<8x128xf32>
    %15 = arith.addf %14, %6 : vector<8x128xf32>
    %16 = arith.addf %15, %13 : vector<8x128xf32>
    %cst = arith.constant 1.000000e+00 : f32
    %17 = vector.broadcast %cst : f32 to vector<8x128xf32>
    %18 = arith.cmpf oge, %16, %17 : vector<8x128xf32>
    %19 = arith.extui %18 : vector<8x128xi1> to vector<8x128xi32>
    %20 = arith.sitofp %19 : vector<8x128xi32> to vector<8x128xf32>
    %21 = arith.truncf %20 : vector<8x128xf32> to vector<8x128xbf16>
    %c0_12 = arith.constant 0 : index
    %c0_13 = arith.constant 0 : index
    %22 = vector.load %arg6[%c0_12, %c0_13] : memref<8x128xbf16, #tpu.memory_space<vmem>>, vector<8x128xbf16>
    tpu.vector_store %arg6[%c0_12, %c0_13], %21 {strides = array<i32>} : memref<8x128xbf16, #tpu.memory_space<vmem>>, vector<8x128xbf16>,
    %cst_14 = arith.constant 0.000000e+00 : f32
    %23 = vector.broadcast %cst_14 : f32 to vector<8x128xf32>
    %24 = arith.select %18, %23, %16 : vector<8x128xi1>, vector<8x128xf32>
    %c0_15 = arith.constant 0 : index
    %c0_16 = arith.constant 0 : index
    %25 = vector.load %arg7[%c0_15, %c0_16] : memref<8x128xf32, #tpu.memory_space<vmem>>, vector<8x128xf32>
    tpu.vector_store %arg7[%c0_15, %c0_16], %24 {strides = array<i32>} : memref<8x128xf32, #tpu.memory_space<vmem>>, vector<8x128xf32>,
    return
  }
  func.func @transform_0(%arg0: i32) -> (i32, i32) {
    %c0_i32 = arith.constant 0 : i32
    %c0_i32_0 = arith.constant 0 : i32
    return %arg0, %c0_i32 : i32, i32
  }
  func.func @transform_1(%arg0: i32) -> (i32, i32) {
    %c0_i32 = arith.constant 0 : i32
    %c0_i32_0 = arith.constant 0 : i32
    %c0_i32_1 = arith.constant 0 : i32
    return %c0_i32, %c0_i32_0 : i32, i32
  }
  func.func @transform_2(%arg0: i32) -> (i32, i32) {
    %c0_i32 = arith.constant 0 : i32
    %c0_i32_0 = arith.constant 0 : i32
    return %arg0, %c0_i32 : i32, i32
  }
  func.func @transform_3(%arg0: i32) -> (i32, i32) {
    %c0_i32 = arith.constant 0 : i32
    %c0_i32_0 = arith.constant 0 : i32
    %c0_i32_1 = arith.constant 0 : i32
    return %c0_i32, %c0_i32_0 : i32, i32
  }
  func.func @transform_4(%arg0: i32) -> (i32, i32) {
    %c0_i32 = arith.constant 0 : i32
    %c0_i32_0 = arith.constant 0 : i32
    return %arg0, %c0_i32 : i32, i32
  }
  func.func @transform_5(%arg0: i32) -> (i32, i32) {
    %c0_i32 = arith.constant 0 : i32
    %c0_i32_0 = arith.constant 0 : i32
    return %arg0, %c0_i32 : i32, i32
  }
  func.func @transform_6(%arg0: i32) -> (i32, i32) {
    %c0_i32 = arith.constant 0 : i32
    %c0_i32_0 = arith.constant 0 : i32
    return %arg0, %c0_i32 : i32, i32
  }
}

module attributes {stable_mosaic.version = 11 : i64} {
  func.func @kernel(%arg0: i32, %arg1: memref<8x2x4x16xbf16, #tpu.memory_space<vmem>>, %arg2: memref<8x4x8xbf16, #tpu.memory_space<vmem>>) attributes {dimension_semantics = [#tpu.dimension_semantics<parallel>], iteration_bounds = array<i64: 1>, scalar_prefetch = 0 : i64, scratch_operands = 0 : i64, tpu.core_type = #tpu.core_type<tc>, window_params = [{transform_indices = @transform_0, window_bounds = array<i64: 8, 2, 4, 16>}, {transform_indices = @transform_1, window_bounds = array<i64: 8, 4, 8>}]} {
    %c0 = arith.constant 0 : index
    %c0_0 = arith.constant 0 : index
    %c0_1 = arith.constant 0 : index
    %c0_2 = arith.constant 0 : index
    %0 = vector.load %arg1[%c0, %c0_0, %c0_1, %c0_2] : memref<8x2x4x16xbf16, #tpu.memory_space<vmem>>, vector<8x2x4x16xbf16>
    %1 = vector.extract_strided_slice %0 {offsets = [0, 0, 0, 0], sizes = [8, 1, 4, 16], strides = [1, 1, 1, 1]} : vector<8x2x4x16xbf16> to vector<8x1x4x16xbf16>
    %2 = vector.shape_cast %1 : vector<8x1x4x16xbf16> to vector<8x4x16xbf16>
    %3 = vector.extract_strided_slice %0 {offsets = [0, 1, 0, 0], sizes = [8, 1, 4, 16], strides = [1, 1, 1, 1]} : vector<8x2x4x16xbf16> to vector<8x1x4x16xbf16>
    %4 = vector.shape_cast %3 : vector<8x1x4x16xbf16> to vector<8x4x16xbf16>
    %5 = arith.maximumf %2, %4 : vector<8x4x16xbf16>
    %6 = vector.extract_strided_slice %5 {offsets = [0, 0, 0], sizes = [8, 4, 8], strides = [1, 1, 1]} : vector<8x4x16xbf16> to vector<8x4x8xbf16>
    %7 = vector.extract_strided_slice %5 {offsets = [0, 0, 8], sizes = [8, 4, 8], strides = [1, 1, 1]} : vector<8x4x16xbf16> to vector<8x4x8xbf16>
    %8 = arith.maximumf %6, %7 : vector<8x4x8xbf16>
    %c0_3 = arith.constant 0 : index
    %c0_4 = arith.constant 0 : index
    %c0_5 = arith.constant 0 : index
    %9 = vector.load %arg2[%c0_3, %c0_4, %c0_5] : memref<8x4x8xbf16, #tpu.memory_space<vmem>>, vector<8x4x8xbf16>
    tpu.vector_store %arg2[%c0_3, %c0_4, %c0_5], %8 {strides = array<i32>} : memref<8x4x8xbf16, #tpu.memory_space<vmem>>, vector<8x4x8xbf16>,
    return
  }
  func.func @transform_0(%arg0: i32) -> (i32, i32, i32, i32) {
    %c0_i32 = arith.constant 0 : i32
    %c0_i32_0 = arith.constant 0 : i32
    %c0_i32_1 = arith.constant 0 : i32
    %c0_i32_2 = arith.constant 0 : i32
    return %arg0, %c0_i32, %c0_i32_0, %c0_i32_1 : i32, i32, i32, i32
  }
  func.func @transform_1(%arg0: i32) -> (i32, i32, i32) {
    %c0_i32 = arith.constant 0 : i32
    %c0_i32_0 = arith.constant 0 : i32
    %c0_i32_1 = arith.constant 0 : i32
    return %arg0, %c0_i32, %c0_i32_0 : i32, i32, i32
  }
}

module attributes {stable_mosaic.version = 11 : i64} {
  func.func @kernel(%arg0: i32, %arg1: memref<32x8xbf16, #tpu.memory_space<vmem>>, %arg2: memref<8x16xbf16, #tpu.memory_space<vmem>>, %arg3: memref<2x16xf32, #tpu.memory_space<vmem>>, %arg4: memref<32x16xf32, #tpu.memory_space<vmem>>, %arg5: memref<2x16xf32, #tpu.memory_space<vmem>>, %arg6: memref<1x16xf32, #tpu.memory_space<vmem>>, %arg7: memref<1x16xf32, #tpu.memory_space<vmem>>) attributes {dimension_semantics = [#tpu.dimension_semantics<arbitrary>], iteration_bounds = array<i64: 1>, scalar_prefetch = 0 : i64, scratch_operands = 2 : i64, tpu.core_type = #tpu.core_type<tc>, window_params = [{transform_indices = @transform_0, window_bounds = array<i64: 32, 8>}, {pipeline_mode = #tpu.pipeline_mode<synchronous>, transform_indices = @transform_1, window_bounds = array<i64: 8, 16>}, {pipeline_mode = #tpu.pipeline_mode<synchronous>, transform_indices = @transform_2, window_bounds = array<i64: 2, 16>}, {transform_indices = @transform_3, window_bounds = array<i64: 32, 16>}, {pipeline_mode = #tpu.pipeline_mode<synchronous>, transform_indices = @transform_4, window_bounds = array<i64: 2, 16>}]} {
    %c0 = arith.constant 0 : index
    %c0_0 = arith.constant 0 : index
    %0 = vector.load %arg1[%c0, %c0_0] : memref<32x8xbf16, #tpu.memory_space<vmem>>, vector<32x8xbf16>
    %c0_1 = arith.constant 0 : index
    %c0_2 = arith.constant 0 : index
    %1 = vector.load %arg2[%c0_1, %c0_2] : memref<8x16xbf16, #tpu.memory_space<vmem>>, vector<8x16xbf16>
    %cst = arith.constant dense<0.000000e+00> : vector<32x16xf32>
    %2 = tpu.matmul %0, %1, %cst {dimension_numbers = #tpu.dot_dimension_numbers<[1], [0], [0], [1], [0, 0, 1, 1], [], []>} : vector<32x8xbf16>, vector<8x16xbf16>, vector<32x16xf32> -> vector<32x16xf32>
    %c0_3 = arith.constant 0 : index
    %c0_4 = arith.constant 0 : index
    %3 = vector.load %arg4[%c0_3, %c0_4] : memref<32x16xf32, #tpu.memory_space<vmem>>, vector<32x16xf32>
    tpu.vector_store %arg4[%c0_3, %c0_4], %2 {strides = array<i32>} : memref<32x16xf32, #tpu.memory_space<vmem>>, vector<32x16xf32>,
    %c0_i32 = arith.constant 0 : i32
    %4 = arith.cmpi eq, %arg0, %c0_i32 : i32
    %5 = arith.extui %4 : i1 to i32
    %c0_i32_5 = arith.constant 0 : i32
    %6 = arith.cmpi ne, %5, %c0_i32_5 : i32
    scf.if %6 {
      %cst_18 = arith.constant 0.000000e+00 : f32
      %21 = vector.broadcast %cst_18 : f32 to vector<1x16xf32>
      %c0_19 = arith.constant 0 : index
      %c0_20 = arith.constant 0 : index
      %22 = vector.load %arg6[%c0_19, %c0_20] : memref<1x16xf32, #tpu.memory_space<vmem>>, vector<1x16xf32>
      tpu.vector_store %arg6[%c0_19, %c0_20], %21 {strides = array<i32>} : memref<1x16xf32, #tpu.memory_space<vmem>>, vector<1x16xf32>,
      %cst_21 = arith.constant 0.000000e+00 : f32
      %23 = vector.broadcast %cst_21 : f32 to vector<1x16xf32>
      %c0_22 = arith.constant 0 : index
      %c0_23 = arith.constant 0 : index
      %24 = vector.load %arg7[%c0_22, %c0_23] : memref<1x16xf32, #tpu.memory_space<vmem>>, vector<1x16xf32>
      tpu.vector_store %arg7[%c0_22, %c0_23], %23 {strides = array<i32>} : memref<1x16xf32, #tpu.memory_space<vmem>>, vector<1x16xf32>,
    } else {
    }
    %c0_6 = arith.constant 0 : index
    %c0_7 = arith.constant 0 : index
    %7 = vector.load %arg6[%c0_6, %c0_7] : memref<1x16xf32, #tpu.memory_space<vmem>>, vector<1x16xf32>
    %cst_8 = arith.constant dense<0.000000e+00> : vector<16xf32>
    %8 = vector.multi_reduction <add>, %2, %cst_8 [0] : vector<32x16xf32> to vector<16xf32>
    %9 = vector.shape_cast %8 : vector<16xf32> to vector<1x16xf32>
    %10 = arith.addf %7, %9 : vector<1x16xf32>
    %c0_9 = arith.constant 0 : index
    %c0_10 = arith.constant 0 : index
    %11 = vector.load %arg6[%c0_9, %c0_10] : memref<1x16xf32, #tpu.memory_space<vmem>>, vector<1x16xf32>
    tpu.vector_store %arg6[%c0_9, %c0_10], %10 {strides = array<i32>} : memref<1x16xf32, #tpu.memory_space<vmem>>, vector<1x16xf32>,
    %c0_11 = arith.constant 0 : index
    %c0_12 = arith.constant 0 : index
    %12 = vector.load %arg7[%c0_11, %c0_12] : memref<1x16xf32, #tpu.memory_space<vmem>>, vector<1x16xf32>
    %13 = arith.mulf %2, %2 : vector<32x16xf32>
    %cst_13 = arith.constant dense<0.000000e+00> : vector<16xf32>
    %14 = vector.multi_reduction <add>, %13, %cst_13 [0] : vector<32x16xf32> to vector<16xf32>
    %15 = vector.shape_cast %14 : vector<16xf32> to vector<1x16xf32>
    %16 = arith.addf %12, %15 : vector<1x16xf32>
    %c0_14 = arith.constant 0 : index
    %c0_15 = arith.constant 0 : index
    %17 = vector.load %arg7[%c0_14, %c0_15] : memref<1x16xf32, #tpu.memory_space<vmem>>, vector<1x16xf32>
    tpu.vector_store %arg7[%c0_14, %c0_15], %16 {strides = array<i32>} : memref<1x16xf32, #tpu.memory_space<vmem>>, vector<1x16xf32>,
    %c0_i32_16 = arith.constant 0 : i32
    %18 = arith.cmpi eq, %arg0, %c0_i32_16 : i32
    %19 = arith.extui %18 : i1 to i32
    %c0_i32_17 = arith.constant 0 : i32
    %20 = arith.cmpi ne, %19, %c0_i32_17 : i32
    scf.if %20 {
      %c0_18 = arith.constant 0 : index
      %c0_19 = arith.constant 0 : index
      %21 = vector.load %arg6[%c0_18, %c0_19] : memref<1x16xf32, #tpu.memory_space<vmem>>, vector<1x16xf32>
      %cst_20 = arith.constant 3.125000e-02 : f32
      %22 = vector.broadcast %cst_20 : f32 to vector<1x16xf32>
      %23 = arith.mulf %21, %22 : vector<1x16xf32>
      %c0_21 = arith.constant 0 : index
      %c0_22 = arith.constant 0 : index
      %24 = vector.load %arg7[%c0_21, %c0_22] : memref<1x16xf32, #tpu.memory_space<vmem>>, vector<1x16xf32>
      %cst_23 = arith.constant 3.125000e-02 : f32
      %25 = vector.broadcast %cst_23 : f32 to vector<1x16xf32>
      %26 = arith.mulf %24, %25 : vector<1x16xf32>
      %27 = arith.mulf %23, %23 : vector<1x16xf32>
      %28 = arith.subf %26, %27 : vector<1x16xf32>
      %cst_24 = arith.constant 0.000000e+00 : f32
      %29 = vector.broadcast %cst_24 : f32 to vector<1x16xf32>
      %30 = arith.maximumf %28, %29 : vector<1x16xf32>
      %c0_25 = arith.constant 0 : index
      %c0_26 = arith.constant 0 : index
      %31 = vector.load %arg3[%c0_25, %c0_26] : memref<2x16xf32, #tpu.memory_space<vmem>>, vector<1x16xf32>
      %cst_27 = arith.constant 9.99999974E-6 : f32
      %32 = vector.broadcast %cst_27 : f32 to vector<1x16xf32>
      %33 = arith.addf %30, %32 : vector<1x16xf32>
      %34 = math.rsqrt %33 : vector<1x16xf32>
      %35 = arith.mulf %31, %34 : vector<1x16xf32>
      %c0_28 = arith.constant 0 : index
      %c0_29 = arith.constant 0 : index
      %36 = vector.load %arg5[%c0_28, %c0_29] : memref<2x16xf32, #tpu.memory_space<vmem>>, vector<1x16xf32>
      tpu.vector_store %arg5[%c0_28, %c0_29], %35 {strides = array<i32>} : memref<2x16xf32, #tpu.memory_space<vmem>>, vector<1x16xf32>,
      %c1 = arith.constant 1 : index
      %c0_30 = arith.constant 0 : index
      %37 = vector.load %arg3[%c1, %c0_30] : memref<2x16xf32, #tpu.memory_space<vmem>>, vector<1x16xf32>
      %38 = arith.mulf %23, %35 : vector<1x16xf32>
      %39 = arith.subf %37, %38 : vector<1x16xf32>
      %c1_31 = arith.constant 1 : index
      %c0_32 = arith.constant 0 : index
      %40 = vector.load %arg5[%c1_31, %c0_32] : memref<2x16xf32, #tpu.memory_space<vmem>>, vector<1x16xf32>
      tpu.vector_store %arg5[%c1_31, %c0_32], %39 {strides = array<i32>} : memref<2x16xf32, #tpu.memory_space<vmem>>, vector<1x16xf32>,
    } else {
    }
    return
  }
  func.func @transform_0(%arg0: i32) -> (i32, i32) {
    %c0_i32 = arith.constant 0 : i32
    %c0_i32_0 = arith.constant 0 : i32
    return %arg0, %c0_i32 : i32, i32
  }
  func.func @transform_1(%arg0: i32) -> (i32, i32) {
    %c0_i32 = arith.constant 0 : i32
    %c0_i32_0 = arith.constant 0 : i32
    %c0_i32_1 = arith.constant 0 : i32
    return %c0_i32, %c0_i32_0 : i32, i32
  }
  func.func @transform_2(%arg0: i32) -> (i32, i32) {
    %c0_i32 = arith.constant 0 : i32
    %c0_i32_0 = arith.constant 0 : i32
    %c0_i32_1 = arith.constant 0 : i32
    return %c0_i32, %c0_i32_0 : i32, i32
  }
  func.func @transform_3(%arg0: i32) -> (i32, i32) {
    %c0_i32 = arith.constant 0 : i32
    %c0_i32_0 = arith.constant 0 : i32
    return %arg0, %c0_i32 : i32, i32
  }
  func.func @transform_4(%arg0: i32) -> (i32, i32) {
    %c0_i32 = arith.constant 0 : i32
    %c0_i32_0 = arith.constant 0 : i32
    %c0_i32_1 = arith.constant 0 : i32
    return %c0_i32, %c0_i32_0 : i32, i32
  }
}

module attributes {stable_mosaic.version = 11 : i64} {
  func.func @kernel(%arg0: i32, %arg1: memref<32x72xbf16, #tpu.memory_space<vmem>>, %arg2: memref<72x16xbf16, #tpu.memory_space<vmem>>, %arg3: memref<2x16xf32, #tpu.memory_space<vmem>>, %arg4: memref<32x16xf32, #tpu.memory_space<vmem>>, %arg5: memref<2x16xf32, #tpu.memory_space<vmem>>, %arg6: memref<1x16xf32, #tpu.memory_space<vmem>>, %arg7: memref<1x16xf32, #tpu.memory_space<vmem>>) attributes {dimension_semantics = [#tpu.dimension_semantics<arbitrary>], iteration_bounds = array<i64: 1>, scalar_prefetch = 0 : i64, scratch_operands = 2 : i64, tpu.core_type = #tpu.core_type<tc>, window_params = [{transform_indices = @transform_0, window_bounds = array<i64: 32, 72>}, {pipeline_mode = #tpu.pipeline_mode<synchronous>, transform_indices = @transform_1, window_bounds = array<i64: 72, 16>}, {pipeline_mode = #tpu.pipeline_mode<synchronous>, transform_indices = @transform_2, window_bounds = array<i64: 2, 16>}, {transform_indices = @transform_3, window_bounds = array<i64: 32, 16>}, {pipeline_mode = #tpu.pipeline_mode<synchronous>, transform_indices = @transform_4, window_bounds = array<i64: 2, 16>}]} {
    %c0 = arith.constant 0 : index
    %c0_0 = arith.constant 0 : index
    %0 = vector.load %arg1[%c0, %c0_0] : memref<32x72xbf16, #tpu.memory_space<vmem>>, vector<32x72xbf16>
    %c0_1 = arith.constant 0 : index
    %c0_2 = arith.constant 0 : index
    %1 = vector.load %arg2[%c0_1, %c0_2] : memref<72x16xbf16, #tpu.memory_space<vmem>>, vector<72x16xbf16>
    %cst = arith.constant dense<0.000000e+00> : vector<32x16xf32>
    %2 = tpu.matmul %0, %1, %cst {dimension_numbers = #tpu.dot_dimension_numbers<[1], [0], [0], [1], [0, 0, 1, 1], [], []>} : vector<32x72xbf16>, vector<72x16xbf16>, vector<32x16xf32> -> vector<32x16xf32>
    %c0_3 = arith.constant 0 : index
    %c0_4 = arith.constant 0 : index
    %3 = vector.load %arg4[%c0_3, %c0_4] : memref<32x16xf32, #tpu.memory_space<vmem>>, vector<32x16xf32>
    tpu.vector_store %arg4[%c0_3, %c0_4], %2 {strides = array<i32>} : memref<32x16xf32, #tpu.memory_space<vmem>>, vector<32x16xf32>,
    %c0_i32 = arith.constant 0 : i32
    %4 = arith.cmpi eq, %arg0, %c0_i32 : i32
    %5 = arith.extui %4 : i1 to i32
    %c0_i32_5 = arith.constant 0 : i32
    %6 = arith.cmpi ne, %5, %c0_i32_5 : i32
    scf.if %6 {
      %cst_18 = arith.constant 0.000000e+00 : f32
      %21 = vector.broadcast %cst_18 : f32 to vector<1x16xf32>
      %c0_19 = arith.constant 0 : index
      %c0_20 = arith.constant 0 : index
      %22 = vector.load %arg6[%c0_19, %c0_20] : memref<1x16xf32, #tpu.memory_space<vmem>>, vector<1x16xf32>
      tpu.vector_store %arg6[%c0_19, %c0_20], %21 {strides = array<i32>} : memref<1x16xf32, #tpu.memory_space<vmem>>, vector<1x16xf32>,
      %cst_21 = arith.constant 0.000000e+00 : f32
      %23 = vector.broadcast %cst_21 : f32 to vector<1x16xf32>
      %c0_22 = arith.constant 0 : index
      %c0_23 = arith.constant 0 : index
      %24 = vector.load %arg7[%c0_22, %c0_23] : memref<1x16xf32, #tpu.memory_space<vmem>>, vector<1x16xf32>
      tpu.vector_store %arg7[%c0_22, %c0_23], %23 {strides = array<i32>} : memref<1x16xf32, #tpu.memory_space<vmem>>, vector<1x16xf32>,
    } else {
    }
    %c0_6 = arith.constant 0 : index
    %c0_7 = arith.constant 0 : index
    %7 = vector.load %arg6[%c0_6, %c0_7] : memref<1x16xf32, #tpu.memory_space<vmem>>, vector<1x16xf32>
    %cst_8 = arith.constant dense<0.000000e+00> : vector<16xf32>
    %8 = vector.multi_reduction <add>, %2, %cst_8 [0] : vector<32x16xf32> to vector<16xf32>
    %9 = vector.shape_cast %8 : vector<16xf32> to vector<1x16xf32>
    %10 = arith.addf %7, %9 : vector<1x16xf32>
    %c0_9 = arith.constant 0 : index
    %c0_10 = arith.constant 0 : index
    %11 = vector.load %arg6[%c0_9, %c0_10] : memref<1x16xf32, #tpu.memory_space<vmem>>, vector<1x16xf32>
    tpu.vector_store %arg6[%c0_9, %c0_10], %10 {strides = array<i32>} : memref<1x16xf32, #tpu.memory_space<vmem>>, vector<1x16xf32>,
    %c0_11 = arith.constant 0 : index
    %c0_12 = arith.constant 0 : index
    %12 = vector.load %arg7[%c0_11, %c0_12] : memref<1x16xf32, #tpu.memory_space<vmem>>, vector<1x16xf32>
    %13 = arith.mulf %2, %2 : vector<32x16xf32>
    %cst_13 = arith.constant dense<0.000000e+00> : vector<16xf32>
    %14 = vector.multi_reduction <add>, %13, %cst_13 [0] : vector<32x16xf32> to vector<16xf32>
    %15 = vector.shape_cast %14 : vector<16xf32> to vector<1x16xf32>
    %16 = arith.addf %12, %15 : vector<1x16xf32>
    %c0_14 = arith.constant 0 : index
    %c0_15 = arith.constant 0 : index
    %17 = vector.load %arg7[%c0_14, %c0_15] : memref<1x16xf32, #tpu.memory_space<vmem>>, vector<1x16xf32>
    tpu.vector_store %arg7[%c0_14, %c0_15], %16 {strides = array<i32>} : memref<1x16xf32, #tpu.memory_space<vmem>>, vector<1x16xf32>,
    %c0_i32_16 = arith.constant 0 : i32
    %18 = arith.cmpi eq, %arg0, %c0_i32_16 : i32
    %19 = arith.extui %18 : i1 to i32
    %c0_i32_17 = arith.constant 0 : i32
    %20 = arith.cmpi ne, %19, %c0_i32_17 : i32
    scf.if %20 {
      %c0_18 = arith.constant 0 : index
      %c0_19 = arith.constant 0 : index
      %21 = vector.load %arg6[%c0_18, %c0_19] : memref<1x16xf32, #tpu.memory_space<vmem>>, vector<1x16xf32>
      %cst_20 = arith.constant 3.125000e-02 : f32
      %22 = vector.broadcast %cst_20 : f32 to vector<1x16xf32>
      %23 = arith.mulf %21, %22 : vector<1x16xf32>
      %c0_21 = arith.constant 0 : index
      %c0_22 = arith.constant 0 : index
      %24 = vector.load %arg7[%c0_21, %c0_22] : memref<1x16xf32, #tpu.memory_space<vmem>>, vector<1x16xf32>
      %cst_23 = arith.constant 3.125000e-02 : f32
      %25 = vector.broadcast %cst_23 : f32 to vector<1x16xf32>
      %26 = arith.mulf %24, %25 : vector<1x16xf32>
      %27 = arith.mulf %23, %23 : vector<1x16xf32>
      %28 = arith.subf %26, %27 : vector<1x16xf32>
      %cst_24 = arith.constant 0.000000e+00 : f32
      %29 = vector.broadcast %cst_24 : f32 to vector<1x16xf32>
      %30 = arith.maximumf %28, %29 : vector<1x16xf32>
      %c0_25 = arith.constant 0 : index
      %c0_26 = arith.constant 0 : index
      %31 = vector.load %arg3[%c0_25, %c0_26] : memref<2x16xf32, #tpu.memory_space<vmem>>, vector<1x16xf32>
      %cst_27 = arith.constant 9.99999974E-6 : f32
      %32 = vector.broadcast %cst_27 : f32 to vector<1x16xf32>
      %33 = arith.addf %30, %32 : vector<1x16xf32>
      %34 = math.rsqrt %33 : vector<1x16xf32>
      %35 = arith.mulf %31, %34 : vector<1x16xf32>
      %c0_28 = arith.constant 0 : index
      %c0_29 = arith.constant 0 : index
      %36 = vector.load %arg5[%c0_28, %c0_29] : memref<2x16xf32, #tpu.memory_space<vmem>>, vector<1x16xf32>
      tpu.vector_store %arg5[%c0_28, %c0_29], %35 {strides = array<i32>} : memref<2x16xf32, #tpu.memory_space<vmem>>, vector<1x16xf32>,
      %c1 = arith.constant 1 : index
      %c0_30 = arith.constant 0 : index
      %37 = vector.load %arg3[%c1, %c0_30] : memref<2x16xf32, #tpu.memory_space<vmem>>, vector<1x16xf32>
      %38 = arith.mulf %23, %35 : vector<1x16xf32>
      %39 = arith.subf %37, %38 : vector<1x16xf32>
      %c1_31 = arith.constant 1 : index
      %c0_32 = arith.constant 0 : index
      %40 = vector.load %arg5[%c1_31, %c0_32] : memref<2x16xf32, #tpu.memory_space<vmem>>, vector<1x16xf32>
      tpu.vector_store %arg5[%c1_31, %c0_32], %39 {strides = array<i32>} : memref<2x16xf32, #tpu.memory_space<vmem>>, vector<1x16xf32>,
    } else {
    }
    return
  }
  func.func @transform_0(%arg0: i32) -> (i32, i32) {
    %c0_i32 = arith.constant 0 : i32
    %c0_i32_0 = arith.constant 0 : i32
    return %arg0, %c0_i32 : i32, i32
  }
  func.func @transform_1(%arg0: i32) -> (i32, i32) {
    %c0_i32 = arith.constant 0 : i32
    %c0_i32_0 = arith.constant 0 : i32
    %c0_i32_1 = arith.constant 0 : i32
    return %c0_i32, %c0_i32_0 : i32, i32
  }
  func.func @transform_2(%arg0: i32) -> (i32, i32) {
    %c0_i32 = arith.constant 0 : i32
    %c0_i32_0 = arith.constant 0 : i32
    %c0_i32_1 = arith.constant 0 : i32
    return %c0_i32, %c0_i32_0 : i32, i32
  }
  func.func @transform_3(%arg0: i32) -> (i32, i32) {
    %c0_i32 = arith.constant 0 : i32
    %c0_i32_0 = arith.constant 0 : i32
    return %arg0, %c0_i32 : i32, i32
  }
  func.func @transform_4(%arg0: i32) -> (i32, i32) {
    %c0_i32 = arith.constant 0 : i32
    %c0_i32_0 = arith.constant 0 : i32
    %c0_i32_1 = arith.constant 0 : i32
    return %c0_i32, %c0_i32_0 : i32, i32
  }
}

module attributes {stable_mosaic.version = 11 : i64} {
  func.func @_bn_if_kernel(%arg0: i32, %arg1: memref<4x128xf32, #tpu.memory_space<vmem>>, %arg2: memref<2x128xf32, #tpu.memory_space<vmem>>, %arg3: memref<4x128xf32, #tpu.memory_space<vmem>>, %arg4: memref<4x128xbf16, #tpu.memory_space<vmem>>, %arg5: memref<4x128xf32, #tpu.memory_space<vmem>>) attributes {dimension_semantics = [#tpu.dimension_semantics<parallel>], iteration_bounds = array<i64: 1>, scalar_prefetch = 0 : i64, scratch_operands = 0 : i64, tpu.core_type = #tpu.core_type<tc>, window_params = [{transform_indices = @transform_0, window_bounds = array<i64: 4, 128>}, {pipeline_mode = #tpu.pipeline_mode<synchronous>, transform_indices = @transform_1, window_bounds = array<i64: 2, 128>}, {transform_indices = @transform_2, window_bounds = array<i64: 4, 128>}, {transform_indices = @transform_3, window_bounds = array<i64: 4, 128>}, {transform_indices = @transform_4, window_bounds = array<i64: 4, 128>}]} {
    %c0 = arith.constant 0 : index
    %c0_0 = arith.constant 0 : index
    %0 = vector.load %arg3[%c0, %c0_0] : memref<4x128xf32, #tpu.memory_space<vmem>>, vector<4x128xf32>
    %c0_1 = arith.constant 0 : index
    %c0_2 = arith.constant 0 : index
    %1 = vector.load %arg1[%c0_1, %c0_2] : memref<4x128xf32, #tpu.memory_space<vmem>>, vector<4x128xf32>
    %c0_3 = arith.constant 0 : index
    %c0_4 = arith.constant 0 : index
    %2 = vector.load %arg2[%c0_3, %c0_4] : memref<2x128xf32, #tpu.memory_space<vmem>>, vector<1x128xf32>
    %3 = vector.broadcast %2 : vector<1x128xf32> to vector<4x128xf32>
    %4 = arith.mulf %1, %3 : vector<4x128xf32>
    %5 = arith.addf %0, %4 : vector<4x128xf32>
    %c1 = arith.constant 1 : index
    %c0_5 = arith.constant 0 : index
    %6 = vector.load %arg2[%c1, %c0_5] : memref<2x128xf32, #tpu.memory_space<vmem>>, vector<1x128xf32>
    %7 = vector.broadcast %6 : vector<1x128xf32> to vector<4x128xf32>
    %8 = arith.addf %5, %7 : vector<4x128xf32>
    %cst = arith.constant 1.000000e+00 : f32
    %9 = vector.broadcast %cst : f32 to vector<4x128xf32>
    %10 = arith.cmpf oge, %8, %9 : vector<4x128xf32>
    %11 = arith.extui %10 : vector<4x128xi1> to vector<4x128xi32>
    %12 = arith.sitofp %11 : vector<4x128xi32> to vector<4x128xf32>
    %13 = arith.truncf %12 : vector<4x128xf32> to vector<4x128xbf16>
    %c0_6 = arith.constant 0 : index
    %c0_7 = arith.constant 0 : index
    %14 = vector.load %arg4[%c0_6, %c0_7] : memref<4x128xbf16, #tpu.memory_space<vmem>>, vector<4x128xbf16>
    tpu.vector_store %arg4[%c0_6, %c0_7], %13 {strides = array<i32>} : memref<4x128xbf16, #tpu.memory_space<vmem>>, vector<4x128xbf16>,
    %cst_8 = arith.constant 0.000000e+00 : f32
    %15 = vector.broadcast %cst_8 : f32 to vector<4x128xf32>
    %16 = arith.select %10, %15, %8 : vector<4x128xi1>, vector<4x128xf32>
    %c0_9 = arith.constant 0 : index
    %c0_10 = arith.constant 0 : index
    %17 = vector.load %arg5[%c0_9, %c0_10] : memref<4x128xf32, #tpu.memory_space<vmem>>, vector<4x128xf32>
    tpu.vector_store %arg5[%c0_9, %c0_10], %16 {strides = array<i32>} : memref<4x128xf32, #tpu.memory_space<vmem>>, vector<4x128xf32>,
    return
  }
  func.func @transform_0(%arg0: i32) -> (i32, i32) {
    %c0_i32 = arith.constant 0 : i32
    %c0_i32_0 = arith.constant 0 : i32
    return %arg0, %c0_i32 : i32, i32
  }
  func.func @transform_1(%arg0: i32) -> (i32, i32) {
    %c0_i32 = arith.constant 0 : i32
    %c0_i32_0 = arith.constant 0 : i32
    %c0_i32_1 = arith.constant 0 : i32
    return %c0_i32, %c0_i32_0 : i32, i32
  }
  func.func @transform_2(%arg0: i32) -> (i32, i32) {
    %c0_i32 = arith.constant 0 : i32
    %c0_i32_0 = arith.constant 0 : i32
    return %arg0, %c0_i32 : i32, i32
  }
  func.func @transform_3(%arg0: i32) -> (i32, i32) {
    %c0_i32 = arith.constant 0 : i32
    %c0_i32_0 = arith.constant 0 : i32
    return %arg0, %c0_i32 : i32, i32
  }
  func.func @transform_4(%arg0: i32) -> (i32, i32) {
    %c0_i32 = arith.constant 0 : i32
    %c0_i32_0 = arith.constant 0 : i32
    return %arg0, %c0_i32 : i32, i32
  }
}

module attributes {stable_mosaic.version = 11 : i64} {
  func.func @_bn_if_res_kernel(%arg0: i32, %arg1: memref<4x128xf32, #tpu.memory_space<vmem>>, %arg2: memref<2x128xf32, #tpu.memory_space<vmem>>, %arg3: memref<4x128xf32, #tpu.memory_space<vmem>>, %arg4: memref<2x128xf32, #tpu.memory_space<vmem>>, %arg5: memref<4x128xf32, #tpu.memory_space<vmem>>, %arg6: memref<4x128xbf16, #tpu.memory_space<vmem>>, %arg7: memref<4x128xf32, #tpu.memory_space<vmem>>) attributes {dimension_semantics = [#tpu.dimension_semantics<parallel>], iteration_bounds = array<i64: 1>, scalar_prefetch = 0 : i64, scratch_operands = 0 : i64, tpu.core_type = #tpu.core_type<tc>, window_params = [{transform_indices = @transform_0, window_bounds = array<i64: 4, 128>}, {pipeline_mode = #tpu.pipeline_mode<synchronous>, transform_indices = @transform_1, window_bounds = array<i64: 2, 128>}, {transform_indices = @transform_2, window_bounds = array<i64: 4, 128>}, {pipeline_mode = #tpu.pipeline_mode<synchronous>, transform_indices = @transform_3, window_bounds = array<i64: 2, 128>}, {transform_indices = @transform_4, window_bounds = array<i64: 4, 128>}, {transform_indices = @transform_5, window_bounds = array<i64: 4, 128>}, {transform_indices = @transform_6, window_bounds = array<i64: 4, 128>}]} {
    %c0 = arith.constant 0 : index
    %c0_0 = arith.constant 0 : index
    %0 = vector.load %arg1[%c0, %c0_0] : memref<4x128xf32, #tpu.memory_space<vmem>>, vector<4x128xf32>
    %c0_1 = arith.constant 0 : index
    %c0_2 = arith.constant 0 : index
    %1 = vector.load %arg2[%c0_1, %c0_2] : memref<2x128xf32, #tpu.memory_space<vmem>>, vector<1x128xf32>
    %2 = vector.broadcast %1 : vector<1x128xf32> to vector<4x128xf32>
    %3 = arith.mulf %0, %2 : vector<4x128xf32>
    %c1 = arith.constant 1 : index
    %c0_3 = arith.constant 0 : index
    %4 = vector.load %arg2[%c1, %c0_3] : memref<2x128xf32, #tpu.memory_space<vmem>>, vector<1x128xf32>
    %5 = vector.broadcast %4 : vector<1x128xf32> to vector<4x128xf32>
    %6 = arith.addf %3, %5 : vector<4x128xf32>
    %c0_4 = arith.constant 0 : index
    %c0_5 = arith.constant 0 : index
    %7 = vector.load %arg3[%c0_4, %c0_5] : memref<4x128xf32, #tpu.memory_space<vmem>>, vector<4x128xf32>
    %c0_6 = arith.constant 0 : index
    %c0_7 = arith.constant 0 : index
    %8 = vector.load %arg4[%c0_6, %c0_7] : memref<2x128xf32, #tpu.memory_space<vmem>>, vector<1x128xf32>
    %9 = vector.broadcast %8 : vector<1x128xf32> to vector<4x128xf32>
    %10 = arith.mulf %7, %9 : vector<4x128xf32>
    %c1_8 = arith.constant 1 : index
    %c0_9 = arith.constant 0 : index
    %11 = vector.load %arg4[%c1_8, %c0_9] : memref<2x128xf32, #tpu.memory_space<vmem>>, vector<1x128xf32>
    %12 = vector.broadcast %11 : vector<1x128xf32> to vector<4x128xf32>
    %13 = arith.addf %10, %12 : vector<4x128xf32>
    %c0_10 = arith.constant 0 : index
    %c0_11 = arith.constant 0 : index
    %14 = vector.load %arg5[%c0_10, %c0_11] : memref<4x128xf32, #tpu.memory_space<vmem>>, vector<4x128xf32>
    %15 = arith.addf %14, %6 : vector<4x128xf32>
    %16 = arith.addf %15, %13 : vector<4x128xf32>
    %cst = arith.constant 1.000000e+00 : f32
    %17 = vector.broadcast %cst : f32 to vector<4x128xf32>
    %18 = arith.cmpf oge, %16, %17 : vector<4x128xf32>
    %19 = arith.extui %18 : vector<4x128xi1> to vector<4x128xi32>
    %20 = arith.sitofp %19 : vector<4x128xi32> to vector<4x128xf32>
    %21 = arith.truncf %20 : vector<4x128xf32> to vector<4x128xbf16>
    %c0_12 = arith.constant 0 : index
    %c0_13 = arith.constant 0 : index
    %22 = vector.load %arg6[%c0_12, %c0_13] : memref<4x128xbf16, #tpu.memory_space<vmem>>, vector<4x128xbf16>
    tpu.vector_store %arg6[%c0_12, %c0_13], %21 {strides = array<i32>} : memref<4x128xbf16, #tpu.memory_space<vmem>>, vector<4x128xbf16>,
    %cst_14 = arith.constant 0.000000e+00 : f32
    %23 = vector.broadcast %cst_14 : f32 to vector<4x128xf32>
    %24 = arith.select %18, %23, %16 : vector<4x128xi1>, vector<4x128xf32>
    %c0_15 = arith.constant 0 : index
    %c0_16 = arith.constant 0 : index
    %25 = vector.load %arg7[%c0_15, %c0_16] : memref<4x128xf32, #tpu.memory_space<vmem>>, vector<4x128xf32>
    tpu.vector_store %arg7[%c0_15, %c0_16], %24 {strides = array<i32>} : memref<4x128xf32, #tpu.memory_space<vmem>>, vector<4x128xf32>,
    return
  }
  func.func @transform_0(%arg0: i32) -> (i32, i32) {
    %c0_i32 = arith.constant 0 : i32
    %c0_i32_0 = arith.constant 0 : i32
    return %arg0, %c0_i32 : i32, i32
  }
  func.func @transform_1(%arg0: i32) -> (i32, i32) {
    %c0_i32 = arith.constant 0 : i32
    %c0_i32_0 = arith.constant 0 : i32
    %c0_i32_1 = arith.constant 0 : i32
    return %c0_i32, %c0_i32_0 : i32, i32
  }
  func.func @transform_2(%arg0: i32) -> (i32, i32) {
    %c0_i32 = arith.constant 0 : i32
    %c0_i32_0 = arith.constant 0 : i32
    return %arg0, %c0_i32 : i32, i32
  }
  func.func @transform_3(%arg0: i32) -> (i32, i32) {
    %c0_i32 = arith.constant 0 : i32
    %c0_i32_0 = arith.constant 0 : i32
    %c0_i32_1 = arith.constant 0 : i32
    return %c0_i32, %c0_i32_0 : i32, i32
  }
  func.func @transform_4(%arg0: i32) -> (i32, i32) {
    %c0_i32 = arith.constant 0 : i32
    %c0_i32_0 = arith.constant 0 : i32
    return %arg0, %c0_i32 : i32, i32
  }
  func.func @transform_5(%arg0: i32) -> (i32, i32) {
    %c0_i32 = arith.constant 0 : i32
    %c0_i32_0 = arith.constant 0 : i32
    return %arg0, %c0_i32 : i32, i32
  }
  func.func @transform_6(%arg0: i32) -> (i32, i32) {
    %c0_i32 = arith.constant 0 : i32
    %c0_i32_0 = arith.constant 0 : i32
    return %arg0, %c0_i32 : i32, i32
  }
}

module attributes {stable_mosaic.version = 11 : i64} {
  func.func @kernel(%arg0: i32, %arg1: memref<4x2x2x32xbf16, #tpu.memory_space<vmem>>, %arg2: memref<4x2x16xbf16, #tpu.memory_space<vmem>>) attributes {dimension_semantics = [#tpu.dimension_semantics<parallel>], iteration_bounds = array<i64: 1>, scalar_prefetch = 0 : i64, scratch_operands = 0 : i64, tpu.core_type = #tpu.core_type<tc>, window_params = [{transform_indices = @transform_0, window_bounds = array<i64: 4, 2, 2, 32>}, {transform_indices = @transform_1, window_bounds = array<i64: 4, 2, 16>}]} {
    %c0 = arith.constant 0 : index
    %c0_0 = arith.constant 0 : index
    %c0_1 = arith.constant 0 : index
    %c0_2 = arith.constant 0 : index
    %0 = vector.load %arg1[%c0, %c0_0, %c0_1, %c0_2] : memref<4x2x2x32xbf16, #tpu.memory_space<vmem>>, vector<4x2x2x32xbf16>
    %1 = vector.extract_strided_slice %0 {offsets = [0, 0, 0, 0], sizes = [4, 1, 2, 32], strides = [1, 1, 1, 1]} : vector<4x2x2x32xbf16> to vector<4x1x2x32xbf16>
    %2 = vector.shape_cast %1 : vector<4x1x2x32xbf16> to vector<4x2x32xbf16>
    %3 = vector.extract_strided_slice %0 {offsets = [0, 1, 0, 0], sizes = [4, 1, 2, 32], strides = [1, 1, 1, 1]} : vector<4x2x2x32xbf16> to vector<4x1x2x32xbf16>
    %4 = vector.shape_cast %3 : vector<4x1x2x32xbf16> to vector<4x2x32xbf16>
    %5 = arith.maximumf %2, %4 : vector<4x2x32xbf16>
    %6 = vector.extract_strided_slice %5 {offsets = [0, 0, 0], sizes = [4, 2, 16], strides = [1, 1, 1]} : vector<4x2x32xbf16> to vector<4x2x16xbf16>
    %7 = vector.extract_strided_slice %5 {offsets = [0, 0, 16], sizes = [4, 2, 16], strides = [1, 1, 1]} : vector<4x2x32xbf16> to vector<4x2x16xbf16>
    %8 = arith.maximumf %6, %7 : vector<4x2x16xbf16>
    %c0_3 = arith.constant 0 : index
    %c0_4 = arith.constant 0 : index
    %c0_5 = arith.constant 0 : index
    %9 = vector.load %arg2[%c0_3, %c0_4, %c0_5] : memref<4x2x16xbf16, #tpu.memory_space<vmem>>, vector<4x2x16xbf16>
    tpu.vector_store %arg2[%c0_3, %c0_4, %c0_5], %8 {strides = array<i32>} : memref<4x2x16xbf16, #tpu.memory_space<vmem>>, vector<4x2x16xbf16>,
    return
  }
  func.func @transform_0(%arg0: i32) -> (i32, i32, i32, i32) {
    %c0_i32 = arith.constant 0 : i32
    %c0_i32_0 = arith.constant 0 : i32
    %c0_i32_1 = arith.constant 0 : i32
    %c0_i32_2 = arith.constant 0 : i32
    return %arg0, %c0_i32, %c0_i32_0, %c0_i32_1 : i32, i32, i32, i32
  }
  func.func @transform_1(%arg0: i32) -> (i32, i32, i32) {
    %c0_i32 = arith.constant 0 : i32
    %c0_i32_0 = arith.constant 0 : i32
    %c0_i32_1 = arith.constant 0 : i32
    return %arg0, %c0_i32, %c0_i32_0 : i32, i32, i32
  }
}

module attributes {stable_mosaic.version = 11 : i64} {
  func.func @kernel(%arg0: i32, %arg1: memref<32x144xbf16, #tpu.memory_space<vmem>>, %arg2: memref<144x16xbf16, #tpu.memory_space<vmem>>, %arg3: memref<2x16xf32, #tpu.memory_space<vmem>>, %arg4: memref<32x16xf32, #tpu.memory_space<vmem>>, %arg5: memref<2x16xf32, #tpu.memory_space<vmem>>, %arg6: memref<1x16xf32, #tpu.memory_space<vmem>>, %arg7: memref<1x16xf32, #tpu.memory_space<vmem>>) attributes {dimension_semantics = [#tpu.dimension_semantics<arbitrary>], iteration_bounds = array<i64: 1>, scalar_prefetch = 0 : i64, scratch_operands = 2 : i64, tpu.core_type = #tpu.core_type<tc>, window_params = [{transform_indices = @transform_0, window_bounds = array<i64: 32, 144>}, {pipeline_mode = #tpu.pipeline_mode<synchronous>, transform_indices = @transform_1, window_bounds = array<i64: 144, 16>}, {pipeline_mode = #tpu.pipeline_mode<synchronous>, transform_indices = @transform_2, window_bounds = array<i64: 2, 16>}, {transform_indices = @transform_3, window_bounds = array<i64: 32, 16>}, {pipeline_mode = #tpu.pipeline_mode<synchronous>, transform_indices = @transform_4, window_bounds = array<i64: 2, 16>}]} {
    %c0 = arith.constant 0 : index
    %c0_0 = arith.constant 0 : index
    %0 = vector.load %arg1[%c0, %c0_0] : memref<32x144xbf16, #tpu.memory_space<vmem>>, vector<32x144xbf16>
    %c0_1 = arith.constant 0 : index
    %c0_2 = arith.constant 0 : index
    %1 = vector.load %arg2[%c0_1, %c0_2] : memref<144x16xbf16, #tpu.memory_space<vmem>>, vector<144x16xbf16>
    %cst = arith.constant dense<0.000000e+00> : vector<32x16xf32>
    %2 = tpu.matmul %0, %1, %cst {dimension_numbers = #tpu.dot_dimension_numbers<[1], [0], [0], [1], [0, 0, 1, 1], [], []>} : vector<32x144xbf16>, vector<144x16xbf16>, vector<32x16xf32> -> vector<32x16xf32>
    %c0_3 = arith.constant 0 : index
    %c0_4 = arith.constant 0 : index
    %3 = vector.load %arg4[%c0_3, %c0_4] : memref<32x16xf32, #tpu.memory_space<vmem>>, vector<32x16xf32>
    tpu.vector_store %arg4[%c0_3, %c0_4], %2 {strides = array<i32>} : memref<32x16xf32, #tpu.memory_space<vmem>>, vector<32x16xf32>,
    %c0_i32 = arith.constant 0 : i32
    %4 = arith.cmpi eq, %arg0, %c0_i32 : i32
    %5 = arith.extui %4 : i1 to i32
    %c0_i32_5 = arith.constant 0 : i32
    %6 = arith.cmpi ne, %5, %c0_i32_5 : i32
    scf.if %6 {
      %cst_18 = arith.constant 0.000000e+00 : f32
      %21 = vector.broadcast %cst_18 : f32 to vector<1x16xf32>
      %c0_19 = arith.constant 0 : index
      %c0_20 = arith.constant 0 : index
      %22 = vector.load %arg6[%c0_19, %c0_20] : memref<1x16xf32, #tpu.memory_space<vmem>>, vector<1x16xf32>
      tpu.vector_store %arg6[%c0_19, %c0_20], %21 {strides = array<i32>} : memref<1x16xf32, #tpu.memory_space<vmem>>, vector<1x16xf32>,
      %cst_21 = arith.constant 0.000000e+00 : f32
      %23 = vector.broadcast %cst_21 : f32 to vector<1x16xf32>
      %c0_22 = arith.constant 0 : index
      %c0_23 = arith.constant 0 : index
      %24 = vector.load %arg7[%c0_22, %c0_23] : memref<1x16xf32, #tpu.memory_space<vmem>>, vector<1x16xf32>
      tpu.vector_store %arg7[%c0_22, %c0_23], %23 {strides = array<i32>} : memref<1x16xf32, #tpu.memory_space<vmem>>, vector<1x16xf32>,
    } else {
    }
    %c0_6 = arith.constant 0 : index
    %c0_7 = arith.constant 0 : index
    %7 = vector.load %arg6[%c0_6, %c0_7] : memref<1x16xf32, #tpu.memory_space<vmem>>, vector<1x16xf32>
    %cst_8 = arith.constant dense<0.000000e+00> : vector<16xf32>
    %8 = vector.multi_reduction <add>, %2, %cst_8 [0] : vector<32x16xf32> to vector<16xf32>
    %9 = vector.shape_cast %8 : vector<16xf32> to vector<1x16xf32>
    %10 = arith.addf %7, %9 : vector<1x16xf32>
    %c0_9 = arith.constant 0 : index
    %c0_10 = arith.constant 0 : index
    %11 = vector.load %arg6[%c0_9, %c0_10] : memref<1x16xf32, #tpu.memory_space<vmem>>, vector<1x16xf32>
    tpu.vector_store %arg6[%c0_9, %c0_10], %10 {strides = array<i32>} : memref<1x16xf32, #tpu.memory_space<vmem>>, vector<1x16xf32>,
    %c0_11 = arith.constant 0 : index
    %c0_12 = arith.constant 0 : index
    %12 = vector.load %arg7[%c0_11, %c0_12] : memref<1x16xf32, #tpu.memory_space<vmem>>, vector<1x16xf32>
    %13 = arith.mulf %2, %2 : vector<32x16xf32>
    %cst_13 = arith.constant dense<0.000000e+00> : vector<16xf32>
    %14 = vector.multi_reduction <add>, %13, %cst_13 [0] : vector<32x16xf32> to vector<16xf32>
    %15 = vector.shape_cast %14 : vector<16xf32> to vector<1x16xf32>
    %16 = arith.addf %12, %15 : vector<1x16xf32>
    %c0_14 = arith.constant 0 : index
    %c0_15 = arith.constant 0 : index
    %17 = vector.load %arg7[%c0_14, %c0_15] : memref<1x16xf32, #tpu.memory_space<vmem>>, vector<1x16xf32>
    tpu.vector_store %arg7[%c0_14, %c0_15], %16 {strides = array<i32>} : memref<1x16xf32, #tpu.memory_space<vmem>>, vector<1x16xf32>,
    %c0_i32_16 = arith.constant 0 : i32
    %18 = arith.cmpi eq, %arg0, %c0_i32_16 : i32
    %19 = arith.extui %18 : i1 to i32
    %c0_i32_17 = arith.constant 0 : i32
    %20 = arith.cmpi ne, %19, %c0_i32_17 : i32
    scf.if %20 {
      %c0_18 = arith.constant 0 : index
      %c0_19 = arith.constant 0 : index
      %21 = vector.load %arg6[%c0_18, %c0_19] : memref<1x16xf32, #tpu.memory_space<vmem>>, vector<1x16xf32>
      %cst_20 = arith.constant 3.125000e-02 : f32
      %22 = vector.broadcast %cst_20 : f32 to vector<1x16xf32>
      %23 = arith.mulf %21, %22 : vector<1x16xf32>
      %c0_21 = arith.constant 0 : index
      %c0_22 = arith.constant 0 : index
      %24 = vector.load %arg7[%c0_21, %c0_22] : memref<1x16xf32, #tpu.memory_space<vmem>>, vector<1x16xf32>
      %cst_23 = arith.constant 3.125000e-02 : f32
      %25 = vector.broadcast %cst_23 : f32 to vector<1x16xf32>
      %26 = arith.mulf %24, %25 : vector<1x16xf32>
      %27 = arith.mulf %23, %23 : vector<1x16xf32>
      %28 = arith.subf %26, %27 : vector<1x16xf32>
      %cst_24 = arith.constant 0.000000e+00 : f32
      %29 = vector.broadcast %cst_24 : f32 to vector<1x16xf32>
      %30 = arith.maximumf %28, %29 : vector<1x16xf32>
      %c0_25 = arith.constant 0 : index
      %c0_26 = arith.constant 0 : index
      %31 = vector.load %arg3[%c0_25, %c0_26] : memref<2x16xf32, #tpu.memory_space<vmem>>, vector<1x16xf32>
      %cst_27 = arith.constant 9.99999974E-6 : f32
      %32 = vector.broadcast %cst_27 : f32 to vector<1x16xf32>
      %33 = arith.addf %30, %32 : vector<1x16xf32>
      %34 = math.rsqrt %33 : vector<1x16xf32>
      %35 = arith.mulf %31, %34 : vector<1x16xf32>
      %c0_28 = arith.constant 0 : index
      %c0_29 = arith.constant 0 : index
      %36 = vector.load %arg5[%c0_28, %c0_29] : memref<2x16xf32, #tpu.memory_space<vmem>>, vector<1x16xf32>
      tpu.vector_store %arg5[%c0_28, %c0_29], %35 {strides = array<i32>} : memref<2x16xf32, #tpu.memory_space<vmem>>, vector<1x16xf32>,
      %c1 = arith.constant 1 : index
      %c0_30 = arith.constant 0 : index
      %37 = vector.load %arg3[%c1, %c0_30] : memref<2x16xf32, #tpu.memory_space<vmem>>, vector<1x16xf32>
      %38 = arith.mulf %23, %35 : vector<1x16xf32>
      %39 = arith.subf %37, %38 : vector<1x16xf32>
      %c1_31 = arith.constant 1 : index
      %c0_32 = arith.constant 0 : index
      %40 = vector.load %arg5[%c1_31, %c0_32] : memref<2x16xf32, #tpu.memory_space<vmem>>, vector<1x16xf32>
      tpu.vector_store %arg5[%c1_31, %c0_32], %39 {strides = array<i32>} : memref<2x16xf32, #tpu.memory_space<vmem>>, vector<1x16xf32>,
    } else {
    }
    return
  }
  func.func @transform_0(%arg0: i32) -> (i32, i32) {
    %c0_i32 = arith.constant 0 : i32
    %c0_i32_0 = arith.constant 0 : i32
    return %arg0, %c0_i32 : i32, i32
  }
  func.func @transform_1(%arg0: i32) -> (i32, i32) {
    %c0_i32 = arith.constant 0 : i32
    %c0_i32_0 = arith.constant 0 : i32
    %c0_i32_1 = arith.constant 0 : i32
    return %c0_i32, %c0_i32_0 : i32, i32
  }
  func.func @transform_2(%arg0: i32) -> (i32, i32) {
    %c0_i32 = arith.constant 0 : i32
    %c0_i32_0 = arith.constant 0 : i32
    %c0_i32_1 = arith.constant 0 : i32
    return %c0_i32, %c0_i32_0 : i32, i32
  }
  func.func @transform_3(%arg0: i32) -> (i32, i32) {
    %c0_i32 = arith.constant 0 : i32
    %c0_i32_0 = arith.constant 0 : i32
    return %arg0, %c0_i32 : i32, i32
  }
  func.func @transform_4(%arg0: i32) -> (i32, i32) {
    %c0_i32 = arith.constant 0 : i32
    %c0_i32_0 = arith.constant 0 : i32
    %c0_i32_1 = arith.constant 0 : i32
    return %c0_i32, %c0_i32_0 : i32, i32
  }
}

module attributes {stable_mosaic.version = 11 : i64} {
  func.func @kernel(%arg0: i32, %arg1: memref<8x16xbf16, #tpu.memory_space<vmem>>, %arg2: memref<16x32xbf16, #tpu.memory_space<vmem>>, %arg3: memref<2x32xf32, #tpu.memory_space<vmem>>, %arg4: memref<8x32xf32, #tpu.memory_space<vmem>>, %arg5: memref<2x32xf32, #tpu.memory_space<vmem>>, %arg6: memref<1x32xf32, #tpu.memory_space<vmem>>, %arg7: memref<1x32xf32, #tpu.memory_space<vmem>>) attributes {dimension_semantics = [#tpu.dimension_semantics<arbitrary>], iteration_bounds = array<i64: 1>, scalar_prefetch = 0 : i64, scratch_operands = 2 : i64, tpu.core_type = #tpu.core_type<tc>, window_params = [{transform_indices = @transform_0, window_bounds = array<i64: 8, 16>}, {pipeline_mode = #tpu.pipeline_mode<synchronous>, transform_indices = @transform_1, window_bounds = array<i64: 16, 32>}, {pipeline_mode = #tpu.pipeline_mode<synchronous>, transform_indices = @transform_2, window_bounds = array<i64: 2, 32>}, {transform_indices = @transform_3, window_bounds = array<i64: 8, 32>}, {pipeline_mode = #tpu.pipeline_mode<synchronous>, transform_indices = @transform_4, window_bounds = array<i64: 2, 32>}]} {
    %c0 = arith.constant 0 : index
    %c0_0 = arith.constant 0 : index
    %0 = vector.load %arg1[%c0, %c0_0] : memref<8x16xbf16, #tpu.memory_space<vmem>>, vector<8x16xbf16>
    %c0_1 = arith.constant 0 : index
    %c0_2 = arith.constant 0 : index
    %1 = vector.load %arg2[%c0_1, %c0_2] : memref<16x32xbf16, #tpu.memory_space<vmem>>, vector<16x32xbf16>
    %cst = arith.constant dense<0.000000e+00> : vector<8x32xf32>
    %2 = tpu.matmul %0, %1, %cst {dimension_numbers = #tpu.dot_dimension_numbers<[1], [0], [0], [1], [0, 0, 1, 1], [], []>} : vector<8x16xbf16>, vector<16x32xbf16>, vector<8x32xf32> -> vector<8x32xf32>
    %c0_3 = arith.constant 0 : index
    %c0_4 = arith.constant 0 : index
    %3 = vector.load %arg4[%c0_3, %c0_4] : memref<8x32xf32, #tpu.memory_space<vmem>>, vector<8x32xf32>
    tpu.vector_store %arg4[%c0_3, %c0_4], %2 {strides = array<i32>} : memref<8x32xf32, #tpu.memory_space<vmem>>, vector<8x32xf32>,
    %c0_i32 = arith.constant 0 : i32
    %4 = arith.cmpi eq, %arg0, %c0_i32 : i32
    %5 = arith.extui %4 : i1 to i32
    %c0_i32_5 = arith.constant 0 : i32
    %6 = arith.cmpi ne, %5, %c0_i32_5 : i32
    scf.if %6 {
      %cst_18 = arith.constant 0.000000e+00 : f32
      %21 = vector.broadcast %cst_18 : f32 to vector<1x32xf32>
      %c0_19 = arith.constant 0 : index
      %c0_20 = arith.constant 0 : index
      %22 = vector.load %arg6[%c0_19, %c0_20] : memref<1x32xf32, #tpu.memory_space<vmem>>, vector<1x32xf32>
      tpu.vector_store %arg6[%c0_19, %c0_20], %21 {strides = array<i32>} : memref<1x32xf32, #tpu.memory_space<vmem>>, vector<1x32xf32>,
      %cst_21 = arith.constant 0.000000e+00 : f32
      %23 = vector.broadcast %cst_21 : f32 to vector<1x32xf32>
      %c0_22 = arith.constant 0 : index
      %c0_23 = arith.constant 0 : index
      %24 = vector.load %arg7[%c0_22, %c0_23] : memref<1x32xf32, #tpu.memory_space<vmem>>, vector<1x32xf32>
      tpu.vector_store %arg7[%c0_22, %c0_23], %23 {strides = array<i32>} : memref<1x32xf32, #tpu.memory_space<vmem>>, vector<1x32xf32>,
    } else {
    }
    %c0_6 = arith.constant 0 : index
    %c0_7 = arith.constant 0 : index
    %7 = vector.load %arg6[%c0_6, %c0_7] : memref<1x32xf32, #tpu.memory_space<vmem>>, vector<1x32xf32>
    %cst_8 = arith.constant dense<0.000000e+00> : vector<32xf32>
    %8 = vector.multi_reduction <add>, %2, %cst_8 [0] : vector<8x32xf32> to vector<32xf32>
    %9 = vector.shape_cast %8 : vector<32xf32> to vector<1x32xf32>
    %10 = arith.addf %7, %9 : vector<1x32xf32>
    %c0_9 = arith.constant 0 : index
    %c0_10 = arith.constant 0 : index
    %11 = vector.load %arg6[%c0_9, %c0_10] : memref<1x32xf32, #tpu.memory_space<vmem>>, vector<1x32xf32>
    tpu.vector_store %arg6[%c0_9, %c0_10], %10 {strides = array<i32>} : memref<1x32xf32, #tpu.memory_space<vmem>>, vector<1x32xf32>,
    %c0_11 = arith.constant 0 : index
    %c0_12 = arith.constant 0 : index
    %12 = vector.load %arg7[%c0_11, %c0_12] : memref<1x32xf32, #tpu.memory_space<vmem>>, vector<1x32xf32>
    %13 = arith.mulf %2, %2 : vector<8x32xf32>
    %cst_13 = arith.constant dense<0.000000e+00> : vector<32xf32>
    %14 = vector.multi_reduction <add>, %13, %cst_13 [0] : vector<8x32xf32> to vector<32xf32>
    %15 = vector.shape_cast %14 : vector<32xf32> to vector<1x32xf32>
    %16 = arith.addf %12, %15 : vector<1x32xf32>
    %c0_14 = arith.constant 0 : index
    %c0_15 = arith.constant 0 : index
    %17 = vector.load %arg7[%c0_14, %c0_15] : memref<1x32xf32, #tpu.memory_space<vmem>>, vector<1x32xf32>
    tpu.vector_store %arg7[%c0_14, %c0_15], %16 {strides = array<i32>} : memref<1x32xf32, #tpu.memory_space<vmem>>, vector<1x32xf32>,
    %c0_i32_16 = arith.constant 0 : i32
    %18 = arith.cmpi eq, %arg0, %c0_i32_16 : i32
    %19 = arith.extui %18 : i1 to i32
    %c0_i32_17 = arith.constant 0 : i32
    %20 = arith.cmpi ne, %19, %c0_i32_17 : i32
    scf.if %20 {
      %c0_18 = arith.constant 0 : index
      %c0_19 = arith.constant 0 : index
      %21 = vector.load %arg6[%c0_18, %c0_19] : memref<1x32xf32, #tpu.memory_space<vmem>>, vector<1x32xf32>
      %cst_20 = arith.constant 1.250000e-01 : f32
      %22 = vector.broadcast %cst_20 : f32 to vector<1x32xf32>
      %23 = arith.mulf %21, %22 : vector<1x32xf32>
      %c0_21 = arith.constant 0 : index
      %c0_22 = arith.constant 0 : index
      %24 = vector.load %arg7[%c0_21, %c0_22] : memref<1x32xf32, #tpu.memory_space<vmem>>, vector<1x32xf32>
      %cst_23 = arith.constant 1.250000e-01 : f32
      %25 = vector.broadcast %cst_23 : f32 to vector<1x32xf32>
      %26 = arith.mulf %24, %25 : vector<1x32xf32>
      %27 = arith.mulf %23, %23 : vector<1x32xf32>
      %28 = arith.subf %26, %27 : vector<1x32xf32>
      %cst_24 = arith.constant 0.000000e+00 : f32
      %29 = vector.broadcast %cst_24 : f32 to vector<1x32xf32>
      %30 = arith.maximumf %28, %29 : vector<1x32xf32>
      %c0_25 = arith.constant 0 : index
      %c0_26 = arith.constant 0 : index
      %31 = vector.load %arg3[%c0_25, %c0_26] : memref<2x32xf32, #tpu.memory_space<vmem>>, vector<1x32xf32>
      %cst_27 = arith.constant 9.99999974E-6 : f32
      %32 = vector.broadcast %cst_27 : f32 to vector<1x32xf32>
      %33 = arith.addf %30, %32 : vector<1x32xf32>
      %34 = math.rsqrt %33 : vector<1x32xf32>
      %35 = arith.mulf %31, %34 : vector<1x32xf32>
      %c0_28 = arith.constant 0 : index
      %c0_29 = arith.constant 0 : index
      %36 = vector.load %arg5[%c0_28, %c0_29] : memref<2x32xf32, #tpu.memory_space<vmem>>, vector<1x32xf32>
      tpu.vector_store %arg5[%c0_28, %c0_29], %35 {strides = array<i32>} : memref<2x32xf32, #tpu.memory_space<vmem>>, vector<1x32xf32>,
      %c1 = arith.constant 1 : index
      %c0_30 = arith.constant 0 : index
      %37 = vector.load %arg3[%c1, %c0_30] : memref<2x32xf32, #tpu.memory_space<vmem>>, vector<1x32xf32>
      %38 = arith.mulf %23, %35 : vector<1x32xf32>
      %39 = arith.subf %37, %38 : vector<1x32xf32>
      %c1_31 = arith.constant 1 : index
      %c0_32 = arith.constant 0 : index
      %40 = vector.load %arg5[%c1_31, %c0_32] : memref<2x32xf32, #tpu.memory_space<vmem>>, vector<1x32xf32>
      tpu.vector_store %arg5[%c1_31, %c0_32], %39 {strides = array<i32>} : memref<2x32xf32, #tpu.memory_space<vmem>>, vector<1x32xf32>,
    } else {
    }
    return
  }
  func.func @transform_0(%arg0: i32) -> (i32, i32) {
    %c0_i32 = arith.constant 0 : i32
    %c0_i32_0 = arith.constant 0 : i32
    return %arg0, %c0_i32 : i32, i32
  }
  func.func @transform_1(%arg0: i32) -> (i32, i32) {
    %c0_i32 = arith.constant 0 : i32
    %c0_i32_0 = arith.constant 0 : i32
    %c0_i32_1 = arith.constant 0 : i32
    return %c0_i32, %c0_i32_0 : i32, i32
  }
  func.func @transform_2(%arg0: i32) -> (i32, i32) {
    %c0_i32 = arith.constant 0 : i32
    %c0_i32_0 = arith.constant 0 : i32
    %c0_i32_1 = arith.constant 0 : i32
    return %c0_i32, %c0_i32_0 : i32, i32
  }
  func.func @transform_3(%arg0: i32) -> (i32, i32) {
    %c0_i32 = arith.constant 0 : i32
    %c0_i32_0 = arith.constant 0 : i32
    return %arg0, %c0_i32 : i32, i32
  }
  func.func @transform_4(%arg0: i32) -> (i32, i32) {
    %c0_i32 = arith.constant 0 : i32
    %c0_i32_0 = arith.constant 0 : i32
    %c0_i32_1 = arith.constant 0 : i32
    return %c0_i32, %c0_i32_0 : i32, i32
  }
}

module attributes {stable_mosaic.version = 11 : i64} {
  func.func @_bn_if_kernel(%arg0: i32, %arg1: memref<2x128xf32, #tpu.memory_space<vmem>>, %arg2: memref<2x128xf32, #tpu.memory_space<vmem>>, %arg3: memref<2x128xf32, #tpu.memory_space<vmem>>, %arg4: memref<2x128xbf16, #tpu.memory_space<vmem>>, %arg5: memref<2x128xf32, #tpu.memory_space<vmem>>) attributes {dimension_semantics = [#tpu.dimension_semantics<parallel>], iteration_bounds = array<i64: 1>, scalar_prefetch = 0 : i64, scratch_operands = 0 : i64, tpu.core_type = #tpu.core_type<tc>, window_params = [{transform_indices = @transform_0, window_bounds = array<i64: 2, 128>}, {pipeline_mode = #tpu.pipeline_mode<synchronous>, transform_indices = @transform_1, window_bounds = array<i64: 2, 128>}, {transform_indices = @transform_2, window_bounds = array<i64: 2, 128>}, {transform_indices = @transform_3, window_bounds = array<i64: 2, 128>}, {transform_indices = @transform_4, window_bounds = array<i64: 2, 128>}]} {
    %c0 = arith.constant 0 : index
    %c0_0 = arith.constant 0 : index
    %0 = vector.load %arg3[%c0, %c0_0] : memref<2x128xf32, #tpu.memory_space<vmem>>, vector<2x128xf32>
    %c0_1 = arith.constant 0 : index
    %c0_2 = arith.constant 0 : index
    %1 = vector.load %arg1[%c0_1, %c0_2] : memref<2x128xf32, #tpu.memory_space<vmem>>, vector<2x128xf32>
    %c0_3 = arith.constant 0 : index
    %c0_4 = arith.constant 0 : index
    %2 = vector.load %arg2[%c0_3, %c0_4] : memref<2x128xf32, #tpu.memory_space<vmem>>, vector<1x128xf32>
    %3 = vector.broadcast %2 : vector<1x128xf32> to vector<2x128xf32>
    %4 = arith.mulf %1, %3 : vector<2x128xf32>
    %5 = arith.addf %0, %4 : vector<2x128xf32>
    %c1 = arith.constant 1 : index
    %c0_5 = arith.constant 0 : index
    %6 = vector.load %arg2[%c1, %c0_5] : memref<2x128xf32, #tpu.memory_space<vmem>>, vector<1x128xf32>
    %7 = vector.broadcast %6 : vector<1x128xf32> to vector<2x128xf32>
    %8 = arith.addf %5, %7 : vector<2x128xf32>
    %cst = arith.constant 1.000000e+00 : f32
    %9 = vector.broadcast %cst : f32 to vector<2x128xf32>
    %10 = arith.cmpf oge, %8, %9 : vector<2x128xf32>
    %11 = arith.extui %10 : vector<2x128xi1> to vector<2x128xi32>
    %12 = arith.sitofp %11 : vector<2x128xi32> to vector<2x128xf32>
    %13 = arith.truncf %12 : vector<2x128xf32> to vector<2x128xbf16>
    %c0_6 = arith.constant 0 : index
    %c0_7 = arith.constant 0 : index
    %14 = vector.load %arg4[%c0_6, %c0_7] : memref<2x128xbf16, #tpu.memory_space<vmem>>, vector<2x128xbf16>
    tpu.vector_store %arg4[%c0_6, %c0_7], %13 {strides = array<i32>} : memref<2x128xbf16, #tpu.memory_space<vmem>>, vector<2x128xbf16>,
    %cst_8 = arith.constant 0.000000e+00 : f32
    %15 = vector.broadcast %cst_8 : f32 to vector<2x128xf32>
    %16 = arith.select %10, %15, %8 : vector<2x128xi1>, vector<2x128xf32>
    %c0_9 = arith.constant 0 : index
    %c0_10 = arith.constant 0 : index
    %17 = vector.load %arg5[%c0_9, %c0_10] : memref<2x128xf32, #tpu.memory_space<vmem>>, vector<2x128xf32>
    tpu.vector_store %arg5[%c0_9, %c0_10], %16 {strides = array<i32>} : memref<2x128xf32, #tpu.memory_space<vmem>>, vector<2x128xf32>,
    return
  }
  func.func @transform_0(%arg0: i32) -> (i32, i32) {
    %c0_i32 = arith.constant 0 : i32
    %c0_i32_0 = arith.constant 0 : i32
    return %arg0, %c0_i32 : i32, i32
  }
  func.func @transform_1(%arg0: i32) -> (i32, i32) {
    %c0_i32 = arith.constant 0 : i32
    %c0_i32_0 = arith.constant 0 : i32
    %c0_i32_1 = arith.constant 0 : i32
    return %c0_i32, %c0_i32_0 : i32, i32
  }
  func.func @transform_2(%arg0: i32) -> (i32, i32) {
    %c0_i32 = arith.constant 0 : i32
    %c0_i32_0 = arith.constant 0 : i32
    return %arg0, %c0_i32 : i32, i32
  }
  func.func @transform_3(%arg0: i32) -> (i32, i32) {
    %c0_i32 = arith.constant 0 : i32
    %c0_i32_0 = arith.constant 0 : i32
    return %arg0, %c0_i32 : i32, i32
  }
  func.func @transform_4(%arg0: i32) -> (i32, i32) {
    %c0_i32 = arith.constant 0 : i32
    %c0_i32_0 = arith.constant 0 : i32
    return %arg0, %c0_i32 : i32, i32
  }
}

module attributes {stable_mosaic.version = 11 : i64} {
  func.func @kernel(%arg0: i32, %arg1: memref<8x144xbf16, #tpu.memory_space<vmem>>, %arg2: memref<144x32xbf16, #tpu.memory_space<vmem>>, %arg3: memref<2x32xf32, #tpu.memory_space<vmem>>, %arg4: memref<8x32xf32, #tpu.memory_space<vmem>>, %arg5: memref<2x32xf32, #tpu.memory_space<vmem>>, %arg6: memref<1x32xf32, #tpu.memory_space<vmem>>, %arg7: memref<1x32xf32, #tpu.memory_space<vmem>>) attributes {dimension_semantics = [#tpu.dimension_semantics<arbitrary>], iteration_bounds = array<i64: 1>, scalar_prefetch = 0 : i64, scratch_operands = 2 : i64, tpu.core_type = #tpu.core_type<tc>, window_params = [{transform_indices = @transform_0, window_bounds = array<i64: 8, 144>}, {pipeline_mode = #tpu.pipeline_mode<synchronous>, transform_indices = @transform_1, window_bounds = array<i64: 144, 32>}, {pipeline_mode = #tpu.pipeline_mode<synchronous>, transform_indices = @transform_2, window_bounds = array<i64: 2, 32>}, {transform_indices = @transform_3, window_bounds = array<i64: 8, 32>}, {pipeline_mode = #tpu.pipeline_mode<synchronous>, transform_indices = @transform_4, window_bounds = array<i64: 2, 32>}]} {
    %c0 = arith.constant 0 : index
    %c0_0 = arith.constant 0 : index
    %0 = vector.load %arg1[%c0, %c0_0] : memref<8x144xbf16, #tpu.memory_space<vmem>>, vector<8x144xbf16>
    %c0_1 = arith.constant 0 : index
    %c0_2 = arith.constant 0 : index
    %1 = vector.load %arg2[%c0_1, %c0_2] : memref<144x32xbf16, #tpu.memory_space<vmem>>, vector<144x32xbf16>
    %cst = arith.constant dense<0.000000e+00> : vector<8x32xf32>
    %2 = tpu.matmul %0, %1, %cst {dimension_numbers = #tpu.dot_dimension_numbers<[1], [0], [0], [1], [0, 0, 1, 1], [], []>} : vector<8x144xbf16>, vector<144x32xbf16>, vector<8x32xf32> -> vector<8x32xf32>
    %c0_3 = arith.constant 0 : index
    %c0_4 = arith.constant 0 : index
    %3 = vector.load %arg4[%c0_3, %c0_4] : memref<8x32xf32, #tpu.memory_space<vmem>>, vector<8x32xf32>
    tpu.vector_store %arg4[%c0_3, %c0_4], %2 {strides = array<i32>} : memref<8x32xf32, #tpu.memory_space<vmem>>, vector<8x32xf32>,
    %c0_i32 = arith.constant 0 : i32
    %4 = arith.cmpi eq, %arg0, %c0_i32 : i32
    %5 = arith.extui %4 : i1 to i32
    %c0_i32_5 = arith.constant 0 : i32
    %6 = arith.cmpi ne, %5, %c0_i32_5 : i32
    scf.if %6 {
      %cst_18 = arith.constant 0.000000e+00 : f32
      %21 = vector.broadcast %cst_18 : f32 to vector<1x32xf32>
      %c0_19 = arith.constant 0 : index
      %c0_20 = arith.constant 0 : index
      %22 = vector.load %arg6[%c0_19, %c0_20] : memref<1x32xf32, #tpu.memory_space<vmem>>, vector<1x32xf32>
      tpu.vector_store %arg6[%c0_19, %c0_20], %21 {strides = array<i32>} : memref<1x32xf32, #tpu.memory_space<vmem>>, vector<1x32xf32>,
      %cst_21 = arith.constant 0.000000e+00 : f32
      %23 = vector.broadcast %cst_21 : f32 to vector<1x32xf32>
      %c0_22 = arith.constant 0 : index
      %c0_23 = arith.constant 0 : index
      %24 = vector.load %arg7[%c0_22, %c0_23] : memref<1x32xf32, #tpu.memory_space<vmem>>, vector<1x32xf32>
      tpu.vector_store %arg7[%c0_22, %c0_23], %23 {strides = array<i32>} : memref<1x32xf32, #tpu.memory_space<vmem>>, vector<1x32xf32>,
    } else {
    }
    %c0_6 = arith.constant 0 : index
    %c0_7 = arith.constant 0 : index
    %7 = vector.load %arg6[%c0_6, %c0_7] : memref<1x32xf32, #tpu.memory_space<vmem>>, vector<1x32xf32>
    %cst_8 = arith.constant dense<0.000000e+00> : vector<32xf32>
    %8 = vector.multi_reduction <add>, %2, %cst_8 [0] : vector<8x32xf32> to vector<32xf32>
    %9 = vector.shape_cast %8 : vector<32xf32> to vector<1x32xf32>
    %10 = arith.addf %7, %9 : vector<1x32xf32>
    %c0_9 = arith.constant 0 : index
    %c0_10 = arith.constant 0 : index
    %11 = vector.load %arg6[%c0_9, %c0_10] : memref<1x32xf32, #tpu.memory_space<vmem>>, vector<1x32xf32>
    tpu.vector_store %arg6[%c0_9, %c0_10], %10 {strides = array<i32>} : memref<1x32xf32, #tpu.memory_space<vmem>>, vector<1x32xf32>,
    %c0_11 = arith.constant 0 : index
    %c0_12 = arith.constant 0 : index
    %12 = vector.load %arg7[%c0_11, %c0_12] : memref<1x32xf32, #tpu.memory_space<vmem>>, vector<1x32xf32>
    %13 = arith.mulf %2, %2 : vector<8x32xf32>
    %cst_13 = arith.constant dense<0.000000e+00> : vector<32xf32>
    %14 = vector.multi_reduction <add>, %13, %cst_13 [0] : vector<8x32xf32> to vector<32xf32>
    %15 = vector.shape_cast %14 : vector<32xf32> to vector<1x32xf32>
    %16 = arith.addf %12, %15 : vector<1x32xf32>
    %c0_14 = arith.constant 0 : index
    %c0_15 = arith.constant 0 : index
    %17 = vector.load %arg7[%c0_14, %c0_15] : memref<1x32xf32, #tpu.memory_space<vmem>>, vector<1x32xf32>
    tpu.vector_store %arg7[%c0_14, %c0_15], %16 {strides = array<i32>} : memref<1x32xf32, #tpu.memory_space<vmem>>, vector<1x32xf32>,
    %c0_i32_16 = arith.constant 0 : i32
    %18 = arith.cmpi eq, %arg0, %c0_i32_16 : i32
    %19 = arith.extui %18 : i1 to i32
    %c0_i32_17 = arith.constant 0 : i32
    %20 = arith.cmpi ne, %19, %c0_i32_17 : i32
    scf.if %20 {
      %c0_18 = arith.constant 0 : index
      %c0_19 = arith.constant 0 : index
      %21 = vector.load %arg6[%c0_18, %c0_19] : memref<1x32xf32, #tpu.memory_space<vmem>>, vector<1x32xf32>
      %cst_20 = arith.constant 1.250000e-01 : f32
      %22 = vector.broadcast %cst_20 : f32 to vector<1x32xf32>
      %23 = arith.mulf %21, %22 : vector<1x32xf32>
      %c0_21 = arith.constant 0 : index
      %c0_22 = arith.constant 0 : index
      %24 = vector.load %arg7[%c0_21, %c0_22] : memref<1x32xf32, #tpu.memory_space<vmem>>, vector<1x32xf32>
      %cst_23 = arith.constant 1.250000e-01 : f32
      %25 = vector.broadcast %cst_23 : f32 to vector<1x32xf32>
      %26 = arith.mulf %24, %25 : vector<1x32xf32>
      %27 = arith.mulf %23, %23 : vector<1x32xf32>
      %28 = arith.subf %26, %27 : vector<1x32xf32>
      %cst_24 = arith.constant 0.000000e+00 : f32
      %29 = vector.broadcast %cst_24 : f32 to vector<1x32xf32>
      %30 = arith.maximumf %28, %29 : vector<1x32xf32>
      %c0_25 = arith.constant 0 : index
      %c0_26 = arith.constant 0 : index
      %31 = vector.load %arg3[%c0_25, %c0_26] : memref<2x32xf32, #tpu.memory_space<vmem>>, vector<1x32xf32>
      %cst_27 = arith.constant 9.99999974E-6 : f32
      %32 = vector.broadcast %cst_27 : f32 to vector<1x32xf32>
      %33 = arith.addf %30, %32 : vector<1x32xf32>
      %34 = math.rsqrt %33 : vector<1x32xf32>
      %35 = arith.mulf %31, %34 : vector<1x32xf32>
      %c0_28 = arith.constant 0 : index
      %c0_29 = arith.constant 0 : index
      %36 = vector.load %arg5[%c0_28, %c0_29] : memref<2x32xf32, #tpu.memory_space<vmem>>, vector<1x32xf32>
      tpu.vector_store %arg5[%c0_28, %c0_29], %35 {strides = array<i32>} : memref<2x32xf32, #tpu.memory_space<vmem>>, vector<1x32xf32>,
      %c1 = arith.constant 1 : index
      %c0_30 = arith.constant 0 : index
      %37 = vector.load %arg3[%c1, %c0_30] : memref<2x32xf32, #tpu.memory_space<vmem>>, vector<1x32xf32>
      %38 = arith.mulf %23, %35 : vector<1x32xf32>
      %39 = arith.subf %37, %38 : vector<1x32xf32>
      %c1_31 = arith.constant 1 : index
      %c0_32 = arith.constant 0 : index
      %40 = vector.load %arg5[%c1_31, %c0_32] : memref<2x32xf32, #tpu.memory_space<vmem>>, vector<1x32xf32>
      tpu.vector_store %arg5[%c1_31, %c0_32], %39 {strides = array<i32>} : memref<2x32xf32, #tpu.memory_space<vmem>>, vector<1x32xf32>,
    } else {
    }
    return
  }
  func.func @transform_0(%arg0: i32) -> (i32, i32) {
    %c0_i32 = arith.constant 0 : i32
    %c0_i32_0 = arith.constant 0 : i32
    return %arg0, %c0_i32 : i32, i32
  }
  func.func @transform_1(%arg0: i32) -> (i32, i32) {
    %c0_i32 = arith.constant 0 : i32
    %c0_i32_0 = arith.constant 0 : i32
    %c0_i32_1 = arith.constant 0 : i32
    return %c0_i32, %c0_i32_0 : i32, i32
  }
  func.func @transform_2(%arg0: i32) -> (i32, i32) {
    %c0_i32 = arith.constant 0 : i32
    %c0_i32_0 = arith.constant 0 : i32
    %c0_i32_1 = arith.constant 0 : i32
    return %c0_i32, %c0_i32_0 : i32, i32
  }
  func.func @transform_3(%arg0: i32) -> (i32, i32) {
    %c0_i32 = arith.constant 0 : i32
    %c0_i32_0 = arith.constant 0 : i32
    return %arg0, %c0_i32 : i32, i32
  }
  func.func @transform_4(%arg0: i32) -> (i32, i32) {
    %c0_i32 = arith.constant 0 : i32
    %c0_i32_0 = arith.constant 0 : i32
    %c0_i32_1 = arith.constant 0 : i32
    return %c0_i32, %c0_i32_0 : i32, i32
  }
}

module attributes {stable_mosaic.version = 11 : i64} {
  func.func @_bn_if_res_kernel(%arg0: i32, %arg1: memref<2x128xf32, #tpu.memory_space<vmem>>, %arg2: memref<2x128xf32, #tpu.memory_space<vmem>>, %arg3: memref<2x128xf32, #tpu.memory_space<vmem>>, %arg4: memref<2x128xf32, #tpu.memory_space<vmem>>, %arg5: memref<2x128xf32, #tpu.memory_space<vmem>>, %arg6: memref<2x128xbf16, #tpu.memory_space<vmem>>, %arg7: memref<2x128xf32, #tpu.memory_space<vmem>>) attributes {dimension_semantics = [#tpu.dimension_semantics<parallel>], iteration_bounds = array<i64: 1>, scalar_prefetch = 0 : i64, scratch_operands = 0 : i64, tpu.core_type = #tpu.core_type<tc>, window_params = [{transform_indices = @transform_0, window_bounds = array<i64: 2, 128>}, {pipeline_mode = #tpu.pipeline_mode<synchronous>, transform_indices = @transform_1, window_bounds = array<i64: 2, 128>}, {transform_indices = @transform_2, window_bounds = array<i64: 2, 128>}, {pipeline_mode = #tpu.pipeline_mode<synchronous>, transform_indices = @transform_3, window_bounds = array<i64: 2, 128>}, {transform_indices = @transform_4, window_bounds = array<i64: 2, 128>}, {transform_indices = @transform_5, window_bounds = array<i64: 2, 128>}, {transform_indices = @transform_6, window_bounds = array<i64: 2, 128>}]} {
    %c0 = arith.constant 0 : index
    %c0_0 = arith.constant 0 : index
    %0 = vector.load %arg1[%c0, %c0_0] : memref<2x128xf32, #tpu.memory_space<vmem>>, vector<2x128xf32>
    %c0_1 = arith.constant 0 : index
    %c0_2 = arith.constant 0 : index
    %1 = vector.load %arg2[%c0_1, %c0_2] : memref<2x128xf32, #tpu.memory_space<vmem>>, vector<1x128xf32>
    %2 = vector.broadcast %1 : vector<1x128xf32> to vector<2x128xf32>
    %3 = arith.mulf %0, %2 : vector<2x128xf32>
    %c1 = arith.constant 1 : index
    %c0_3 = arith.constant 0 : index
    %4 = vector.load %arg2[%c1, %c0_3] : memref<2x128xf32, #tpu.memory_space<vmem>>, vector<1x128xf32>
    %5 = vector.broadcast %4 : vector<1x128xf32> to vector<2x128xf32>
    %6 = arith.addf %3, %5 : vector<2x128xf32>
    %c0_4 = arith.constant 0 : index
    %c0_5 = arith.constant 0 : index
    %7 = vector.load %arg3[%c0_4, %c0_5] : memref<2x128xf32, #tpu.memory_space<vmem>>, vector<2x128xf32>
    %c0_6 = arith.constant 0 : index
    %c0_7 = arith.constant 0 : index
    %8 = vector.load %arg4[%c0_6, %c0_7] : memref<2x128xf32, #tpu.memory_space<vmem>>, vector<1x128xf32>
    %9 = vector.broadcast %8 : vector<1x128xf32> to vector<2x128xf32>
    %10 = arith.mulf %7, %9 : vector<2x128xf32>
    %c1_8 = arith.constant 1 : index
    %c0_9 = arith.constant 0 : index
    %11 = vector.load %arg4[%c1_8, %c0_9] : memref<2x128xf32, #tpu.memory_space<vmem>>, vector<1x128xf32>
    %12 = vector.broadcast %11 : vector<1x128xf32> to vector<2x128xf32>
    %13 = arith.addf %10, %12 : vector<2x128xf32>
    %c0_10 = arith.constant 0 : index
    %c0_11 = arith.constant 0 : index
    %14 = vector.load %arg5[%c0_10, %c0_11] : memref<2x128xf32, #tpu.memory_space<vmem>>, vector<2x128xf32>
    %15 = arith.addf %14, %6 : vector<2x128xf32>
    %16 = arith.addf %15, %13 : vector<2x128xf32>
    %cst = arith.constant 1.000000e+00 : f32
    %17 = vector.broadcast %cst : f32 to vector<2x128xf32>
    %18 = arith.cmpf oge, %16, %17 : vector<2x128xf32>
    %19 = arith.extui %18 : vector<2x128xi1> to vector<2x128xi32>
    %20 = arith.sitofp %19 : vector<2x128xi32> to vector<2x128xf32>
    %21 = arith.truncf %20 : vector<2x128xf32> to vector<2x128xbf16>
    %c0_12 = arith.constant 0 : index
    %c0_13 = arith.constant 0 : index
    %22 = vector.load %arg6[%c0_12, %c0_13] : memref<2x128xbf16, #tpu.memory_space<vmem>>, vector<2x128xbf16>
    tpu.vector_store %arg6[%c0_12, %c0_13], %21 {strides = array<i32>} : memref<2x128xbf16, #tpu.memory_space<vmem>>, vector<2x128xbf16>,
    %cst_14 = arith.constant 0.000000e+00 : f32
    %23 = vector.broadcast %cst_14 : f32 to vector<2x128xf32>
    %24 = arith.select %18, %23, %16 : vector<2x128xi1>, vector<2x128xf32>
    %c0_15 = arith.constant 0 : index
    %c0_16 = arith.constant 0 : index
    %25 = vector.load %arg7[%c0_15, %c0_16] : memref<2x128xf32, #tpu.memory_space<vmem>>, vector<2x128xf32>
    tpu.vector_store %arg7[%c0_15, %c0_16], %24 {strides = array<i32>} : memref<2x128xf32, #tpu.memory_space<vmem>>, vector<2x128xf32>,
    return
  }
  func.func @transform_0(%arg0: i32) -> (i32, i32) {
    %c0_i32 = arith.constant 0 : i32
    %c0_i32_0 = arith.constant 0 : i32
    return %arg0, %c0_i32 : i32, i32
  }
  func.func @transform_1(%arg0: i32) -> (i32, i32) {
    %c0_i32 = arith.constant 0 : i32
    %c0_i32_0 = arith.constant 0 : i32
    %c0_i32_1 = arith.constant 0 : i32
    return %c0_i32, %c0_i32_0 : i32, i32
  }
  func.func @transform_2(%arg0: i32) -> (i32, i32) {
    %c0_i32 = arith.constant 0 : i32
    %c0_i32_0 = arith.constant 0 : i32
    return %arg0, %c0_i32 : i32, i32
  }
  func.func @transform_3(%arg0: i32) -> (i32, i32) {
    %c0_i32 = arith.constant 0 : i32
    %c0_i32_0 = arith.constant 0 : i32
    %c0_i32_1 = arith.constant 0 : i32
    return %c0_i32, %c0_i32_0 : i32, i32
  }
  func.func @transform_4(%arg0: i32) -> (i32, i32) {
    %c0_i32 = arith.constant 0 : i32
    %c0_i32_0 = arith.constant 0 : i32
    return %arg0, %c0_i32 : i32, i32
  }
  func.func @transform_5(%arg0: i32) -> (i32, i32) {
    %c0_i32 = arith.constant 0 : i32
    %c0_i32_0 = arith.constant 0 : i32
    return %arg0, %c0_i32 : i32, i32
  }
  func.func @transform_6(%arg0: i32) -> (i32, i32) {
    %c0_i32 = arith.constant 0 : i32
    %c0_i32_0 = arith.constant 0 : i32
    return %arg0, %c0_i32 : i32, i32
  }
}

module attributes {stable_mosaic.version = 11 : i64} {
  func.func @kernel(%arg0: i32, %arg1: memref<8x288xbf16, #tpu.memory_space<vmem>>, %arg2: memref<288x32xbf16, #tpu.memory_space<vmem>>, %arg3: memref<2x32xf32, #tpu.memory_space<vmem>>, %arg4: memref<8x32xf32, #tpu.memory_space<vmem>>, %arg5: memref<2x32xf32, #tpu.memory_space<vmem>>, %arg6: memref<1x32xf32, #tpu.memory_space<vmem>>, %arg7: memref<1x32xf32, #tpu.memory_space<vmem>>) attributes {dimension_semantics = [#tpu.dimension_semantics<arbitrary>], iteration_bounds = array<i64: 1>, scalar_prefetch = 0 : i64, scratch_operands = 2 : i64, tpu.core_type = #tpu.core_type<tc>, window_params = [{transform_indices = @transform_0, window_bounds = array<i64: 8, 288>}, {pipeline_mode = #tpu.pipeline_mode<synchronous>, transform_indices = @transform_1, window_bounds = array<i64: 288, 32>}, {pipeline_mode = #tpu.pipeline_mode<synchronous>, transform_indices = @transform_2, window_bounds = array<i64: 2, 32>}, {transform_indices = @transform_3, window_bounds = array<i64: 8, 32>}, {pipeline_mode = #tpu.pipeline_mode<synchronous>, transform_indices = @transform_4, window_bounds = array<i64: 2, 32>}]} {
    %c0 = arith.constant 0 : index
    %c0_0 = arith.constant 0 : index
    %0 = vector.load %arg1[%c0, %c0_0] : memref<8x288xbf16, #tpu.memory_space<vmem>>, vector<8x288xbf16>
    %c0_1 = arith.constant 0 : index
    %c0_2 = arith.constant 0 : index
    %1 = vector.load %arg2[%c0_1, %c0_2] : memref<288x32xbf16, #tpu.memory_space<vmem>>, vector<288x32xbf16>
    %cst = arith.constant dense<0.000000e+00> : vector<8x32xf32>
    %2 = tpu.matmul %0, %1, %cst {dimension_numbers = #tpu.dot_dimension_numbers<[1], [0], [0], [1], [0, 0, 1, 1], [], []>} : vector<8x288xbf16>, vector<288x32xbf16>, vector<8x32xf32> -> vector<8x32xf32>
    %c0_3 = arith.constant 0 : index
    %c0_4 = arith.constant 0 : index
    %3 = vector.load %arg4[%c0_3, %c0_4] : memref<8x32xf32, #tpu.memory_space<vmem>>, vector<8x32xf32>
    tpu.vector_store %arg4[%c0_3, %c0_4], %2 {strides = array<i32>} : memref<8x32xf32, #tpu.memory_space<vmem>>, vector<8x32xf32>,
    %c0_i32 = arith.constant 0 : i32
    %4 = arith.cmpi eq, %arg0, %c0_i32 : i32
    %5 = arith.extui %4 : i1 to i32
    %c0_i32_5 = arith.constant 0 : i32
    %6 = arith.cmpi ne, %5, %c0_i32_5 : i32
    scf.if %6 {
      %cst_18 = arith.constant 0.000000e+00 : f32
      %21 = vector.broadcast %cst_18 : f32 to vector<1x32xf32>
      %c0_19 = arith.constant 0 : index
      %c0_20 = arith.constant 0 : index
      %22 = vector.load %arg6[%c0_19, %c0_20] : memref<1x32xf32, #tpu.memory_space<vmem>>, vector<1x32xf32>
      tpu.vector_store %arg6[%c0_19, %c0_20], %21 {strides = array<i32>} : memref<1x32xf32, #tpu.memory_space<vmem>>, vector<1x32xf32>,
      %cst_21 = arith.constant 0.000000e+00 : f32
      %23 = vector.broadcast %cst_21 : f32 to vector<1x32xf32>
      %c0_22 = arith.constant 0 : index
      %c0_23 = arith.constant 0 : index
      %24 = vector.load %arg7[%c0_22, %c0_23] : memref<1x32xf32, #tpu.memory_space<vmem>>, vector<1x32xf32>
      tpu.vector_store %arg7[%c0_22, %c0_23], %23 {strides = array<i32>} : memref<1x32xf32, #tpu.memory_space<vmem>>, vector<1x32xf32>,
    } else {
    }
    %c0_6 = arith.constant 0 : index
    %c0_7 = arith.constant 0 : index
    %7 = vector.load %arg6[%c0_6, %c0_7] : memref<1x32xf32, #tpu.memory_space<vmem>>, vector<1x32xf32>
    %cst_8 = arith.constant dense<0.000000e+00> : vector<32xf32>
    %8 = vector.multi_reduction <add>, %2, %cst_8 [0] : vector<8x32xf32> to vector<32xf32>
    %9 = vector.shape_cast %8 : vector<32xf32> to vector<1x32xf32>
    %10 = arith.addf %7, %9 : vector<1x32xf32>
    %c0_9 = arith.constant 0 : index
    %c0_10 = arith.constant 0 : index
    %11 = vector.load %arg6[%c0_9, %c0_10] : memref<1x32xf32, #tpu.memory_space<vmem>>, vector<1x32xf32>
    tpu.vector_store %arg6[%c0_9, %c0_10], %10 {strides = array<i32>} : memref<1x32xf32, #tpu.memory_space<vmem>>, vector<1x32xf32>,
    %c0_11 = arith.constant 0 : index
    %c0_12 = arith.constant 0 : index
    %12 = vector.load %arg7[%c0_11, %c0_12] : memref<1x32xf32, #tpu.memory_space<vmem>>, vector<1x32xf32>
    %13 = arith.mulf %2, %2 : vector<8x32xf32>
    %cst_13 = arith.constant dense<0.000000e+00> : vector<32xf32>
    %14 = vector.multi_reduction <add>, %13, %cst_13 [0] : vector<8x32xf32> to vector<32xf32>
    %15 = vector.shape_cast %14 : vector<32xf32> to vector<1x32xf32>
    %16 = arith.addf %12, %15 : vector<1x32xf32>
    %c0_14 = arith.constant 0 : index
    %c0_15 = arith.constant 0 : index
    %17 = vector.load %arg7[%c0_14, %c0_15] : memref<1x32xf32, #tpu.memory_space<vmem>>, vector<1x32xf32>
    tpu.vector_store %arg7[%c0_14, %c0_15], %16 {strides = array<i32>} : memref<1x32xf32, #tpu.memory_space<vmem>>, vector<1x32xf32>,
    %c0_i32_16 = arith.constant 0 : i32
    %18 = arith.cmpi eq, %arg0, %c0_i32_16 : i32
    %19 = arith.extui %18 : i1 to i32
    %c0_i32_17 = arith.constant 0 : i32
    %20 = arith.cmpi ne, %19, %c0_i32_17 : i32
    scf.if %20 {
      %c0_18 = arith.constant 0 : index
      %c0_19 = arith.constant 0 : index
      %21 = vector.load %arg6[%c0_18, %c0_19] : memref<1x32xf32, #tpu.memory_space<vmem>>, vector<1x32xf32>
      %cst_20 = arith.constant 1.250000e-01 : f32
      %22 = vector.broadcast %cst_20 : f32 to vector<1x32xf32>
      %23 = arith.mulf %21, %22 : vector<1x32xf32>
      %c0_21 = arith.constant 0 : index
      %c0_22 = arith.constant 0 : index
      %24 = vector.load %arg7[%c0_21, %c0_22] : memref<1x32xf32, #tpu.memory_space<vmem>>, vector<1x32xf32>
      %cst_23 = arith.constant 1.250000e-01 : f32
      %25 = vector.broadcast %cst_23 : f32 to vector<1x32xf32>
      %26 = arith.mulf %24, %25 : vector<1x32xf32>
      %27 = arith.mulf %23, %23 : vector<1x32xf32>
      %28 = arith.subf %26, %27 : vector<1x32xf32>
      %cst_24 = arith.constant 0.000000e+00 : f32
      %29 = vector.broadcast %cst_24 : f32 to vector<1x32xf32>
      %30 = arith.maximumf %28, %29 : vector<1x32xf32>
      %c0_25 = arith.constant 0 : index
      %c0_26 = arith.constant 0 : index
      %31 = vector.load %arg3[%c0_25, %c0_26] : memref<2x32xf32, #tpu.memory_space<vmem>>, vector<1x32xf32>
      %cst_27 = arith.constant 9.99999974E-6 : f32
      %32 = vector.broadcast %cst_27 : f32 to vector<1x32xf32>
      %33 = arith.addf %30, %32 : vector<1x32xf32>
      %34 = math.rsqrt %33 : vector<1x32xf32>
      %35 = arith.mulf %31, %34 : vector<1x32xf32>
      %c0_28 = arith.constant 0 : index
      %c0_29 = arith.constant 0 : index
      %36 = vector.load %arg5[%c0_28, %c0_29] : memref<2x32xf32, #tpu.memory_space<vmem>>, vector<1x32xf32>
      tpu.vector_store %arg5[%c0_28, %c0_29], %35 {strides = array<i32>} : memref<2x32xf32, #tpu.memory_space<vmem>>, vector<1x32xf32>,
      %c1 = arith.constant 1 : index
      %c0_30 = arith.constant 0 : index
      %37 = vector.load %arg3[%c1, %c0_30] : memref<2x32xf32, #tpu.memory_space<vmem>>, vector<1x32xf32>
      %38 = arith.mulf %23, %35 : vector<1x32xf32>
      %39 = arith.subf %37, %38 : vector<1x32xf32>
      %c1_31 = arith.constant 1 : index
      %c0_32 = arith.constant 0 : index
      %40 = vector.load %arg5[%c1_31, %c0_32] : memref<2x32xf32, #tpu.memory_space<vmem>>, vector<1x32xf32>
      tpu.vector_store %arg5[%c1_31, %c0_32], %39 {strides = array<i32>} : memref<2x32xf32, #tpu.memory_space<vmem>>, vector<1x32xf32>,
    } else {
    }
    return
  }
  func.func @transform_0(%arg0: i32) -> (i32, i32) {
    %c0_i32 = arith.constant 0 : i32
    %c0_i32_0 = arith.constant 0 : i32
    return %arg0, %c0_i32 : i32, i32
  }
  func.func @transform_1(%arg0: i32) -> (i32, i32) {
    %c0_i32 = arith.constant 0 : i32
    %c0_i32_0 = arith.constant 0 : i32
    %c0_i32_1 = arith.constant 0 : i32
    return %c0_i32, %c0_i32_0 : i32, i32
  }
  func.func @transform_2(%arg0: i32) -> (i32, i32) {
    %c0_i32 = arith.constant 0 : i32
    %c0_i32_0 = arith.constant 0 : i32
    %c0_i32_1 = arith.constant 0 : i32
    return %c0_i32, %c0_i32_0 : i32, i32
  }
  func.func @transform_3(%arg0: i32) -> (i32, i32) {
    %c0_i32 = arith.constant 0 : i32
    %c0_i32_0 = arith.constant 0 : i32
    return %arg0, %c0_i32 : i32, i32
  }
  func.func @transform_4(%arg0: i32) -> (i32, i32) {
    %c0_i32 = arith.constant 0 : i32
    %c0_i32_0 = arith.constant 0 : i32
    %c0_i32_1 = arith.constant 0 : i32
    return %c0_i32, %c0_i32_0 : i32, i32
  }
}

module attributes {stable_mosaic.version = 11 : i64} {
  func.func @kernel(%arg0: i32, %arg1: memref<2x2x1x64xbf16, #tpu.memory_space<vmem>>, %arg2: memref<2x1x32xbf16, #tpu.memory_space<vmem>>) attributes {dimension_semantics = [#tpu.dimension_semantics<parallel>], iteration_bounds = array<i64: 1>, scalar_prefetch = 0 : i64, scratch_operands = 0 : i64, tpu.core_type = #tpu.core_type<tc>, window_params = [{transform_indices = @transform_0, window_bounds = array<i64: 2, 2, 1, 64>}, {transform_indices = @transform_1, window_bounds = array<i64: 2, 1, 32>}]} {
    %c0 = arith.constant 0 : index
    %c0_0 = arith.constant 0 : index
    %c0_1 = arith.constant 0 : index
    %c0_2 = arith.constant 0 : index
    %0 = vector.load %arg1[%c0, %c0_0, %c0_1, %c0_2] : memref<2x2x1x64xbf16, #tpu.memory_space<vmem>>, vector<2x2x1x64xbf16>
    %1 = vector.extract_strided_slice %0 {offsets = [0, 0, 0, 0], sizes = [2, 1, 1, 64], strides = [1, 1, 1, 1]} : vector<2x2x1x64xbf16> to vector<2x1x1x64xbf16>
    %2 = vector.shape_cast %1 : vector<2x1x1x64xbf16> to vector<2x1x64xbf16>
    %3 = vector.extract_strided_slice %0 {offsets = [0, 1, 0, 0], sizes = [2, 1, 1, 64], strides = [1, 1, 1, 1]} : vector<2x2x1x64xbf16> to vector<2x1x1x64xbf16>
    %4 = vector.shape_cast %3 : vector<2x1x1x64xbf16> to vector<2x1x64xbf16>
    %5 = arith.maximumf %2, %4 : vector<2x1x64xbf16>
    %6 = vector.extract_strided_slice %5 {offsets = [0, 0, 0], sizes = [2, 1, 32], strides = [1, 1, 1]} : vector<2x1x64xbf16> to vector<2x1x32xbf16>
    %7 = vector.extract_strided_slice %5 {offsets = [0, 0, 32], sizes = [2, 1, 32], strides = [1, 1, 1]} : vector<2x1x64xbf16> to vector<2x1x32xbf16>
    %8 = arith.maximumf %6, %7 : vector<2x1x32xbf16>
    %c0_3 = arith.constant 0 : index
    %c0_4 = arith.constant 0 : index
    %c0_5 = arith.constant 0 : index
    %9 = vector.load %arg2[%c0_3, %c0_4, %c0_5] : memref<2x1x32xbf16, #tpu.memory_space<vmem>>, vector<2x1x32xbf16>
    tpu.vector_store %arg2[%c0_3, %c0_4, %c0_5], %8 {strides = array<i32>} : memref<2x1x32xbf16, #tpu.memory_space<vmem>>, vector<2x1x32xbf16>,
    return
  }
  func.func @transform_0(%arg0: i32) -> (i32, i32, i32, i32) {
    %c0_i32 = arith.constant 0 : i32
    %c0_i32_0 = arith.constant 0 : i32
    %c0_i32_1 = arith.constant 0 : i32
    %c0_i32_2 = arith.constant 0 : i32
    return %arg0, %c0_i32, %c0_i32_0, %c0_i32_1 : i32, i32, i32, i32
  }
  func.func @transform_1(%arg0: i32) -> (i32, i32, i32) {
    %c0_i32 = arith.constant 0 : i32
    %c0_i32_0 = arith.constant 0 : i32
    %c0_i32_1 = arith.constant 0 : i32
    return %arg0, %c0_i32, %c0_i32_0 : i32, i32, i32
  }
}

</mosaic_0001>

<bundles_post_ra>
// kernel: custom-call
= control target key start
LH: loop header
LB: loop body
LE: loop exit
PB: predicated region body
PF: predicated region fallthrough
CT: control target
= control target key end

     0   :  { %s6_s0 = inlined_call_operand.vmem [shape: f32[2,1,1,32], index: 0, kind: output, shape index: {}]  }

// kernel: jelly_resnet12_forward.1
= control target key start
LH: loop header
LB: loop body
LE: loop exit
PB: predicated region body
PF: predicated region fallthrough
CT: control target
= control target key end

     0   :  { %s1051_s15 = smov 0   ;;  %s1496_s0 = inlined_call_operand.vmem [shape: f32[512,27], index: 0, kind: input, shape index: {}]   ;;  %s1497_s1 = inlined_call_operand.vmem [shape: f32[27,3], index: 1, kind: input, shape index: {}]   ;;  %s1498_s2 = inlined_call_operand.vmem [shape: f32[2,3], index: 2, kind: input, shape index: {}]   ;;  %s1499_s3 = inlined_call_operand.vmem [shape: f32[512,3], index: 3, kind: output, shape index: {0}]   ;;  %s1500_s4 = inlined_call_operand.vmem [shape: f32[2,3], index: 4, kind: output, shape index: {1}]  }
   0x1 LB: > { %s1057_s16 = sadd.s32 4294967295, %s1023_s15   ;;  %p864_p0 = scmp.ge.s32.totalorder %s1023_s15, 1  ;;  %s1023_s15 = sphi %s1051_s15, %s15_s15  }
   0x2   : > { %p161_p1 = scmp.lt.s32.totalorder %s1023_s15, 3 }
   0x4   : > { %p162_p2 = pnand %p864_p0, %p161_p1 }
   0x5   : > { %s865_s21 = sshll.u32 (!%p162_p2), %s1057_s16, 5  ;;  %p902_p4 = scmp.ne.s32.totalorder (!%p162_p2), %s1057_s16, 0 }
   0x6   : > { %165 = sbr.rel (%p162_p2) target bundleno = 366 (0x16e), region = 32  ;;  %p188_p3 = scmp.lt.s32.totalorder (!%p162_p2), %s865_s21, 63 }
   0xb   : > { %v234_v0 = vld [vmem:[%s1497_s1 + $0x18] sm:$0x7]  ;;  %vm332_vm0 = vcmask 1042432   ;;  %v233_v1 = vld [vmem:[%s1497_s1 + $0x10] sm:$0xff]  ;;  %v232_v2 = vld [vmem:[%s1497_s1 + $0x8] sm:$0xff]  ;;  %s1502_s21 = smov (!%p188_p3, %s865_s21), 63 }
   0xc   : > { %942 = vmatprep.subr.msk.mxu0 %vm332_vm0, %v234_v0  ;;  %998 = vmatprep.subr.msk.mxu1 %vm332_vm0, %v234_v0  ;;  %v231_v3 = vld [vmem:[%s1497_s1] sm:$0xff]  ;;  %s866_s26 = sshll.u32 %s1502_s21, 3  ;;  %vm235_vm1 = vcmask 220160   ;;  %vm561_vm2 = vcmask 23552  }
   0xd   : > { %943 = vmatpush3.msk.msra.mxu0 %vm332_vm0, %v234_v0  ;;  %1002 = vmatpush3.msk.msra.mxu1 %vm332_vm0, %v234_v0  ;;  %s1082_s29 = scalar_lea.vmem %s1496_s0, %s866_s26  ;;  %s1153_s6 = scalar_lea.vmem %s1499_s3, %s866_s26 }
   0xe   : > { %944 = vmatprep.subr.mxu0 %v233_v1  ;;  %999 = vmatprep.subr.mxu1 %v233_v1  ;;  %v199_v4 = vld [vmem:[%s1082_s29] sm:$0xff]  ;;  %v200_v6 = vld [vmem:[%s1082_s29 + $0x8] sm:$0xff]  ;;  %v201_v8 = vld [vmem:[%s1082_s29 + $0x10] sm:$0xff] }
   0xf   : > { %945 = vmatpush3.msra.mxu0 %v233_v1  ;;  %1003 = vmatpush3.msra.mxu1 %v233_v1  ;;  %v215_v5 = vld [vmem:[%s1082_s29 + $0x80] sm:$0xff]  ;;  %v216_v7 = vld [vmem:[%s1082_s29 + $0x88] sm:$0xff]  ;;  %v217_v9 = vld [vmem:[%s1082_s29 + $0x90] sm:$0xff] }
  0x10   : > { %946 = vmatprep.subr.mxu0 %v232_v2  ;;  %1000 = vmatprep.subr.mxu1 %v232_v2  ;;  %v202_v10 = vld [vmem:[%s1082_s29 + $0x18] sm:$0xff]  ;;  %v203_v12 = vld [vmem:[%s1082_s29 + $0x20] sm:$0xff]  ;;  %v204_v14 = vld [vmem:[%s1082_s29 + $0x28] sm:$0xff] }
  0x11   : > { %947 = vmatpush3.msra.mxu0 %v232_v2  ;;  %1004 = vmatpush3.msra.mxu1 %v232_v2  ;;  %v218_v11 = vld [vmem:[%s1082_s29 + $0x98] sm:$0xff]  ;;  %v219_v13 = vld [vmem:[%s1082_s29 + $0xa0] sm:$0xff]  ;;  %v220_v15 = vld [vmem:[%s1082_s29 + $0xa8] sm:$0xff] }
  0x12   : > { %948 = vmatprep.subr.mxu0 %v231_v3  ;;  %1001 = vmatprep.subr.mxu1 %v231_v3  ;;  %v205_v16 = vld [vmem:[%s1082_s29 + $0x30] sm:$0xff]  ;;  %v206_v18 = vld [vmem:[%s1082_s29 + $0x38] sm:$0xff]  ;;  %v207_v20 = vld [vmem:[%s1082_s29 + $0x40] sm:$0xff] }
  0x13   : > { %949 = vmatpush3.msra.mxu0 %v231_v3  ;;  %1005 = vmatpush3.msra.mxu1 %v231_v3  ;;  %v221_v17 = vld [vmem:[%s1082_s29 + $0xb0] sm:$0xff]  ;;  %v222_v19 = vld [vmem:[%s1082_s29 + $0xb8] sm:$0xff]  ;;  %v223_v21 = vld [vmem:[%s1082_s29 + $0xc0] sm:$0xff] }
  0x14   : > { %950 = vmatprep.mubr.msk.f32.mxu0 %vm235_vm1, %v199_v4  ;;  %974 = vmatprep.mubr.msk.f32.mxu1 %vm235_vm1, %v215_v5  ;;  %v208_v22 = vld [vmem:[%s1082_s29 + $0x48] sm:$0xff]  ;;  %v209_v24 = vld [vmem:[%s1082_s29 + $0x50] sm:$0xff]  ;;  %v210_v26 = vld [vmem:[%s1082_s29 + $0x58] sm:$0xff] }
  0x15   : > { %951 = vmatmul.mubr.msk.f32.vlgmr.msra.gmra.mxu0 %vm235_vm1, %v200_v6  ;;  %975 = vmatmul.mubr.msk.f32.vlgmr.msra.gmra.mxu1 %vm235_vm1, %v216_v7  ;;  %v224_v23 = vld [vmem:[%s1082_s29 + $0xc8] sm:$0xff]  ;;  %v225_v25 = vld [vmem:[%s1082_s29 + $0xd0] sm:$0xff]  ;;  %v226_v27 = vld [vmem:[%s1082_s29 + $0xd8] sm:$0xff] }
  0x16   : > { %953 = vmatprep.mubr.msk.f32.mxu0 %vm235_vm1, %v201_v8  ;;  %977 = vmatprep.mubr.msk.f32.mxu1 %vm235_vm1, %v217_v9  ;;  %v211_v28 = vld [vmem:[%s1082_s29 + $0x60] sm:$0xff]  ;;  %v212_v30 = vld [vmem:[%s1082_s29 + $0x68] sm:$0xff]  ;;  %v213_v32 = vld [vmem:[%s1082_s29 + $0x70] sm:$0xff] }
  0x17   : > { %v227_v29 = vld [vmem:[%s1082_s29 + $0xe0] sm:$0xff]  ;;  %v228_v31 = vld [vmem:[%s1082_s29 + $0xe8] sm:$0xff]  ;;  %v229_v33 = vld [vmem:[%s1082_s29 + $0xf0] sm:$0xff] }
  0x18   : > { %v214_v34 = vld [vmem:[%s1082_s29 + $0x78] sm:$0xff] }
  0x19   : > { %954 = vmatmul.mubr.msk.f32.gmra.mxu0 %vm235_vm1, %v202_v10  ;;  %978 = vmatmul.mubr.msk.f32.gmra.mxu1 %vm235_vm1, %v218_v11  ;;  %v230_v35 = vld [vmem:[%s1082_s29 + $0xf8] sm:$0xff] }
  0x1a   : > { %956 = vmatprep.mubr.msk.f32.mxu0 %vm235_vm1, %v203_v12  ;;  %980 = vmatprep.mubr.msk.f32.mxu1 %vm235_vm1, %v219_v13 }
  0x1d   : > { %957 = vmatmul.mubr.msk.f32.gmra.mxu0 %vm235_vm1, %v204_v14  ;;  %981 = vmatmul.mubr.msk.f32.gmra.mxu1 %vm235_vm1, %v220_v15 }
  0x1e   : > { %959 = vmatprep.mubr.msk.f32.mxu0 %vm235_vm1, %v205_v16  ;;  %983 = vmatprep.mubr.msk.f32.mxu1 %vm235_vm1, %v221_v17 }
  0x21   : > { %960 = vmatmul.mubr.msk.f32.gmra.mxu0 %vm235_vm1, %v206_v18  ;;  %984 = vmatmul.mubr.msk.f32.gmra.mxu1 %vm235_vm1, %v222_v19 }
  0x22   : > { %962 = vmatprep.mubr.msk.f32.mxu0 %vm235_vm1, %v207_v20  ;;  %986 = vmatprep.mubr.msk.f32.mxu1 %vm235_vm1, %v223_v21 }
  0x25   : > { %963 = vmatmul.mubr.msk.f32.gmra.mxu0 %vm235_vm1, %v208_v22  ;;  %987 = vmatmul.mubr.msk.f32.gmra.mxu1 %vm235_vm1, %v224_v23 }
  0x26   : > { %965 = vmatprep.mubr.msk.f32.mxu0 %vm235_vm1, %v209_v24  ;;  %989 = vmatprep.mubr.msk.f32.mxu1 %vm235_vm1, %v225_v25 }
  0x29   : > { %966 = vmatmul.mubr.msk.f32.gmra.mxu0 %vm235_vm1, %v210_v26  ;;  %990 = vmatmul.mubr.msk.f32.gmra.mxu1 %vm235_vm1, %v226_v27 }
  0x2a   : > { %968 = vmatprep.mubr.msk.f32.mxu0 %vm235_vm1, %v211_v28  ;;  %992 = vmatprep.mubr.msk.f32.mxu1 %vm235_vm1, %v227_v29 }
  0x2d   : > { %969 = vmatmul.mubr.msk.f32.gmra.mxu0 %vm235_vm1, %v212_v30  ;;  %993 = vmatmul.mubr.msk.f32.gmra.mxu1 %vm235_vm1, %v228_v31 }
  0x2e   : > { %971 = vmatprep.mubr.msk.f32.mxu0 %vm235_vm1, %v213_v32  ;;  %995 = vmatprep.mubr.msk.f32.mxu1 %vm235_vm1, %v229_v33 }
  0x31   : > { %972 = vmatmul.mubr.msk.f32.gmra.mxu0 %vm235_vm1, %v214_v34  ;;  %996 = vmatmul.mubr.msk.f32.gmra.mxu1 %vm235_vm1, %v230_v35 }
  0xd5   : > { %v1155_v36 = vpop.f32.mrf.mxu0  ;;  %v1157_v37 = vpop.f32.mrf.mxu1 }
  0xd6   : > { %563 = vst.msk [vmem:[%s1153_s6 + $0x8] sm:$0xff] %vm561_vm2, %v1155_v36  ;;  %579 = vst.msk [vmem:[%s1153_s6 + $0x88] sm:$0xff] %vm561_vm2, %v1157_v37 }
  0xd7   : > { %v1165_v38 = vpop.f32.mrf.mxu0  ;;  %v1167_v39 = vpop.f32.mrf.mxu1 }
  0xd8   : > { %562 = vst.msk [vmem:[%s1153_s6] sm:$0xff] %vm561_vm2, %v1165_v38  ;;  %578 = vst.msk [vmem:[%s1153_s6 + $0x80] sm:$0xff] %vm561_vm2, %v1167_v39 }
  0xd9   : > { %v1175_v40 = vpop.f32.mrf.mxu0  ;;  %v1177_v41 = vpop.f32.mrf.mxu1 }
  0xda   : > { %565 = vst.msk [vmem:[%s1153_s6 + $0x18] sm:$0xff] %vm561_vm2, %v1175_v40  ;;  %581 = vst.msk [vmem:[%s1153_s6 + $0x98] sm:$0xff] %vm561_vm2, %v1177_v41 }
  0xdb   : > { %v1185_v42 = vpop.f32.mrf.mxu0  ;;  %v1187_v43 = vpop.f32.mrf.mxu1 }
  0xdc   : > { %564 = vst.msk [vmem:[%s1153_s6 + $0x10] sm:$0xff] %vm561_vm2, %v1185_v42  ;;  %580 = vst.msk [vmem:[%s1153_s6 + $0x90] sm:$0xff] %vm561_vm2, %v1187_v43 }
  0xdd   : > { %v1195_v44 = vpop.f32.mrf.mxu0  ;;  %v1197_v45 = vpop.f32.mrf.mxu1 }
  0xde   : > { %567 = vst.msk [vmem:[%s1153_s6 + $0x28] sm:$0xff] %vm561_vm2, %v1195_v44  ;;  %583 = vst.msk [vmem:[%s1153_s6 + $0xa8] sm:$0xff] %vm561_vm2, %v1197_v45 }
  0xdf   : > { %v1205_v46 = vpop.f32.mrf.mxu0  ;;  %v1207_v47 = vpop.f32.mrf.mxu1 }
  0xe0   : > { %566 = vst.msk [vmem:[%s1153_s6 + $0x20] sm:$0xff] %vm561_vm2, %v1205_v46  ;;  %582 = vst.msk [vmem:[%s1153_s6 + $0xa0] sm:$0xff] %vm561_vm2, %v1207_v47 }
  0xe1   : > { %v1215_v48 = vpop.f32.mrf.mxu0  ;;  %v1217_v49 = vpop.f32.mrf.mxu1 }
  0xe2   : > { %569 = vst.msk [vmem:[%s1153_s6 + $0x38] sm:$0xff] %vm561_vm2, %v1215_v48  ;;  %585 = vst.msk [vmem:[%s1153_s6 + $0xb8] sm:$0xff] %vm561_vm2, %v1217_v49 }
  0xe3   : > { %v1225_v50 = vpop.f32.mrf.mxu0  ;;  %v1227_v51 = vpop.f32.mrf.mxu1 }
  0xe4   : > { %568 = vst.msk [vmem:[%s1153_s6 + $0x30] sm:$0xff] %vm561_vm2, %v1225_v50  ;;  %584 = vst.msk [vmem:[%s1153_s6 + $0xb0] sm:$0xff] %vm561_vm2, %v1227_v51 }
  0xe5   : > { %v1235_v52 = vpop.f32.mrf.mxu0  ;;  %v1237_v53 = vpop.f32.mrf.mxu1 }
  0xe6   : > { %571 = vst.msk [vmem:[%s1153_s6 + $0x48] sm:$0xff] %vm561_vm2, %v1235_v52  ;;  %587 = vst.msk [vmem:[%s1153_s6 + $0xc8] sm:$0xff] %vm561_vm2, %v1237_v53 }
  0xe7   : > { %v1245_v54 = vpop.f32.mrf.mxu0  ;;  %v1247_v55 = vpop.f32.mrf.mxu1 }
  0xe8   : > { %570 = vst.msk [vmem:[%s1153_s6 + $0x40] sm:$0xff] %vm561_vm2, %v1245_v54  ;;  %586 = vst.msk [vmem:[%s1153_s6 + $0xc0] sm:$0xff] %vm561_vm2, %v1247_v55 }
  0xe9   : > { %v1255_v56 = vpop.f32.mrf.mxu0  ;;  %v1257_v57 = vpop.f32.mrf.mxu1 }
  0xea   : > { %573 = vst.msk [vmem:[%s1153_s6 + $0x58] sm:$0xff] %vm561_vm2, %v1255_v56  ;;  %589 = vst.msk [vmem:[%s1153_s6 + $0xd8] sm:$0xff] %vm561_vm2, %v1257_v57 }
  0xeb   : > { %v1265_v58 = vpop.f32.mrf.mxu0  ;;  %v1267_v59 = vpop.f32.mrf.mxu1 }
  0xec   : > { %572 = vst.msk [vmem:[%s1153_s6 + $0x50] sm:$0xff] %vm561_vm2, %v1265_v58  ;;  %588 = vst.msk [vmem:[%s1153_s6 + $0xd0] sm:$0xff] %vm561_vm2, %v1267_v59 }
  0xed   : > { %v1275_v60 = vpop.f32.mrf.mxu0  ;;  %v1277_v61 = vpop.f32.mrf.mxu1 }
  0xee   : > { %575 = vst.msk [vmem:[%s1153_s6 + $0x68] sm:$0xff] %vm561_vm2, %v1275_v60  ;;  %591 = vst.msk [vmem:[%s1153_s6 + $0xe8] sm:$0xff] %vm561_vm2, %v1277_v61 }
  0xef   : > { %v1285_v62 = vpop.f32.mrf.mxu0  ;;  %v1287_v63 = vpop.f32.mrf.mxu1 }
  0xf0   : > { %574 = vst.msk [vmem:[%s1153_s6 + $0x60] sm:$0xff] %vm561_vm2, %v1285_v62  ;;  %590 = vst.msk [vmem:[%s1153_s6 + $0xe0] sm:$0xff] %vm561_vm2, %v1287_v63  ;;  %597 = sbr.rel (%p902_p4) target bundleno = 247 (0xf7), region = 36 }
  0xf1   : > { %v1295_v0 = vpop.f32.mrf.mxu0  ;;  %v1297_v1 = vpop.f32.mrf.mxu1 }
  0xf2   : > { %577 = vst.msk [vmem:[%s1153_s6 + $0x78] sm:$0xff] %vm561_vm2, %v1295_v0  ;;  %593 = vst.msk [vmem:[%s1153_s6 + $0xf8] sm:$0xff] %vm561_vm2, %v1297_v1 }
  0xf3   : > { %v1305_v2 = vpop.f32.mrf.mxu0  ;;  %v1307_v3 = vpop.f32.mrf.mxu1 }
  0xf4   : > { %576 = vst.msk [vmem:[%s1153_s6 + $0x70] sm:$0xff] %vm561_vm2, %v1305_v2  ;;  %592 = vst.msk [vmem:[%s1153_s6 + $0xf0] sm:$0xff] %vm561_vm2, %v1307_v3 }
  0xf5   : > { %vm598_vm3 = vcmask 16384   ;;  %v1025_v4 = vmov 0.0  }
  0xf6   : > { %599 = vst.msk [vmem:[#allocation2] sm:$0x1] %vm598_vm3, %v1025_v4  ;;  %600 = vst.msk [vmem:[#allocation3] sm:$0x1] %vm598_vm3, %v1025_v4 }
  0xf7 PF: > { %v602_v5 = vsel %vm561_vm2, %v1165_v38, 0.0  ;;  %v603_v6 = vsel %vm561_vm2, %v1155_v36, 0.0  ;;  %v605_v7 = vsel %vm561_vm2, %v1185_v42, 0.0  ;;  %v607_v9 = vsel %vm561_vm2, %v1175_v40, 0.0  ;;  %p903_p5 = scmp.ne.s32.totalorder %s1057_s16, 1 }
  0xf8   : > { %v604_v8 = vadd.f32 %v603_v6, %v602_v5  ;;  %v609_v11 = vsel %vm561_vm2, %v1205_v46, 0.0  ;;  %v611_v13 = vsel %vm561_vm2, %v1195_v44, 0.0  ;;  %v613_v15 = vsel %vm561_vm2, %v1225_v50, 0.0 }
  0xf9   : > { %v615_v17 = vsel %vm561_vm2, %v1215_v48, 0.0  ;;  %v617_v19 = vsel %vm561_vm2, %v1245_v54, 0.0  ;;  %v619_v21 = vsel %vm561_vm2, %v1235_v52, 0.0  ;;  %v675_v22 = vmul.f32 %v1165_v38, %v1165_v38 }
  0xfa   : > { %v606_v10 = vadd.f32 %v605_v7, %v604_v8  ;;  %v676_v23 = vmul.f32 %v1155_v36, %v1155_v36  ;;  %v677_v25 = vmul.f32 %v1185_v42, %v1185_v42  ;;  %v621_v26 = vsel %vm561_vm2, %v1265_v58, 0.0 }
  0xfb   : > { %v678_v27 = vmul.f32 %v1175_v40, %v1175_v40  ;;  %v623_v29 = vsel %vm561_vm2, %v1255_v56, 0.0  ;;  %v679_v30 = vmul.f32 %v1205_v46, %v1205_v46  ;;  %v707_v31 = vsel %vm561_vm2, %v675_v22, 0.0 }
  0xfc   : > { %v608_v12 = vadd.f32 %v607_v9, %v606_v10  ;;  %v708_v32 = vsel %vm561_vm2, %v676_v23, 0.0  ;;  %v710_v35 = vsel %vm561_vm2, %v677_v25, 0.0  ;;  %v625_v36 = vsel %vm561_vm2, %v1285_v62, 0.0 }
  0xfd   : > { %v709_v34 = vadd.f32 %v708_v32, %v707_v31  ;;  %v680_v38 = vmul.f32 %v1195_v44, %v1195_v44  ;;  %v712_v40 = vsel %vm561_vm2, %v678_v27, 0.0  ;;  %v627_v46 = vsel %vm561_vm2, %v1275_v60, 0.0 }
  0xfe   : > { %v610_v14 = vadd.f32 %v609_v11, %v608_v12  ;;  %v681_v5 = vmul.f32 %v1225_v50, %v1225_v50  ;;  %v714_v6 = vsel %vm561_vm2, %v679_v30, 0.0  ;;  %v629_v9 = vsel %vm561_vm2, %v1305_v2, 0.0 }
  0xff   : > { %v711_v4 = vadd.f32 %v710_v35, %v709_v34  ;;  %v682_v44 = vmul.f32 %v1215_v48, %v1215_v48  ;;  %v716_v10 = vsel %vm561_vm2, %v680_v38, 0.0  ;;  %v683_v50 = vmul.f32 %v1245_v54, %v1245_v54 }
 0x100   : > { %v612_v16 = vadd.f32 %v611_v13, %v610_v14  ;;  %v631_v13 = vsel %vm561_vm2, %v1295_v0, 0.0  ;;  %v718_v14 = vsel %vm561_vm2, %v681_v5, 0.0  ;;  %v684_v48 = vmul.f32 %v1235_v52, %v1235_v52 }
 0x101   : > { %v713_v8 = vadd.f32 %v712_v40, %v711_v4  ;;  %v685_v54 = vmul.f32 %v1265_v58, %v1265_v58  ;;  %v722_v22 = vsel %vm561_vm2, %v683_v50, 0.0  ;;  %v637_v25 = vsel %vm561_vm2, %v1187_v43, 0.0 }
 0x102   : > { %v614_v18 = vadd.f32 %v613_v15, %v612_v16  ;;  %v686_v52 = vmul.f32 %v1255_v56, %v1255_v56  ;;  %v687_v58 = vmul.f32 %v1285_v62, %v1285_v62  ;;  %v688_v56 = vmul.f32 %v1275_v60, %v1275_v60 }
 0x103   : > { %v715_v12 = vadd.f32 %v714_v6, %v713_v8  ;;  %v726_v30 = vsel %vm561_vm2, %v685_v54, 0.0  ;;  %v643_v38 = vsel %vm561_vm2, %v1197_v45, 0.0  ;;  %v689_v62 = vmul.f32 %v1305_v2, %v1305_v2 }
 0x104   : > { %v616_v20 = vadd.f32 %v615_v17, %v614_v18  ;;  %v633_v17 = vsel %vm561_vm2, %v1167_v39, 0.0  ;;  %v720_v18 = vsel %vm561_vm2, %v682_v44, 0.0  ;;  %v728_v34 = vsel %vm561_vm2, %v686_v52, 0.0 }
 0x105   : > { %v717_v16 = vadd.f32 %v716_v10, %v715_v12  ;;  %v730_v40 = vsel %vm561_vm2, %v687_v58, 0.0  ;;  %v690_v60 = vmul.f32 %v1295_v0, %v1295_v0  ;;  %v732_v5 = vsel %vm561_vm2, %v688_v56, 0.0 }
 0x106   : > { %v618_v24 = vadd.f32 %v617_v19, %v616_v20  ;;  %v647_v8 = vsel %vm561_vm2, %v1217_v49, 0.0  ;;  %v691_v2 = vmul.f32 %v1167_v39, %v1167_v39  ;;  %v692_v0 = vmul.f32 %v1157_v37, %v1157_v37 }
 0x107   : > { %v719_v20 = vadd.f32 %v718_v14, %v717_v16  ;;  %v736_v12 = vsel %vm561_vm2, %v690_v60, 0.0  ;;  %v651_v14 = vsel %vm561_vm2, %v1237_v53, 0.0  ;;  %v693_v39 = vmul.f32 %v1187_v43, %v1187_v43 }
 0x108   : > { %v620_v28 = vadd.f32 %v619_v21, %v618_v24  ;;  %v635_v21 = vsel %vm561_vm2, %v1157_v37, 0.0  ;;  %v694_v37 = vmul.f32 %v1177_v41, %v1177_v41  ;;  %v695_v43 = vmul.f32 %v1207_v47, %v1207_v47 }
 0x109   : > { %v721_v24 = vadd.f32 %v720_v18, %v719_v20  ;;  %v740_v18 = vsel %vm561_vm2, %v692_v0, 0.0  ;;  %v742_v54 = vsel %vm561_vm2, %v693_v39, 0.0  ;;  %v663_v56 = vsel %vm561_vm2, %v1297_v1, 0.0 }
 0x10a   : > { %v622_v33 = vadd.f32 %v621_v26, %v620_v28  ;;  %v724_v26 = vsel %vm561_vm2, %v684_v48, 0.0  ;;  %v653_v48 = vsel %vm561_vm2, %v1267_v59, 0.0  ;;  %vm672_vm4 = vcmask 16384  }
 0x10b   : > { %v723_v28 = vadd.f32 %v722_v22, %v721_v24  ;;  %v657_v24 = vsel %vm561_vm2, %v1287_v63, 0.0 }
 0x10c   : > { %v624_v42 = vadd.f32 %v623_v29, %v622_v33  ;;  %v639_v29 = vsel %vm561_vm2, %v1177_v41, 0.0  ;;  %v641_v33 = vsel %vm561_vm2, %v1207_v47, 0.0  ;;  %v696_v41 = vmul.f32 %v1197_v45, %v1197_v45 }
 0x10d   : > { %v725_v32 = vadd.f32 %v724_v26, %v723_v28  ;;  %v697_v47 = vmul.f32 %v1227_v51, %v1227_v51  ;;  %v746_v28 = vsel %vm561_vm2, %v695_v43, 0.0  ;;  %v698_v45 = vmul.f32 %v1217_v49, %v1217_v49  ;;  %v674_v43 = vld [vmem:[#allocation3] sm:$0x1] }
 0x10e   : > { %v626_v7 = vadd.f32 %v625_v36, %v624_v42 }
 0x10f   : > { %v727_v36 = vadd.f32 %v726_v30, %v725_v32  ;;  %v661_v30 = vsel %vm561_vm2, %v1307_v3, 0.0 }
 0x110   : > { %v628_v11 = vadd.f32 %v627_v46, %v626_v7  ;;  %v645_v46 = vsel %vm561_vm2, %v1227_v51, 0.0  ;;  %v699_v51 = vmul.f32 %v1247_v55, %v1247_v55 }
 0x111   : > { %v729_v4 = vadd.f32 %v728_v34, %v727_v36  ;;  %v750_v34 = vsel %vm561_vm2, %v697_v47, 0.0 }
 0x112   : > { %v630_v15 = vadd.f32 %v629_v9, %v628_v11  ;;  %v734_v9 = vsel %vm561_vm2, %v689_v62, 0.0  ;;  %v649_v11 = vsel %vm561_vm2, %v1247_v55, 0.0  ;;  %v752_v62 = vsel %vm561_vm2, %v698_v45, 0.0 }
 0x113   : > { %v731_v7 = vadd.f32 %v730_v40, %v729_v4  ;;  %v754_v4 = vsel %vm561_vm2, %v699_v51, 0.0  ;;  %v702_v55 = vmul.f32 %v1257_v57, %v1257_v57 }
 0x114   : > { %v632_v19 = vadd.f32 %v631_v13, %v630_v15  ;;  %v738_v15 = vsel %vm561_vm2, %v691_v2, 0.0 }
 0x115   : > { %v733_v10 = vadd.f32 %v732_v5, %v731_v7 }
 0x116   : > { %v634_v23 = vadd.f32 %v633_v17, %v632_v19 }
 0x117   : > { %v735_v50 = vadd.f32 %v734_v9, %v733_v10 }
 0x118   : > { %v636_v27 = vadd.f32 %v635_v21, %v634_v23  ;;  %v655_v21 = vsel %vm561_vm2, %v1257_v57, 0.0  ;;  %v705_v57 = vmul.f32 %v1307_v3, %v1307_v3 }
 0x119   : > { %v737_v17 = vadd.f32 %v736_v12, %v735_v50  ;;  %v601_v50 = vld [vmem:[#allocation2] sm:$0x1] }
 0x11a   : > { %v638_v31 = vadd.f32 %v637_v25, %v636_v27  ;;  %v744_v25 = vsel %vm561_vm2, %v694_v37, 0.0  ;;  %v659_v27 = vsel %vm561_vm2, %v1277_v61, 0.0 }
 0x11b   : > { %v739_v20 = vadd.f32 %v738_v15, %v737_v17 }
 0x11c   : > { %v640_v35 = vadd.f32 %v639_v29, %v638_v31  ;;  %v748_v31 = vsel %vm561_vm2, %v696_v41, 0.0 }
 0x11d   : > { %v741_v23 = vadd.f32 %v740_v18, %v739_v20 }
 0x11e   : > { %v642_v42 = vadd.f32 %v641_v33, %v640_v35 }
 0x11f   : > { %v743_v26 = vadd.f32 %v742_v54, %v741_v23 }
 0x120   : > { %v644_v6 = vadd.f32 %v643_v38, %v642_v42  ;;  %v700_v38 = vmul.f32 %v1237_v53, %v1237_v53  ;;  %v701_v42 = vmul.f32 %v1267_v59, %v1267_v59  ;;  %v703_v53 = vmul.f32 %v1287_v63, %v1287_v63 }
 0x121   : > { %v745_v58 = vadd.f32 %v744_v25, %v743_v26  ;;  %v704_v59 = vmul.f32 %v1277_v61, %v1277_v61  ;;  %v706_v63 = vmul.f32 %v1297_v1, %v1297_v1  ;;  %v766_v61 = vsel %vm561_vm2, %v705_v57, 0.0 }
 0x122   : > { %v646_v44 = vadd.f32 %v645_v46, %v644_v6  ;;  %v756_v5 = vsel %vm561_vm2, %v700_v38, 0.0  ;;  %v762_v0 = vsel %vm561_vm2, %v703_v53, 0.0 }
 0x123   : > { %v747_v33 = vadd.f32 %v746_v28, %v745_v58 }
 0x124   : > { %v648_v13 = vadd.f32 %v647_v8, %v646_v44  ;;  %v758_v8 = vsel %vm561_vm2, %v701_v42, 0.0  ;;  %v760_v44 = vsel %vm561_vm2, %v702_v55, 0.0 }
 0x125   : > { %v749_v36 = vadd.f32 %v748_v31, %v747_v33 }
 0x126   : > { %v650_v16 = vadd.f32 %v649_v11, %v648_v13 }
 0x127   : > { %v751_v40 = vadd.f32 %v750_v34, %v749_v36 }
 0x128   : > { %v652_v19 = vadd.f32 %v651_v14, %v650_v16  ;;  %v764_v14 = vsel %vm561_vm2, %v704_v59, 0.0 }
 0x129   : > { %v753_v60 = vadd.f32 %v752_v62, %v751_v40 }
 0x12a   : > { %v654_v22 = vadd.f32 %v653_v48, %v652_v19  ;;  %v768_v48 = vsel %vm561_vm2, %v706_v63, 0.0 }
 0x12b   : > { %v755_v7 = vadd.f32 %v754_v4, %v753_v60 }
 0x12c   : > { %v656_v52 = vadd.f32 %v655_v21, %v654_v22 }
 0x12d   : > { %v757_v9 = vadd.f32 %v756_v5, %v755_v7 }
 0x12e   : > { %v658_v29 = vadd.f32 %v657_v24, %v656_v52 }
 0x12f   : > { %v759_v11 = vadd.f32 %v758_v8, %v757_v9 }
 0x130   : > { %v660_v32 = vadd.f32 %v659_v27, %v658_v29 }
 0x131   : > { %v761_v13 = vadd.f32 %v760_v44, %v759_v11 }
 0x132   : > { %v662_v35 = vadd.f32 %v661_v30, %v660_v32 }
 0x133   : > { %v763_v15 = vadd.f32 %v762_v0, %v761_v13 }
 0x134   : > { %v664_v49 = vadd.f32 %v663_v56, %v662_v35 }
 0x135   : > { %v765_v17 = vadd.f32 %v764_v14, %v763_v15 }
 0x136   : > { %v665_v46 = vrot.slane %v664_v49, 4 }
 0x137   : > { %v767_v3 = vadd.f32 %v766_v61, %v765_v17 }
 0x138   : > { %v666_v6 = vadd.f32 %v665_v46, %v664_v49 }
 0x139   : > { %v769_v37 = vadd.f32 %v768_v48, %v767_v3 }
 0x13a   : > { %v667_v2 = vrot.slane %v666_v6, 2 }
 0x13b   : > { %v770_v18 = vrot.slane %v769_v37, 4 }
 0x13c   : > { %v668_v10 = vadd.f32 %v667_v2, %v666_v6 }
 0x13d   : > { %v771_v19 = vadd.f32 %v770_v18, %v769_v37 }
 0x13e   : > { %v669_v12 = vrot.slane %v668_v10, 1 }
 0x13f   : > { %v772_v20 = vrot.slane %v771_v19, 2 }
 0x140   : > { %v670_v39 = vadd.f32 %v669_v12, %v668_v10 }
 0x141   : > { %v773_v21 = vadd.f32 %v772_v20, %v771_v19 }
 0x142   : > { %v671_v16 = vadd.f32 %v670_v39, %v601_v50 }
 0x143   : > { %v774_v1 = vrot.slane %v773_v21, 1 }
 0x144   : > { %673 = vst.msk [vmem:[#allocation2] sm:$0x1] %vm672_vm4, %v671_v16 }
 0x145   : > { %v775_v54 = vadd.f32 %v774_v1, %v773_v21  ;;  %781 = sbr.rel (%p903_p5) target bundleno = 366 (0x16e), region = 40 }
 0x147   : > { %v776_v22 = vadd.f32 %v775_v54, %v674_v43 }
 0x149   : > { %777 = vst.msk [vmem:[#allocation3] sm:$0x1] %vm672_vm4, %v776_v22 }
 0x14a   : > { %v789_v28 = vld [vmem:[%s1498_s2] sm:$0x1]  ;;  %v794_v30 = vld [vmem:[%s1498_s2 + $0x1] sm:$0x1] }
 0x14b   : > { %v782_v23 = vld [vmem:[#allocation2] sm:$0x1] }
 0x14c   : > { %v783_v41 = vmul.f32 0.001953125, %v782_v23 }
 0x14e   : > { %v786_v52 = vmul.f32 %v783_v41, %v783_v41 }
 0x150   : > { %v784_v24 = vld [vmem:[#allocation3] sm:$0x1] }
 0x151   : > { %v785_v25 = vmul.f32 0.001953125, %v784_v24 }
 0x153   : > { %v787_v26 = vsub.f32 %v785_v25, %v786_v52 }
 0x155   : > { %v788_v27 = vmax.f32 %v787_v26, 0.0 }
 0x157   : > { %v790_v47 = vadd.f32 1e-05, %v788_v27 }
 0x159   : > { %1015 = vrsqrt.f32 %v790_v47 }
 0x166   : > { %v1016_v29 = vpop.eup %1015 }
 0x167   : > { %v792_v58 = vmul.f32 %v1016_v29, %v789_v28 }
 0x169   : > { %793 = vst.msk [vmem:[%s1500_s4] sm:$0x1] %vm672_vm4, %v792_v58  ;;  %v795_v45 = vmul.f32 %v792_v58, %v783_v41 }
 0x16b   : > { %v796_v31 = vsub.f32 %v794_v30, %v795_v45 }
 0x16d   : > { %797 = vst.msk [vmem:[%s1500_s4 + $0x1] sm:$0x1] %vm672_vm4, %v796_v31 }
 0x16e PF: > { %s15_s15 = sadd.s32 1, %s1023_s15  }
 0x16f   : > { %p12_p6 = scmp.ge.s32.totalorder %s15_s15, 4  }
 0x171   :  { %14 = sbr.rel (!%p12_p6) target bundleno = 1 (0x1), region = 78 }

// kernel: closed_call.259
= control target key start
LH: loop header
LB: loop body
LE: loop exit
PB: predicated region body
PF: predicated region fallthrough
CT: control target
= control target key end

     0   :  { %s987_s15 = smov 0   ;;  %s1394_s0 = inlined_call_operand.vmem [shape: f32[512,3], index: 0, kind: input, shape index: {}]   ;;  %s1395_s1 = inlined_call_operand.vmem [shape: f32[2,3], index: 1, kind: input, shape index: {}]   ;;  %s1396_s2 = inlined_call_operand.vmem [shape: f32[512,3], index: 2, kind: input, shape index: {}, may-alias: {2,4}]   ;;  %s1397_s3 = inlined_call_operand.vmem [shape: bf16[512,3], index: 3, kind: output, shape index: {0}]   ;;  %s1398_s4 = inlined_call_operand.vmem [shape: f32[512,3], index: 4, kind: output, shape index: {1}, may-alias: {2,4}]  }
   0x1 LB: > { %s831_s16 = sadd.s32 4294967295, %s959_s15   ;;  %p835_p0 = scmp.ge.s32.totalorder %s959_s15, 1  ;;  %s959_s15 = sphi %s987_s15, %s15_s15  }
   0x2   : > { %p177_p1 = scmp.lt.s32.totalorder %s959_s15, 3 }
   0x4   : > { %p178_p2 = pnand %p835_p0, %p177_p1 }
   0x5   : > { %s836_s17 = sshll.u32 (!%p178_p2), %s831_s16, 5 }
   0x6   : > { %181 = sbr.rel (%p178_p2) target bundleno = 79 (0x4f), region = 32  ;;  %p214_p3 = scmp.lt.s32.totalorder (!%p178_p2), %s836_s17, 63 }
   0xb   : > { %s1400_s17 = smov (!%p214_p3, %s836_s17), 63  ;;  %v1003_v0 = vld [vmem:[%s1395_s1] ss:$0 sm:$0xff]  ;;  %v1022_v3 = vld [vmem:[%s1395_s1 + $0x1] ss:$0 sm:$0xff]  ;;  %vm631_vm0 = vcmask 19456  }
   0xc   : > { %s998_s18 = sshll.u32 %s1400_s17, 3  ;;  %s841_s29 = sshll.u32 %s1400_s17, 2  ;;  %v961_v36 = vmov 0.0   ;;  %vm696_vm5 = vcmask 23552  }
   0xd   : > { %s1009_s23 = scalar_lea.vmem %s1394_s0, %s998_s18  ;;  %s1015_s26 = scalar_lea.vmem %s1396_s2, %s998_s18 }
   0xe   : > { %v237_v1 = vld [vmem:[%s1015_s26] sm:$0xff]  ;;  %v238_v4 = vld [vmem:[%s1015_s26 + $0x8] sm:$0xff]  ;;  %v239_v7 = vld [vmem:[%s1015_s26 + $0x10] sm:$0xff]  ;;  %s1053_s6 = scalar_lea.vmem %s1397_s3, %s841_s29  ;;  %s1117_s9 = scalar_lea.vmem %s1398_s4, %s998_s18 }
   0xf   : > { %v269_v2 = vld [vmem:[%s1009_s23] sm:$0xff]  ;;  %v270_v6 = vld [vmem:[%s1009_s23 + $0x8] sm:$0xff]  ;;  %v271_v8 = vld [vmem:[%s1009_s23 + $0x10] sm:$0xff] }
  0x10   : > { %v306_v5 = vmul.f32 %v1003_v0, %v269_v2  ;;  %v307_v9 = vmul.f32 %v1003_v0, %v270_v6  ;;  %v308_v10 = vmul.f32 %v1003_v0, %v271_v8  ;;  %v240_v11 = vld [vmem:[%s1015_s26 + $0x18] sm:$0xff]  ;;  %v241_v13 = vld [vmem:[%s1015_s26 + $0x20] sm:$0xff]  ;;  %v242_v17 = vld [vmem:[%s1015_s26 + $0x28] sm:$0xff] }
  0x11   : > { %v272_v12 = vld [vmem:[%s1009_s23 + $0x18] sm:$0xff]  ;;  %v273_v16 = vld [vmem:[%s1009_s23 + $0x20] sm:$0xff]  ;;  %v274_v18 = vld [vmem:[%s1009_s23 + $0x28] sm:$0xff] }
  0x12   : > { %v338_v14 = vadd.f32 %v306_v5, %v237_v1  ;;  %v309_v15 = vmul.f32 %v1003_v0, %v272_v12  ;;  %v339_v19 = vadd.f32 %v307_v9, %v238_v4  ;;  %v340_v20 = vadd.f32 %v308_v10, %v239_v7  ;;  %v243_v23 = vld [vmem:[%s1015_s26 + $0x30] sm:$0xff]  ;;  %v276_v28 = vld [vmem:[%s1009_s23 + $0x38] sm:$0xff]  ;;  %v277_v44 = vld [vmem:[%s1009_s23 + $0x40] sm:$0xff] }
  0x13   : > { %v310_v21 = vmul.f32 %v1003_v0, %v273_v16  ;;  %v311_v22 = vmul.f32 %v1003_v0, %v274_v18  ;;  %v275_v24 = vld [vmem:[%s1009_s23 + $0x30] sm:$0xff]  ;;  %v313_v35 = vmul.f32 %v1003_v0, %v276_v28  ;;  %v244_v43 = vld [vmem:[%s1015_s26 + $0x38] sm:$0xff]  ;;  %v278_v48 = vld [vmem:[%s1009_s23 + $0x48] sm:$0xff]  ;;  %v314_v57 = vmul.f32 %v1003_v0, %v277_v44 }
  0x14   : > { %v375_v25 = vadd.f32 %v1022_v3, %v338_v14  ;;  %v341_v26 = vadd.f32 %v309_v15, %v240_v11  ;;  %v312_v27 = vmul.f32 %v1003_v0, %v275_v24  ;;  %v376_v29 = vadd.f32 %v1022_v3, %v339_v19  ;;  %v279_v49 = vld [vmem:[%s1009_s23 + $0x50] sm:$0xff]  ;;  %v245_v58 = vld [vmem:[%s1015_s26 + $0x40] sm:$0xff]  ;;  %v246_v59 = vld [vmem:[%s1015_s26 + $0x48] sm:$0xff] }
  0x15   : > { %v377_v30 = vadd.f32 %v1022_v3, %v340_v20  ;;  %v342_v31 = vadd.f32 %v310_v21, %v241_v13  ;;  %v343_v32 = vadd.f32 %v311_v22, %v242_v17  ;;  %v345_v56 = vadd.f32 %v313_v35, %v244_v43  ;;  %v247_v4 = vld [vmem:[%s1015_s26 + $0x50] sm:$0xff]  ;;  %v280_v5 = vld [vmem:[%s1009_s23 + $0x58] sm:$0xff]  ;;  %v281_v14 = vld [vmem:[%s1009_s23 + $0x60] sm:$0xff] }
  0x16   : > { %vm407_vm1 = vcmp.ge.f32.partialorder %v375_v25, 1.0  ;;  %v378_v33 = vadd.f32 %v1022_v3, %v341_v26  ;;  %v344_v34 = vadd.f32 %v312_v27, %v243_v23  ;;  %vm408_vm2 = vcmp.ge.f32.partialorder %v376_v29, 1.0  ;;  %v248_v13 = vld [vmem:[%s1015_s26 + $0x58] sm:$0xff]  ;;  %v282_v18 = vld [vmem:[%s1009_s23 + $0x68] sm:$0xff]  ;;  %v283_v19 = vld [vmem:[%s1009_s23 + $0x70] sm:$0xff] }
  0x17   : > { %v846_v37 = vsel %vm407_vm1, 1.0, %v961_v36  ;;  %v1056_v38 = vsel %vm407_vm1, 0.0, %v375_v25  ;;  %vm409_vm3 = vcmp.ge.f32.partialorder %v377_v30, 1.0  ;;  %v847_v40 = vsel %vm408_vm2, 1.0, %v961_v36  ;;  %v249_v24 = vld [vmem:[%s1015_s26 + $0x60] sm:$0xff]  ;;  %v250_v25 = vld [vmem:[%s1015_s26 + $0x68] sm:$0xff] }
  0x18   : > { %v912_v39 = vpack.c.bf16 %v846_v37, %v846_v37  ;;  %v1059_v41 = vsel %vm408_vm2, 0.0, %v376_v29  ;;  %v848_v42 = vsel %vm409_vm3, 1.0, %v961_v36  ;;  %v913_v45 = vpack.c.bf16 %v847_v40, %v847_v40  ;;  %v1133_v35 = vld [vmem:[%s1015_s26 + $0x90] sm:$0xff]  ;;  %v1136_v37 = vld [vmem:[%s1015_s26 + $0x98] sm:$0xff]  ;;  %v1142_v40 = vld [vmem:[%s1015_s26 + $0xa8] sm:$0xff] }
  0x19   : > { %v914_v46 = vpack.c.bf16 %v848_v42, %v848_v42  ;;  %v1064_v47 = vsel %vm409_vm3, 0.0, %v377_v30  ;;  %vm410_vm4 = vcmp.ge.f32.partialorder %v378_v33, 1.0  ;;  %v379_v52 = vadd.f32 %v1022_v3, %v342_v31  ;;  %v251_v30 = vld [vmem:[%s1015_s26 + $0x70] sm:$0xff]  ;;  %v252_v31 = vld [vmem:[%s1015_s26 + $0x78] sm:$0xff]  ;;  %v1151_v44 = vld [vmem:[%s1015_s26 + $0xc0] sm:$0xff] }
  0x1a   : > { %632 = vst.msk [vmem:[%s1053_s6] sm:$0xf] %vm631_vm0, %v912_v39  ;;  %v849_v50 = vsel %vm410_vm4, 1.0, %v961_v36  ;;  %v1071_v51 = vsel %vm410_vm4, 0.0, %v378_v33  ;;  %v380_v53 = vadd.f32 %v1022_v3, %v343_v32  ;;  %633 = vst.msk [vmem:[%s1053_s6 + $0x4] sm:$0xf] %vm631_vm0, %v913_v45  ;;  %v381_v55 = vadd.f32 %v1022_v3, %v344_v34 }
  0x1b   : > { %634 = vst.msk [vmem:[%s1053_s6 + $0x8] sm:$0xf] %vm631_vm0, %v914_v46  ;;  %v915_v54 = vpack.c.bf16 %v849_v50, %v849_v50  ;;  %vm411_vm6 = vcmp.ge.f32.partialorder %v379_v52, 1.0  ;;  %v315_v60 = vmul.f32 %v1003_v0, %v278_v48  ;;  %v316_v61 = vmul.f32 %v1003_v0, %v279_v49  ;;  %v284_v32 = vld [vmem:[%s1009_s23 + $0x78] sm:$0xff]  ;;  %v1127_v33 = vld [vmem:[%s1015_s26 + $0x80] sm:$0xff]  ;;  %v1130_v34 = vld [vmem:[%s1015_s26 + $0x88] sm:$0xff] }
  0x1c   : > { %vm412_vm7 = vcmp.ge.f32.partialorder %v380_v53, 1.0  ;;  %v850_v62 = vsel %vm411_vm6, 1.0, %v961_v36  ;;  %v1088_v63 = vsel %vm411_vm6, 0.0, %v379_v52  ;;  %vm413_vm8 = vcmp.ge.f32.partialorder %v381_v55, 1.0  ;;  %v1139_v39 = vld [vmem:[%s1015_s26 + $0xa0] sm:$0xff]  ;;  %v1145_v42 = vld [vmem:[%s1015_s26 + $0xb0] sm:$0xff] }
  0x1d   : > { %635 = vst.msk [vmem:[%s1053_s6 + $0xc] sm:$0xf] %vm631_vm0, %v915_v54  ;;  %v851_v1 = vsel %vm412_vm7, 1.0, %v961_v36  ;;  %v1091_v2 = vsel %vm412_vm7, 0.0, %v380_v53  ;;  %v916_v6 = vpack.c.bf16 %v850_v62, %v850_v62  ;;  %v382_v8 = vadd.f32 %v1022_v3, %v345_v56  ;;  %v1148_v43 = vld [vmem:[%s1015_s26 + $0xb8] sm:$0xff]  ;;  %v1154_v45 = vld [vmem:[%s1015_s26 + $0xc8] sm:$0xff] }
  0x1e   : > { %v917_v7 = vpack.c.bf16 %v851_v1, %v851_v1  ;;  %v852_v9 = vsel %vm413_vm8, 1.0, %v961_v36  ;;  %v1097_v10 = vsel %vm413_vm8, 0.0, %v381_v55  ;;  %v346_v11 = vadd.f32 %v314_v57, %v245_v58  ;;  %v1157_v46 = vld [vmem:[%s1015_s26 + $0xd0] sm:$0xff]  ;;  %v1162_v50 = vld [vmem:[%s1015_s26 + $0xd8] sm:$0xff]  ;;  %v1165_v52 = vld [vmem:[%s1015_s26 + $0xe0] sm:$0xff] }
  0x1f   : > { %v347_v12 = vadd.f32 %v315_v60, %v246_v59  ;;  %636 = vst.msk [vmem:[%s1053_s6 + $0x10] sm:$0xf] %vm631_vm0, %v916_v6  ;;  %v918_v15 = vpack.c.bf16 %v852_v9, %v852_v9  ;;  %vm414_vm9 = vcmp.ge.f32.partialorder %v382_v8, 1.0  ;;  %v348_v16 = vadd.f32 %v316_v61, %v247_v4  ;;  %v1168_v53 = vld [vmem:[%s1015_s26 + $0xe8] sm:$0xff]  ;;  %v1175_v58 = vld [vmem:[%s1015_s26 + $0xf0] sm:$0xff]  ;;  %v1178_v59 = vld [vmem:[%s1015_s26 + $0xf8] sm:$0xff] }
  0x20   : > { %637 = vst.msk [vmem:[%s1053_s6 + $0x14] sm:$0xf] %vm631_vm0, %v917_v7  ;;  %v317_v17 = vmul.f32 %v1003_v0, %v280_v5  ;;  %v853_v20 = vsel %vm414_vm9, 1.0, %v961_v36  ;;  %v671_v21 = vsel %vm414_vm9, 0.0, %v382_v8  ;;  %v383_v22 = vadd.f32 %v1022_v3, %v346_v11  ;;  %v286_v5 = vld [vmem:[%s1009_s23 + $0x88] sm:$0xff]  ;;  %v287_v6 = vld [vmem:[%s1009_s23 + $0x90] sm:$0xff] }
  0x21   : > { %v384_v23 = vadd.f32 %v1022_v3, %v347_v12  ;;  %638 = vst.msk [vmem:[%s1053_s6 + $0x18] sm:$0xf] %vm631_vm0, %v918_v15  ;;  %v919_v26 = vpack.c.bf16 %v853_v20, %v853_v20  ;;  %v385_v27 = vadd.f32 %v1022_v3, %v348_v16  ;;  %v318_v29 = vmul.f32 %v1003_v0, %v281_v14 }
  0x22   : > { %v349_v28 = vadd.f32 %v317_v17, %v248_v13  ;;  %vm415_vm10 = vcmp.ge.f32.partialorder %v383_v22, 1.0  ;;  %v319_v48 = vmul.f32 %v1003_v0, %v282_v18  ;;  %v320_v49 = vmul.f32 %v1003_v0, %v283_v19  ;;  %697 = vst.msk [vmem:[%s1117_s9] sm:$0xff] %vm696_vm5, %v1056_v38  ;;  %698 = vst.msk [vmem:[%s1117_s9 + $0x8] sm:$0xff] %vm696_vm5, %v1059_v41 }
  0x23   : > { %vm416_vm11 = vcmp.ge.f32.partialorder %v384_v23, 1.0  ;;  %639 = vst.msk [vmem:[%s1053_s6 + $0x1c] sm:$0xf] %vm631_vm0, %v919_v26  ;;  %v854_v54 = vsel %vm415_vm10, 1.0, %v961_v36  ;;  %v672_v55 = vsel %vm415_vm10, 0.0, %v383_v22  ;;  %vm417_vm12 = vcmp.ge.f32.partialorder %v385_v27, 1.0 }
  0x24   : > { %v855_v56 = vsel %vm416_vm11, 1.0, %v961_v36  ;;  %v673_v57 = vsel %vm416_vm11, 0.0, %v384_v23  ;;  %v920_v60 = vpack.c.bf16 %v854_v54, %v854_v54  ;;  %v386_v62 = vadd.f32 %v1022_v3, %v349_v28  ;;  %699 = vst.msk [vmem:[%s1117_s9 + $0x10] sm:$0xff] %vm696_vm5, %v1064_v47  ;;  %700 = vst.msk [vmem:[%s1117_s9 + $0x18] sm:$0xff] %vm696_vm5, %v1071_v51 }
  0x25   : > { %v921_v61 = vpack.c.bf16 %v855_v56, %v855_v56  ;;  %701 = vst.msk [vmem:[%s1117_s9 + $0x20] sm:$0xff] %vm696_vm5, %v1088_v63  ;;  %702 = vst.msk [vmem:[%s1117_s9 + $0x28] sm:$0xff] %vm696_vm5, %v1091_v2  ;;  %v856_v38 = vsel %vm417_vm12, 1.0, %v961_v36  ;;  %v674_v41 = vsel %vm417_vm12, 0.0, %v385_v27  ;;  %v350_v47 = vadd.f32 %v318_v29, %v249_v24  ;;  %v285_v63 = vld [vmem:[%s1009_s23 + $0x80] sm:$0xff] }
  0x26   : > { %703 = vst.msk [vmem:[%s1117_s9 + $0x30] sm:$0xff] %vm696_vm5, %v1097_v10  ;;  %704 = vst.msk [vmem:[%s1117_s9 + $0x38] sm:$0xff] %vm696_vm5, %v671_v21  ;;  %v351_v51 = vadd.f32 %v319_v48, %v250_v25  ;;  %v922_v1 = vpack.c.bf16 %v856_v38, %v856_v38  ;;  %vm418_vm13 = vcmp.ge.f32.partialorder %v386_v62, 1.0  ;;  %v352_v2 = vadd.f32 %v320_v49, %v251_v30  ;;  %v288_v21 = vld [vmem:[%s1009_s23 + $0x98] sm:$0xff]  ;;  %v289_v29 = vld [vmem:[%s1009_s23 + $0xa0] sm:$0xff] }
  0x27   : > { %705 = vst.msk [vmem:[%s1117_s9 + $0x40] sm:$0xff] %vm696_vm5, %v672_v55  ;;  %706 = vst.msk [vmem:[%s1117_s9 + $0x48] sm:$0xff] %vm696_vm5, %v673_v57  ;;  %v321_v4 = vmul.f32 %v1003_v0, %v284_v32  ;;  %v857_v7 = vsel %vm418_vm13, 1.0, %v961_v36  ;;  %v675_v8 = vsel %vm418_vm13, 0.0, %v386_v62  ;;  %v387_v9 = vadd.f32 %v1022_v3, %v350_v47  ;;  %v290_v48 = vld [vmem:[%s1009_s23 + $0xa8] sm:$0xff]  ;;  %v291_v49 = vld [vmem:[%s1009_s23 + $0xb0] sm:$0xff] }
  0x28   : > { %640 = vst.msk [vmem:[%s1053_s6 + $0x20] sm:$0xf] %vm631_vm0, %v920_v60  ;;  %641 = vst.msk [vmem:[%s1053_s6 + $0x24] sm:$0xf] %vm631_vm0, %v921_v61  ;;  %v388_v10 = vadd.f32 %v1022_v3, %v351_v51  ;;  %v923_v11 = vpack.c.bf16 %v857_v7, %v857_v7  ;;  %v389_v12 = vadd.f32 %v1022_v3, %v352_v2  ;;  %v292_v51 = vld [vmem:[%s1009_s23 + $0xb8] sm:$0xff] }
  0x29   : > { %707 = vst.msk [vmem:[%s1117_s9 + $0x50] sm:$0xff] %vm696_vm5, %v674_v41  ;;  %v353_v13 = vadd.f32 %v321_v4, %v252_v31  ;;  %v322_v14 = vmul.f32 %v1003_v0, %v285_v63  ;;  %708 = vst.msk [vmem:[%s1117_s9 + $0x58] sm:$0xff] %vm696_vm5, %v675_v8  ;;  %vm419_vm14 = vcmp.ge.f32.partialorder %v387_v9, 1.0  ;;  %v323_v15 = vmul.f32 %v1003_v0, %v286_v5  ;;  %v293_v8 = vld [vmem:[%s1009_s23 + $0xc0] sm:$0xff] }
  0x2a   : > { %642 = vst.msk [vmem:[%s1053_s6 + $0x28] sm:$0xf] %vm631_vm0, %v922_v1  ;;  %vm420_vm15 = vcmp.ge.f32.partialorder %v388_v10, 1.0  ;;  %v324_v16 = vmul.f32 %v1003_v0, %v287_v6  ;;  %643 = vst.msk [vmem:[%s1053_s6 + $0x2c] sm:$0xf] %vm631_vm0, %v923_v11  ;;  %v858_v17 = vsel %vm419_vm14, 1.0, %v961_v36  ;;  %v325_v32 = vmul.f32 %v1003_v0, %v288_v21 }
  0x2b   : > { %v676_v18 = vsel %vm419_vm14, 0.0, %v387_v9  ;;  %v859_v19 = vsel %vm420_vm15, 1.0, %v961_v36  ;;  %v677_v20 = vsel %vm420_vm15, 0.0, %v388_v10  ;;  %v924_v22 = vpack.c.bf16 %v858_v17, %v858_v17 }
  0x2c   : > { %v925_v23 = vpack.c.bf16 %v859_v19, %v859_v19  ;;  %vm421_vm1 = vcmp.ge.f32.partialorder %v389_v12, 1.0  ;;  %v390_v24 = vadd.f32 %v1022_v3, %v353_v13  ;;  %709 = vst.msk [vmem:[%s1117_s9 + $0x60] sm:$0xff] %vm696_vm5, %v676_v18  ;;  %710 = vst.msk [vmem:[%s1117_s9 + $0x68] sm:$0xff] %vm696_vm5, %v677_v20  ;;  %v354_v27 = vadd.f32 %v322_v14, %v1127_v33  ;;  %v295_v13 = vld [vmem:[%s1009_s23 + $0xd0] sm:$0xff] }
  0x2d   : > { %v860_v25 = vsel %vm421_vm1, 1.0, %v961_v36  ;;  %v678_v26 = vsel %vm421_vm1, 0.0, %v389_v12  ;;  %v355_v28 = vadd.f32 %v323_v15, %v1130_v34  ;;  %644 = vst.msk [vmem:[%s1053_s6 + $0x30] sm:$0xf] %vm631_vm0, %v924_v22  ;;  %v356_v31 = vadd.f32 %v324_v16, %v1133_v35  ;;  %v294_v12 = vld [vmem:[%s1009_s23 + $0xc8] sm:$0xff] }
  0x2e   : > { %645 = vst.msk [vmem:[%s1053_s6 + $0x34] sm:$0xf] %vm631_vm0, %v925_v23  ;;  %v926_v30 = vpack.c.bf16 %v860_v25, %v860_v25  ;;  %vm422_vm2 = vcmp.ge.f32.partialorder %v390_v24, 1.0  ;;  %v391_v54 = vadd.f32 %v1022_v3, %v354_v27  ;;  %v357_v57 = vadd.f32 %v325_v32, %v1136_v37  ;;  %v297_v32 = vld [vmem:[%s1009_s23 + $0xe0] sm:$0xff] }
  0x2f   : > { %711 = vst.msk [vmem:[%s1117_s9 + $0x70] sm:$0xff] %vm696_vm5, %v678_v26  ;;  %v861_v33 = vsel %vm422_vm2, 1.0, %v961_v36  ;;  %v679_v34 = vsel %vm422_vm2, 0.0, %v390_v24  ;;  %v392_v55 = vadd.f32 %v1022_v3, %v355_v28  ;;  %v393_v35 = vadd.f32 %v1022_v3, %v356_v31  ;;  %v296_v24 = vld [vmem:[%s1009_s23 + $0xd8] sm:$0xff] }
  0x30   : > { %646 = vst.msk [vmem:[%s1053_s6 + $0x38] sm:$0xf] %vm631_vm0, %v926_v30  ;;  %v927_v56 = vpack.c.bf16 %v861_v33, %v861_v33  ;;  %v326_v60 = vmul.f32 %v1003_v0, %v289_v29  ;;  %vm423_vm3 = vcmp.ge.f32.partialorder %v391_v54, 1.0  ;;  %v327_v61 = vmul.f32 %v1003_v0, %v290_v48 }
  0x31   : > { %712 = vst.msk [vmem:[%s1117_s9 + $0x78] sm:$0xff] %vm696_vm5, %v679_v34  ;;  %vm424_vm4 = vcmp.ge.f32.partialorder %v392_v55, 1.0  ;;  %v328_v62 = vmul.f32 %v1003_v0, %v291_v49  ;;  %v862_v38 = vsel %vm423_vm3, 1.0, %v961_v36  ;;  %v680_v41 = vsel %vm423_vm3, 0.0, %v391_v54  ;;  %v298_v34 = vld [vmem:[%s1009_s23 + $0xe8] sm:$0xff]  ;;  %v299_v54 = vld [vmem:[%s1009_s23 + $0xf0] sm:$0xff] }
  0x32   : > { %647 = vst.msk [vmem:[%s1053_s6 + $0x3c] sm:$0xf] %vm631_vm0, %v927_v56  ;;  %v863_v37 = vsel %vm424_vm4, 1.0, %v961_v36  ;;  %v681_v47 = vsel %vm424_vm4, 0.0, %v392_v55  ;;  %v928_v63 = vpack.c.bf16 %v862_v38, %v862_v38  ;;  %vm425_vm6 = vcmp.ge.f32.partialorder %v393_v35, 1.0 }
  0x33   : > { %v929_v1 = vpack.c.bf16 %v863_v37, %v863_v37  ;;  %v394_v2 = vadd.f32 %v1022_v3, %v357_v57  ;;  %713 = vst.msk [vmem:[%s1117_s9 + $0x80] sm:$0xff] %vm696_vm5, %v680_v41  ;;  %714 = vst.msk [vmem:[%s1117_s9 + $0x88] sm:$0xff] %vm696_vm5, %v681_v47  ;;  %v864_v4 = vsel %vm425_vm6, 1.0, %v961_v36  ;;  %v682_v5 = vsel %vm425_vm6, 0.0, %v393_v35  ;;  %v300_v47 = vld [vmem:[%s1009_s23 + $0xf8] sm:$0xff] }
  0x34   : > { %v358_v6 = vadd.f32 %v326_v60, %v1139_v39  ;;  %v359_v7 = vadd.f32 %v327_v61, %v1142_v40  ;;  %648 = vst.msk [vmem:[%s1053_s6 + $0x40] sm:$0xf] %vm631_vm0, %v928_v63  ;;  %v930_v9 = vpack.c.bf16 %v864_v4, %v864_v4  ;;  %v360_v10 = vadd.f32 %v328_v62, %v1145_v42 }
  0x35   : > { %649 = vst.msk [vmem:[%s1053_s6 + $0x44] sm:$0xf] %vm631_vm0, %v929_v1  ;;  %vm426_vm7 = vcmp.ge.f32.partialorder %v394_v2, 1.0  ;;  %v329_v11 = vmul.f32 %v1003_v0, %v292_v51  ;;  %v330_v18 = vmul.f32 %v1003_v0, %v293_v8  ;;  %v331_v19 = vmul.f32 %v1003_v0, %v294_v12 }
  0x36   : > { %715 = vst.msk [vmem:[%s1117_s9 + $0x90] sm:$0xff] %vm696_vm5, %v682_v5  ;;  %v865_v39 = vsel %vm426_vm7, 1.0, %v961_v36  ;;  %v683_v40 = vsel %vm426_vm7, 0.0, %v394_v2  ;;  %v395_v14 = vadd.f32 %v1022_v3, %v358_v6  ;;  %v396_v15 = vadd.f32 %v1022_v3, %v359_v7 }
  0x37   : > { %650 = vst.msk [vmem:[%s1053_s6 + $0x48] sm:$0xf] %vm631_vm0, %v930_v9  ;;  %v931_v16 = vpack.c.bf16 %v865_v39, %v865_v39  ;;  %v397_v42 = vadd.f32 %v1022_v3, %v360_v10  ;;  %v361_v17 = vadd.f32 %v329_v11, %v1148_v43  ;;  %v332_v20 = vmul.f32 %v1003_v0, %v295_v13 }
  0x38   : > { %716 = vst.msk [vmem:[%s1117_s9 + $0x98] sm:$0xff] %vm696_vm5, %v683_v40  ;;  %vm427_vm8 = vcmp.ge.f32.partialorder %v395_v14, 1.0  ;;  %vm428_vm9 = vcmp.ge.f32.partialorder %v396_v15, 1.0  ;;  %v362_v30 = vadd.f32 %v330_v18, %v1151_v44  ;;  %v363_v31 = vadd.f32 %v331_v19, %v1154_v45 }
  0x39   : > { %651 = vst.msk [vmem:[%s1053_s6 + $0x4c] sm:$0xf] %vm631_vm0, %v931_v16  ;;  %v866_v21 = vsel %vm427_vm8, 1.0, %v961_v36  ;;  %v684_v22 = vsel %vm427_vm8, 0.0, %v395_v14  ;;  %v867_v43 = vsel %vm428_vm9, 1.0, %v961_v36  ;;  %v685_v23 = vsel %vm428_vm9, 0.0, %v396_v15 }
  0x3a   : > { %v932_v25 = vpack.c.bf16 %v866_v21, %v866_v21  ;;  %v933_v26 = vpack.c.bf16 %v867_v43, %v867_v43  ;;  %vm429_vm10 = vcmp.ge.f32.partialorder %v397_v42, 1.0  ;;  %v398_v27 = vadd.f32 %v1022_v3, %v361_v17  ;;  %717 = vst.msk [vmem:[%s1117_s9 + $0xa0] sm:$0xff] %vm696_vm5, %v684_v22  ;;  %718 = vst.msk [vmem:[%s1117_s9 + $0xa8] sm:$0xff] %vm696_vm5, %v685_v23 }
  0x3b   : > { %v868_v28 = vsel %vm429_vm10, 1.0, %v961_v36  ;;  %v686_v29 = vsel %vm429_vm10, 0.0, %v397_v42  ;;  %v364_v49 = vadd.f32 %v332_v20, %v1157_v46  ;;  %v333_v33 = vmul.f32 %v1003_v0, %v296_v24 }
  0x3c   : > { %652 = vst.msk [vmem:[%s1053_s6 + $0x50] sm:$0xf] %vm631_vm0, %v932_v25  ;;  %653 = vst.msk [vmem:[%s1053_s6 + $0x54] sm:$0xf] %vm631_vm0, %v933_v26  ;;  %v934_v48 = vpack.c.bf16 %v868_v28, %v868_v28  ;;  %vm430_vm11 = vcmp.ge.f32.partialorder %v398_v27, 1.0  ;;  %v399_v55 = vadd.f32 %v1022_v3, %v362_v30  ;;  %v400_v56 = vadd.f32 %v1022_v3, %v363_v31 }
  0x3d   : > { %719 = vst.msk [vmem:[%s1117_s9 + $0xb0] sm:$0xff] %vm696_vm5, %v686_v29  ;;  %v869_v44 = vsel %vm430_vm11, 1.0, %v961_v36  ;;  %v687_v45 = vsel %vm430_vm11, 0.0, %v398_v27  ;;  %v401_v46 = vadd.f32 %v1022_v3, %v364_v49  ;;  %v365_v57 = vadd.f32 %v333_v33, %v1162_v50 }
  0x3e   : > { %654 = vst.msk [vmem:[%s1053_s6 + $0x58] sm:$0xf] %vm631_vm0, %v934_v48  ;;  %v935_v35 = vpack.c.bf16 %v869_v44, %v869_v44  ;;  %v334_v60 = vmul.f32 %v1003_v0, %v297_v32  ;;  %vm431_vm12 = vcmp.ge.f32.partialorder %v399_v55, 1.0  ;;  %vm432_vm13 = vcmp.ge.f32.partialorder %v400_v56, 1.0 }
  0x3f   : > { %720 = vst.msk [vmem:[%s1117_s9 + $0xb8] sm:$0xff] %vm696_vm5, %v687_v45  ;;  %v335_v61 = vmul.f32 %v1003_v0, %v298_v34  ;;  %v336_v62 = vmul.f32 %v1003_v0, %v299_v54  ;;  %v870_v38 = vsel %vm431_vm12, 1.0, %v961_v36  ;;  %v688_v41 = vsel %vm431_vm12, 0.0, %v399_v55 }
  0x40   : > { %655 = vst.msk [vmem:[%s1053_s6 + $0x5c] sm:$0xf] %vm631_vm0, %v935_v35  ;;  %v871_v50 = vsel %vm432_vm13, 1.0, %v961_v36  ;;  %v689_v37 = vsel %vm432_vm13, 0.0, %v400_v56  ;;  %v936_v51 = vpack.c.bf16 %v870_v38, %v870_v38  ;;  %vm433_vm14 = vcmp.ge.f32.partialorder %v401_v46, 1.0 }
  0x41   : > { %v937_v63 = vpack.c.bf16 %v871_v50, %v871_v50  ;;  %v402_v1 = vadd.f32 %v1022_v3, %v365_v57  ;;  %721 = vst.msk [vmem:[%s1117_s9 + $0xc0] sm:$0xff] %vm696_vm5, %v688_v41  ;;  %722 = vst.msk [vmem:[%s1117_s9 + $0xc8] sm:$0xff] %vm696_vm5, %v689_v37  ;;  %v872_v2 = vsel %vm433_vm14, 1.0, %v961_v36  ;;  %v690_v4 = vsel %vm433_vm14, 0.0, %v401_v46 }
  0x42   : > { %v366_v5 = vadd.f32 %v334_v60, %v1165_v52  ;;  %v367_v6 = vadd.f32 %v335_v61, %v1168_v53  ;;  %656 = vst.msk [vmem:[%s1053_s6 + $0x60] sm:$0xf] %vm631_vm0, %v936_v51  ;;  %v938_v7 = vpack.c.bf16 %v872_v2, %v872_v2  ;;  %v368_v8 = vadd.f32 %v336_v62, %v1175_v58 }
  0x43   : > { %657 = vst.msk [vmem:[%s1053_s6 + $0x64] sm:$0xf] %vm631_vm0, %v937_v63  ;;  %vm434_vm15 = vcmp.ge.f32.partialorder %v402_v1, 1.0  ;;  %v337_v9 = vmul.f32 %v1003_v0, %v300_v47 }
  0x44   : > { %723 = vst.msk [vmem:[%s1117_s9 + $0xd0] sm:$0xff] %vm696_vm5, %v690_v4  ;;  %v873_v10 = vsel %vm434_vm15, 1.0, %v961_v36  ;;  %v691_v11 = vsel %vm434_vm15, 0.0, %v402_v1  ;;  %v403_v52 = vadd.f32 %v1022_v3, %v366_v5  ;;  %v404_v53 = vadd.f32 %v1022_v3, %v367_v6 }
  0x45   : > { %658 = vst.msk [vmem:[%s1053_s6 + $0x68] sm:$0xf] %vm631_vm0, %v938_v7  ;;  %v939_v12 = vpack.c.bf16 %v873_v10, %v873_v10  ;;  %v405_v13 = vadd.f32 %v1022_v3, %v368_v8  ;;  %v369_v58 = vadd.f32 %v337_v9, %v1178_v59 }
  0x46   : > { %724 = vst.msk [vmem:[%s1117_s9 + $0xd8] sm:$0xff] %vm696_vm5, %v691_v11  ;;  %vm435_vm1 = vcmp.ge.f32.partialorder %v403_v52, 1.0  ;;  %vm436_vm2 = vcmp.ge.f32.partialorder %v404_v53, 1.0 }
  0x47   : > { %659 = vst.msk [vmem:[%s1053_s6 + $0x6c] sm:$0xf] %vm631_vm0, %v939_v12  ;;  %v874_v0 = vsel %vm435_vm1, 1.0, %v961_v36  ;;  %v692_v39 = vsel %vm435_vm1, 0.0, %v403_v52  ;;  %v875_v40 = vsel %vm436_vm2, 1.0, %v961_v36  ;;  %v693_v14 = vsel %vm436_vm2, 0.0, %v404_v53 }
  0x48   : > { %v940_v15 = vpack.c.bf16 %v874_v0, %v874_v0  ;;  %v941_v16 = vpack.c.bf16 %v875_v40, %v875_v40  ;;  %vm437_vm3 = vcmp.ge.f32.partialorder %v405_v13, 1.0  ;;  %v406_v59 = vadd.f32 %v1022_v3, %v369_v58  ;;  %725 = vst.msk [vmem:[%s1117_s9 + $0xe0] sm:$0xff] %vm696_vm5, %v692_v39  ;;  %726 = vst.msk [vmem:[%s1117_s9 + $0xe8] sm:$0xff] %vm696_vm5, %v693_v14 }
  0x49   : > { %v876_v42 = vsel %vm437_vm3, 1.0, %v961_v36  ;;  %v694_v17 = vsel %vm437_vm3, 0.0, %v405_v13 }
  0x4a   : > { %660 = vst.msk [vmem:[%s1053_s6 + $0x70] sm:$0xf] %vm631_vm0, %v940_v15  ;;  %661 = vst.msk [vmem:[%s1053_s6 + $0x74] sm:$0xf] %vm631_vm0, %v941_v16  ;;  %v942_v18 = vpack.c.bf16 %v876_v42, %v876_v42  ;;  %vm438_vm4 = vcmp.ge.f32.partialorder %v406_v59, 1.0 }
  0x4b   : > { %727 = vst.msk [vmem:[%s1117_s9 + $0xf0] sm:$0xff] %vm696_vm5, %v694_v17  ;;  %v877_v19 = vsel %vm438_vm4, 1.0, %v961_v36  ;;  %v695_v20 = vsel %vm438_vm4, 0.0, %v406_v59 }
  0x4c   : > { %662 = vst.msk [vmem:[%s1053_s6 + $0x78] sm:$0xf] %vm631_vm0, %v942_v18  ;;  %v943_v3 = vpack.c.bf16 %v877_v19, %v877_v19 }
  0x4d   : > { %728 = vst.msk [vmem:[%s1117_s9 + $0xf8] sm:$0xff] %vm696_vm5, %v695_v20 }
  0x4e   : > { %663 = vst.msk [vmem:[%s1053_s6 + $0x7c] sm:$0xf] %vm631_vm0, %v943_v3 }
  0x4f PF: > { %s15_s15 = sadd.s32 1, %s959_s15  }
  0x50   : > { %p12_p4 = scmp.ge.s32.totalorder %s15_s15, 4  }
  0x52   :  { %14 = sbr.rel (!%p12_p4) target bundleno = 1 (0x1), region = 77 }

// kernel: tile.243
= control target key start
LH: loop header
LB: loop body
LE: loop exit
PB: predicated region body
PF: predicated region fallthrough
CT: control target
= control target key end

     0   :  { %vm5_vm0 = vcmask 1041409   ;;  %s421_s14 = smov 124   ;;  %s422_s21 = smov 116   ;;  %vm7_vm1 = vcmask 31744   ;;  %vm17_vm2 = vcmask 1048544   ;;  %vm27_vm3 = vcmask 1015744   ;;  %s689_s0 = inlined_call_operand.vmem [shape: f32[2,32,4], index: 0, kind: input, shape index: {}]   ;;  %s690_s1 = inlined_call_operand.vmem [shape: f32[2,128], index: 1, kind: output, shape index: {}]  }
   0x1   :  { %v328_v0 = vld [vmem:[%s689_s0 + $0x1f] sm:$0x1]   ;;  %v332_v3 = vld [vmem:[%s689_s0 + $0x1d] sm:$0x1]   ;;  %v330_v6 = vld [vmem:[%s689_s0 + $0x1e] sm:$0x1]  }
   0x2   :  { %v329_v1 = vld [vmem:[%s689_s0 + $0x3e] sm:$0x2]   ;;  %v333_v4 = vld [vmem:[%s689_s0 + $0x3c] sm:$0x2]   ;;  %v331_v7 = vld [vmem:[%s689_s0 + $0x3d] sm:$0x2]  }
   0x3   :  { %v14_v2 = vsel %vm5_vm0, %v329_v1, %v328_v0  ;;  %v34_v5 = vsel %vm5_vm0, %v333_v4, %v332_v3  ;;  %v334_v8 = vld [vmem:[%s689_s0 + $0x1c] sm:$0x1]   ;;  %v24_v9 = vsel %vm5_vm0, %v331_v7, %v330_v6  ;;  %v336_v12 = vld [vmem:[%s689_s0 + $0x1b] sm:$0x1]   ;;  %v338_v14 = vld [vmem:[%s689_s0 + $0x1a] sm:$0x1]  }
   0x4   :  { %15 = vrot.lane.b32.xlu0 %v14_v2, %s421_s14  ;;  %35 = vrot.lane.b32.xlu1 %v34_v5, %s422_s21  ;;  %v335_v10 = vld [vmem:[%s689_s0 + $0x3b] sm:$0x2]   ;;  %v337_v13 = vld [vmem:[%s689_s0 + $0x3a] sm:$0x2]   ;;  %s423_s3 = smov 120   ;;  %s424_s4 = smov 112  }
   0x5   :  { %v44_v11 = vsel %vm5_vm0, %v335_v10, %v334_v8  ;;  %v339_v15 = vld [vmem:[%s689_s0 + $0x39] sm:$0x2]   ;;  %v54_v16 = vsel %vm5_vm0, %v337_v13, %v336_v12  ;;  %v340_v18 = vld [vmem:[%s689_s0 + $0x19] sm:$0x1]   ;;  %v342_v20 = vld [vmem:[%s689_s0 + $0x18] sm:$0x1]  }
   0x6   :  { %v64_v17 = vsel %vm5_vm0, %v339_v15, %v338_v14  ;;  %v341_v19 = vld [vmem:[%s689_s0 + $0x38] sm:$0x2]   ;;  %v343_v21 = vld [vmem:[%s689_s0 + $0x37] sm:$0x2]   ;;  %s425_s13 = smov 108   ;;  %s426_s14 = smov 104  }
   0x7   :  { %v74_v22 = vsel %vm5_vm0, %v341_v19, %v340_v18  ;;  %v84_v23 = vsel %vm5_vm0, %v343_v21, %v342_v20  ;;  %v344_v24 = vld [vmem:[%s689_s0 + $0x17] sm:$0x1]   ;;  %v346_v26 = vld [vmem:[%s689_s0 + $0x16] sm:$0x1]   ;;  %s427_s23 = smov 100   ;;  %s428_s24 = smov 96  }
   0x8   :  { %25 = vrot.lane.b32.xlu0 %v24_v9, %s423_s3  ;;  %45 = vrot.lane.b32.xlu1 %v44_v11, %s424_s4  ;;  %v345_v25 = vld [vmem:[%s689_s0 + $0x36] sm:$0x2]   ;;  %v347_v27 = vld [vmem:[%s689_s0 + $0x35] sm:$0x2]   ;;  %s429_s4 = smov 92   ;;  %s430_s5 = smov 88  }
   0x9   :  { %v94_v28 = vsel %vm5_vm0, %v345_v25, %v344_v24  ;;  %v104_v29 = vsel %vm5_vm0, %v347_v27, %v346_v26  ;;  %v348_v30 = vld [vmem:[%s689_s0 + $0x15] sm:$0x1]   ;;  %v350_v32 = vld [vmem:[%s689_s0 + $0x14] sm:$0x1]   ;;  %v352_v36 = vld [vmem:[%s689_s0 + $0x13] sm:$0x1]  }
   0xa   :  { %v349_v31 = vld [vmem:[%s689_s0 + $0x34] sm:$0x2]   ;;  %v351_v33 = vld [vmem:[%s689_s0 + $0x33] sm:$0x2]   ;;  %v353_v37 = vld [vmem:[%s689_s0 + $0x32] sm:$0x2]  }
   0xb   :  { %v114_v34 = vsel %vm5_vm0, %v349_v31, %v348_v30  ;;  %v124_v35 = vsel %vm5_vm0, %v351_v33, %v350_v32  ;;  %v354_v38 = vld [vmem:[%s689_s0 + $0x12] sm:$0x1]   ;;  %s432_s15 = smov 80   ;;  %v134_v40 = vsel %vm5_vm0, %v353_v37, %v352_v36  ;;  %v356_v42 = vld [vmem:[%s689_s0 + $0x11] sm:$0x1]   ;;  %s434_s29 = smov 72  }
   0xc   :  { %55 = vrot.lane.b32.xlu0 %v54_v16, %s425_s13  ;;  %65 = vrot.lane.b32.xlu1 %v64_v17, %s426_s14  ;;  %v355_v39 = vld [vmem:[%s689_s0 + $0x31] sm:$0x2]   ;;  %s431_s14 = smov 84   ;;  %v357_v43 = vld [vmem:[%s689_s0 + $0x30] sm:$0x2]   ;;  %s435_s9 = smov 68  }
   0xd   :  { %v144_v41 = vsel %vm5_vm0, %v355_v39, %v354_v38  ;;  %v358_v44 = vld [vmem:[%s689_s0 + $0x10] sm:$0x1]   ;;  %v2_v46 = vld [vmem:[%s689_s0] sm:$0x1]   ;;  %v154_v48 = vsel %vm5_vm0, %v357_v43, %v356_v42  ;;  %v360_v51 = vld [vmem:[%s689_s0 + $0xf] sm:$0x1]  }
   0xe   :  { %v359_v45 = vld [vmem:[%s689_s0 + $0x2f] sm:$0x2]   ;;  %v327_v47 = vld [vmem:[%s689_s0 + $0x1f] sm:$0x2]   ;;  %v361_v52 = vld [vmem:[%s689_s0 + $0x2e] sm:$0x2]  }
   0xf   :  { %v6_v49 = vsel %vm5_vm0, %v327_v47, %v2_v46  ;;  %v164_v50 = vsel %vm5_vm0, %v359_v45, %v358_v44  ;;  %v362_v53 = vld [vmem:[%s689_s0 + $0xe] sm:$0x1]   ;;  %s436_s10 = smov 64   ;;  %v174_v55 = vsel %vm5_vm0, %v361_v52, %v360_v51  ;;  %v364_v57 = vld [vmem:[%s689_s0 + $0xd] sm:$0x1]   ;;  %s437_s19 = smov 60  }
  0x10   :  { %75 = vrot.lane.b32.xlu0 %v74_v22, %s427_s23  ;;  %85 = vrot.lane.b32.xlu1 %v84_v23, %s428_s24  ;;  %s433_s24 = smov 76   ;;  %8 = vst.msk [vmem:[#allocation0] sm:$0x3] %vm7_vm1, %v6_v49   ;;  %v363_v54 = vld [vmem:[%s689_s0 + $0x2d] sm:$0x2]   ;;  %s438_s20 = smov 56  }
  0x11   :  { %v184_v56 = vsel %vm5_vm0, %v363_v54, %v362_v53  ;;  %v365_v58 = vld [vmem:[%s689_s0 + $0x2c] sm:$0x2]   ;;  %v366_v59 = vld [vmem:[%s689_s0 + $0xc] sm:$0x1]   ;;  %v368_v63 = vld [vmem:[%s689_s0 + $0xb] sm:$0x1]  }
  0x12   :  { %v367_v60 = vld [vmem:[%s689_s0 + $0x2b] sm:$0x2]   ;;  %v194_v61 = vsel %vm5_vm0, %v365_v58, %v364_v57  ;;  %v369_v0 = vld [vmem:[%s689_s0 + $0x2a] sm:$0x2]   ;;  %v370_v1 = vld [vmem:[%s689_s0 + $0xa] sm:$0x1]  }
  0x13   :  { %v204_v62 = vsel %vm5_vm0, %v367_v60, %v366_v59  ;;  %v371_v2 = vld [vmem:[%s689_s0 + $0x29] sm:$0x2]   ;;  %s440_s30 = smov 48   ;;  %v214_v3 = vsel %vm5_vm0, %v369_v0, %v368_v63  ;;  %v372_v5 = vld [vmem:[%s689_s0 + $0x9] sm:$0x1]   ;;  %s442_s11 = smov 40  }
  0x14   :  { %95 = vrot.lane.b32.xlu0 %v94_v28, %s429_s4  ;;  %105 = vrot.lane.b32.xlu1 %v104_v29, %s430_s5  ;;  %v224_v4 = vsel %vm5_vm0, %v371_v2, %v370_v1  ;;  %v373_v6 = vld [vmem:[%s689_s0 + $0x28] sm:$0x2]   ;;  %v374_v7 = vld [vmem:[%s689_s0 + $0x8] sm:$0x1]   ;;  %s444_s21 = smov 32   ;;  %s446_s2 = smov 24  }
  0x15   :  { %v375_v8 = vld [vmem:[%s689_s0 + $0x27] sm:$0x2]   ;;  %v234_v9 = vsel %vm5_vm0, %v373_v6, %v372_v5  ;;  %v376_v11 = vld [vmem:[%s689_s0 + $0x7] sm:$0x1]   ;;  %v378_v13 = vld [vmem:[%s689_s0 + $0x6] sm:$0x1]  }
  0x16   :  { %v244_v10 = vsel %vm5_vm0, %v375_v8, %v374_v7  ;;  %v377_v12 = vld [vmem:[%s689_s0 + $0x26] sm:$0x2]   ;;  %v379_v14 = vld [vmem:[%s689_s0 + $0x25] sm:$0x2]   ;;  %v380_v17 = vld [vmem:[%s689_s0 + $0x5] sm:$0x1]  }
  0x17   :  { %v254_v15 = vsel %vm5_vm0, %v377_v12, %v376_v11  ;;  %v264_v16 = vsel %vm5_vm0, %v379_v14, %v378_v13  ;;  %v381_v18 = vld [vmem:[%s689_s0 + $0x24] sm:$0x2]   ;;  %v382_v19 = vld [vmem:[%s689_s0 + $0x4] sm:$0x1]   ;;  %v384_v23 = vld [vmem:[%s689_s0 + $0x3] sm:$0x1]  }
  0x18   :  { %115 = vrot.lane.b32.xlu0 %v114_v34, %s431_s14  ;;  %125 = vrot.lane.b32.xlu1 %v124_v35, %s432_s15  ;;  %v383_v20 = vld [vmem:[%s689_s0 + $0x23] sm:$0x2]   ;;  %v274_v21 = vsel %vm5_vm0, %v381_v18, %v380_v17  ;;  %v385_v24 = vld [vmem:[%s689_s0 + $0x22] sm:$0x2]   ;;  %s448_s12 = smov 16   ;;  %s450_s17 = smov 8  }
  0x19   :  { %v284_v22 = vsel %vm5_vm0, %v383_v20, %v382_v19  ;;  %v386_v25 = vld [vmem:[%s689_s0 + $0x2] sm:$0x1]   ;;  %v294_v27 = vsel %vm5_vm0, %v385_v24, %v384_v23  ;;  %v388_v29 = vld [vmem:[%s689_s0 + $0x1] sm:$0x1]   ;;  %s451_s18 = smov 4   ;;  %vm37_vm4 = vcmask 982944  }
  0x1a   :  { %v387_v26 = vld [vmem:[%s689_s0 + $0x21] sm:$0x2]   ;;  %v389_v30 = vld [vmem:[%s689_s0 + $0x20] sm:$0x2]   ;;  %s449_s0 = smov 12   ;;  %vm47_vm5 = vcmask 950144  }
  0x1b   :  { %v304_v28 = vsel %vm5_vm0, %v387_v26, %v386_v25  ;;  %v314_v31 = vsel %vm5_vm0, %v389_v30, %v388_v29  ;;  %vm57_vm6 = vcmask 917344   ;;  %vm67_vm7 = vcmask 884544  }
  0x1c   :  { %135 = vrot.lane.b32.xlu0 %v134_v40, %s433_s24  ;;  %145 = vrot.lane.b32.xlu1 %v144_v41, %s434_s29  ;;  %s439_s29 = smov 52   ;;  %vm77_vm8 = vcmask 851744   ;;  %vm87_vm9 = vcmask 818944   ;;  %vm97_vm10 = vcmask 786144   ;;  %vm107_vm11 = vcmask 753344  }
  0x1d   :  { %vm117_vm12 = vcmask 720544   ;;  %vm127_vm13 = vcmask 687744   ;;  %vm137_vm14 = vcmask 654944   ;;  %vm147_vm15 = vcmask 622144  }
  0x1e   :  { %vm157_vm0 = vcmask 589344   ;;  %vm167_vm1 = vcmask 556544  }
  0x20   :  { %155 = vrot.lane.b32.xlu0 %v154_v48, %s435_s9  ;;  %165 = vrot.lane.b32.xlu1 %v164_v50, %s436_s10  ;;  %s441_s10 = smov 44  }
  0x24   :  { %175 = vrot.lane.b32.xlu0 %v174_v55, %s437_s19  ;;  %185 = vrot.lane.b32.xlu1 %v184_v56, %s438_s20  ;;  %s443_s20 = smov 36  }
  0x28   :  { %195 = vrot.lane.b32.xlu0 %v194_v61, %s439_s29  ;;  %205 = vrot.lane.b32.xlu1 %v204_v62, %s440_s30  ;;  %s445_s30 = smov 28  }
  0x2c   :  { %215 = vrot.lane.b32.xlu0 %v214_v3, %s441_s10  ;;  %225 = vrot.lane.b32.xlu1 %v224_v4, %s442_s11  ;;  %s447_s11 = smov 20  }
  0x30   :  { %235 = vrot.lane.b32.xlu0 %v234_v9, %s443_s20  ;;  %245 = vrot.lane.b32.xlu1 %v244_v10, %s444_s21 }
  0x34   :  { %255 = vrot.lane.b32.xlu0 %v254_v15, %s445_s30  ;;  %265 = vrot.lane.b32.xlu1 %v264_v16, %s446_s2 }
  0x38   :  { %275 = vrot.lane.b32.xlu0 %v274_v21, %s447_s11  ;;  %285 = vrot.lane.b32.xlu1 %v284_v22, %s448_s12 }
  0x3c   :  { %295 = vrot.lane.b32.xlu0 %v294_v27, %s449_s0  ;;  %305 = vrot.lane.b32.xlu1 %v304_v28, %s450_s17 }
  0x40   :  { %315 = vrot.lane.b32.xlu0 %v314_v31, %s451_s18 }
  0x76   :  { %v16_v32 = vpop.permute.xlu0 %15   ;;  %v36_v33 = vpop.permute.xlu1 %35  }
  0x77   :  { %18 = vst.msk [vmem:[#allocation0] sm:$0x3] %vm17_vm2, %v16_v32   ;;  %vm177_vm2 = vcmask 523744  }
  0x7a   :  { %v26_v34 = vpop.permute.xlu0 %25   ;;  %v46_v35 = vpop.permute.xlu1 %45  }
  0x7b   :  { %28 = vst.msk [vmem:[#allocation0] sm:$0x3] %vm27_vm3, %v26_v34   ;;  %vm187_vm3 = vcmask 490944  }
  0x7c   :  { %38 = vst.msk [vmem:[#allocation0] sm:$0x3] %vm37_vm4, %v36_v33   ;;  %vm197_vm4 = vcmask 458144  }
  0x7d   :  { %48 = vst.msk [vmem:[#allocation0] sm:$0x3] %vm47_vm5, %v46_v35   ;;  %vm207_vm5 = vcmask 425344  }
  0x7e   :  { %v56_v36 = vpop.permute.xlu0 %55   ;;  %v66_v37 = vpop.permute.xlu1 %65  }
  0x7f   :  { %58 = vst.msk [vmem:[#allocation0] sm:$0x3] %vm57_vm6, %v56_v36   ;;  %vm217_vm6 = vcmask 392544  }
  0x80   :  { %68 = vst.msk [vmem:[#allocation0] sm:$0x3] %vm67_vm7, %v66_v37   ;;  %vm227_vm7 = vcmask 359744  }
  0x82   :  { %v76_v38 = vpop.permute.xlu0 %75   ;;  %v86_v39 = vpop.permute.xlu1 %85  }
  0x83   :  { %78 = vst.msk [vmem:[#allocation0] sm:$0x3] %vm77_vm8, %v76_v38   ;;  %vm237_vm8 = vcmask 326944  }
  0x84   :  { %88 = vst.msk [vmem:[#allocation0] sm:$0x3] %vm87_vm9, %v86_v39   ;;  %vm247_vm9 = vcmask 294144  }
  0x86   :  { %v96_v40 = vpop.permute.xlu0 %95   ;;  %v106_v41 = vpop.permute.xlu1 %105  }
  0x87   :  { %98 = vst.msk [vmem:[#allocation0] sm:$0x3] %vm97_vm10, %v96_v40   ;;  %vm257_vm10 = vcmask 261344  }
  0x88   :  { %108 = vst.msk [vmem:[#allocation0] sm:$0x3] %vm107_vm11, %v106_v41   ;;  %vm267_vm11 = vcmask 228544  }
  0x8a   :  { %v116_v42 = vpop.permute.xlu0 %115   ;;  %v126_v43 = vpop.permute.xlu1 %125  }
  0x8b   :  { %118 = vst.msk [vmem:[#allocation0] sm:$0x3] %vm117_vm12, %v116_v42   ;;  %vm277_vm12 = vcmask 195744  }
  0x8c   :  { %128 = vst.msk [vmem:[#allocation0] sm:$0x3] %vm127_vm13, %v126_v43   ;;  %vm287_vm13 = vcmask 162944  }
  0x8e   :  { %v136_v44 = vpop.permute.xlu0 %135   ;;  %v146_v45 = vpop.permute.xlu1 %145  }
  0x8f   :  { %138 = vst.msk [vmem:[#allocation0] sm:$0x3] %vm137_vm14, %v136_v44   ;;  %vm297_vm14 = vcmask 130144  }
  0x90   :  { %148 = vst.msk [vmem:[#allocation0] sm:$0x3] %vm147_vm15, %v146_v45   ;;  %vm307_vm15 = vcmask 97344  }
  0x92   :  { %v156_v46 = vpop.permute.xlu0 %155   ;;  %v166_v47 = vpop.permute.xlu1 %165  }
  0x93   :  { %158 = vst.msk [vmem:[#allocation0] sm:$0x3] %vm157_vm0, %v156_v46   ;;  %vm317_vm0 = vcmask 64544  }
  0x94   :  { %168 = vst.msk [vmem:[#allocation0] sm:$0x3] %vm167_vm1, %v166_v47  }
  0x96   :  { %v176_v48 = vpop.permute.xlu0 %175   ;;  %v186_v49 = vpop.permute.xlu1 %185  }
  0x97   :  { %178 = vst.msk [vmem:[#allocation0] sm:$0x3] %vm177_vm2, %v176_v48  }
  0x98   :  { %188 = vst.msk [vmem:[#allocation0] sm:$0x3] %vm187_vm3, %v186_v49  }
  0x9a   :  { %v196_v50 = vpop.permute.xlu0 %195   ;;  %v206_v51 = vpop.permute.xlu1 %205  }
  0x9b   :  { %198 = vst.msk [vmem:[#allocation0] sm:$0x3] %vm197_vm4, %v196_v50  }
  0x9c   :  { %208 = vst.msk [vmem:[#allocation0] sm:$0x3] %vm207_vm5, %v206_v51  }
  0x9e   :  { %v216_v52 = vpop.permute.xlu0 %215   ;;  %v226_v53 = vpop.permute.xlu1 %225  }
  0x9f   :  { %218 = vst.msk [vmem:[#allocation0] sm:$0x3] %vm217_vm6, %v216_v52  }
  0xa0   :  { %228 = vst.msk [vmem:[#allocation0] sm:$0x3] %vm227_vm7, %v226_v53  }
  0xa2   :  { %v236_v54 = vpop.permute.xlu0 %235   ;;  %v246_v55 = vpop.permute.xlu1 %245  }
  0xa3   :  { %238 = vst.msk [vmem:[#allocation0] sm:$0x3] %vm237_vm8, %v236_v54  }
  0xa4   :  { %248 = vst.msk [vmem:[#allocation0] sm:$0x3] %vm247_vm9, %v246_v55  }
  0xa6   :  { %v256_v56 = vpop.permute.xlu0 %255   ;;  %v266_v57 = vpop.permute.xlu1 %265  }
  0xa7   :  { %258 = vst.msk [vmem:[#allocation0] sm:$0x3] %vm257_vm10, %v256_v56  }
  0xa8   :  { %268 = vst.msk [vmem:[#allocation0] sm:$0x3] %vm267_vm11, %v266_v57  }
  0xaa   :  { %v276_v58 = vpop.permute.xlu0 %275   ;;  %v286_v59 = vpop.permute.xlu1 %285  }
  0xab   :  { %278 = vst.msk [vmem:[#allocation0] sm:$0x3] %vm277_vm12, %v276_v58  }
  0xac   :  { %288 = vst.msk [vmem:[#allocation0] sm:$0x3] %vm287_vm13, %v286_v59  }
  0xae   :  { %v296_v60 = vpop.permute.xlu0 %295   ;;  %v306_v61 = vpop.permute.xlu1 %305  }
  0xaf   :  { %298 = vst.msk [vmem:[#allocation0] sm:$0x3] %vm297_vm14, %v296_v60  }
  0xb0   :  { %308 = vst.msk [vmem:[#allocation0] sm:$0x3] %vm307_vm15, %v306_v61  }
  0xb2   :  { %v316_v62 = vpop.permute.xlu0 %315  }
  0xb3   :  { %318 = vst.msk [vmem:[#allocation0] sm:$0x3] %vm317_vm0, %v316_v62  }
  0xba   :  { %v323_v63 = vld [vmem:[#allocation0] sm:$0x3] }
  0xbb   :  { %326 = vst [vmem:[%s690_s1] sm:$0x3] %v323_v63 }

// kernel: closed_call.265
= control target key start
LH: loop header
LB: loop body
LE: loop exit
PB: predicated region body
PF: predicated region fallthrough
CT: control target
= control target key end

     0   :  { %s990_s15 = smov 0   ;;  %s1391_s0 = inlined_call_operand.vmem [shape: bf16[512,3], index: 0, kind: input, shape index: {}]   ;;  %s1392_s1 = inlined_call_operand.vmem [shape: bf16[3,4], index: 1, kind: input, shape index: {}]   ;;  %s1393_s2 = inlined_call_operand.vmem [shape: f32[2,4], index: 2, kind: input, shape index: {}]   ;;  %s1394_s3 = inlined_call_operand.vmem [shape: f32[512,4], index: 3, kind: output, shape index: {0}]   ;;  %s1395_s4 = inlined_call_operand.vmem [shape: f32[2,4], index: 4, kind: output, shape index: {1}]  }
   0x1 LB: > { %s996_s16 = sadd.s32 4294967295, %s961_s15   ;;  %p833_p0 = scmp.ge.s32.totalorder %s961_s15, 1  ;;  %s961_s15 = sphi %s990_s15, %s15_s15  }
   0x2   : > { %p161_p1 = scmp.lt.s32.totalorder %s961_s15, 3 }
   0x4   : > { %p162_p2 = pnand %p833_p0, %p161_p1 }
   0x5   : > { %s834_s19 = sshll.u32 (!%p162_p2), %s996_s16, 5  ;;  %p870_p4 = scmp.ne.s32.totalorder (!%p162_p2), %s996_s16, 0 }
   0x6   : > { %165 = sbr.rel (%p162_p2) target bundleno = 365 (0x16d), region = 32  ;;  %p188_p3 = scmp.lt.s32.totalorder (!%p162_p2), %s834_s19, 63 }
   0xb   : > { %v232_v0 = vld [vmem:[%s1392_s1] sm:$0x3]  ;;  %vm362_vm0 = vcmask 1040384   ;;  %vm363_vm1 = vcmask 1041408   ;;  %v963_v1 = vmov 65535   ;;  %s1397_s19 = smov (!%p188_p3, %s834_s19), 63 }
   0xc   : > { %v364_v2 = vsel %vm362_vm0, 4294967295, %v963_v1  ;;  %s835_s20 = sshll.u32 %s1397_s19, 2  ;;  %vm313_vm2 = vcmask 23552   ;;  %s837_s24 = sshll.u32 %s1397_s19, 3  ;;  %vm530_vm3 = vcmask 31744  }
   0xd   : > { %v365_v3 = vsel %vm363_vm1, %v364_v2, 0  ;;  %s1010_s23 = scalar_lea.vmem %s1391_s0, %s835_s20  ;;  %s1048_s27 = scalar_lea.vmem %s1394_s3, %s837_s24 }
   0xe   : > { %v367_v4 = vand.u32 %v365_v3, %v232_v0  ;;  %v937_v5 = vld [vmem:[%s1010_s23] sm:$0xff]   ;;  %v939_v7 = vld [vmem:[%s1010_s23 + $0x8] sm:$0xff]   ;;  %v941_v9 = vld [vmem:[%s1010_s23 + $0x10] sm:$0xff]  }
   0xf   : > { %v938_v6 = vld [vmem:[%s1010_s23 + $0x40] sm:$0xff]   ;;  %893 = vmatprep.mubr.msk.bf16.mxu0 %vm313_vm2, %v937_v5  ;;  %v940_v8 = vld [vmem:[%s1010_s23 + $0x48] sm:$0xff]   ;;  %v942_v10 = vld [vmem:[%s1010_s23 + $0x50] sm:$0xff]  }
  0x10   : > { %891 = vmatprep.subr.bf16.mxu0 %v367_v4  ;;  %925 = vmatprep.subr.bf16.mxu1 %v367_v4  ;;  %v943_v11 = vld [vmem:[%s1010_s23 + $0x18] sm:$0xff]   ;;  %v945_v13 = vld [vmem:[%s1010_s23 + $0x20] sm:$0xff]   ;;  %v947_v15 = vld [vmem:[%s1010_s23 + $0x28] sm:$0xff]  }
  0x11   : > { %892 = vmatpush3.bf16.msra.mxu0 %v367_v4  ;;  %926 = vmatpush3.bf16.msra.mxu1 %v367_v4  ;;  %v944_v12 = vld [vmem:[%s1010_s23 + $0x58] sm:$0xff]   ;;  %v946_v14 = vld [vmem:[%s1010_s23 + $0x60] sm:$0xff]   ;;  %v948_v16 = vld [vmem:[%s1010_s23 + $0x68] sm:$0xff]  }
  0x12   : > { %909 = vmatprep.mubr.msk.bf16.mxu1 %vm313_vm2, %v938_v6  ;;  %v949_v17 = vld [vmem:[%s1010_s23 + $0x30] sm:$0xff]   ;;  %v951_v19 = vld [vmem:[%s1010_s23 + $0x38] sm:$0xff]  }
  0x13   : > { %v950_v18 = vld [vmem:[%s1010_s23 + $0x70] sm:$0xff]   ;;  %v952_v20 = vld [vmem:[%s1010_s23 + $0x78] sm:$0xff]  }
  0x14   : > { %894 = vmatmul.mubr.msk.bf16.vlgmr.msra.gmra.mxu0 %vm313_vm2, %v939_v7  ;;  %910 = vmatmul.mubr.msk.bf16.vlgmr.msra.gmra.mxu1 %vm313_vm2, %v940_v8 }
  0x15   : > { %897 = vmatprep.mubr.msk.bf16.mxu0 %vm313_vm2, %v941_v9  ;;  %913 = vmatprep.mubr.msk.bf16.mxu1 %vm313_vm2, %v942_v10 }
  0x1c   : > { %898 = vmatmul.mubr.msk.bf16.gmra.mxu0 %vm313_vm2, %v943_v11  ;;  %914 = vmatmul.mubr.msk.bf16.gmra.mxu1 %vm313_vm2, %v944_v12 }
  0x1d   : > { %901 = vmatprep.mubr.msk.bf16.mxu0 %vm313_vm2, %v945_v13  ;;  %917 = vmatprep.mubr.msk.bf16.mxu1 %vm313_vm2, %v946_v14 }
  0x24   : > { %902 = vmatmul.mubr.msk.bf16.gmra.mxu0 %vm313_vm2, %v947_v15  ;;  %918 = vmatmul.mubr.msk.bf16.gmra.mxu1 %vm313_vm2, %v948_v16 }
  0x25   : > { %905 = vmatprep.mubr.msk.bf16.mxu0 %vm313_vm2, %v949_v17  ;;  %921 = vmatprep.mubr.msk.bf16.mxu1 %vm313_vm2, %v950_v18 }
  0x2c   : > { %906 = vmatmul.mubr.msk.bf16.gmra.mxu0 %vm313_vm2, %v951_v19  ;;  %922 = vmatmul.mubr.msk.bf16.gmra.mxu1 %vm313_vm2, %v952_v20 }
  0xd4   : > { %v1050_v21 = vpop.f32.mrf.mxu0  ;;  %v1055_v22 = vpop.f32.mrf.mxu1 }
  0xd5   : > { %533 = vst.msk [vmem:[%s1048_s27 + $0x10] sm:$0xff] %vm530_vm3, %v1050_v21  ;;  %549 = vst.msk [vmem:[%s1048_s27 + $0x90] sm:$0xff] %vm530_vm3, %v1055_v22 }
  0xd6   : > { %v1060_v23 = vpop.f32.mrf.mxu0  ;;  %v1065_v24 = vpop.f32.mrf.mxu1 }
  0xd7   : > { %531 = vst.msk [vmem:[%s1048_s27] sm:$0xff] %vm530_vm3, %v1060_v23  ;;  %547 = vst.msk [vmem:[%s1048_s27 + $0x80] sm:$0xff] %vm530_vm3, %v1065_v24 }
  0xd8   : > { %v1070_v25 = vpop.f32.mrf.mxu0  ;;  %v1075_v26 = vpop.f32.mrf.mxu1 }
  0xd9   : > { %534 = vst.msk [vmem:[%s1048_s27 + $0x18] sm:$0xff] %vm530_vm3, %v1070_v25  ;;  %550 = vst.msk [vmem:[%s1048_s27 + $0x98] sm:$0xff] %vm530_vm3, %v1075_v26 }
  0xda   : > { %v1080_v27 = vpop.f32.mrf.mxu0  ;;  %v1085_v28 = vpop.f32.mrf.mxu1 }
  0xdb   : > { %532 = vst.msk [vmem:[%s1048_s27 + $0x8] sm:$0xff] %vm530_vm3, %v1080_v27  ;;  %548 = vst.msk [vmem:[%s1048_s27 + $0x88] sm:$0xff] %vm530_vm3, %v1085_v28 }
  0xdc   : > { %v1090_v29 = vpop.f32.mrf.mxu0  ;;  %v1095_v30 = vpop.f32.mrf.mxu1 }
  0xdd   : > { %537 = vst.msk [vmem:[%s1048_s27 + $0x30] sm:$0xff] %vm530_vm3, %v1090_v29  ;;  %553 = vst.msk [vmem:[%s1048_s27 + $0xb0] sm:$0xff] %vm530_vm3, %v1095_v30 }
  0xde   : > { %v1100_v31 = vpop.f32.mrf.mxu0  ;;  %v1105_v32 = vpop.f32.mrf.mxu1 }
  0xdf   : > { %535 = vst.msk [vmem:[%s1048_s27 + $0x20] sm:$0xff] %vm530_vm3, %v1100_v31  ;;  %551 = vst.msk [vmem:[%s1048_s27 + $0xa0] sm:$0xff] %vm530_vm3, %v1105_v32 }
  0xe0   : > { %v1110_v33 = vpop.f32.mrf.mxu0  ;;  %v1115_v34 = vpop.f32.mrf.mxu1 }
  0xe1   : > { %538 = vst.msk [vmem:[%s1048_s27 + $0x38] sm:$0xff] %vm530_vm3, %v1110_v33  ;;  %554 = vst.msk [vmem:[%s1048_s27 + $0xb8] sm:$0xff] %vm530_vm3, %v1115_v34 }
  0xe2   : > { %v1120_v35 = vpop.f32.mrf.mxu0  ;;  %v1125_v36 = vpop.f32.mrf.mxu1 }
  0xe3   : > { %536 = vst.msk [vmem:[%s1048_s27 + $0x28] sm:$0xff] %vm530_vm3, %v1120_v35  ;;  %552 = vst.msk [vmem:[%s1048_s27 + $0xa8] sm:$0xff] %vm530_vm3, %v1125_v36 }
  0xe4   : > { %v1130_v37 = vpop.f32.mrf.mxu0  ;;  %v1135_v38 = vpop.f32.mrf.mxu1 }
  0xe5   : > { %541 = vst.msk [vmem:[%s1048_s27 + $0x50] sm:$0xff] %vm530_vm3, %v1130_v37  ;;  %557 = vst.msk [vmem:[%s1048_s27 + $0xd0] sm:$0xff] %vm530_vm3, %v1135_v38 }
  0xe6   : > { %v1140_v39 = vpop.f32.mrf.mxu0  ;;  %v1145_v40 = vpop.f32.mrf.mxu1 }
  0xe7   : > { %539 = vst.msk [vmem:[%s1048_s27 + $0x40] sm:$0xff] %vm530_vm3, %v1140_v39  ;;  %555 = vst.msk [vmem:[%s1048_s27 + $0xc0] sm:$0xff] %vm530_vm3, %v1145_v40 }
  0xe8   : > { %v1150_v41 = vpop.f32.mrf.mxu0  ;;  %v1155_v42 = vpop.f32.mrf.mxu1 }
  0xe9   : > { %542 = vst.msk [vmem:[%s1048_s27 + $0x58] sm:$0xff] %vm530_vm3, %v1150_v41  ;;  %558 = vst.msk [vmem:[%s1048_s27 + $0xd8] sm:$0xff] %vm530_vm3, %v1155_v42 }
  0xea   : > { %v1160_v43 = vpop.f32.mrf.mxu0  ;;  %v1165_v44 = vpop.f32.mrf.mxu1 }
  0xeb   : > { %540 = vst.msk [vmem:[%s1048_s27 + $0x48] sm:$0xff] %vm530_vm3, %v1160_v43  ;;  %556 = vst.msk [vmem:[%s1048_s27 + $0xc8] sm:$0xff] %vm530_vm3, %v1165_v44 }
  0xec   : > { %v1170_v45 = vpop.f32.mrf.mxu0  ;;  %v1175_v46 = vpop.f32.mrf.mxu1 }
  0xed   : > { %545 = vst.msk [vmem:[%s1048_s27 + $0x70] sm:$0xff] %vm530_vm3, %v1170_v45  ;;  %561 = vst.msk [vmem:[%s1048_s27 + $0xf0] sm:$0xff] %vm530_vm3, %v1175_v46 }
  0xee   : > { %v1180_v47 = vpop.f32.mrf.mxu0  ;;  %v1185_v48 = vpop.f32.mrf.mxu1 }
  0xef   : > { %543 = vst.msk [vmem:[%s1048_s27 + $0x60] sm:$0xff] %vm530_vm3, %v1180_v47  ;;  %559 = vst.msk [vmem:[%s1048_s27 + $0xe0] sm:$0xff] %vm530_vm3, %v1185_v48  ;;  %566 = sbr.rel (%p870_p4) target bundleno = 246 (0xf6), region = 36 }
  0xf0   : > { %v1190_v49 = vpop.f32.mrf.mxu0  ;;  %v1195_v50 = vpop.f32.mrf.mxu1 }
  0xf1   : > { %546 = vst.msk [vmem:[%s1048_s27 + $0x78] sm:$0xff] %vm530_vm3, %v1190_v49  ;;  %562 = vst.msk [vmem:[%s1048_s27 + $0xf8] sm:$0xff] %vm530_vm3, %v1195_v50 }
  0xf2   : > { %v1200_v51 = vpop.f32.mrf.mxu0  ;;  %v1205_v52 = vpop.f32.mrf.mxu1 }
  0xf3   : > { %544 = vst.msk [vmem:[%s1048_s27 + $0x68] sm:$0xff] %vm530_vm3, %v1200_v51  ;;  %560 = vst.msk [vmem:[%s1048_s27 + $0xe8] sm:$0xff] %vm530_vm3, %v1205_v52 }
  0xf4   : > { %vm567_vm4 = vcmask 24576   ;;  %v964_v53 = vmov 0.0  }
  0xf5   : > { %568 = vst.msk [vmem:[#allocation2] sm:$0x1] %vm567_vm4, %v964_v53  ;;  %569 = vst.msk [vmem:[#allocation3] sm:$0x1] %vm567_vm4, %v964_v53 }
  0xf6 PF: > { %v571_v54 = vsel %vm530_vm3, %v1060_v23, 0.0  ;;  %v572_v55 = vsel %vm530_vm3, %v1080_v27, 0.0  ;;  %v574_v56 = vsel %vm530_vm3, %v1050_v21, 0.0  ;;  %v576_v58 = vsel %vm530_vm3, %v1070_v25, 0.0  ;;  %p871_p5 = scmp.ne.s32.totalorder %s996_s16, 1 }
  0xf7   : > { %v573_v57 = vadd.f32 %v572_v55, %v571_v54  ;;  %v578_v60 = vsel %vm530_vm3, %v1100_v31, 0.0  ;;  %v580_v62 = vsel %vm530_vm3, %v1120_v35, 0.0  ;;  %v582_v0 = vsel %vm530_vm3, %v1090_v29, 0.0 }
  0xf8   : > { %v584_v2 = vsel %vm530_vm3, %v1110_v33, 0.0  ;;  %v586_v4 = vsel %vm530_vm3, %v1140_v39, 0.0  ;;  %v588_v6 = vsel %vm530_vm3, %v1160_v43, 0.0  ;;  %v644_v7 = vmul.f32 %v1060_v23, %v1060_v23 }
  0xf9   : > { %v575_v59 = vadd.f32 %v574_v56, %v573_v57  ;;  %v645_v8 = vmul.f32 %v1080_v27, %v1080_v27  ;;  %v646_v10 = vmul.f32 %v1050_v21, %v1050_v21  ;;  %v590_v11 = vsel %vm530_vm3, %v1130_v37, 0.0 }
  0xfa   : > { %v647_v12 = vmul.f32 %v1070_v25, %v1070_v25  ;;  %v592_v14 = vsel %vm530_vm3, %v1150_v41, 0.0  ;;  %v648_v15 = vmul.f32 %v1100_v31, %v1100_v31  ;;  %v676_v16 = vsel %vm530_vm3, %v644_v7, 0.0 }
  0xfb   : > { %v577_v61 = vadd.f32 %v576_v58, %v575_v59  ;;  %v677_v17 = vsel %vm530_vm3, %v645_v8, 0.0  ;;  %v679_v20 = vsel %vm530_vm3, %v646_v10, 0.0  ;;  %v594_v21 = vsel %vm530_vm3, %v1180_v47, 0.0 }
  0xfc   : > { %v678_v19 = vadd.f32 %v677_v17, %v676_v16  ;;  %v649_v23 = vmul.f32 %v1120_v35, %v1120_v35  ;;  %v681_v25 = vsel %vm530_vm3, %v647_v12, 0.0  ;;  %v596_v31 = vsel %vm530_vm3, %v1200_v51, 0.0 }
  0xfd   : > { %v579_v63 = vadd.f32 %v578_v60, %v577_v61  ;;  %v650_v54 = vmul.f32 %v1090_v29, %v1090_v29  ;;  %v683_v55 = vsel %vm530_vm3, %v648_v15, 0.0  ;;  %v598_v58 = vsel %vm530_vm3, %v1170_v45, 0.0 }
  0xfe   : > { %v680_v53 = vadd.f32 %v679_v20, %v678_v19  ;;  %v651_v35 = vmul.f32 %v1110_v33, %v1110_v33  ;;  %v685_v59 = vsel %vm530_vm3, %v649_v23, 0.0  ;;  %v652_v29 = vmul.f32 %v1140_v39, %v1140_v39 }
  0xff   : > { %v581_v1 = vadd.f32 %v580_v62, %v579_v63  ;;  %v600_v62 = vsel %vm530_vm3, %v1190_v49, 0.0  ;;  %v687_v63 = vsel %vm530_vm3, %v650_v54, 0.0  ;;  %v653_v33 = vmul.f32 %v1160_v43, %v1160_v43 }
 0x100   : > { %v682_v57 = vadd.f32 %v681_v25, %v680_v53  ;;  %v654_v39 = vmul.f32 %v1130_v37, %v1130_v37  ;;  %v691_v7 = vsel %vm530_vm3, %v652_v29, 0.0  ;;  %v606_v10 = vsel %vm530_vm3, %v1055_v22, 0.0 }
 0x101   : > { %v583_v3 = vadd.f32 %v582_v0, %v581_v1  ;;  %v655_v43 = vmul.f32 %v1150_v41, %v1150_v41  ;;  %v656_v37 = vmul.f32 %v1180_v47, %v1180_v47  ;;  %v657_v41 = vmul.f32 %v1200_v51, %v1200_v51 }
 0x102   : > { %v684_v61 = vadd.f32 %v683_v55, %v682_v57  ;;  %v695_v15 = vsel %vm530_vm3, %v654_v39, 0.0  ;;  %v612_v23 = vsel %vm530_vm3, %v1125_v36, 0.0  ;;  %v658_v47 = vmul.f32 %v1170_v45, %v1170_v45 }
 0x103   : > { %v585_v5 = vadd.f32 %v584_v2, %v583_v3  ;;  %v602_v2 = vsel %vm530_vm3, %v1065_v24, 0.0  ;;  %v689_v3 = vsel %vm530_vm3, %v651_v35, 0.0  ;;  %v697_v19 = vsel %vm530_vm3, %v655_v43, 0.0 }
 0x104   : > { %v686_v1 = vadd.f32 %v685_v59, %v684_v61  ;;  %v699_v25 = vsel %vm530_vm3, %v656_v37, 0.0  ;;  %v659_v51 = vmul.f32 %v1190_v49, %v1190_v49  ;;  %v701_v54 = vsel %vm530_vm3, %v657_v41, 0.0 }
 0x105   : > { %v587_v9 = vadd.f32 %v586_v4, %v585_v5  ;;  %v616_v57 = vsel %vm530_vm3, %v1115_v34, 0.0  ;;  %v660_v45 = vmul.f32 %v1065_v24, %v1065_v24  ;;  %v661_v49 = vmul.f32 %v1085_v28, %v1085_v28 }
 0x106   : > { %v688_v5 = vadd.f32 %v687_v63, %v686_v1  ;;  %v705_v61 = vsel %vm530_vm3, %v659_v51, 0.0  ;;  %v620_v63 = vsel %vm530_vm3, %v1165_v44, 0.0  ;;  %v662_v24 = vmul.f32 %v1055_v22, %v1055_v22 }
 0x107   : > { %v589_v13 = vadd.f32 %v588_v6, %v587_v9  ;;  %v604_v6 = vsel %vm530_vm3, %v1085_v28, 0.0  ;;  %v663_v28 = vmul.f32 %v1075_v26, %v1075_v26  ;;  %v664_v22 = vmul.f32 %v1105_v32, %v1105_v32 }
 0x108   : > { %v690_v9 = vadd.f32 %v689_v3, %v688_v5  ;;  %v709_v3 = vsel %vm530_vm3, %v661_v49, 0.0  ;;  %v711_v39 = vsel %vm530_vm3, %v662_v24, 0.0  ;;  %v632_v41 = vsel %vm530_vm3, %v1195_v50, 0.0 }
 0x109   : > { %v591_v18 = vadd.f32 %v590_v11, %v589_v13  ;;  %v693_v11 = vsel %vm530_vm3, %v653_v33, 0.0  ;;  %v622_v33 = vsel %vm530_vm3, %v1135_v38, 0.0  ;;  %vm641_vm5 = vcmask 24576  }
 0x10a   : > { %v692_v13 = vadd.f32 %v691_v7, %v690_v9  ;;  %v626_v9 = vsel %vm530_vm3, %v1185_v48, 0.0 }
 0x10b   : > { %v593_v27 = vadd.f32 %v592_v14, %v591_v18  ;;  %v608_v14 = vsel %vm530_vm3, %v1075_v26, 0.0  ;;  %v610_v18 = vsel %vm530_vm3, %v1105_v32, 0.0  ;;  %v665_v26 = vmul.f32 %v1125_v36, %v1125_v36 }
 0x10c   : > { %v694_v17 = vadd.f32 %v693_v11, %v692_v13  ;;  %v666_v32 = vmul.f32 %v1095_v30, %v1095_v30  ;;  %v715_v13 = vsel %vm530_vm3, %v664_v22, 0.0  ;;  %v667_v36 = vmul.f32 %v1115_v34, %v1115_v34  ;;  %v643_v22 = vld [vmem:[#allocation3] sm:$0x1] }
 0x10d   : > { %v595_v56 = vadd.f32 %v594_v21, %v593_v27 }
 0x10e   : > { %v696_v21 = vadd.f32 %v695_v15, %v694_v17  ;;  %v630_v15 = vsel %vm530_vm3, %v1175_v46, 0.0 }
 0x10f   : > { %v597_v60 = vadd.f32 %v596_v31, %v595_v56  ;;  %v614_v31 = vsel %vm530_vm3, %v1095_v30, 0.0  ;;  %v668_v30 = vmul.f32 %v1145_v40, %v1145_v40 }
 0x110   : > { %v698_v53 = vadd.f32 %v697_v19, %v696_v21  ;;  %v719_v19 = vsel %vm530_vm3, %v666_v32, 0.0 }
 0x111   : > { %v599_v0 = vadd.f32 %v598_v58, %v597_v60  ;;  %v703_v58 = vsel %vm530_vm3, %v658_v47, 0.0  ;;  %v618_v60 = vsel %vm530_vm3, %v1145_v40, 0.0  ;;  %v721_v47 = vsel %vm530_vm3, %v667_v36, 0.0 }
 0x112   : > { %v700_v56 = vadd.f32 %v699_v25, %v698_v53  ;;  %v723_v53 = vsel %vm530_vm3, %v668_v30, 0.0  ;;  %v671_v40 = vmul.f32 %v1155_v42, %v1155_v42 }
 0x113   : > { %v601_v4 = vadd.f32 %v600_v62, %v599_v0  ;;  %v707_v0 = vsel %vm530_vm3, %v660_v45, 0.0 }
 0x114   : > { %v702_v59 = vadd.f32 %v701_v54, %v700_v56 }
 0x115   : > { %v603_v8 = vadd.f32 %v602_v2, %v601_v4 }
 0x116   : > { %v704_v29 = vadd.f32 %v703_v58, %v702_v59 }
 0x117   : > { %v605_v12 = vadd.f32 %v604_v6, %v603_v8  ;;  %v624_v6 = vsel %vm530_vm3, %v1155_v42, 0.0  ;;  %v674_v42 = vmul.f32 %v1175_v46, %v1175_v46 }
 0x118   : > { %v706_v2 = vadd.f32 %v705_v61, %v704_v29  ;;  %v570_v29 = vld [vmem:[#allocation2] sm:$0x1] }
 0x119   : > { %v607_v16 = vadd.f32 %v606_v10, %v605_v12  ;;  %v713_v10 = vsel %vm530_vm3, %v663_v28, 0.0  ;;  %v628_v12 = vsel %vm530_vm3, %v1205_v52, 0.0 }
 0x11a   : > { %v708_v5 = vadd.f32 %v707_v0, %v706_v2 }
 0x11b   : > { %v609_v20 = vadd.f32 %v608_v14, %v607_v16  ;;  %v717_v16 = vsel %vm530_vm3, %v665_v26, 0.0 }
 0x11c   : > { %v710_v8 = vadd.f32 %v709_v3, %v708_v5 }
 0x11d   : > { %v611_v27 = vadd.f32 %v610_v18, %v609_v20 }
 0x11e   : > { %v712_v11 = vadd.f32 %v711_v39, %v710_v8 }
 0x11f   : > { %v613_v55 = vadd.f32 %v612_v23, %v611_v27  ;;  %v669_v23 = vmul.f32 %v1165_v44, %v1165_v44  ;;  %v670_v27 = vmul.f32 %v1135_v38, %v1135_v38  ;;  %v672_v44 = vmul.f32 %v1185_v48, %v1185_v48 }
 0x120   : > { %v714_v37 = vadd.f32 %v713_v10, %v712_v11  ;;  %v673_v38 = vmul.f32 %v1205_v52, %v1205_v52  ;;  %v675_v48 = vmul.f32 %v1195_v50, %v1195_v50  ;;  %v735_v52 = vsel %vm530_vm3, %v674_v42, 0.0 }
 0x121   : > { %v615_v35 = vadd.f32 %v614_v31, %v613_v55  ;;  %v725_v54 = vsel %vm530_vm3, %v669_v23, 0.0  ;;  %v731_v49 = vsel %vm530_vm3, %v672_v44, 0.0 }
 0x122   : > { %v716_v18 = vadd.f32 %v715_v13, %v714_v37 }
 0x123   : > { %v617_v62 = vadd.f32 %v616_v57, %v615_v35  ;;  %v727_v57 = vsel %vm530_vm3, %v670_v27, 0.0  ;;  %v729_v35 = vsel %vm530_vm3, %v671_v40, 0.0 }
 0x124   : > { %v718_v21 = vadd.f32 %v717_v16, %v716_v18 }
 0x125   : > { %v619_v1 = vadd.f32 %v618_v60, %v617_v62 }
 0x126   : > { %v720_v25 = vadd.f32 %v719_v19, %v718_v21 }
 0x127   : > { %v621_v4 = vadd.f32 %v620_v63, %v619_v1  ;;  %v733_v63 = vsel %vm530_vm3, %v673_v38, 0.0 }
 0x128   : > { %v722_v51 = vadd.f32 %v721_v47, %v720_v25 }
 0x129   : > { %v623_v7 = vadd.f32 %v622_v33, %v621_v4  ;;  %v737_v33 = vsel %vm530_vm3, %v675_v48, 0.0 }
 0x12a   : > { %v724_v56 = vadd.f32 %v723_v53, %v722_v51 }
 0x12b   : > { %v625_v43 = vadd.f32 %v624_v6, %v623_v7 }
 0x12c   : > { %v726_v58 = vadd.f32 %v725_v54, %v724_v56 }
 0x12d   : > { %v627_v14 = vadd.f32 %v626_v9, %v625_v43 }
 0x12e   : > { %v728_v60 = vadd.f32 %v727_v57, %v726_v58 }
 0x12f   : > { %v629_v17 = vadd.f32 %v628_v12, %v627_v14 }
 0x130   : > { %v730_v62 = vadd.f32 %v729_v35, %v728_v60 }
 0x131   : > { %v631_v20 = vadd.f32 %v630_v15, %v629_v17 }
 0x132   : > { %v732_v0 = vadd.f32 %v731_v49, %v730_v62 }
 0x133   : > { %v633_v34 = vadd.f32 %v632_v41, %v631_v20 }
 0x134   : > { %v734_v2 = vadd.f32 %v733_v63, %v732_v0 }
 0x135   : > { %v634_v31 = vrot.slane %v633_v34, 4 }
 0x136   : > { %v736_v46 = vadd.f32 %v735_v52, %v734_v2 }
 0x137   : > { %v635_v55 = vadd.f32 %v634_v31, %v633_v34 }
 0x138   : > { %v738_v28 = vadd.f32 %v737_v33, %v736_v46 }
 0x139   : > { %v636_v45 = vrot.slane %v635_v55, 2 }
 0x13a   : > { %v739_v3 = vrot.slane %v738_v28, 4 }
 0x13b   : > { %v637_v59 = vadd.f32 %v636_v45, %v635_v55 }
 0x13c   : > { %v740_v4 = vadd.f32 %v739_v3, %v738_v28 }
 0x13d   : > { %v638_v61 = vrot.slane %v637_v59, 1 }
 0x13e   : > { %v741_v5 = vrot.slane %v740_v4, 2 }
 0x13f   : > { %v639_v24 = vadd.f32 %v638_v61, %v637_v59 }
 0x140   : > { %v742_v6 = vadd.f32 %v741_v5, %v740_v4 }
 0x141   : > { %v640_v1 = vadd.f32 %v639_v24, %v570_v29 }
 0x142   : > { %v743_v50 = vrot.slane %v742_v6, 1 }
 0x143   : > { %642 = vst.msk [vmem:[#allocation2] sm:$0x1] %vm641_vm5, %v640_v1 }
 0x144   : > { %v744_v39 = vadd.f32 %v743_v50, %v742_v6  ;;  %750 = sbr.rel (%p871_p5) target bundleno = 365 (0x16d), region = 40 }
 0x146   : > { %v745_v7 = vadd.f32 %v744_v39, %v643_v22 }
 0x148   : > { %746 = vst.msk [vmem:[#allocation3] sm:$0x1] %vm641_vm5, %v745_v7 }
 0x149   : > { %v758_v13 = vld [vmem:[%s1393_s2] sm:$0x1]  ;;  %v763_v15 = vld [vmem:[%s1393_s2 + $0x1] sm:$0x1] }
 0x14a   : > { %v751_v8 = vld [vmem:[#allocation2] sm:$0x1] }
 0x14b   : > { %v752_v26 = vmul.f32 0.001953125, %v751_v8 }
 0x14d   : > { %v755_v43 = vmul.f32 %v752_v26, %v752_v26 }
 0x14f   : > { %v753_v9 = vld [vmem:[#allocation3] sm:$0x1] }
 0x150   : > { %v754_v10 = vmul.f32 0.001953125, %v753_v9 }
 0x152   : > { %v756_v11 = vsub.f32 %v754_v10, %v755_v43 }
 0x154   : > { %v757_v12 = vmax.f32 %v756_v11, 0.0 }
 0x156   : > { %v759_v32 = vadd.f32 1e-05, %v757_v12 }
 0x158   : > { %953 = vrsqrt.f32 %v759_v32 }
 0x165   : > { %v954_v14 = vpop.eup %953 }
 0x166   : > { %v761_v37 = vmul.f32 %v954_v14, %v758_v13 }
 0x168   : > { %762 = vst.msk [vmem:[%s1395_s4] sm:$0x1] %vm641_vm5, %v761_v37  ;;  %v764_v36 = vmul.f32 %v761_v37, %v752_v26 }
 0x16a   : > { %v765_v16 = vsub.f32 %v763_v15, %v764_v36 }
 0x16c   : > { %766 = vst.msk [vmem:[%s1395_s4 + $0x1] sm:$0x1] %vm641_vm5, %v765_v16 }
 0x16d PF: > { %s15_s15 = sadd.s32 1, %s961_s15  }
 0x16e   : > { %p12_p6 = scmp.ge.s32.totalorder %s15_s15, 4  }
 0x170   :  { %14 = sbr.rel (!%p12_p6) target bundleno = 1 (0x1), region = 78 }

// kernel: closed_call.261
= control target key start
LH: loop header
LB: loop body
LE: loop exit
PB: predicated region body
PF: predicated region fallthrough
CT: control target
= control target key end

     0   :  { %v76_v12 = vmov 0.0   ;;  %s129_s0 = inlined_call_operand.vmem [shape: f32[16,128], index: 0, kind: input, shape index: {}]   ;;  %s130_s1 = inlined_call_operand.vmem [shape: f32[2,128], index: 1, kind: input, shape index: {}]   ;;  %s131_s2 = inlined_call_operand.vmem [shape: f32[16,128], index: 2, kind: input, shape index: {}, may-alias: {2,4}]   ;;  %s132_s4 = inlined_call_operand.vmem [shape: f32[16,128], index: 4, kind: output, shape index: {1}, may-alias: {2,4}]   ;;  %s133_s3 = inlined_call_operand.vmem [shape: bf16[16,128], index: 3, kind: output, shape index: {0}]  }
   0x1   :  { %v16_v0 = vld [vmem:[%s131_s2] sm:$0xff]  ;;  %v17_v2 = vld [vmem:[%s131_s2 + $0x8] sm:$0xff] }
   0x2   :  { %v18_v1 = vld [vmem:[%s129_s0] sm:$0xff]  ;;  %v19_v3 = vld [vmem:[%s129_s0 + $0x8] sm:$0xff] }
   0x3   :  { %v64_v4 = vld [vmem:[%s130_s1] ss:$0 sm:$0xff]  ;;  %v65_v7 = vld [vmem:[%s130_s1 + $0x1] ss:$0 sm:$0xff] }
   0x4   :  { %v25_v5 = vmul.f32 %v64_v4, %v18_v1  ;;  %v26_v6 = vmul.f32 %v64_v4, %v19_v3 }
   0x6   :  { %v27_v8 = vadd.f32 %v25_v5, %v16_v0  ;;  %v28_v9 = vadd.f32 %v26_v6, %v17_v2 }
   0x8   :  { %v34_v10 = vadd.f32 %v65_v7, %v27_v8  ;;  %v35_v11 = vadd.f32 %v65_v7, %v28_v9 }
   0xa   :  { %vm36_vm0 = vcmp.ge.f32.partialorder %v34_v10, 1.0  ;;  %vm37_vm1 = vcmp.ge.f32.partialorder %v35_v11, 1.0 }
   0xb   :  { %v66_v13 = vsel %vm36_vm0, 1.0, %v76_v12  ;;  %v67_v14 = vsel %vm37_vm1, 1.0, %v76_v12  ;;  %v52_v15 = vsel %vm36_vm0, 0.0, %v34_v10  ;;  %v53_v16 = vsel %vm37_vm1, 0.0, %v35_v11 }
   0xc   :  { %v73_v17 = vpack.c.bf16 %v67_v14, %v66_v13  ;;  %54 = vst [vmem:[%s132_s4] sm:$0xff] %v52_v15  ;;  %55 = vst [vmem:[%s132_s4 + $0x8] sm:$0xff] %v53_v16 }
   0xe   :  { %74 = vst [vmem:[%s133_s3] sm:$0xff] %v73_v17  }

// kernel: closed_call.260
= control target key start
LH: loop header
LB: loop body
LE: loop exit
PB: predicated region body
PF: predicated region fallthrough
CT: control target
= control target key end

     0   :  { %s1013_s15 = smov 0   ;;  %s1417_s0 = inlined_call_operand.vmem [shape: bf16[512,27], index: 0, kind: input, shape index: {}]   ;;  %s1418_s1 = inlined_call_operand.vmem [shape: bf16[27,4], index: 1, kind: input, shape index: {}]   ;;  %s1419_s2 = inlined_call_operand.vmem [shape: f32[2,4], index: 2, kind: input, shape index: {}]   ;;  %s1420_s3 = inlined_call_operand.vmem [shape: f32[512,4], index: 3, kind: output, shape index: {0}]   ;;  %s1421_s4 = inlined_call_operand.vmem [shape: f32[2,4], index: 4, kind: output, shape index: {1}]  }
   0x1 LB: > { %s1019_s16 = sadd.s32 4294967295, %s984_s15   ;;  %p847_p0 = scmp.ge.s32.totalorder %s984_s15, 1  ;;  %s984_s15 = sphi %s1013_s15, %s15_s15  }
   0x2   : > { %p161_p1 = scmp.lt.s32.totalorder %s984_s15, 3 }
   0x4   : > { %p162_p2 = pnand %p847_p0, %p161_p1 }
   0x5   : > { %s848_s19 = sshll.u32 (!%p162_p2), %s1019_s16, 5  ;;  %p886_p4 = scmp.ne.s32.totalorder (!%p162_p2), %s1019_s16, 0 }
   0x6   : > { %165 = sbr.rel (%p162_p2) target bundleno = 369 (0x171), region = 32  ;;  %p188_p3 = scmp.lt.s32.totalorder (!%p162_p2), %s848_s19, 63 }
   0xb   : > { %v958_v0 = vld [vmem:[%s1418_s1 + $0x8] sm:$0x3f]   ;;  %vm376_vm0 = vcmask 1044480   ;;  %vm377_vm1 = vcmask 1045504   ;;  %v986_v1 = vmov 65535   ;;  %v959_v5 = vld [vmem:[%s1418_s1] sm:$0xff]  }
   0xc   : > { %v378_v2 = vsel %vm376_vm0, 4294967295, %v986_v1  ;;  %s1423_s19 = smov (!%p188_p3, %s848_s19), 63  ;;  %vm327_vm2 = vcmask 220160   ;;  %vm544_vm3 = vcmask 31744  }
   0xd   : > { %v379_v3 = vsel %vm377_vm1, %v378_v2, 0  ;;  %s849_s22 = sshll.u32 %s1423_s19, 2  ;;  %s851_s26 = sshll.u32 %s1423_s19, 3 }
   0xe   : > { %v381_v4 = vand.u32 %v958_v0, %v379_v3  ;;  %s1036_s25 = scalar_lea.vmem %s1417_s0, %s849_s22  ;;  %s1074_s29 = scalar_lea.vmem %s1420_s3, %s851_s26 }
   0xf   : > { %v960_v6 = vld [vmem:[%s1036_s25] sm:$0xff]   ;;  %v962_v8 = vld [vmem:[%s1036_s25 + $0x8] sm:$0xff]   ;;  %v964_v10 = vld [vmem:[%s1036_s25 + $0x10] sm:$0xff]  }
  0x10   : > { %908 = vmatprep.subr.bf16.mxu0 %v381_v4  ;;  %944 = vmatprep.subr.bf16.mxu1 %v381_v4  ;;  %v961_v7 = vld [vmem:[%s1036_s25 + $0x40] sm:$0xff]   ;;  %v963_v9 = vld [vmem:[%s1036_s25 + $0x48] sm:$0xff]   ;;  %v965_v11 = vld [vmem:[%s1036_s25 + $0x50] sm:$0xff]  }
  0x11   : > { %909 = vmatpush3.bf16.msra.mxu0 %v381_v4  ;;  %946 = vmatpush3.bf16.msra.mxu1 %v381_v4  ;;  %v966_v12 = vld [vmem:[%s1036_s25 + $0x18] sm:$0xff]   ;;  %v968_v14 = vld [vmem:[%s1036_s25 + $0x20] sm:$0xff]   ;;  %v970_v16 = vld [vmem:[%s1036_s25 + $0x28] sm:$0xff]  }
  0x12   : > { %910 = vmatprep.subr.bf16.mxu0 %v959_v5  ;;  %945 = vmatprep.subr.bf16.mxu1 %v959_v5  ;;  %v967_v13 = vld [vmem:[%s1036_s25 + $0x58] sm:$0xff]   ;;  %v969_v15 = vld [vmem:[%s1036_s25 + $0x60] sm:$0xff]   ;;  %v971_v17 = vld [vmem:[%s1036_s25 + $0x68] sm:$0xff]  }
  0x13   : > { %912 = vmatprep.mubr.msk.bf16.mxu0 %vm327_vm2, %v960_v6  ;;  %928 = vmatprep.mubr.msk.bf16.mxu1 %vm327_vm2, %v961_v7  ;;  %v972_v18 = vld [vmem:[%s1036_s25 + $0x30] sm:$0xff]   ;;  %v974_v20 = vld [vmem:[%s1036_s25 + $0x38] sm:$0xff]  }
  0x14   : > { %v973_v19 = vld [vmem:[%s1036_s25 + $0x70] sm:$0xff]   ;;  %v975_v21 = vld [vmem:[%s1036_s25 + $0x78] sm:$0xff]  }
  0x15   : > { %911 = vmatpush3.bf16.msra.mxu0 %v959_v5  ;;  %947 = vmatpush3.bf16.msra.mxu1 %v959_v5 }
  0x18   : > { %913 = vmatmul.mubr.msk.bf16.vlgmr.msra.gmra.mxu0 %vm327_vm2, %v962_v8  ;;  %929 = vmatmul.mubr.msk.bf16.vlgmr.msra.gmra.mxu1 %vm327_vm2, %v963_v9 }
  0x19   : > { %916 = vmatprep.mubr.msk.bf16.mxu0 %vm327_vm2, %v964_v10  ;;  %932 = vmatprep.mubr.msk.bf16.mxu1 %vm327_vm2, %v965_v11 }
  0x20   : > { %917 = vmatmul.mubr.msk.bf16.gmra.mxu0 %vm327_vm2, %v966_v12  ;;  %933 = vmatmul.mubr.msk.bf16.gmra.mxu1 %vm327_vm2, %v967_v13 }
  0x21   : > { %920 = vmatprep.mubr.msk.bf16.mxu0 %vm327_vm2, %v968_v14  ;;  %936 = vmatprep.mubr.msk.bf16.mxu1 %vm327_vm2, %v969_v15 }
  0x28   : > { %921 = vmatmul.mubr.msk.bf16.gmra.mxu0 %vm327_vm2, %v970_v16  ;;  %937 = vmatmul.mubr.msk.bf16.gmra.mxu1 %vm327_vm2, %v971_v17 }
  0x29   : > { %924 = vmatprep.mubr.msk.bf16.mxu0 %vm327_vm2, %v972_v18  ;;  %940 = vmatprep.mubr.msk.bf16.mxu1 %vm327_vm2, %v973_v19 }
  0x30   : > { %925 = vmatmul.mubr.msk.bf16.gmra.mxu0 %vm327_vm2, %v974_v20  ;;  %941 = vmatmul.mubr.msk.bf16.gmra.mxu1 %vm327_vm2, %v975_v21 }
  0xd8   : > { %v1076_v22 = vpop.f32.mrf.mxu0  ;;  %v1078_v23 = vpop.f32.mrf.mxu1 }
  0xd9   : > { %547 = vst.msk [vmem:[%s1074_s29 + $0x10] sm:$0xff] %vm544_vm3, %v1076_v22  ;;  %563 = vst.msk [vmem:[%s1074_s29 + $0x90] sm:$0xff] %vm544_vm3, %v1078_v23 }
  0xda   : > { %v1086_v24 = vpop.f32.mrf.mxu0  ;;  %v1088_v25 = vpop.f32.mrf.mxu1 }
  0xdb   : > { %545 = vst.msk [vmem:[%s1074_s29] sm:$0xff] %vm544_vm3, %v1086_v24  ;;  %561 = vst.msk [vmem:[%s1074_s29 + $0x80] sm:$0xff] %vm544_vm3, %v1088_v25 }
  0xdc   : > { %v1096_v26 = vpop.f32.mrf.mxu0  ;;  %v1098_v27 = vpop.f32.mrf.mxu1 }
  0xdd   : > { %548 = vst.msk [vmem:[%s1074_s29 + $0x18] sm:$0xff] %vm544_vm3, %v1096_v26  ;;  %564 = vst.msk [vmem:[%s1074_s29 + $0x98] sm:$0xff] %vm544_vm3, %v1098_v27 }
  0xde   : > { %v1106_v28 = vpop.f32.mrf.mxu0  ;;  %v1108_v29 = vpop.f32.mrf.mxu1 }
  0xdf   : > { %546 = vst.msk [vmem:[%s1074_s29 + $0x8] sm:$0xff] %vm544_vm3, %v1106_v28  ;;  %562 = vst.msk [vmem:[%s1074_s29 + $0x88] sm:$0xff] %vm544_vm3, %v1108_v29 }
  0xe0   : > { %v1116_v30 = vpop.f32.mrf.mxu0  ;;  %v1118_v31 = vpop.f32.mrf.mxu1 }
  0xe1   : > { %551 = vst.msk [vmem:[%s1074_s29 + $0x30] sm:$0xff] %vm544_vm3, %v1116_v30  ;;  %567 = vst.msk [vmem:[%s1074_s29 + $0xb0] sm:$0xff] %vm544_vm3, %v1118_v31 }
  0xe2   : > { %v1126_v32 = vpop.f32.mrf.mxu0  ;;  %v1128_v33 = vpop.f32.mrf.mxu1 }
  0xe3   : > { %549 = vst.msk [vmem:[%s1074_s29 + $0x20] sm:$0xff] %vm544_vm3, %v1126_v32  ;;  %565 = vst.msk [vmem:[%s1074_s29 + $0xa0] sm:$0xff] %vm544_vm3, %v1128_v33 }
  0xe4   : > { %v1136_v34 = vpop.f32.mrf.mxu0  ;;  %v1138_v35 = vpop.f32.mrf.mxu1 }
  0xe5   : > { %552 = vst.msk [vmem:[%s1074_s29 + $0x38] sm:$0xff] %vm544_vm3, %v1136_v34  ;;  %568 = vst.msk [vmem:[%s1074_s29 + $0xb8] sm:$0xff] %vm544_vm3, %v1138_v35 }
  0xe6   : > { %v1146_v36 = vpop.f32.mrf.mxu0  ;;  %v1148_v37 = vpop.f32.mrf.mxu1 }
  0xe7   : > { %550 = vst.msk [vmem:[%s1074_s29 + $0x28] sm:$0xff] %vm544_vm3, %v1146_v36  ;;  %566 = vst.msk [vmem:[%s1074_s29 + $0xa8] sm:$0xff] %vm544_vm3, %v1148_v37 }
  0xe8   : > { %v1156_v38 = vpop.f32.mrf.mxu0  ;;  %v1158_v39 = vpop.f32.mrf.mxu1 }
  0xe9   : > { %555 = vst.msk [vmem:[%s1074_s29 + $0x50] sm:$0xff] %vm544_vm3, %v1156_v38  ;;  %571 = vst.msk [vmem:[%s1074_s29 + $0xd0] sm:$0xff] %vm544_vm3, %v1158_v39 }
  0xea   : > { %v1166_v40 = vpop.f32.mrf.mxu0  ;;  %v1168_v41 = vpop.f32.mrf.mxu1 }
  0xeb   : > { %553 = vst.msk [vmem:[%s1074_s29 + $0x40] sm:$0xff] %vm544_vm3, %v1166_v40  ;;  %569 = vst.msk [vmem:[%s1074_s29 + $0xc0] sm:$0xff] %vm544_vm3, %v1168_v41 }
  0xec   : > { %v1176_v42 = vpop.f32.mrf.mxu0  ;;  %v1178_v43 = vpop.f32.mrf.mxu1 }
  0xed   : > { %556 = vst.msk [vmem:[%s1074_s29 + $0x58] sm:$0xff] %vm544_vm3, %v1176_v42  ;;  %572 = vst.msk [vmem:[%s1074_s29 + $0xd8] sm:$0xff] %vm544_vm3, %v1178_v43 }
  0xee   : > { %v1186_v44 = vpop.f32.mrf.mxu0  ;;  %v1188_v45 = vpop.f32.mrf.mxu1 }
  0xef   : > { %554 = vst.msk [vmem:[%s1074_s29 + $0x48] sm:$0xff] %vm544_vm3, %v1186_v44  ;;  %570 = vst.msk [vmem:[%s1074_s29 + $0xc8] sm:$0xff] %vm544_vm3, %v1188_v45 }
  0xf0   : > { %v1196_v46 = vpop.f32.mrf.mxu0  ;;  %v1198_v47 = vpop.f32.mrf.mxu1 }
  0xf1   : > { %559 = vst.msk [vmem:[%s1074_s29 + $0x70] sm:$0xff] %vm544_vm3, %v1196_v46  ;;  %575 = vst.msk [vmem:[%s1074_s29 + $0xf0] sm:$0xff] %vm544_vm3, %v1198_v47 }
  0xf2   : > { %v1206_v48 = vpop.f32.mrf.mxu0  ;;  %v1208_v49 = vpop.f32.mrf.mxu1 }
  0xf3   : > { %557 = vst.msk [vmem:[%s1074_s29 + $0x60] sm:$0xff] %vm544_vm3, %v1206_v48  ;;  %573 = vst.msk [vmem:[%s1074_s29 + $0xe0] sm:$0xff] %vm544_vm3, %v1208_v49  ;;  %580 = sbr.rel (%p886_p4) target bundleno = 250 (0xfa), region = 36 }
  0xf4   : > { %v1216_v50 = vpop.f32.mrf.mxu0  ;;  %v1218_v51 = vpop.f32.mrf.mxu1 }
  0xf5   : > { %560 = vst.msk [vmem:[%s1074_s29 + $0x78] sm:$0xff] %vm544_vm3, %v1216_v50  ;;  %576 = vst.msk [vmem:[%s1074_s29 + $0xf8] sm:$0xff] %vm544_vm3, %v1218_v51 }
  0xf6   : > { %v1226_v52 = vpop.f32.mrf.mxu0  ;;  %v1228_v53 = vpop.f32.mrf.mxu1 }
  0xf7   : > { %558 = vst.msk [vmem:[%s1074_s29 + $0x68] sm:$0xff] %vm544_vm3, %v1226_v52  ;;  %574 = vst.msk [vmem:[%s1074_s29 + $0xe8] sm:$0xff] %vm544_vm3, %v1228_v53 }
  0xf8   : > { %vm581_vm4 = vcmask 24576   ;;  %v987_v54 = vmov 0.0  }
  0xf9   : > { %582 = vst.msk [vmem:[#allocation2] sm:$0x1] %vm581_vm4, %v987_v54  ;;  %583 = vst.msk [vmem:[#allocation3] sm:$0x1] %vm581_vm4, %v987_v54 }
  0xfa PF: > { %v585_v55 = vsel %vm544_vm3, %v1086_v24, 0.0  ;;  %v586_v56 = vsel %vm544_vm3, %v1106_v28, 0.0  ;;  %v588_v57 = vsel %vm544_vm3, %v1076_v22, 0.0  ;;  %v590_v59 = vsel %vm544_vm3, %v1096_v26, 0.0  ;;  %p887_p5 = scmp.ne.s32.totalorder %s1019_s16, 1 }
  0xfb   : > { %v587_v58 = vadd.f32 %v586_v56, %v585_v55  ;;  %v592_v61 = vsel %vm544_vm3, %v1126_v32, 0.0  ;;  %v594_v63 = vsel %vm544_vm3, %v1146_v36, 0.0  ;;  %v596_v1 = vsel %vm544_vm3, %v1116_v30, 0.0 }
  0xfc   : > { %v598_v3 = vsel %vm544_vm3, %v1136_v34, 0.0  ;;  %v600_v5 = vsel %vm544_vm3, %v1166_v40, 0.0  ;;  %v602_v7 = vsel %vm544_vm3, %v1186_v44, 0.0  ;;  %v658_v8 = vmul.f32 %v1086_v24, %v1086_v24 }
  0xfd   : > { %v589_v60 = vadd.f32 %v588_v57, %v587_v58  ;;  %v659_v9 = vmul.f32 %v1106_v28, %v1106_v28  ;;  %v660_v11 = vmul.f32 %v1076_v22, %v1076_v22  ;;  %v604_v12 = vsel %vm544_vm3, %v1156_v38, 0.0 }
  0xfe   : > { %v661_v13 = vmul.f32 %v1096_v26, %v1096_v26  ;;  %v606_v15 = vsel %vm544_vm3, %v1176_v42, 0.0  ;;  %v662_v16 = vmul.f32 %v1126_v32, %v1126_v32  ;;  %v690_v17 = vsel %vm544_vm3, %v658_v8, 0.0 }
  0xff   : > { %v591_v62 = vadd.f32 %v590_v59, %v589_v60  ;;  %v691_v18 = vsel %vm544_vm3, %v659_v9, 0.0  ;;  %v693_v21 = vsel %vm544_vm3, %v660_v11, 0.0  ;;  %v608_v22 = vsel %vm544_vm3, %v1206_v48, 0.0 }
 0x100   : > { %v692_v20 = vadd.f32 %v691_v18, %v690_v17  ;;  %v663_v24 = vmul.f32 %v1146_v36, %v1146_v36  ;;  %v695_v26 = vsel %vm544_vm3, %v661_v13, 0.0  ;;  %v610_v32 = vsel %vm544_vm3, %v1226_v52, 0.0 }
 0x101   : > { %v593_v0 = vadd.f32 %v592_v61, %v591_v62  ;;  %v664_v55 = vmul.f32 %v1116_v30, %v1116_v30  ;;  %v697_v56 = vsel %vm544_vm3, %v662_v16, 0.0  ;;  %v612_v59 = vsel %vm544_vm3, %v1196_v46, 0.0 }
 0x102   : > { %v694_v54 = vadd.f32 %v693_v21, %v692_v20  ;;  %v665_v36 = vmul.f32 %v1136_v34, %v1136_v34  ;;  %v699_v60 = vsel %vm544_vm3, %v663_v24, 0.0  ;;  %v666_v30 = vmul.f32 %v1166_v40, %v1166_v40 }
 0x103   : > { %v595_v2 = vadd.f32 %v594_v63, %v593_v0  ;;  %v614_v63 = vsel %vm544_vm3, %v1216_v50, 0.0  ;;  %v701_v0 = vsel %vm544_vm3, %v664_v55, 0.0  ;;  %v667_v34 = vmul.f32 %v1186_v44, %v1186_v44 }
 0x104   : > { %v696_v58 = vadd.f32 %v695_v26, %v694_v54  ;;  %v668_v40 = vmul.f32 %v1156_v38, %v1156_v38  ;;  %v705_v8 = vsel %vm544_vm3, %v666_v30, 0.0  ;;  %v620_v11 = vsel %vm544_vm3, %v1078_v23, 0.0 }
 0x105   : > { %v597_v4 = vadd.f32 %v596_v1, %v595_v2  ;;  %v669_v44 = vmul.f32 %v1176_v42, %v1176_v42  ;;  %v670_v38 = vmul.f32 %v1206_v48, %v1206_v48  ;;  %v671_v42 = vmul.f32 %v1226_v52, %v1226_v52 }
 0x106   : > { %v698_v62 = vadd.f32 %v697_v56, %v696_v58  ;;  %v709_v16 = vsel %vm544_vm3, %v668_v40, 0.0  ;;  %v626_v24 = vsel %vm544_vm3, %v1148_v37, 0.0  ;;  %v672_v48 = vmul.f32 %v1196_v46, %v1196_v46 }
 0x107   : > { %v599_v6 = vadd.f32 %v598_v3, %v597_v4  ;;  %v616_v3 = vsel %vm544_vm3, %v1088_v25, 0.0  ;;  %v703_v4 = vsel %vm544_vm3, %v665_v36, 0.0  ;;  %v711_v20 = vsel %vm544_vm3, %v669_v44, 0.0 }
 0x108   : > { %v700_v2 = vadd.f32 %v699_v60, %v698_v62  ;;  %v713_v26 = vsel %vm544_vm3, %v670_v38, 0.0  ;;  %v673_v52 = vmul.f32 %v1216_v50, %v1216_v50  ;;  %v715_v55 = vsel %vm544_vm3, %v671_v42, 0.0 }
 0x109   : > { %v601_v10 = vadd.f32 %v600_v5, %v599_v6  ;;  %v630_v58 = vsel %vm544_vm3, %v1138_v35, 0.0  ;;  %v674_v46 = vmul.f32 %v1088_v25, %v1088_v25  ;;  %v675_v50 = vmul.f32 %v1108_v29, %v1108_v29 }
 0x10a   : > { %v702_v6 = vadd.f32 %v701_v0, %v700_v2  ;;  %v719_v62 = vsel %vm544_vm3, %v673_v52, 0.0  ;;  %v634_v0 = vsel %vm544_vm3, %v1188_v45, 0.0  ;;  %v676_v25 = vmul.f32 %v1078_v23, %v1078_v23 }
 0x10b   : > { %v603_v14 = vadd.f32 %v602_v7, %v601_v10  ;;  %v618_v7 = vsel %vm544_vm3, %v1108_v29, 0.0  ;;  %v677_v29 = vmul.f32 %v1098_v27, %v1098_v27  ;;  %v678_v23 = vmul.f32 %v1128_v33, %v1128_v33 }
 0x10c   : > { %v704_v10 = vadd.f32 %v703_v4, %v702_v6  ;;  %v723_v4 = vsel %vm544_vm3, %v675_v50, 0.0  ;;  %v725_v40 = vsel %vm544_vm3, %v676_v25, 0.0  ;;  %v646_v42 = vsel %vm544_vm3, %v1218_v51, 0.0 }
 0x10d   : > { %v605_v19 = vadd.f32 %v604_v12, %v603_v14  ;;  %v707_v12 = vsel %vm544_vm3, %v667_v34, 0.0  ;;  %v636_v34 = vsel %vm544_vm3, %v1158_v39, 0.0  ;;  %vm655_vm5 = vcmask 24576  }
 0x10e   : > { %v706_v14 = vadd.f32 %v705_v8, %v704_v10  ;;  %v640_v10 = vsel %vm544_vm3, %v1208_v49, 0.0 }
 0x10f   : > { %v607_v28 = vadd.f32 %v606_v15, %v605_v19  ;;  %v622_v15 = vsel %vm544_vm3, %v1098_v27, 0.0  ;;  %v624_v19 = vsel %vm544_vm3, %v1128_v33, 0.0  ;;  %v679_v27 = vmul.f32 %v1148_v37, %v1148_v37 }
 0x110   : > { %v708_v18 = vadd.f32 %v707_v12, %v706_v14  ;;  %v680_v33 = vmul.f32 %v1118_v31, %v1118_v31  ;;  %v729_v14 = vsel %vm544_vm3, %v678_v23, 0.0  ;;  %v681_v37 = vmul.f32 %v1138_v35, %v1138_v35  ;;  %v657_v23 = vld [vmem:[#allocation3] sm:$0x1] }
 0x111   : > { %v609_v57 = vadd.f32 %v608_v22, %v607_v28 }
 0x112   : > { %v710_v22 = vadd.f32 %v709_v16, %v708_v18  ;;  %v644_v16 = vsel %vm544_vm3, %v1198_v47, 0.0 }
 0x113   : > { %v611_v61 = vadd.f32 %v610_v32, %v609_v57  ;;  %v628_v32 = vsel %vm544_vm3, %v1118_v31, 0.0  ;;  %v682_v31 = vmul.f32 %v1168_v41, %v1168_v41 }
 0x114   : > { %v712_v54 = vadd.f32 %v711_v20, %v710_v22  ;;  %v733_v20 = vsel %vm544_vm3, %v680_v33, 0.0 }
 0x115   : > { %v613_v1 = vadd.f32 %v612_v59, %v611_v61  ;;  %v717_v59 = vsel %vm544_vm3, %v672_v48, 0.0  ;;  %v632_v61 = vsel %vm544_vm3, %v1168_v41, 0.0  ;;  %v735_v48 = vsel %vm544_vm3, %v681_v37, 0.0 }
 0x116   : > { %v714_v57 = vadd.f32 %v713_v26, %v712_v54  ;;  %v737_v54 = vsel %vm544_vm3, %v682_v31, 0.0  ;;  %v685_v41 = vmul.f32 %v1178_v43, %v1178_v43 }
 0x117   : > { %v615_v5 = vadd.f32 %v614_v63, %v613_v1  ;;  %v721_v1 = vsel %vm544_vm3, %v674_v46, 0.0 }
 0x118   : > { %v716_v60 = vadd.f32 %v715_v55, %v714_v57 }
 0x119   : > { %v617_v9 = vadd.f32 %v616_v3, %v615_v5 }
 0x11a   : > { %v718_v30 = vadd.f32 %v717_v59, %v716_v60 }
 0x11b   : > { %v619_v13 = vadd.f32 %v618_v7, %v617_v9  ;;  %v638_v7 = vsel %vm544_vm3, %v1178_v43, 0.0  ;;  %v688_v43 = vmul.f32 %v1198_v47, %v1198_v47 }
 0x11c   : > { %v720_v3 = vadd.f32 %v719_v62, %v718_v30  ;;  %v584_v30 = vld [vmem:[#allocation2] sm:$0x1] }
 0x11d   : > { %v621_v17 = vadd.f32 %v620_v11, %v619_v13  ;;  %v727_v11 = vsel %vm544_vm3, %v677_v29, 0.0  ;;  %v642_v13 = vsel %vm544_vm3, %v1228_v53, 0.0 }
 0x11e   : > { %v722_v6 = vadd.f32 %v721_v1, %v720_v3 }
 0x11f   : > { %v623_v21 = vadd.f32 %v622_v15, %v621_v17  ;;  %v731_v17 = vsel %vm544_vm3, %v679_v27, 0.0 }
 0x120   : > { %v724_v9 = vadd.f32 %v723_v4, %v722_v6 }
 0x121   : > { %v625_v28 = vadd.f32 %v624_v19, %v623_v21 }
 0x122   : > { %v726_v12 = vadd.f32 %v725_v40, %v724_v9 }
 0x123   : > { %v627_v56 = vadd.f32 %v626_v24, %v625_v28  ;;  %v683_v24 = vmul.f32 %v1188_v45, %v1188_v45  ;;  %v684_v28 = vmul.f32 %v1158_v39, %v1158_v39  ;;  %v686_v45 = vmul.f32 %v1208_v49, %v1208_v49 }
 0x124   : > { %v728_v38 = vadd.f32 %v727_v11, %v726_v12  ;;  %v687_v39 = vmul.f32 %v1228_v53, %v1228_v53  ;;  %v689_v49 = vmul.f32 %v1218_v51, %v1218_v51  ;;  %v749_v53 = vsel %vm544_vm3, %v688_v43, 0.0 }
 0x125   : > { %v629_v36 = vadd.f32 %v628_v32, %v627_v56  ;;  %v739_v55 = vsel %vm544_vm3, %v683_v24, 0.0  ;;  %v745_v50 = vsel %vm544_vm3, %v686_v45, 0.0 }
 0x126   : > { %v730_v19 = vadd.f32 %v729_v14, %v728_v38 }
 0x127   : > { %v631_v63 = vadd.f32 %v630_v58, %v629_v36  ;;  %v741_v58 = vsel %vm544_vm3, %v684_v28, 0.0  ;;  %v743_v36 = vsel %vm544_vm3, %v685_v41, 0.0 }
 0x128   : > { %v732_v22 = vadd.f32 %v731_v17, %v730_v19 }
 0x129   : > { %v633_v2 = vadd.f32 %v632_v61, %v631_v63 }
 0x12a   : > { %v734_v26 = vadd.f32 %v733_v20, %v732_v22 }
 0x12b   : > { %v635_v5 = vadd.f32 %v634_v0, %v633_v2  ;;  %v747_v0 = vsel %vm544_vm3, %v687_v39, 0.0 }
 0x12c   : > { %v736_v52 = vadd.f32 %v735_v48, %v734_v26 }
 0x12d   : > { %v637_v8 = vadd.f32 %v636_v34, %v635_v5  ;;  %v751_v34 = vsel %vm544_vm3, %v689_v49, 0.0 }
 0x12e   : > { %v738_v57 = vadd.f32 %v737_v54, %v736_v52 }
 0x12f   : > { %v639_v44 = vadd.f32 %v638_v7, %v637_v8 }
 0x130   : > { %v740_v59 = vadd.f32 %v739_v55, %v738_v57 }
 0x131   : > { %v641_v15 = vadd.f32 %v640_v10, %v639_v44 }
 0x132   : > { %v742_v61 = vadd.f32 %v741_v58, %v740_v59 }
 0x133   : > { %v643_v18 = vadd.f32 %v642_v13, %v641_v15 }
 0x134   : > { %v744_v63 = vadd.f32 %v743_v36, %v742_v61 }
 0x135   : > { %v645_v21 = vadd.f32 %v644_v16, %v643_v18 }
 0x136   : > { %v746_v1 = vadd.f32 %v745_v50, %v744_v63 }
 0x137   : > { %v647_v35 = vadd.f32 %v646_v42, %v645_v21 }
 0x138   : > { %v748_v3 = vadd.f32 %v747_v0, %v746_v1 }
 0x139   : > { %v648_v32 = vrot.slane %v647_v35, 4 }
 0x13a   : > { %v750_v47 = vadd.f32 %v749_v53, %v748_v3 }
 0x13b   : > { %v649_v56 = vadd.f32 %v648_v32, %v647_v35 }
 0x13c   : > { %v752_v29 = vadd.f32 %v751_v34, %v750_v47 }
 0x13d   : > { %v650_v46 = vrot.slane %v649_v56, 2 }
 0x13e   : > { %v753_v4 = vrot.slane %v752_v29, 4 }
 0x13f   : > { %v651_v60 = vadd.f32 %v650_v46, %v649_v56 }
 0x140   : > { %v754_v5 = vadd.f32 %v753_v4, %v752_v29 }
 0x141   : > { %v652_v62 = vrot.slane %v651_v60, 1 }
 0x142   : > { %v755_v6 = vrot.slane %v754_v5, 2 }
 0x143   : > { %v653_v25 = vadd.f32 %v652_v62, %v651_v60 }
 0x144   : > { %v756_v7 = vadd.f32 %v755_v6, %v754_v5 }
 0x145   : > { %v654_v2 = vadd.f32 %v653_v25, %v584_v30 }
 0x146   : > { %v757_v51 = vrot.slane %v756_v7, 1 }
 0x147   : > { %656 = vst.msk [vmem:[#allocation2] sm:$0x1] %vm655_vm5, %v654_v2 }
 0x148   : > { %v758_v40 = vadd.f32 %v757_v51, %v756_v7  ;;  %764 = sbr.rel (%p887_p5) target bundleno = 369 (0x171), region = 40 }
 0x14a   : > { %v759_v8 = vadd.f32 %v758_v40, %v657_v23 }
 0x14c   : > { %760 = vst.msk [vmem:[#allocation3] sm:$0x1] %vm655_vm5, %v759_v8 }
 0x14d   : > { %v772_v14 = vld [vmem:[%s1419_s2] sm:$0x1]  ;;  %v777_v16 = vld [vmem:[%s1419_s2 + $0x1] sm:$0x1] }
 0x14e   : > { %v765_v9 = vld [vmem:[#allocation2] sm:$0x1] }
 0x14f   : > { %v766_v27 = vmul.f32 0.001953125, %v765_v9 }
 0x151   : > { %v769_v44 = vmul.f32 %v766_v27, %v766_v27 }
 0x153   : > { %v767_v10 = vld [vmem:[#allocation3] sm:$0x1] }
 0x154   : > { %v768_v11 = vmul.f32 0.001953125, %v767_v10 }
 0x156   : > { %v770_v12 = vsub.f32 %v768_v11, %v769_v44 }
 0x158   : > { %v771_v13 = vmax.f32 %v770_v12, 0.0 }
 0x15a   : > { %v773_v33 = vadd.f32 1e-05, %v771_v13 }
 0x15c   : > { %976 = vrsqrt.f32 %v773_v33 }
 0x169   : > { %v977_v15 = vpop.eup %976 }
 0x16a   : > { %v775_v38 = vmul.f32 %v977_v15, %v772_v14 }
 0x16c   : > { %776 = vst.msk [vmem:[%s1421_s4] sm:$0x1] %vm655_vm5, %v775_v38  ;;  %v778_v37 = vmul.f32 %v775_v38, %v766_v27 }
 0x16e   : > { %v779_v17 = vsub.f32 %v777_v16, %v778_v37 }
 0x170   : > { %780 = vst.msk [vmem:[%s1421_s4 + $0x1] sm:$0x1] %vm655_vm5, %v779_v17 }
 0x171 PF: > { %s15_s15 = sadd.s32 1, %s984_s15  }
 0x172   : > { %p12_p6 = scmp.ge.s32.totalorder %s15_s15, 4  }
 0x174   :  { %14 = sbr.rel (!%p12_p6) target bundleno = 1 (0x1), region = 78 }

// kernel: closed_call.262
= control target key start
LH: loop header
LB: loop body
LE: loop exit
PB: predicated region body
PF: predicated region fallthrough
CT: control target
= control target key end

     0   :  { %s1022_s15 = smov 0   ;;  %s1429_s0 = inlined_call_operand.vmem [shape: bf16[512,36], index: 0, kind: input, shape index: {}]   ;;  %s1430_s1 = inlined_call_operand.vmem [shape: bf16[36,4], index: 1, kind: input, shape index: {}]   ;;  %s1431_s2 = inlined_call_operand.vmem [shape: f32[2,4], index: 2, kind: input, shape index: {}]   ;;  %s1432_s3 = inlined_call_operand.vmem [shape: f32[512,4], index: 3, kind: output, shape index: {0}]   ;;  %s1433_s4 = inlined_call_operand.vmem [shape: f32[2,4], index: 4, kind: output, shape index: {1}]  }
   0x1 LB: > { %s1028_s16 = sadd.s32 4294967295, %s994_s15   ;;  %p849_p0 = scmp.ge.s32.totalorder %s994_s15, 1  ;;  %s994_s15 = sphi %s1022_s15, %s15_s15  }
   0x2   : > { %p161_p1 = scmp.lt.s32.totalorder %s994_s15, 3 }
   0x4   : > { %p162_p2 = pnand %p849_p0, %p161_p1 }
   0x5   : > { %s850_s21 = sshll.u32 (!%p162_p2), %s1028_s16, 5  ;;  %p889_p4 = scmp.ne.s32.totalorder (!%p162_p2), %s1028_s16, 0 }
   0x6   : > { %165 = sbr.rel (%p162_p2) target bundleno = 369 (0x171), region = 32  ;;  %p188_p3 = scmp.lt.s32.totalorder (!%p162_p2), %s850_s21, 63 }
   0xb   : > { %v967_v0 = vld [vmem:[%s1430_s1 + $0x10] ss:$0 sps:$4 sm:$0x33]   ;;  %vm381_vm0 = vcmask 1041408   ;;  %v968_v1 = vld [vmem:[%s1430_s1 + $0x8] sm:$0xff]   ;;  %v969_v3 = vld [vmem:[%s1430_s1] sm:$0xff]  }
   0xc   : > { %956 = vmatprep.subr.msk.bf16.mxu0 %vm381_vm0, %v967_v0  ;;  %957 = vmatprep.subr.msk.bf16.mxu1 %vm381_vm0, %v967_v0  ;;  %v383_v2 = vsel %vm381_vm0, %v967_v0, 0  ;;  %s1435_s21 = smov (!%p188_p3, %s850_s21), 63  ;;  %vm332_vm1 = vcmask 293888   ;;  %vm546_vm2 = vcmask 31744  }
   0xd   : > { %913 = vmatpush3.bf16.msra.mxu0 %v383_v2  ;;  %953 = vmatpush3.bf16.msra.mxu1 %v383_v2  ;;  %s851_s24 = sshll.u32 %s1435_s21, 2  ;;  %s853_s28 = sshll.u32 %s1435_s21, 3 }
   0xe   : > { %914 = vmatprep.subr.bf16.mxu0 %v968_v1  ;;  %951 = vmatprep.subr.bf16.mxu1 %v968_v1  ;;  %s1048_s27 = scalar_lea.vmem %s1429_s0, %s851_s24  ;;  %s1086_s5 = scalar_lea.vmem %s1432_s3, %s853_s28 }
   0xf   : > { %v970_v4 = vld [vmem:[%s1048_s27] sm:$0xff]   ;;  %v972_v6 = vld [vmem:[%s1048_s27 + $0x8] sm:$0xff]   ;;  %v974_v8 = vld [vmem:[%s1048_s27 + $0x10] sm:$0xff]  }
  0x10   : > { %v971_v5 = vld [vmem:[%s1048_s27 + $0x40] sm:$0xff]   ;;  %918 = vmatprep.mubr.msk.bf16.mxu0 %vm332_vm1, %v970_v4  ;;  %v973_v7 = vld [vmem:[%s1048_s27 + $0x48] sm:$0xff]   ;;  %v975_v9 = vld [vmem:[%s1048_s27 + $0x50] sm:$0xff]  }
  0x11   : > { %915 = vmatpush3.bf16.msra.mxu0 %v968_v1  ;;  %954 = vmatpush3.bf16.msra.mxu1 %v968_v1  ;;  %v976_v10 = vld [vmem:[%s1048_s27 + $0x18] sm:$0xff]   ;;  %v978_v12 = vld [vmem:[%s1048_s27 + $0x20] sm:$0xff]   ;;  %v980_v14 = vld [vmem:[%s1048_s27 + $0x28] sm:$0xff]  }
  0x12   : > { %916 = vmatprep.subr.bf16.mxu0 %v969_v3  ;;  %952 = vmatprep.subr.bf16.mxu1 %v969_v3  ;;  %v977_v11 = vld [vmem:[%s1048_s27 + $0x58] sm:$0xff]   ;;  %v979_v13 = vld [vmem:[%s1048_s27 + $0x60] sm:$0xff]   ;;  %v981_v15 = vld [vmem:[%s1048_s27 + $0x68] sm:$0xff]  }
  0x13   : > { %934 = vmatprep.mubr.msk.bf16.mxu1 %vm332_vm1, %v971_v5  ;;  %v982_v16 = vld [vmem:[%s1048_s27 + $0x30] sm:$0xff]   ;;  %v984_v18 = vld [vmem:[%s1048_s27 + $0x38] sm:$0xff]  }
  0x14   : > { %v983_v17 = vld [vmem:[%s1048_s27 + $0x70] sm:$0xff]   ;;  %v985_v19 = vld [vmem:[%s1048_s27 + $0x78] sm:$0xff]  }
  0x15   : > { %917 = vmatpush3.bf16.msra.mxu0 %v969_v3  ;;  %955 = vmatpush3.bf16.msra.mxu1 %v969_v3 }
  0x18   : > { %919 = vmatmul.mubr.msk.bf16.vlgmr.msra.gmra.mxu0 %vm332_vm1, %v972_v6  ;;  %935 = vmatmul.mubr.msk.bf16.vlgmr.msra.gmra.mxu1 %vm332_vm1, %v973_v7 }
  0x19   : > { %922 = vmatprep.mubr.msk.bf16.mxu0 %vm332_vm1, %v974_v8  ;;  %938 = vmatprep.mubr.msk.bf16.mxu1 %vm332_vm1, %v975_v9 }
  0x20   : > { %923 = vmatmul.mubr.msk.bf16.gmra.mxu0 %vm332_vm1, %v976_v10  ;;  %939 = vmatmul.mubr.msk.bf16.gmra.mxu1 %vm332_vm1, %v977_v11 }
  0x21   : > { %926 = vmatprep.mubr.msk.bf16.mxu0 %vm332_vm1, %v978_v12  ;;  %942 = vmatprep.mubr.msk.bf16.mxu1 %vm332_vm1, %v979_v13 }
  0x28   : > { %927 = vmatmul.mubr.msk.bf16.gmra.mxu0 %vm332_vm1, %v980_v14  ;;  %943 = vmatmul.mubr.msk.bf16.gmra.mxu1 %vm332_vm1, %v981_v15 }
  0x29   : > { %930 = vmatprep.mubr.msk.bf16.mxu0 %vm332_vm1, %v982_v16  ;;  %946 = vmatprep.mubr.msk.bf16.mxu1 %vm332_vm1, %v983_v17 }
  0x30   : > { %931 = vmatmul.mubr.msk.bf16.gmra.mxu0 %vm332_vm1, %v984_v18  ;;  %947 = vmatmul.mubr.msk.bf16.gmra.mxu1 %vm332_vm1, %v985_v19 }
  0xd8   : > { %v1088_v20 = vpop.f32.mrf.mxu0  ;;  %v1090_v21 = vpop.f32.mrf.mxu1 }
  0xd9   : > { %549 = vst.msk [vmem:[%s1086_s5 + $0x10] sm:$0xff] %vm546_vm2, %v1088_v20  ;;  %565 = vst.msk [vmem:[%s1086_s5 + $0x90] sm:$0xff] %vm546_vm2, %v1090_v21 }
  0xda   : > { %v1098_v22 = vpop.f32.mrf.mxu0  ;;  %v1100_v23 = vpop.f32.mrf.mxu1 }
  0xdb   : > { %547 = vst.msk [vmem:[%s1086_s5] sm:$0xff] %vm546_vm2, %v1098_v22  ;;  %563 = vst.msk [vmem:[%s1086_s5 + $0x80] sm:$0xff] %vm546_vm2, %v1100_v23 }
  0xdc   : > { %v1108_v24 = vpop.f32.mrf.mxu0  ;;  %v1110_v25 = vpop.f32.mrf.mxu1 }
  0xdd   : > { %550 = vst.msk [vmem:[%s1086_s5 + $0x18] sm:$0xff] %vm546_vm2, %v1108_v24  ;;  %566 = vst.msk [vmem:[%s1086_s5 + $0x98] sm:$0xff] %vm546_vm2, %v1110_v25 }
  0xde   : > { %v1118_v26 = vpop.f32.mrf.mxu0  ;;  %v1120_v27 = vpop.f32.mrf.mxu1 }
  0xdf   : > { %548 = vst.msk [vmem:[%s1086_s5 + $0x8] sm:$0xff] %vm546_vm2, %v1118_v26  ;;  %564 = vst.msk [vmem:[%s1086_s5 + $0x88] sm:$0xff] %vm546_vm2, %v1120_v27 }
  0xe0   : > { %v1128_v28 = vpop.f32.mrf.mxu0  ;;  %v1130_v29 = vpop.f32.mrf.mxu1 }
  0xe1   : > { %553 = vst.msk [vmem:[%s1086_s5 + $0x30] sm:$0xff] %vm546_vm2, %v1128_v28  ;;  %569 = vst.msk [vmem:[%s1086_s5 + $0xb0] sm:$0xff] %vm546_vm2, %v1130_v29 }
  0xe2   : > { %v1138_v30 = vpop.f32.mrf.mxu0  ;;  %v1140_v31 = vpop.f32.mrf.mxu1 }
  0xe3   : > { %551 = vst.msk [vmem:[%s1086_s5 + $0x20] sm:$0xff] %vm546_vm2, %v1138_v30  ;;  %567 = vst.msk [vmem:[%s1086_s5 + $0xa0] sm:$0xff] %vm546_vm2, %v1140_v31 }
  0xe4   : > { %v1148_v32 = vpop.f32.mrf.mxu0  ;;  %v1150_v33 = vpop.f32.mrf.mxu1 }
  0xe5   : > { %554 = vst.msk [vmem:[%s1086_s5 + $0x38] sm:$0xff] %vm546_vm2, %v1148_v32  ;;  %570 = vst.msk [vmem:[%s1086_s5 + $0xb8] sm:$0xff] %vm546_vm2, %v1150_v33 }
  0xe6   : > { %v1158_v34 = vpop.f32.mrf.mxu0  ;;  %v1160_v35 = vpop.f32.mrf.mxu1 }
  0xe7   : > { %552 = vst.msk [vmem:[%s1086_s5 + $0x28] sm:$0xff] %vm546_vm2, %v1158_v34  ;;  %568 = vst.msk [vmem:[%s1086_s5 + $0xa8] sm:$0xff] %vm546_vm2, %v1160_v35 }
  0xe8   : > { %v1168_v36 = vpop.f32.mrf.mxu0  ;;  %v1170_v37 = vpop.f32.mrf.mxu1 }
  0xe9   : > { %557 = vst.msk [vmem:[%s1086_s5 + $0x50] sm:$0xff] %vm546_vm2, %v1168_v36  ;;  %573 = vst.msk [vmem:[%s1086_s5 + $0xd0] sm:$0xff] %vm546_vm2, %v1170_v37 }
  0xea   : > { %v1178_v38 = vpop.f32.mrf.mxu0  ;;  %v1180_v39 = vpop.f32.mrf.mxu1 }
  0xeb   : > { %555 = vst.msk [vmem:[%s1086_s5 + $0x40] sm:$0xff] %vm546_vm2, %v1178_v38  ;;  %571 = vst.msk [vmem:[%s1086_s5 + $0xc0] sm:$0xff] %vm546_vm2, %v1180_v39 }
  0xec   : > { %v1188_v40 = vpop.f32.mrf.mxu0  ;;  %v1190_v41 = vpop.f32.mrf.mxu1 }
  0xed   : > { %558 = vst.msk [vmem:[%s1086_s5 + $0x58] sm:$0xff] %vm546_vm2, %v1188_v40  ;;  %574 = vst.msk [vmem:[%s1086_s5 + $0xd8] sm:$0xff] %vm546_vm2, %v1190_v41 }
  0xee   : > { %v1198_v42 = vpop.f32.mrf.mxu0  ;;  %v1200_v43 = vpop.f32.mrf.mxu1 }
  0xef   : > { %556 = vst.msk [vmem:[%s1086_s5 + $0x48] sm:$0xff] %vm546_vm2, %v1198_v42  ;;  %572 = vst.msk [vmem:[%s1086_s5 + $0xc8] sm:$0xff] %vm546_vm2, %v1200_v43 }
  0xf0   : > { %v1208_v44 = vpop.f32.mrf.mxu0  ;;  %v1210_v45 = vpop.f32.mrf.mxu1 }
  0xf1   : > { %561 = vst.msk [vmem:[%s1086_s5 + $0x70] sm:$0xff] %vm546_vm2, %v1208_v44  ;;  %577 = vst.msk [vmem:[%s1086_s5 + $0xf0] sm:$0xff] %vm546_vm2, %v1210_v45 }
  0xf2   : > { %v1218_v46 = vpop.f32.mrf.mxu0  ;;  %v1220_v47 = vpop.f32.mrf.mxu1 }
  0xf3   : > { %559 = vst.msk [vmem:[%s1086_s5 + $0x60] sm:$0xff] %vm546_vm2, %v1218_v46  ;;  %575 = vst.msk [vmem:[%s1086_s5 + $0xe0] sm:$0xff] %vm546_vm2, %v1220_v47  ;;  %582 = sbr.rel (%p889_p4) target bundleno = 250 (0xfa), region = 36 }
  0xf4   : > { %v1228_v48 = vpop.f32.mrf.mxu0  ;;  %v1230_v49 = vpop.f32.mrf.mxu1 }
  0xf5   : > { %562 = vst.msk [vmem:[%s1086_s5 + $0x78] sm:$0xff] %vm546_vm2, %v1228_v48  ;;  %578 = vst.msk [vmem:[%s1086_s5 + $0xf8] sm:$0xff] %vm546_vm2, %v1230_v49 }
  0xf6   : > { %v1238_v50 = vpop.f32.mrf.mxu0  ;;  %v1240_v51 = vpop.f32.mrf.mxu1 }
  0xf7   : > { %560 = vst.msk [vmem:[%s1086_s5 + $0x68] sm:$0xff] %vm546_vm2, %v1238_v50  ;;  %576 = vst.msk [vmem:[%s1086_s5 + $0xe8] sm:$0xff] %vm546_vm2, %v1240_v51 }
  0xf8   : > { %vm583_vm3 = vcmask 24576   ;;  %v996_v52 = vmov 0.0  }
  0xf9   : > { %584 = vst.msk [vmem:[#allocation2] sm:$0x1] %vm583_vm3, %v996_v52  ;;  %585 = vst.msk [vmem:[#allocation3] sm:$0x1] %vm583_vm3, %v996_v52 }
  0xfa PF: > { %v587_v53 = vsel %vm546_vm2, %v1098_v22, 0.0  ;;  %v588_v54 = vsel %vm546_vm2, %v1118_v26, 0.0  ;;  %v590_v55 = vsel %vm546_vm2, %v1088_v20, 0.0  ;;  %v592_v57 = vsel %vm546_vm2, %v1108_v24, 0.0  ;;  %p890_p5 = scmp.ne.s32.totalorder %s1028_s16, 1 }
  0xfb   : > { %v589_v56 = vadd.f32 %v588_v54, %v587_v53  ;;  %v594_v59 = vsel %vm546_vm2, %v1138_v30, 0.0  ;;  %v596_v61 = vsel %vm546_vm2, %v1158_v34, 0.0  ;;  %v598_v63 = vsel %vm546_vm2, %v1128_v28, 0.0 }
  0xfc   : > { %v600_v1 = vsel %vm546_vm2, %v1148_v32, 0.0  ;;  %v602_v3 = vsel %vm546_vm2, %v1178_v38, 0.0  ;;  %v604_v5 = vsel %vm546_vm2, %v1198_v42, 0.0  ;;  %v660_v6 = vmul.f32 %v1098_v22, %v1098_v22 }
  0xfd   : > { %v591_v58 = vadd.f32 %v590_v55, %v589_v56  ;;  %v661_v7 = vmul.f32 %v1118_v26, %v1118_v26  ;;  %v662_v9 = vmul.f32 %v1088_v20, %v1088_v20  ;;  %v606_v10 = vsel %vm546_vm2, %v1168_v36, 0.0 }
  0xfe   : > { %v663_v11 = vmul.f32 %v1108_v24, %v1108_v24  ;;  %v608_v13 = vsel %vm546_vm2, %v1188_v40, 0.0  ;;  %v664_v14 = vmul.f32 %v1138_v30, %v1138_v30  ;;  %v692_v15 = vsel %vm546_vm2, %v660_v6, 0.0 }
  0xff   : > { %v593_v60 = vadd.f32 %v592_v57, %v591_v58  ;;  %v693_v16 = vsel %vm546_vm2, %v661_v7, 0.0  ;;  %v695_v19 = vsel %vm546_vm2, %v662_v9, 0.0  ;;  %v610_v20 = vsel %vm546_vm2, %v1218_v46, 0.0 }
 0x100   : > { %v694_v18 = vadd.f32 %v693_v16, %v692_v15  ;;  %v665_v22 = vmul.f32 %v1158_v34, %v1158_v34  ;;  %v697_v24 = vsel %vm546_vm2, %v663_v11, 0.0  ;;  %v612_v30 = vsel %vm546_vm2, %v1238_v50, 0.0 }
 0x101   : > { %v595_v62 = vadd.f32 %v594_v59, %v593_v60  ;;  %v666_v53 = vmul.f32 %v1128_v28, %v1128_v28  ;;  %v699_v54 = vsel %vm546_vm2, %v664_v14, 0.0  ;;  %v614_v57 = vsel %vm546_vm2, %v1208_v44, 0.0 }
 0x102   : > { %v696_v52 = vadd.f32 %v695_v19, %v694_v18  ;;  %v667_v34 = vmul.f32 %v1148_v32, %v1148_v32  ;;  %v701_v58 = vsel %vm546_vm2, %v665_v22, 0.0  ;;  %v668_v28 = vmul.f32 %v1178_v38, %v1178_v38 }
 0x103   : > { %v597_v0 = vadd.f32 %v596_v61, %v595_v62  ;;  %v616_v61 = vsel %vm546_vm2, %v1228_v48, 0.0  ;;  %v703_v62 = vsel %vm546_vm2, %v666_v53, 0.0  ;;  %v669_v32 = vmul.f32 %v1198_v42, %v1198_v42 }
 0x104   : > { %v698_v56 = vadd.f32 %v697_v24, %v696_v52  ;;  %v670_v38 = vmul.f32 %v1168_v36, %v1168_v36  ;;  %v707_v6 = vsel %vm546_vm2, %v668_v28, 0.0  ;;  %v622_v9 = vsel %vm546_vm2, %v1090_v21, 0.0 }
 0x105   : > { %v599_v2 = vadd.f32 %v598_v63, %v597_v0  ;;  %v671_v42 = vmul.f32 %v1188_v40, %v1188_v40  ;;  %v672_v36 = vmul.f32 %v1218_v46, %v1218_v46  ;;  %v673_v40 = vmul.f32 %v1238_v50, %v1238_v50 }
 0x106   : > { %v700_v60 = vadd.f32 %v699_v54, %v698_v56  ;;  %v711_v14 = vsel %vm546_vm2, %v670_v38, 0.0  ;;  %v628_v22 = vsel %vm546_vm2, %v1160_v35, 0.0  ;;  %v674_v46 = vmul.f32 %v1208_v44, %v1208_v44 }
 0x107   : > { %v601_v4 = vadd.f32 %v600_v1, %v599_v2  ;;  %v618_v1 = vsel %vm546_vm2, %v1100_v23, 0.0  ;;  %v705_v2 = vsel %vm546_vm2, %v667_v34, 0.0  ;;  %v713_v18 = vsel %vm546_vm2, %v671_v42, 0.0 }
 0x108   : > { %v702_v0 = vadd.f32 %v701_v58, %v700_v60  ;;  %v715_v24 = vsel %vm546_vm2, %v672_v36, 0.0  ;;  %v675_v50 = vmul.f32 %v1228_v48, %v1228_v48  ;;  %v717_v53 = vsel %vm546_vm2, %v673_v40, 0.0 }
 0x109   : > { %v603_v8 = vadd.f32 %v602_v3, %v601_v4  ;;  %v632_v56 = vsel %vm546_vm2, %v1150_v33, 0.0  ;;  %v676_v44 = vmul.f32 %v1100_v23, %v1100_v23  ;;  %v677_v48 = vmul.f32 %v1120_v27, %v1120_v27 }
 0x10a   : > { %v704_v4 = vadd.f32 %v703_v62, %v702_v0  ;;  %v721_v60 = vsel %vm546_vm2, %v675_v50, 0.0  ;;  %v636_v62 = vsel %vm546_vm2, %v1200_v43, 0.0  ;;  %v678_v23 = vmul.f32 %v1090_v21, %v1090_v21 }
 0x10b   : > { %v605_v12 = vadd.f32 %v604_v5, %v603_v8  ;;  %v620_v5 = vsel %vm546_vm2, %v1120_v27, 0.0  ;;  %v679_v27 = vmul.f32 %v1110_v25, %v1110_v25  ;;  %v680_v21 = vmul.f32 %v1140_v31, %v1140_v31 }
 0x10c   : > { %v706_v8 = vadd.f32 %v705_v2, %v704_v4  ;;  %v725_v2 = vsel %vm546_vm2, %v677_v48, 0.0  ;;  %v727_v38 = vsel %vm546_vm2, %v678_v23, 0.0  ;;  %v648_v40 = vsel %vm546_vm2, %v1230_v49, 0.0 }
 0x10d   : > { %v607_v17 = vadd.f32 %v606_v10, %v605_v12  ;;  %v709_v10 = vsel %vm546_vm2, %v669_v32, 0.0  ;;  %v638_v32 = vsel %vm546_vm2, %v1170_v37, 0.0  ;;  %vm657_vm4 = vcmask 24576  }
 0x10e   : > { %v708_v12 = vadd.f32 %v707_v6, %v706_v8  ;;  %v642_v8 = vsel %vm546_vm2, %v1220_v47, 0.0 }
 0x10f   : > { %v609_v26 = vadd.f32 %v608_v13, %v607_v17  ;;  %v624_v13 = vsel %vm546_vm2, %v1110_v25, 0.0  ;;  %v626_v17 = vsel %vm546_vm2, %v1140_v31, 0.0  ;;  %v681_v25 = vmul.f32 %v1160_v35, %v1160_v35 }
 0x110   : > { %v710_v16 = vadd.f32 %v709_v10, %v708_v12  ;;  %v682_v31 = vmul.f32 %v1130_v29, %v1130_v29  ;;  %v731_v12 = vsel %vm546_vm2, %v680_v21, 0.0  ;;  %v683_v35 = vmul.f32 %v1150_v33, %v1150_v33  ;;  %v659_v21 = vld [vmem:[#allocation3] sm:$0x1] }
 0x111   : > { %v611_v55 = vadd.f32 %v610_v20, %v609_v26 }
 0x112   : > { %v712_v20 = vadd.f32 %v711_v14, %v710_v16  ;;  %v646_v14 = vsel %vm546_vm2, %v1210_v45, 0.0 }
 0x113   : > { %v613_v59 = vadd.f32 %v612_v30, %v611_v55  ;;  %v630_v30 = vsel %vm546_vm2, %v1130_v29, 0.0  ;;  %v684_v29 = vmul.f32 %v1180_v39, %v1180_v39 }
 0x114   : > { %v714_v52 = vadd.f32 %v713_v18, %v712_v20  ;;  %v735_v18 = vsel %vm546_vm2, %v682_v31, 0.0 }
 0x115   : > { %v615_v63 = vadd.f32 %v614_v57, %v613_v59  ;;  %v719_v57 = vsel %vm546_vm2, %v674_v46, 0.0  ;;  %v634_v59 = vsel %vm546_vm2, %v1180_v39, 0.0  ;;  %v737_v46 = vsel %vm546_vm2, %v683_v35, 0.0 }
 0x116   : > { %v716_v55 = vadd.f32 %v715_v24, %v714_v52  ;;  %v739_v52 = vsel %vm546_vm2, %v684_v29, 0.0  ;;  %v687_v39 = vmul.f32 %v1190_v41, %v1190_v41 }
 0x117   : > { %v617_v3 = vadd.f32 %v616_v61, %v615_v63  ;;  %v723_v63 = vsel %vm546_vm2, %v676_v44, 0.0 }
 0x118   : > { %v718_v58 = vadd.f32 %v717_v53, %v716_v55 }
 0x119   : > { %v619_v7 = vadd.f32 %v618_v1, %v617_v3 }
 0x11a   : > { %v720_v28 = vadd.f32 %v719_v57, %v718_v58 }
 0x11b   : > { %v621_v11 = vadd.f32 %v620_v5, %v619_v7  ;;  %v640_v5 = vsel %vm546_vm2, %v1190_v41, 0.0  ;;  %v690_v41 = vmul.f32 %v1210_v45, %v1210_v45 }
 0x11c   : > { %v722_v1 = vadd.f32 %v721_v60, %v720_v28  ;;  %v586_v28 = vld [vmem:[#allocation2] sm:$0x1] }
 0x11d   : > { %v623_v15 = vadd.f32 %v622_v9, %v621_v11  ;;  %v729_v9 = vsel %vm546_vm2, %v679_v27, 0.0  ;;  %v644_v11 = vsel %vm546_vm2, %v1240_v51, 0.0 }
 0x11e   : > { %v724_v4 = vadd.f32 %v723_v63, %v722_v1 }
 0x11f   : > { %v625_v19 = vadd.f32 %v624_v13, %v623_v15  ;;  %v733_v15 = vsel %vm546_vm2, %v681_v25, 0.0 }
 0x120   : > { %v726_v7 = vadd.f32 %v725_v2, %v724_v4 }
 0x121   : > { %v627_v26 = vadd.f32 %v626_v17, %v625_v19 }
 0x122   : > { %v728_v10 = vadd.f32 %v727_v38, %v726_v7 }
 0x123   : > { %v629_v54 = vadd.f32 %v628_v22, %v627_v26  ;;  %v685_v22 = vmul.f32 %v1200_v43, %v1200_v43  ;;  %v686_v26 = vmul.f32 %v1170_v37, %v1170_v37  ;;  %v688_v43 = vmul.f32 %v1220_v47, %v1220_v47 }
 0x124   : > { %v730_v36 = vadd.f32 %v729_v9, %v728_v10  ;;  %v689_v37 = vmul.f32 %v1240_v51, %v1240_v51  ;;  %v691_v47 = vmul.f32 %v1230_v49, %v1230_v49  ;;  %v751_v51 = vsel %vm546_vm2, %v690_v41, 0.0 }
 0x125   : > { %v631_v34 = vadd.f32 %v630_v30, %v629_v54  ;;  %v741_v53 = vsel %vm546_vm2, %v685_v22, 0.0  ;;  %v747_v48 = vsel %vm546_vm2, %v688_v43, 0.0 }
 0x126   : > { %v732_v17 = vadd.f32 %v731_v12, %v730_v36 }
 0x127   : > { %v633_v61 = vadd.f32 %v632_v56, %v631_v34  ;;  %v743_v56 = vsel %vm546_vm2, %v686_v26, 0.0  ;;  %v745_v34 = vsel %vm546_vm2, %v687_v39, 0.0 }
 0x128   : > { %v734_v20 = vadd.f32 %v733_v15, %v732_v17 }
 0x129   : > { %v635_v0 = vadd.f32 %v634_v59, %v633_v61 }
 0x12a   : > { %v736_v24 = vadd.f32 %v735_v18, %v734_v20 }
 0x12b   : > { %v637_v3 = vadd.f32 %v636_v62, %v635_v0  ;;  %v749_v62 = vsel %vm546_vm2, %v689_v37, 0.0 }
 0x12c   : > { %v738_v50 = vadd.f32 %v737_v46, %v736_v24 }
 0x12d   : > { %v639_v6 = vadd.f32 %v638_v32, %v637_v3  ;;  %v753_v32 = vsel %vm546_vm2, %v691_v47, 0.0 }
 0x12e   : > { %v740_v55 = vadd.f32 %v739_v52, %v738_v50 }
 0x12f   : > { %v641_v42 = vadd.f32 %v640_v5, %v639_v6 }
 0x130   : > { %v742_v57 = vadd.f32 %v741_v53, %v740_v55 }
 0x131   : > { %v643_v13 = vadd.f32 %v642_v8, %v641_v42 }
 0x132   : > { %v744_v59 = vadd.f32 %v743_v56, %v742_v57 }
 0x133   : > { %v645_v16 = vadd.f32 %v644_v11, %v643_v13 }
 0x134   : > { %v746_v61 = vadd.f32 %v745_v34, %v744_v59 }
 0x135   : > { %v647_v19 = vadd.f32 %v646_v14, %v645_v16 }
 0x136   : > { %v748_v63 = vadd.f32 %v747_v48, %v746_v61 }
 0x137   : > { %v649_v33 = vadd.f32 %v648_v40, %v647_v19 }
 0x138   : > { %v750_v1 = vadd.f32 %v749_v62, %v748_v63 }
 0x139   : > { %v650_v30 = vrot.slane %v649_v33, 4 }
 0x13a   : > { %v752_v45 = vadd.f32 %v751_v51, %v750_v1 }
 0x13b   : > { %v651_v54 = vadd.f32 %v650_v30, %v649_v33 }
 0x13c   : > { %v754_v27 = vadd.f32 %v753_v32, %v752_v45 }
 0x13d   : > { %v652_v44 = vrot.slane %v651_v54, 2 }
 0x13e   : > { %v755_v2 = vrot.slane %v754_v27, 4 }
 0x13f   : > { %v653_v58 = vadd.f32 %v652_v44, %v651_v54 }
 0x140   : > { %v756_v3 = vadd.f32 %v755_v2, %v754_v27 }
 0x141   : > { %v654_v60 = vrot.slane %v653_v58, 1 }
 0x142   : > { %v757_v4 = vrot.slane %v756_v3, 2 }
 0x143   : > { %v655_v23 = vadd.f32 %v654_v60, %v653_v58 }
 0x144   : > { %v758_v5 = vadd.f32 %v757_v4, %v756_v3 }
 0x145   : > { %v656_v0 = vadd.f32 %v655_v23, %v586_v28 }
 0x146   : > { %v759_v49 = vrot.slane %v758_v5, 1 }
 0x147   : > { %658 = vst.msk [vmem:[#allocation2] sm:$0x1] %vm657_vm4, %v656_v0 }
 0x148   : > { %v760_v38 = vadd.f32 %v759_v49, %v758_v5  ;;  %766 = sbr.rel (%p890_p5) target bundleno = 369 (0x171), region = 40 }
 0x14a   : > { %v761_v6 = vadd.f32 %v760_v38, %v659_v21 }
 0x14c   : > { %762 = vst.msk [vmem:[#allocation3] sm:$0x1] %vm657_vm4, %v761_v6 }
 0x14d   : > { %v774_v12 = vld [vmem:[%s1431_s2] sm:$0x1]  ;;  %v779_v14 = vld [vmem:[%s1431_s2 + $0x1] sm:$0x1] }
 0x14e   : > { %v767_v7 = vld [vmem:[#allocation2] sm:$0x1] }
 0x14f   : > { %v768_v25 = vmul.f32 0.001953125, %v767_v7 }
 0x151   : > { %v771_v42 = vmul.f32 %v768_v25, %v768_v25 }
 0x153   : > { %v769_v8 = vld [vmem:[#allocation3] sm:$0x1] }
 0x154   : > { %v770_v9 = vmul.f32 0.001953125, %v769_v8 }
 0x156   : > { %v772_v10 = vsub.f32 %v770_v9, %v771_v42 }
 0x158   : > { %v773_v11 = vmax.f32 %v772_v10, 0.0 }
 0x15a   : > { %v775_v31 = vadd.f32 1e-05, %v773_v11 }
 0x15c   : > { %986 = vrsqrt.f32 %v775_v31 }
 0x169   : > { %v987_v13 = vpop.eup %986 }
 0x16a   : > { %v777_v36 = vmul.f32 %v987_v13, %v774_v12 }
 0x16c   : > { %778 = vst.msk [vmem:[%s1433_s4] sm:$0x1] %vm657_vm4, %v777_v36  ;;  %v780_v35 = vmul.f32 %v777_v36, %v768_v25 }
 0x16e   : > { %v781_v15 = vsub.f32 %v779_v14, %v780_v35 }
 0x170   : > { %782 = vst.msk [vmem:[%s1433_s4 + $0x1] sm:$0x1] %vm657_vm4, %v781_v15 }
 0x171 PF: > { %s15_s15 = sadd.s32 1, %s994_s15  }
 0x172   : > { %p12_p6 = scmp.ge.s32.totalorder %s15_s15, 4  }
 0x174   :  { %14 = sbr.rel (!%p12_p6) target bundleno = 1 (0x1), region = 78 }

// kernel: closed_call.266
= control target key start
LH: loop header
LB: loop body
LE: loop exit
PB: predicated region body
PF: predicated region fallthrough
CT: control target
= control target key end

     0   :  { %v102_v22 = vmov 0.0   ;;  %s177_s0 = inlined_call_operand.vmem [shape: f32[16,128], index: 0, kind: input, shape index: {}]   ;;  %s178_s1 = inlined_call_operand.vmem [shape: f32[2,128], index: 1, kind: input, shape index: {}]   ;;  %s179_s2 = inlined_call_operand.vmem [shape: f32[16,128], index: 2, kind: input, shape index: {}]   ;;  %s180_s3 = inlined_call_operand.vmem [shape: f32[2,128], index: 3, kind: input, shape index: {}]   ;;  %s181_s4 = inlined_call_operand.vmem [shape: f32[16,128], index: 4, kind: input, shape index: {}, may-alias: {4,6}]   ;;  %s182_s6 = inlined_call_operand.vmem [shape: f32[16,128], index: 6, kind: output, shape index: {1}, may-alias: {4,6}]   ;;  %s183_s5 = inlined_call_operand.vmem [shape: bf16[16,128], index: 5, kind: output, shape index: {0}]  }
   0x1   :  { %v22_v0 = vld [vmem:[%s177_s0] sm:$0xff]  ;;  %v23_v1 = vld [vmem:[%s177_s0 + $0x8] sm:$0xff] }
   0x2   :  { %v88_v2 = vld [vmem:[%s178_s1] ss:$0 sm:$0xff]  ;;  %v89_v5 = vld [vmem:[%s178_s1 + $0x1] ss:$0 sm:$0xff]  ;;  %v39_v7 = vld [vmem:[%s179_s2 + $0x8] sm:$0xff] }
   0x3   :  { %v29_v3 = vmul.f32 %v88_v2, %v22_v0  ;;  %v30_v4 = vmul.f32 %v88_v2, %v23_v1  ;;  %v38_v6 = vld [vmem:[%s179_s2] sm:$0xff]  ;;  %v55_v15 = vld [vmem:[%s181_s4 + $0x8] sm:$0xff] }
   0x4   :  { %v90_v8 = vld [vmem:[%s180_s3] ss:$0 sm:$0xff]  ;;  %v91_v9 = vld [vmem:[%s180_s3 + $0x1] ss:$0 sm:$0xff] }
   0x5   :  { %v54_v10 = vld [vmem:[%s181_s4] sm:$0xff]  ;;  %v36_v11 = vadd.f32 %v89_v5, %v29_v3  ;;  %v37_v12 = vadd.f32 %v89_v5, %v30_v4  ;;  %v45_v13 = vmul.f32 %v90_v8, %v38_v6  ;;  %v46_v14 = vmul.f32 %v90_v8, %v39_v7 }
   0x7   :  { %v52_v16 = vadd.f32 %v91_v9, %v45_v13  ;;  %v53_v17 = vadd.f32 %v91_v9, %v46_v14  ;;  %v56_v18 = vadd.f32 %v54_v10, %v36_v11  ;;  %v57_v19 = vadd.f32 %v55_v15, %v37_v12 }
   0x9   :  { %v58_v20 = vadd.f32 %v56_v18, %v52_v16  ;;  %v59_v21 = vadd.f32 %v57_v19, %v53_v17 }
   0xb   :  { %vm60_vm0 = vcmp.ge.f32.partialorder %v58_v20, 1.0  ;;  %vm61_vm1 = vcmp.ge.f32.partialorder %v59_v21, 1.0 }
   0xc   :  { %v92_v23 = vsel %vm60_vm0, 1.0, %v102_v22  ;;  %v93_v24 = vsel %vm61_vm1, 1.0, %v102_v22  ;;  %v76_v25 = vsel %vm60_vm0, 0.0, %v58_v20  ;;  %v77_v26 = vsel %vm61_vm1, 0.0, %v59_v21 }
   0xd   :  { %v99_v27 = vpack.c.bf16 %v93_v24, %v92_v23  ;;  %78 = vst [vmem:[%s182_s6] sm:$0xff] %v76_v25  ;;  %79 = vst [vmem:[%s182_s6 + $0x8] sm:$0xff] %v77_v26 }
   0xf   :  { %100 = vst [vmem:[%s183_s5] sm:$0xff] %v99_v27  }

// kernel: closed_call.267
= control target key start
LH: loop header
LB: loop body
LE: loop exit
PB: predicated region body
PF: predicated region fallthrough
CT: control target
= control target key end

     0   :  { %s158_s22 = smov 124   ;;  %vm136_vm0 = vcmask 27648   ;;  %s369_s0 = inlined_call_operand.vmem [shape: bf16[16,2,8,8], index: 0, kind: input, shape index: {}]   ;;  %s370_s1 = inlined_call_operand.vmem [shape: bf16[16,8,4], index: 1, kind: output, shape index: {}]  }
   0x1   :  { %v12_v0 = vld [vmem:[%s369_s0 + $0x10] sm:$0xf]  ;;  %v13_v1 = vld [vmem:[%s369_s0 + $0x14] sm:$0xf]  ;;  %v8_v2 = vld [vmem:[%s369_s0] sm:$0xf] }
   0x2   :  { %v178_v3 = vmax.bf16 %v13_v1, %v12_v0  ;;  %v9_v4 = vld [vmem:[%s369_s0 + $0x4] sm:$0xf]  ;;  %v14_v5 = vld [vmem:[%s369_s0 + $0x18] sm:$0xf]  ;;  %v15_v6 = vld [vmem:[%s369_s0 + $0x1c] sm:$0xf] }
   0x3   :  { %v189_v7 = vmax.bf16 %v9_v4, %v8_v2  ;;  %v10_v8 = vld [vmem:[%s369_s0 + $0x8] sm:$0xf]  ;;  %v11_v9 = vld [vmem:[%s369_s0 + $0xc] sm:$0xf]  ;;  %v199_v10 = vmax.bf16 %v15_v6, %v14_v5  ;;  %v16_v14 = vld [vmem:[%s369_s0 + $0x20] sm:$0xf] }
   0x4   :  { %76 = vrot.lane.b32.xlu1 %v178_v3, %s158_s22  ;;  %v203_v11 = vmax.bf16 %v11_v9, %v10_v8  ;;  %v18_v12 = vld [vmem:[%s369_s0 + $0x28] sm:$0xf]  ;;  %v19_v13 = vld [vmem:[%s369_s0 + $0x2c] sm:$0xf]  ;;  %v17_v15 = vld [vmem:[%s369_s0 + $0x24] sm:$0xf] }
   0x5   :  { %72 = vrot.lane.b32.xlu0 %v189_v7, %s158_s22  ;;  %v219_v16 = vmax.bf16 %v19_v13, %v18_v12  ;;  %v223_v17 = vmax.bf16 %v17_v15, %v16_v14  ;;  %v22_v18 = vld [vmem:[%s369_s0 + $0x38] sm:$0xf]  ;;  %v23_v19 = vld [vmem:[%s369_s0 + $0x3c] sm:$0xf]  ;;  %v20_v20 = vld [vmem:[%s369_s0 + $0x30] sm:$0xf] }
   0x6   :  { %v21_v21 = vld [vmem:[%s369_s0 + $0x34] sm:$0xf]  ;;  %v47_v22 = vmax.bf16 %v23_v19, %v22_v18  ;;  %v26_v24 = vld [vmem:[%s369_s0 + $0x48] sm:$0xf]  ;;  %v27_v25 = vld [vmem:[%s369_s0 + $0x4c] sm:$0xf] }
   0x7   :  { %v46_v23 = vmax.bf16 %v21_v21, %v20_v20  ;;  %v24_v26 = vld [vmem:[%s369_s0 + $0x40] sm:$0xf]  ;;  %v25_v27 = vld [vmem:[%s369_s0 + $0x44] sm:$0xf]  ;;  %v49_v28 = vmax.bf16 %v27_v25, %v26_v24  ;;  %v30_v30 = vld [vmem:[%s369_s0 + $0x58] sm:$0xf] }
   0x8   :  { %78 = vrot.lane.b32.xlu1 %v199_v10, %s158_s22  ;;  %v48_v29 = vmax.bf16 %v25_v27, %v24_v26  ;;  %v31_v31 = vld [vmem:[%s369_s0 + $0x5c] sm:$0xf]  ;;  %v28_v32 = vld [vmem:[%s369_s0 + $0x50] sm:$0xf]  ;;  %v29_v33 = vld [vmem:[%s369_s0 + $0x54] sm:$0xf] }
   0x9   :  { %74 = vrot.lane.b32.xlu0 %v203_v11, %s158_s22  ;;  %v51_v34 = vmax.bf16 %v31_v31, %v30_v30  ;;  %v50_v35 = vmax.bf16 %v29_v33, %v28_v32  ;;  %v34_v36 = vld [vmem:[%s369_s0 + $0x68] sm:$0xf]  ;;  %v35_v37 = vld [vmem:[%s369_s0 + $0x6c] sm:$0xf]  ;;  %v32_v38 = vld [vmem:[%s369_s0 + $0x60] sm:$0xf] }
   0xa   :  { %v33_v39 = vld [vmem:[%s369_s0 + $0x64] sm:$0xf]  ;;  %v53_v40 = vmax.bf16 %v35_v37, %v34_v36  ;;  %v38_v42 = vld [vmem:[%s369_s0 + $0x78] sm:$0xf]  ;;  %v39_v43 = vld [vmem:[%s369_s0 + $0x7c] sm:$0xf] }
   0xb   :  { %v52_v41 = vmax.bf16 %v33_v39, %v32_v38  ;;  %v36_v44 = vld [vmem:[%s369_s0 + $0x70] sm:$0xf]  ;;  %v37_v45 = vld [vmem:[%s369_s0 + $0x74] sm:$0xf]  ;;  %v55_v46 = vmax.bf16 %v39_v43, %v38_v42 }
   0xc   :  { %82 = vrot.lane.b32.xlu1 %v219_v16, %s158_s22  ;;  %v54_v47 = vmax.bf16 %v37_v45, %v36_v44 }
   0xd   :  { %80 = vrot.lane.b32.xlu0 %v223_v17, %s158_s22 }
  0x10   :  { %86 = vrot.lane.b32.xlu1 %v47_v22, %s158_s22 }
  0x11   :  { %84 = vrot.lane.b32.xlu0 %v46_v23, %s158_s22 }
  0x14   :  { %90 = vrot.lane.b32.xlu1 %v49_v28, %s158_s22 }
  0x15   :  { %88 = vrot.lane.b32.xlu0 %v48_v29, %s158_s22 }
  0x18   :  { %94 = vrot.lane.b32.xlu1 %v51_v34, %s158_s22 }
  0x19   :  { %92 = vrot.lane.b32.xlu0 %v50_v35, %s158_s22 }
  0x1c   :  { %98 = vrot.lane.b32.xlu1 %v53_v40, %s158_s22 }
  0x1d   :  { %96 = vrot.lane.b32.xlu0 %v52_v41, %s158_s22 }
  0x20   :  { %102 = vrot.lane.b32.xlu1 %v55_v46, %s158_s22 }
  0x21   :  { %100 = vrot.lane.b32.xlu0 %v54_v47, %s158_s22 }
  0x76   :  { %v77_v48 = vpop.permute.xlu1 %76 }
  0x77   :  { %v122_v49 = vmax.bf16 %v77_v48, %v178_v3  ;;  %v73_v50 = vpop.permute.xlu0 %72 }
  0x78   :  { %v120_v51 = vmax.bf16 %v73_v50, %v189_v7 }
  0x79   :  { %139 = vst.msk [vmem:[%s370_s1 + $0x8] sm:$0xf] %vm136_vm0, %v122_v49 }
  0x7a   :  { %137 = vst.msk [vmem:[%s370_s1] sm:$0xf] %vm136_vm0, %v120_v51  ;;  %v79_v52 = vpop.permute.xlu1 %78 }
  0x7b   :  { %v123_v53 = vmax.bf16 %v79_v52, %v199_v10  ;;  %v75_v54 = vpop.permute.xlu0 %74 }
  0x7c   :  { %v121_v55 = vmax.bf16 %v75_v54, %v203_v11 }
  0x7d   :  { %140 = vst.msk [vmem:[%s370_s1 + $0xc] sm:$0xf] %vm136_vm0, %v123_v53 }
  0x7e   :  { %138 = vst.msk [vmem:[%s370_s1 + $0x4] sm:$0xf] %vm136_vm0, %v121_v55  ;;  %v83_v56 = vpop.permute.xlu1 %82 }
  0x7f   :  { %v125_v57 = vmax.bf16 %v83_v56, %v219_v16  ;;  %v81_v58 = vpop.permute.xlu0 %80 }
  0x80   :  { %v124_v59 = vmax.bf16 %v81_v58, %v223_v17 }
  0x81   :  { %142 = vst.msk [vmem:[%s370_s1 + $0x14] sm:$0xf] %vm136_vm0, %v125_v57 }
  0x82   :  { %141 = vst.msk [vmem:[%s370_s1 + $0x10] sm:$0xf] %vm136_vm0, %v124_v59  ;;  %v87_v60 = vpop.permute.xlu1 %86 }
  0x83   :  { %v127_v61 = vmax.bf16 %v87_v60, %v47_v22  ;;  %v85_v62 = vpop.permute.xlu0 %84 }
  0x84   :  { %v126_v63 = vmax.bf16 %v85_v62, %v46_v23 }
  0x85   :  { %144 = vst.msk [vmem:[%s370_s1 + $0x1c] sm:$0xf] %vm136_vm0, %v127_v61 }
  0x86   :  { %143 = vst.msk [vmem:[%s370_s1 + $0x18] sm:$0xf] %vm136_vm0, %v126_v63  ;;  %v91_v0 = vpop.permute.xlu1 %90 }
  0x87   :  { %v129_v1 = vmax.bf16 %v91_v0, %v49_v28  ;;  %v89_v2 = vpop.permute.xlu0 %88 }
  0x88   :  { %v128_v3 = vmax.bf16 %v89_v2, %v48_v29 }
  0x89   :  { %146 = vst.msk [vmem:[%s370_s1 + $0x24] sm:$0xf] %vm136_vm0, %v129_v1 }
  0x8a   :  { %145 = vst.msk [vmem:[%s370_s1 + $0x20] sm:$0xf] %vm136_vm0, %v128_v3  ;;  %v95_v4 = vpop.permute.xlu1 %94 }
  0x8b   :  { %v131_v5 = vmax.bf16 %v95_v4, %v51_v34  ;;  %v93_v6 = vpop.permute.xlu0 %92 }
  0x8c   :  { %v130_v7 = vmax.bf16 %v93_v6, %v50_v35 }
  0x8d   :  { %148 = vst.msk [vmem:[%s370_s1 + $0x2c] sm:$0xf] %vm136_vm0, %v131_v5 }
  0x8e   :  { %147 = vst.msk [vmem:[%s370_s1 + $0x28] sm:$0xf] %vm136_vm0, %v130_v7  ;;  %v99_v8 = vpop.permute.xlu1 %98 }
  0x8f   :  { %v133_v9 = vmax.bf16 %v99_v8, %v53_v40  ;;  %v97_v10 = vpop.permute.xlu0 %96 }
  0x90   :  { %v132_v11 = vmax.bf16 %v97_v10, %v52_v41 }
  0x91   :  { %150 = vst.msk [vmem:[%s370_s1 + $0x34] sm:$0xf] %vm136_vm0, %v133_v9 }
  0x92   :  { %149 = vst.msk [vmem:[%s370_s1 + $0x30] sm:$0xf] %vm136_vm0, %v132_v11  ;;  %v103_v12 = vpop.permute.xlu1 %102 }
  0x93   :  { %v135_v13 = vmax.bf16 %v103_v12, %v55_v46  ;;  %v101_v14 = vpop.permute.xlu0 %100 }
  0x94   :  { %v134_v15 = vmax.bf16 %v101_v14, %v54_v47 }
  0x95   :  { %152 = vst.msk [vmem:[%s370_s1 + $0x3c] sm:$0xf] %vm136_vm0, %v135_v13 }
  0x96   :  { %151 = vst.msk [vmem:[%s370_s1 + $0x38] sm:$0xf] %vm136_vm0, %v134_v15 }

// kernel: tile.247
= control target key start
LH: loop header
LB: loop body
LE: loop exit
PB: predicated region body
PF: predicated region fallthrough
CT: control target
= control target key end

     0   :  { %s7_s6 = smov 3  ;;  %s21_s9 = smov 3  ;;  %vm4_vm0 = vcmask 64512   ;;  %vm11_vm1 = vcmask 1048512   ;;  %vm18_vm2 = vcmask 982912   ;;  %vm25_vm3 = vcmask 917312   ;;  %s225_s0 = inlined_call_operand.vmem [shape: f32[2,16,8], index: 0, kind: input, shape index: {}]   ;;  %s226_s1 = inlined_call_operand.vmem [shape: f32[2,128], index: 1, kind: output, shape index: {}]  }
   0x1   :  { %v119_v0 = vld [vmem:[%s225_s0 + $0xf] ss:$16 sm:%s7_s6]   ;;  %s149_s10 = smov 120   ;;  %v121_v1 = vld [vmem:[%s225_s0 + $0xd] ss:$16 sm:%s21_s9]   ;;  %s14_s13 = smov 3 }
   0x2   :  { %9 = vrot.lane.b32.xlu0 %v119_v0, %s149_s10  ;;  %s150_s14 = smov 104   ;;  %v120_v2 = vld [vmem:[%s225_s0 + $0xe] ss:$16 sm:%s14_s13]   ;;  %s28_s17 = smov 3  ;;  %vm32_vm4 = vcmask 851712   ;;  %vm39_vm5 = vcmask 786112  }
   0x3   :  { %23 = vrot.lane.b32.xlu1 %v121_v1, %s150_s14  ;;  %v122_v3 = vld [vmem:[%s225_s0 + $0xc] ss:$16 sm:%s28_s17]   ;;  %s35_s20 = smov 3  ;;  %s42_s21 = smov 3  ;;  %vm46_vm6 = vcmask 720512   ;;  %vm53_vm7 = vcmask 654912  }
   0x4   :  { %s151_s22 = smov 112   ;;  %s152_s23 = smov 96   ;;  %v123_v4 = vld [vmem:[%s225_s0 + $0xb] ss:$16 sm:%s35_s20]   ;;  %v124_v5 = vld [vmem:[%s225_s0 + $0xa] ss:$16 sm:%s42_s21]  }
   0x5   :  { %s49_s28 = smov 3  ;;  %s56_s29 = smov 3  ;;  %vm60_vm8 = vcmask 589312   ;;  %vm67_vm9 = vcmask 523712   ;;  %vm74_vm10 = vcmask 458112   ;;  %vm81_vm11 = vcmask 392512  }
   0x6   :  { %16 = vrot.lane.b32.xlu0 %v120_v2, %s151_s22  ;;  %s153_s30 = smov 88   ;;  %s154_s2 = smov 80   ;;  %v125_v6 = vld [vmem:[%s225_s0 + $0x9] ss:$16 sm:%s49_s28]   ;;  %vm88_vm12 = vcmask 326912   ;;  %vm95_vm13 = vcmask 261312  }
   0x7   :  { %30 = vrot.lane.b32.xlu1 %v122_v3, %s152_s23  ;;  %v126_v7 = vld [vmem:[%s225_s0 + $0x8] ss:$16 sm:%s56_s29]   ;;  %s63_s7 = smov 3  ;;  %s70_s8 = smov 3  ;;  %vm102_vm14 = vcmask 195712   ;;  %vm109_vm15 = vcmask 130112  }
   0x8   :  { %s155_s9 = smov 72   ;;  %s156_s10 = smov 64   ;;  %v127_v8 = vld [vmem:[%s225_s0 + $0x7] ss:$16 sm:%s63_s7]   ;;  %v128_v9 = vld [vmem:[%s225_s0 + $0x6] ss:$16 sm:%s70_s8]  }
   0x9   :  { %s2_s13 = smov 3  ;;  %s77_s16 = smov 3 }
   0xa   :  { %37 = vrot.lane.b32.xlu0 %v123_v4, %s153_s30  ;;  %v3_v10 = vld [vmem:[%s225_s0] ss:$16 sm:%s2_s13]   ;;  %s84_s19 = smov 3  ;;  %s157_s20 = smov 56  }
   0xb   :  { %44 = vrot.lane.b32.xlu1 %v124_v5, %s154_s2  ;;  %5 = vst.msk [vmem:[#allocation0] sm:$0x3] %vm4_vm0, %v3_v10   ;;  %s158_s21 = smov 48   ;;  %v129_v11 = vld [vmem:[%s225_s0 + $0x5] ss:$16 sm:%s77_s16]   ;;  %s91_s26 = smov 3 }
   0xc   :  { %v130_v12 = vld [vmem:[%s225_s0 + $0x4] ss:$16 sm:%s84_s19]   ;;  %s98_s27 = smov 3  ;;  %s159_s28 = smov 40   ;;  %v131_v13 = vld [vmem:[%s225_s0 + $0x3] ss:$16 sm:%s91_s26]  }
   0xd   :  { %s160_s29 = smov 32   ;;  %v132_v14 = vld [vmem:[%s225_s0 + $0x2] ss:$16 sm:%s98_s27]   ;;  %s105_s5 = smov 3 }
   0xe   :  { %51 = vrot.lane.b32.xlu0 %v125_v6, %s155_s9  ;;  %s161_s6 = smov 24   ;;  %s162_s7 = smov 16   ;;  %v133_v15 = vld [vmem:[%s225_s0 + $0x1] ss:$16 sm:%s105_s5]  }
   0xf   :  { %58 = vrot.lane.b32.xlu1 %v126_v7, %s156_s10  ;;  %s163_s0 = smov 8  }
  0x12   :  { %65 = vrot.lane.b32.xlu0 %v127_v8, %s157_s20 }
  0x13   :  { %72 = vrot.lane.b32.xlu1 %v128_v9, %s158_s21 }
  0x16   :  { %79 = vrot.lane.b32.xlu0 %v129_v11, %s159_s28 }
  0x17   :  { %86 = vrot.lane.b32.xlu1 %v130_v12, %s160_s29 }
  0x1a   :  { %93 = vrot.lane.b32.xlu0 %v131_v13, %s161_s6 }
  0x1b   :  { %100 = vrot.lane.b32.xlu1 %v132_v14, %s162_s7 }
  0x1e   :  { %107 = vrot.lane.b32.xlu0 %v133_v15, %s163_s0 }
  0x74   :  { %v10_v16 = vpop.permute.xlu0 %9  }
  0x75   :  { %12 = vst.msk [vmem:[#allocation0] sm:$0x3] %vm11_vm1, %v10_v16   ;;  %v24_v17 = vpop.permute.xlu1 %23  }
  0x78   :  { %v17_v18 = vpop.permute.xlu0 %16  }
  0x79   :  { %19 = vst.msk [vmem:[#allocation0] sm:$0x3] %vm18_vm2, %v17_v18   ;;  %v31_v19 = vpop.permute.xlu1 %30  }
  0x7a   :  { %26 = vst.msk [vmem:[#allocation0] sm:$0x3] %vm25_vm3, %v24_v17  }
  0x7b   :  { %33 = vst.msk [vmem:[#allocation0] sm:$0x3] %vm32_vm4, %v31_v19  }
  0x7c   :  { %v38_v20 = vpop.permute.xlu0 %37  }
  0x7d   :  { %40 = vst.msk [vmem:[#allocation0] sm:$0x3] %vm39_vm5, %v38_v20   ;;  %v45_v21 = vpop.permute.xlu1 %44  }
  0x7e   :  { %47 = vst.msk [vmem:[#allocation0] sm:$0x3] %vm46_vm6, %v45_v21  }
  0x80   :  { %v52_v22 = vpop.permute.xlu0 %51  }
  0x81   :  { %54 = vst.msk [vmem:[#allocation0] sm:$0x3] %vm53_vm7, %v52_v22   ;;  %v59_v23 = vpop.permute.xlu1 %58  }
  0x82   :  { %61 = vst.msk [vmem:[#allocation0] sm:$0x3] %vm60_vm8, %v59_v23  }
  0x84   :  { %v66_v24 = vpop.permute.xlu0 %65  }
  0x85   :  { %68 = vst.msk [vmem:[#allocation0] sm:$0x3] %vm67_vm9, %v66_v24   ;;  %v73_v25 = vpop.permute.xlu1 %72  }
  0x86   :  { %75 = vst.msk [vmem:[#allocation0] sm:$0x3] %vm74_vm10, %v73_v25  }
  0x88   :  { %v80_v26 = vpop.permute.xlu0 %79  }
  0x89   :  { %82 = vst.msk [vmem:[#allocation0] sm:$0x3] %vm81_vm11, %v80_v26   ;;  %v87_v27 = vpop.permute.xlu1 %86  }
  0x8a   :  { %89 = vst.msk [vmem:[#allocation0] sm:$0x3] %vm88_vm12, %v87_v27  }
  0x8c   :  { %v94_v28 = vpop.permute.xlu0 %93  }
  0x8d   :  { %96 = vst.msk [vmem:[#allocation0] sm:$0x3] %vm95_vm13, %v94_v28   ;;  %v101_v29 = vpop.permute.xlu1 %100  }
  0x8e   :  { %103 = vst.msk [vmem:[#allocation0] sm:$0x3] %vm102_vm14, %v101_v29  }
  0x90   :  { %v108_v30 = vpop.permute.xlu0 %107  }
  0x91   :  { %110 = vst.msk [vmem:[#allocation0] sm:$0x3] %vm109_vm15, %v108_v30  }
  0x98   :  { %v115_v31 = vld [vmem:[#allocation0] sm:$0x3] }
  0x99   :  { %118 = vst [vmem:[%s226_s1] sm:$0x3] %v115_v31 }

// kernel: closed_call.273
= control target key start
LH: loop header
LB: loop body
LE: loop exit
PB: predicated region body
PF: predicated region fallthrough
CT: control target
= control target key end

     0   :  { %vm99_vm0 = vcmask 1041408   ;;  %vm74_vm1 = vcmask 31744   ;;  %vm221_vm2 = vcmask 57344   ;;  %v406_v10 = vmov 0.0   ;;  %s599_s1 = inlined_call_operand.vmem [shape: bf16[4,8], index: 1, kind: input, shape index: {}]   ;;  %s600_s0 = inlined_call_operand.vmem [shape: bf16[128,4], index: 0, kind: input, shape index: {}]   ;;  %s601_s3 = inlined_call_operand.vmem [shape: f32[128,8], index: 3, kind: output, shape index: {0}]   ;;  %s602_s2 = inlined_call_operand.vmem [shape: f32[2,8], index: 2, kind: input, shape index: {}]   ;;  %s603_s4 = inlined_call_operand.vmem [shape: f32[2,8], index: 4, kind: output, shape index: {1}]  }
   0x1   :  { %v33_v0 = vld [vmem:[%s599_s1] sm:$0x3]  ;;  %v397_v3 = vld [vmem:[%s600_s0 + $0x8] sm:$0xff]   ;;  %v398_v4 = vld [vmem:[%s600_s0 + $0x10] sm:$0xff]   ;;  %222 = vst.msk [vmem:[#allocation2] sm:$0x1] %vm221_vm2, %v406_v10 }
   0x2   :  { %393 = vmatprep.subr.msk.bf16.mxu0 %vm99_vm0, %v33_v0  ;;  %v101_v1 = vsel %vm99_vm0, %v33_v0, 0  ;;  %v396_v2 = vld [vmem:[%s600_s0] sm:$0xff]   ;;  %394 = vmatprep.subr.msk.bf16.mxu1 %vm99_vm0, %v33_v0  ;;  %v401_v6 = vld [vmem:[%s600_s0 + $0x28] sm:$0xff]   ;;  %v402_v7 = vld [vmem:[%s600_s0 + $0x30] sm:$0xff]   ;;  %223 = vst.msk [vmem:[#allocation3] sm:$0x1] %vm221_vm2, %v406_v10 }
   0x3   :  { %374 = vmatpush3.bf16.msra.mxu0 %v101_v1  ;;  %392 = vmatpush3.bf16.msra.mxu1 %v101_v1  ;;  %v400_v5 = vld [vmem:[%s600_s0 + $0x20] sm:$0xff]   ;;  %v399_v8 = vld [vmem:[%s600_s0 + $0x18] sm:$0xff]   ;;  %vm200_vm3 = vcmask 64512  }
   0x4   :  { %375 = vmatprep.mubr.msk.bf16.mxu0 %vm74_vm1, %v396_v2  ;;  %383 = vmatprep.mubr.msk.bf16.mxu1 %vm74_vm1, %v400_v5  ;;  %v403_v9 = vld [vmem:[%s600_s0 + $0x38] sm:$0xff]  }
   0x6   :  { %376 = vmatmul.mubr.msk.bf16.vlgmr.msra.gmra.mxu0 %vm74_vm1, %v397_v3  ;;  %384 = vmatmul.mubr.msk.bf16.vlgmr.msra.gmra.mxu1 %vm74_vm1, %v401_v6 }
   0x7   :  { %379 = vmatprep.mubr.msk.bf16.mxu0 %vm74_vm1, %v398_v4  ;;  %387 = vmatprep.mubr.msk.bf16.mxu1 %vm74_vm1, %v402_v7 }
   0xe   :  { %380 = vmatmul.mubr.msk.bf16.gmra.mxu0 %vm74_vm1, %v399_v8  ;;  %388 = vmatmul.mubr.msk.bf16.gmra.mxu1 %vm74_vm1, %v403_v9 }
  0xc6   :  { %v377_v11 = vpop.f32.mrf.mxu0  ;;  %v477_v13 = vpop.f32.mrf.mxu1 }
  0xc7   :  { %203 = vst.msk [vmem:[%s601_s3 + $0x10] sm:$0xff] %vm200_vm3, %v377_v11  ;;  %211 = vst.msk [vmem:[%s601_s3 + $0x50] sm:$0xff] %vm200_vm3, %v477_v13  ;;  %v268_v18 = vmul.f32 %v377_v11, %v377_v11  ;;  %v228_v25 = vsel %vm200_vm3, %v377_v11, 0.0  ;;  %v276_v5 = vmul.f32 %v477_v13, %v477_v13  ;;  %v244_v10 = vsel %vm200_vm3, %v477_v13, 0.0 }
  0xc8   :  { %v137_v12 = vpop.f32.mrf.mxu0  ;;  %v169_v16 = vpop.f32.mrf.mxu1 }
  0xc9   :  { %201 = vst.msk [vmem:[%s601_s3] sm:$0xff] %vm200_vm3, %v137_v12  ;;  %v266_v15 = vmul.f32 %v137_v12, %v137_v12  ;;  %209 = vst.msk [vmem:[%s601_s3 + $0x40] sm:$0xff] %vm200_vm3, %v169_v16  ;;  %v225_v19 = vsel %vm200_vm3, %v137_v12, 0.0  ;;  %v285_v33 = vsel %vm200_vm3, %v268_v18, 0.0  ;;  %v274_v61 = vmul.f32 %v169_v16, %v169_v16 }
  0xca   :  { %v378_v14 = vpop.f32.mrf.mxu0  ;;  %v498_v22 = vpop.f32.mrf.mxu1  ;;  %v240_v1 = vsel %vm200_vm3, %v169_v16, 0.0  ;;  %v301_v16 = vsel %vm200_vm3, %v276_v5, 0.0 }
  0xcb   :  { %204 = vst.msk [vmem:[%s601_s3 + $0x18] sm:$0xff] %vm200_vm3, %v378_v14  ;;  %212 = vst.msk [vmem:[%s601_s3 + $0x58] sm:$0xff] %vm200_vm3, %v498_v22  ;;  %v282_v26 = vsel %vm200_vm3, %v266_v15, 0.0  ;;  %v269_v27 = vmul.f32 %v378_v14, %v378_v14  ;;  %v230_v34 = vsel %vm200_vm3, %v378_v14, 0.0  ;;  %v297_v6 = vsel %vm200_vm3, %v274_v61, 0.0 }
  0xcc   :  { %v140_v17 = vpop.f32.mrf.mxu0  ;;  %v172_v29 = vpop.f32.mrf.mxu1  ;;  %v277_v11 = vmul.f32 %v498_v22, %v498_v22 }
  0xcd   :  { %202 = vst.msk [vmem:[%s601_s3 + $0x8] sm:$0xff] %vm200_vm3, %v140_v17  ;;  %v226_v20 = vsel %vm200_vm3, %v140_v17, 0.0  ;;  %v267_v21 = vmul.f32 %v140_v17, %v140_v17  ;;  %210 = vst.msk [vmem:[%s601_s3 + $0x48] sm:$0xff] %vm200_vm3, %v172_v29  ;;  %v287_v40 = vsel %vm200_vm3, %v269_v27, 0.0  ;;  %v275_v2 = vmul.f32 %v172_v29, %v172_v29 }
  0xce   :  { %v227_v23 = vadd.f32 %v226_v20, %v225_v19  ;;  %v381_v24 = vpop.f32.mrf.mxu0  ;;  %v522_v36 = vpop.f32.mrf.mxu1  ;;  %v242_v7 = vsel %vm200_vm3, %v172_v29, 0.0  ;;  %v246_v17 = vsel %vm200_vm3, %v498_v22, 0.0 }
  0xcf   :  { %v283_v28 = vsel %vm200_vm3, %v267_v21, 0.0  ;;  %207 = vst.msk [vmem:[%s601_s3 + $0x30] sm:$0xff] %vm200_vm3, %v381_v24  ;;  %215 = vst.msk [vmem:[%s601_s3 + $0x70] sm:$0xff] %vm200_vm3, %v522_v36  ;;  %v272_v46 = vmul.f32 %v381_v24, %v381_v24  ;;  %v236_v53 = vsel %vm200_vm3, %v381_v24, 0.0  ;;  %v299_v12 = vsel %vm200_vm3, %v275_v2, 0.0 }
  0xd0   :  { %v229_v30 = vadd.f32 %v228_v25, %v227_v23  ;;  %v284_v31 = vadd.f32 %v283_v28, %v282_v26  ;;  %v153_v32 = vpop.f32.mrf.mxu0  ;;  %v185_v42 = vpop.f32.mrf.mxu1  ;;  %v303_v21 = vsel %vm200_vm3, %v277_v11, 0.0  ;;  %v280_v26 = vmul.f32 %v522_v36, %v522_v36 }
  0xd1   :  { %205 = vst.msk [vmem:[%s601_s3 + $0x20] sm:$0xff] %vm200_vm3, %v153_v32  ;;  %v270_v35 = vmul.f32 %v153_v32, %v153_v32  ;;  %v232_v41 = vsel %vm200_vm3, %v153_v32, 0.0  ;;  %213 = vst.msk [vmem:[%s601_s3 + $0x60] sm:$0xff] %vm200_vm3, %v185_v42  ;;  %v293_v59 = vsel %vm200_vm3, %v272_v46, 0.0  ;;  %v278_v18 = vmul.f32 %v185_v42, %v185_v42 }
  0xd2   :  { %v286_v37 = vadd.f32 %v285_v33, %v284_v31  ;;  %v231_v38 = vadd.f32 %v230_v34, %v229_v30  ;;  %v382_v39 = vpop.f32.mrf.mxu0  ;;  %v390_v50 = vpop.f32.mrf.mxu1  ;;  %v248_v23 = vsel %vm200_vm3, %v185_v42, 0.0  ;;  %v252_v22 = vsel %vm200_vm3, %v522_v36, 0.0 }
  0xd3   :  { %208 = vst.msk [vmem:[%s601_s3 + $0x38] sm:$0xff] %vm200_vm3, %v382_v39  ;;  %v289_v47 = vsel %vm200_vm3, %v270_v35, 0.0  ;;  %216 = vst.msk [vmem:[%s601_s3 + $0x78] sm:$0xff] %vm200_vm3, %v390_v50  ;;  %v273_v54 = vmul.f32 %v382_v39, %v382_v39  ;;  %v238_v60 = vsel %vm200_vm3, %v382_v39, 0.0  ;;  %v305_v27 = vsel %vm200_vm3, %v278_v18, 0.0 }
  0xd4   :  { %v233_v43 = vadd.f32 %v232_v41, %v231_v38  ;;  %v288_v44 = vadd.f32 %v287_v40, %v286_v37  ;;  %v156_v45 = vpop.f32.mrf.mxu0  ;;  %v188_v56 = vpop.f32.mrf.mxu1  ;;  %v281_v31 = vmul.f32 %v390_v50, %v390_v50  ;;  %v309_v35 = vsel %vm200_vm3, %v280_v26, 0.0 }
  0xd5   :  { %206 = vst.msk [vmem:[%s601_s3 + $0x28] sm:$0xff] %vm200_vm3, %v156_v45  ;;  %v234_v48 = vsel %vm200_vm3, %v156_v45, 0.0  ;;  %v271_v49 = vmul.f32 %v156_v45, %v156_v45  ;;  %214 = vst.msk [vmem:[%s601_s3 + $0x68] sm:$0xff] %vm200_vm3, %v188_v56  ;;  %v295_v0 = vsel %vm200_vm3, %v273_v54, 0.0  ;;  %v279_v13 = vmul.f32 %v188_v56, %v188_v56  ;;  %v265_v54 = vld [vmem:[#allocation3] sm:$0x1] }
  0xd6   :  { %v290_v51 = vadd.f32 %v289_v47, %v288_v44  ;;  %v235_v52 = vadd.f32 %v234_v48, %v233_v43  ;;  %v250_v28 = vsel %vm200_vm3, %v188_v56, 0.0  ;;  %v254_v37 = vsel %vm200_vm3, %v390_v50, 0.0 }
  0xd7   :  { %v291_v55 = vsel %vm200_vm3, %v271_v49, 0.0  ;;  %v307_v32 = vsel %vm200_vm3, %v279_v13, 0.0  ;;  %v311_v40 = vsel %vm200_vm3, %v281_v31, 0.0 }
  0xd8   :  { %v237_v57 = vadd.f32 %v236_v53, %v235_v52  ;;  %v292_v58 = vadd.f32 %v291_v55, %v290_v51  ;;  %v224_v51 = vld [vmem:[#allocation2] sm:$0x1] }
  0xda   :  { %v239_v62 = vadd.f32 %v238_v60, %v237_v57  ;;  %v294_v63 = vadd.f32 %v293_v59, %v292_v58 }
  0xdc   :  { %v296_v3 = vadd.f32 %v295_v0, %v294_v63  ;;  %v241_v4 = vadd.f32 %v240_v1, %v239_v62  ;;  %v331_v1 = vld [vmem:[%s602_s2] sm:$0x1] }
  0xde   :  { %v243_v8 = vadd.f32 %v242_v7, %v241_v4  ;;  %v298_v9 = vadd.f32 %v297_v6, %v296_v3  ;;  %v336_v4 = vld [vmem:[%s602_s2 + $0x1] sm:$0x1] }
  0xe0   :  { %v245_v14 = vadd.f32 %v244_v10, %v243_v8  ;;  %v300_v15 = vadd.f32 %v299_v12, %v298_v9 }
  0xe2   :  { %v302_v19 = vadd.f32 %v301_v16, %v300_v15  ;;  %v247_v20 = vadd.f32 %v246_v17, %v245_v14 }
  0xe4   :  { %v249_v24 = vadd.f32 %v248_v23, %v247_v20  ;;  %v304_v25 = vadd.f32 %v303_v21, %v302_v19 }
  0xe6   :  { %v306_v29 = vadd.f32 %v305_v27, %v304_v25  ;;  %v251_v30 = vadd.f32 %v250_v28, %v249_v24 }
  0xe8   :  { %v253_v33 = vadd.f32 %v252_v22, %v251_v30  ;;  %v308_v34 = vadd.f32 %v307_v32, %v306_v29 }
  0xea   :  { %v255_v38 = vadd.f32 %v254_v37, %v253_v33  ;;  %v310_v39 = vadd.f32 %v309_v35, %v308_v34 }
  0xec   :  { %v256_v41 = vrot.slane %v255_v38, 4  ;;  %v312_v42 = vadd.f32 %v311_v40, %v310_v39 }
  0xee   :  { %v257_v43 = vadd.f32 %v256_v41, %v255_v38  ;;  %v313_v44 = vrot.slane %v312_v42, 4 }
  0xf0   :  { %v258_v45 = vrot.slane %v257_v43, 2  ;;  %v314_v46 = vadd.f32 %v313_v44, %v312_v42 }
  0xf2   :  { %v259_v36 = vadd.f32 %v258_v45, %v257_v43  ;;  %v315_v47 = vrot.slane %v314_v46, 2 }
  0xf4   :  { %v260_v48 = vrot.slane %v259_v36, 1  ;;  %v316_v49 = vadd.f32 %v315_v47, %v314_v46 }
  0xf6   :  { %v261_v52 = vadd.f32 %v260_v48, %v259_v36  ;;  %v317_v53 = vrot.slane %v316_v49, 1 }
  0xf8   :  { %v262_v55 = vadd.f32 %v261_v52, %v224_v51  ;;  %v318_v50 = vadd.f32 %v317_v53, %v316_v49 }
  0xfa   :  { %264 = vst.msk [vmem:[#allocation2] sm:$0x1] %vm221_vm2, %v262_v55  ;;  %v319_v56 = vadd.f32 %v318_v50, %v265_v54 }
  0xfc   :  { %320 = vst.msk [vmem:[#allocation3] sm:$0x1] %vm221_vm2, %v319_v56 }
 0x101   :  { %v324_v57 = vld [vmem:[#allocation2] sm:$0x1] }
 0x102   :  { %v325_v58 = vmul.f32 0.0078125, %v324_v57 }
 0x103   :  { %v326_v59 = vld [vmem:[#allocation3] sm:$0x1] }
 0x104   :  { %v327_v60 = vmul.f32 0.0078125, %v326_v59  ;;  %v328_v61 = vmul.f32 %v325_v58, %v325_v58 }
 0x106   :  { %v329_v62 = vsub.f32 %v327_v60, %v328_v61 }
 0x108   :  { %v330_v63 = vmax.f32 %v329_v62, 0.0 }
 0x10a   :  { %v332_v0 = vadd.f32 1e-05, %v330_v63 }
 0x10c   :  { %404 = vrsqrt.f32 %v332_v0 }
 0x119   :  { %v405_v2 = vpop.eup %404 }
 0x11a   :  { %v334_v3 = vmul.f32 %v405_v2, %v331_v1 }
 0x11c   :  { %335 = vst.msk [vmem:[%s603_s4] sm:$0x1] %vm221_vm2, %v334_v3  ;;  %v337_v5 = vmul.f32 %v334_v3, %v325_v58 }
 0x11e   :  { %v338_v6 = vsub.f32 %v336_v4, %v337_v5 }
 0x120   :  { %339 = vst.msk [vmem:[%s603_s4 + $0x1] sm:$0x1] %vm221_vm2, %v338_v6 }

// kernel: closed_call.269
= control target key start
LH: loop header
LB: loop body
LE: loop exit
PB: predicated region body
PF: predicated region fallthrough
CT: control target
= control target key end

     0   :  { %v50_v7 = vmov 0.0   ;;  %s94_s0 = inlined_call_operand.vmem [shape: f32[8,128], index: 0, kind: input, shape index: {}]   ;;  %s95_s1 = inlined_call_operand.vmem [shape: f32[2,128], index: 1, kind: input, shape index: {}]   ;;  %s96_s2 = inlined_call_operand.vmem [shape: f32[8,128], index: 2, kind: input, shape index: {}, may-alias: {2,4}]   ;;  %s97_s4 = inlined_call_operand.vmem [shape: f32[8,128], index: 4, kind: output, shape index: {1}, may-alias: {2,4}]   ;;  %s98_s3 = inlined_call_operand.vmem [shape: bf16[8,128], index: 3, kind: output, shape index: {0}]  }
   0x1   :  { %v16_v0 = vld [vmem:[%s96_s2] sm:$0xff] }
   0x2   :  { %v17_v1 = vld [vmem:[%s94_s0] sm:$0xff] }
   0x3   :  { %v46_v2 = vld [vmem:[%s95_s1] ss:$0 sm:$0xff]  ;;  %v47_v4 = vld [vmem:[%s95_s1 + $0x1] ss:$0 sm:$0xff] }
   0x4   :  { %v23_v3 = vmul.f32 %v46_v2, %v17_v1 }
   0x6   :  { %v24_v5 = vadd.f32 %v23_v3, %v16_v0 }
   0x8   :  { %v30_v6 = vadd.f32 %v47_v4, %v24_v5 }
   0xa   :  { %vm31_vm0 = vcmp.ge.f32.partialorder %v30_v6, 1.0 }
   0xb   :  { %v48_v8 = vsel %vm31_vm0, 1.0, %v50_v7  ;;  %v36_v9 = vsel %vm31_vm0, 0.0, %v30_v6 }
   0xc   :  { %v34_v10 = vpack.c.bf16 %v48_v8, %v48_v8  ;;  %37 = vst [vmem:[%s97_s4] sm:$0xff] %v36_v9 }
   0xe   :  { %35 = vst [vmem:[%s98_s3] sm:$0xf] %v34_v10 }

// kernel: closed_call.268
= control target key start
LH: loop header
LB: loop body
LE: loop exit
PB: predicated region body
PF: predicated region fallthrough
CT: control target
= control target key end

     0   :  { %vm118_vm0 = vcmask 1041408   ;;  %vm93_vm1 = vcmask 293888   ;;  %vm240_vm2 = vcmask 57344   ;;  %v441_v12 = vmov 0.0   ;;  %s652_s1 = inlined_call_operand.vmem [shape: bf16[36,8], index: 1, kind: input, shape index: {}]   ;;  %s653_s0 = inlined_call_operand.vmem [shape: bf16[128,36], index: 0, kind: input, shape index: {}]   ;;  %s654_s3 = inlined_call_operand.vmem [shape: f32[128,8], index: 3, kind: output, shape index: {0}]   ;;  %s655_s2 = inlined_call_operand.vmem [shape: f32[2,8], index: 2, kind: input, shape index: {}]   ;;  %s656_s4 = inlined_call_operand.vmem [shape: f32[2,8], index: 4, kind: output, shape index: {1}]  }
   0x1   :  { %v428_v0 = vld [vmem:[%s652_s1 + $0x10] ss:$0 sps:$4 sm:$0x33]   ;;  %v429_v1 = vld [vmem:[%s652_s1 + $0x8] sm:$0xff]   ;;  %v431_v3 = vld [vmem:[%s653_s0] sm:$0xff]   ;;  %vm219_vm3 = vcmask 64512  }
   0x2   :  { %425 = vmatprep.subr.msk.bf16.mxu0 %vm118_vm0, %v428_v0  ;;  %v120_v2 = vsel %vm118_vm0, %v428_v0, 0  ;;  %426 = vmatprep.subr.msk.bf16.mxu1 %vm118_vm0, %v428_v0  ;;  %v430_v4 = vld [vmem:[%s652_s1] sm:$0xff]   ;;  %v432_v6 = vld [vmem:[%s653_s0 + $0x8] sm:$0xff]   ;;  %v433_v8 = vld [vmem:[%s653_s0 + $0x10] sm:$0xff]   ;;  %241 = vst.msk [vmem:[#allocation2] sm:$0x1] %vm240_vm2, %v441_v12 }
   0x3   :  { %398 = vmatpush3.bf16.msra.mxu0 %v120_v2  ;;  %422 = vmatpush3.bf16.msra.mxu1 %v120_v2  ;;  %v435_v5 = vld [vmem:[%s653_s0 + $0x20] sm:$0xff]   ;;  %v436_v7 = vld [vmem:[%s653_s0 + $0x28] sm:$0xff]   ;;  %v437_v9 = vld [vmem:[%s653_s0 + $0x30] sm:$0xff]   ;;  %242 = vst.msk [vmem:[#allocation3] sm:$0x1] %vm240_vm2, %v441_v12 }
   0x4   :  { %399 = vmatprep.subr.bf16.mxu0 %v429_v1  ;;  %420 = vmatprep.subr.bf16.mxu1 %v429_v1  ;;  %v434_v10 = vld [vmem:[%s653_s0 + $0x18] sm:$0xff]  }
   0x5   :  { %403 = vmatprep.mubr.msk.bf16.mxu0 %vm93_vm1, %v431_v3  ;;  %411 = vmatprep.mubr.msk.bf16.mxu1 %vm93_vm1, %v435_v5  ;;  %v438_v11 = vld [vmem:[%s653_s0 + $0x38] sm:$0xff]  }
   0x7   :  { %400 = vmatpush3.bf16.msra.mxu0 %v429_v1  ;;  %423 = vmatpush3.bf16.msra.mxu1 %v429_v1 }
   0x8   :  { %401 = vmatprep.subr.bf16.mxu0 %v430_v4  ;;  %421 = vmatprep.subr.bf16.mxu1 %v430_v4 }
   0xb   :  { %402 = vmatpush3.bf16.msra.mxu0 %v430_v4  ;;  %424 = vmatpush3.bf16.msra.mxu1 %v430_v4 }
   0xe   :  { %404 = vmatmul.mubr.msk.bf16.vlgmr.msra.gmra.mxu0 %vm93_vm1, %v432_v6  ;;  %412 = vmatmul.mubr.msk.bf16.vlgmr.msra.gmra.mxu1 %vm93_vm1, %v436_v7 }
   0xf   :  { %407 = vmatprep.mubr.msk.bf16.mxu0 %vm93_vm1, %v433_v8  ;;  %415 = vmatprep.mubr.msk.bf16.mxu1 %vm93_vm1, %v437_v9 }
  0x16   :  { %408 = vmatmul.mubr.msk.bf16.gmra.mxu0 %vm93_vm1, %v434_v10  ;;  %416 = vmatmul.mubr.msk.bf16.gmra.mxu1 %vm93_vm1, %v438_v11 }
  0xce   :  { %v405_v13 = vpop.f32.mrf.mxu0  ;;  %v510_v14 = vpop.f32.mrf.mxu1 }
  0xcf   :  { %222 = vst.msk [vmem:[%s654_s3 + $0x10] sm:$0xff] %vm219_vm3, %v405_v13  ;;  %230 = vst.msk [vmem:[%s654_s3 + $0x50] sm:$0xff] %vm219_vm3, %v510_v14  ;;  %v287_v22 = vmul.f32 %v405_v13, %v405_v13  ;;  %v247_v29 = vsel %vm219_vm3, %v405_v13, 0.0  ;;  %v295_v7 = vmul.f32 %v510_v14, %v510_v14  ;;  %v263_v12 = vsel %vm219_vm3, %v510_v14, 0.0 }
  0xd0   :  { %v156_v15 = vpop.f32.mrf.mxu0  ;;  %v521_v16 = vpop.f32.mrf.mxu1 }
  0xd1   :  { %220 = vst.msk [vmem:[%s654_s3] sm:$0xff] %vm219_vm3, %v156_v15  ;;  %228 = vst.msk [vmem:[%s654_s3 + $0x40] sm:$0xff] %vm219_vm3, %v521_v16  ;;  %v285_v19 = vmul.f32 %v156_v15, %v156_v15  ;;  %v244_v23 = vsel %vm219_vm3, %v156_v15, 0.0  ;;  %v304_v37 = vsel %vm219_vm3, %v287_v22, 0.0  ;;  %v293_v63 = vmul.f32 %v521_v16, %v521_v16 }
  0xd2   :  { %v406_v17 = vpop.f32.mrf.mxu0  ;;  %v532_v18 = vpop.f32.mrf.mxu1  ;;  %v259_v3 = vsel %vm219_vm3, %v521_v16, 0.0 }
  0xd3   :  { %223 = vst.msk [vmem:[%s654_s3 + $0x18] sm:$0xff] %vm219_vm3, %v406_v17  ;;  %231 = vst.msk [vmem:[%s654_s3 + $0x58] sm:$0xff] %vm219_vm3, %v532_v18  ;;  %v301_v30 = vsel %vm219_vm3, %v285_v19, 0.0  ;;  %v288_v31 = vmul.f32 %v406_v17, %v406_v17  ;;  %v249_v38 = vsel %vm219_vm3, %v406_v17, 0.0  ;;  %v316_v8 = vsel %vm219_vm3, %v293_v63, 0.0 }
  0xd4   :  { %v159_v20 = vpop.f32.mrf.mxu0  ;;  %v191_v21 = vpop.f32.mrf.mxu1  ;;  %v296_v13 = vmul.f32 %v532_v18, %v532_v18  ;;  %v320_v19 = vsel %vm219_vm3, %v295_v7, 0.0 }
  0xd5   :  { %221 = vst.msk [vmem:[%s654_s3 + $0x8] sm:$0xff] %vm219_vm3, %v159_v20  ;;  %v245_v24 = vsel %vm219_vm3, %v159_v20, 0.0  ;;  %v286_v25 = vmul.f32 %v159_v20, %v159_v20  ;;  %229 = vst.msk [vmem:[%s654_s3 + $0x48] sm:$0xff] %vm219_vm3, %v191_v21  ;;  %v306_v44 = vsel %vm219_vm3, %v288_v31, 0.0  ;;  %v294_v4 = vmul.f32 %v191_v21, %v191_v21 }
  0xd6   :  { %v246_v26 = vadd.f32 %v245_v24, %v244_v23  ;;  %v409_v27 = vpop.f32.mrf.mxu0  ;;  %v553_v28 = vpop.f32.mrf.mxu1  ;;  %v261_v9 = vsel %vm219_vm3, %v191_v21, 0.0  ;;  %v265_v20 = vsel %vm219_vm3, %v532_v18, 0.0  ;;  %v322_v24 = vsel %vm219_vm3, %v296_v13, 0.0 }
  0xd7   :  { %v302_v32 = vsel %vm219_vm3, %v286_v25, 0.0  ;;  %226 = vst.msk [vmem:[%s654_s3 + $0x30] sm:$0xff] %vm219_vm3, %v409_v27  ;;  %234 = vst.msk [vmem:[%s654_s3 + $0x70] sm:$0xff] %vm219_vm3, %v553_v28  ;;  %v291_v50 = vmul.f32 %v409_v27, %v409_v27  ;;  %v255_v56 = vsel %vm219_vm3, %v409_v27, 0.0  ;;  %v318_v15 = vsel %vm219_vm3, %v294_v4, 0.0 }
  0xd8   :  { %v248_v33 = vadd.f32 %v247_v29, %v246_v26  ;;  %v303_v34 = vadd.f32 %v302_v32, %v301_v30  ;;  %v172_v35 = vpop.f32.mrf.mxu0  ;;  %v204_v36 = vpop.f32.mrf.mxu1  ;;  %v299_v29 = vmul.f32 %v553_v28, %v553_v28  ;;  %v271_v18 = vsel %vm219_vm3, %v553_v28, 0.0 }
  0xd9   :  { %224 = vst.msk [vmem:[%s654_s3 + $0x20] sm:$0xff] %vm219_vm3, %v172_v35  ;;  %v289_v39 = vmul.f32 %v172_v35, %v172_v35  ;;  %232 = vst.msk [vmem:[%s654_s3 + $0x60] sm:$0xff] %vm219_vm3, %v204_v36  ;;  %v251_v45 = vsel %vm219_vm3, %v172_v35, 0.0  ;;  %v312_v61 = vsel %vm219_vm3, %v291_v50, 0.0  ;;  %v297_v22 = vmul.f32 %v204_v36, %v204_v36 }
  0xda   :  { %v305_v40 = vadd.f32 %v304_v37, %v303_v34  ;;  %v250_v41 = vadd.f32 %v249_v38, %v248_v33  ;;  %v410_v42 = vpop.f32.mrf.mxu0  ;;  %v577_v43 = vpop.f32.mrf.mxu1  ;;  %v267_v25 = vsel %vm219_vm3, %v204_v36, 0.0  ;;  %v328_v38 = vsel %vm219_vm3, %v299_v29, 0.0 }
  0xdb   :  { %227 = vst.msk [vmem:[%s654_s3 + $0x38] sm:$0xff] %vm219_vm3, %v410_v42  ;;  %235 = vst.msk [vmem:[%s654_s3 + $0x78] sm:$0xff] %vm219_vm3, %v577_v43  ;;  %v308_v51 = vsel %vm219_vm3, %v289_v39, 0.0  ;;  %v292_v57 = vmul.f32 %v410_v42, %v410_v42  ;;  %v257_v62 = vsel %vm219_vm3, %v410_v42, 0.0  ;;  %v324_v30 = vsel %vm219_vm3, %v297_v22, 0.0 }
  0xdc   :  { %v252_v46 = vadd.f32 %v251_v45, %v250_v41  ;;  %v307_v47 = vadd.f32 %v306_v44, %v305_v40  ;;  %v175_v48 = vpop.f32.mrf.mxu0  ;;  %v207_v49 = vpop.f32.mrf.mxu1  ;;  %v300_v34 = vmul.f32 %v577_v43, %v577_v43  ;;  %v273_v39 = vsel %vm219_vm3, %v577_v43, 0.0 }
  0xdd   :  { %225 = vst.msk [vmem:[%s654_s3 + $0x28] sm:$0xff] %vm219_vm3, %v175_v48  ;;  %v253_v52 = vsel %vm219_vm3, %v175_v48, 0.0  ;;  %v290_v53 = vmul.f32 %v175_v48, %v175_v48  ;;  %233 = vst.msk [vmem:[%s654_s3 + $0x68] sm:$0xff] %vm219_vm3, %v207_v49  ;;  %v314_v2 = vsel %vm219_vm3, %v292_v57, 0.0  ;;  %v298_v14 = vmul.f32 %v207_v49, %v207_v49 }
  0xde   :  { %v309_v54 = vadd.f32 %v308_v51, %v307_v47  ;;  %v254_v55 = vadd.f32 %v253_v52, %v252_v46  ;;  %v269_v31 = vsel %vm219_vm3, %v207_v49, 0.0  ;;  %v330_v42 = vsel %vm219_vm3, %v300_v34, 0.0 }
  0xdf   :  { %v310_v58 = vsel %vm219_vm3, %v290_v53, 0.0  ;;  %v326_v35 = vsel %vm219_vm3, %v298_v14, 0.0  ;;  %v243_v53 = vld [vmem:[#allocation2] sm:$0x1] }
  0xe0   :  { %v256_v59 = vadd.f32 %v255_v56, %v254_v55  ;;  %v311_v60 = vadd.f32 %v310_v58, %v309_v54  ;;  %v284_v56 = vld [vmem:[#allocation3] sm:$0x1] }
  0xe2   :  { %v258_v0 = vadd.f32 %v257_v62, %v256_v59  ;;  %v313_v1 = vadd.f32 %v312_v61, %v311_v60 }
  0xe4   :  { %v315_v5 = vadd.f32 %v314_v2, %v313_v1  ;;  %v260_v6 = vadd.f32 %v259_v3, %v258_v0  ;;  %v350_v3 = vld [vmem:[%s655_s2] sm:$0x1] }
  0xe6   :  { %v262_v10 = vadd.f32 %v261_v9, %v260_v6  ;;  %v317_v11 = vadd.f32 %v316_v8, %v315_v5  ;;  %v355_v6 = vld [vmem:[%s655_s2 + $0x1] sm:$0x1] }
  0xe8   :  { %v264_v16 = vadd.f32 %v263_v12, %v262_v10  ;;  %v319_v17 = vadd.f32 %v318_v15, %v317_v11 }
  0xea   :  { %v321_v23 = vadd.f32 %v320_v19, %v319_v17  ;;  %v266_v21 = vadd.f32 %v265_v20, %v264_v16 }
  0xec   :  { %v268_v26 = vadd.f32 %v267_v25, %v266_v21  ;;  %v323_v27 = vadd.f32 %v322_v24, %v321_v23 }
  0xee   :  { %v325_v32 = vadd.f32 %v324_v30, %v323_v27  ;;  %v270_v33 = vadd.f32 %v269_v31, %v268_v26 }
  0xf0   :  { %v272_v36 = vadd.f32 %v271_v18, %v270_v33  ;;  %v327_v37 = vadd.f32 %v326_v35, %v325_v32 }
  0xf2   :  { %v274_v40 = vadd.f32 %v273_v39, %v272_v36  ;;  %v329_v41 = vadd.f32 %v328_v38, %v327_v37 }
  0xf4   :  { %v275_v44 = vrot.slane %v274_v40, 4  ;;  %v331_v45 = vadd.f32 %v330_v42, %v329_v41 }
  0xf6   :  { %v276_v46 = vadd.f32 %v275_v44, %v274_v40  ;;  %v332_v28 = vrot.slane %v331_v45, 4 }
  0xf8   :  { %v277_v47 = vrot.slane %v276_v46, 2  ;;  %v333_v48 = vadd.f32 %v332_v28, %v331_v45 }
  0xfa   :  { %v278_v49 = vadd.f32 %v277_v47, %v276_v46  ;;  %v334_v50 = vrot.slane %v333_v48, 2 }
  0xfc   :  { %v279_v51 = vrot.slane %v278_v49, 1  ;;  %v335_v52 = vadd.f32 %v334_v50, %v333_v48 }
  0xfe   :  { %v280_v54 = vadd.f32 %v279_v51, %v278_v49  ;;  %v336_v55 = vrot.slane %v335_v52, 1 }
 0x100   :  { %v281_v57 = vadd.f32 %v280_v54, %v243_v53  ;;  %v337_v43 = vadd.f32 %v336_v55, %v335_v52 }
 0x102   :  { %283 = vst.msk [vmem:[#allocation2] sm:$0x1] %vm240_vm2, %v281_v57  ;;  %v338_v58 = vadd.f32 %v337_v43, %v284_v56 }
 0x104   :  { %339 = vst.msk [vmem:[#allocation3] sm:$0x1] %vm240_vm2, %v338_v58 }
 0x109   :  { %v343_v59 = vld [vmem:[#allocation2] sm:$0x1] }
 0x10a   :  { %v344_v60 = vmul.f32 0.0078125, %v343_v59 }
 0x10b   :  { %v345_v61 = vld [vmem:[#allocation3] sm:$0x1] }
 0x10c   :  { %v346_v62 = vmul.f32 0.0078125, %v345_v61  ;;  %v347_v63 = vmul.f32 %v344_v60, %v344_v60 }
 0x10e   :  { %v348_v0 = vsub.f32 %v346_v62, %v347_v63 }
 0x110   :  { %v349_v1 = vmax.f32 %v348_v0, 0.0 }
 0x112   :  { %v351_v2 = vadd.f32 1e-05, %v349_v1 }
 0x114   :  { %439 = vrsqrt.f32 %v351_v2 }
 0x121   :  { %v440_v4 = vpop.eup %439 }
 0x122   :  { %v353_v5 = vmul.f32 %v440_v4, %v350_v3 }
 0x124   :  { %354 = vst.msk [vmem:[%s656_s4] sm:$0x1] %vm240_vm2, %v353_v5  ;;  %v356_v7 = vmul.f32 %v353_v5, %v344_v60 }
 0x126   :  { %v357_v8 = vsub.f32 %v355_v6, %v356_v7 }
 0x128   :  { %358 = vst.msk [vmem:[%s656_s4 + $0x1] sm:$0x1] %vm240_vm2, %v357_v8 }

// kernel: closed_call.274
= control target key start
LH: loop header
LB: loop body
LE: loop exit
PB: predicated region body
PF: predicated region fallthrough
CT: control target
= control target key end

     0   :  { %v72_v13 = vmov 0.0   ;;  %s135_s0 = inlined_call_operand.vmem [shape: f32[8,128], index: 0, kind: input, shape index: {}]   ;;  %s136_s1 = inlined_call_operand.vmem [shape: f32[2,128], index: 1, kind: input, shape index: {}]   ;;  %s137_s2 = inlined_call_operand.vmem [shape: f32[8,128], index: 2, kind: input, shape index: {}]   ;;  %s138_s3 = inlined_call_operand.vmem [shape: f32[2,128], index: 3, kind: input, shape index: {}]   ;;  %s139_s4 = inlined_call_operand.vmem [shape: f32[8,128], index: 4, kind: input, shape index: {}, may-alias: {4,6}]   ;;  %s140_s6 = inlined_call_operand.vmem [shape: f32[8,128], index: 6, kind: output, shape index: {1}, may-alias: {4,6}]   ;;  %s141_s5 = inlined_call_operand.vmem [shape: bf16[8,128], index: 5, kind: output, shape index: {0}]  }
   0x1   :  { %v22_v0 = vld [vmem:[%s135_s0] sm:$0xff] }
   0x2   :  { %v66_v1 = vld [vmem:[%s136_s1] ss:$0 sm:$0xff]  ;;  %v67_v2 = vld [vmem:[%s136_s1 + $0x1] ss:$0 sm:$0xff] }
   0x3   :  { %v28_v3 = vmul.f32 %v66_v1, %v22_v0  ;;  %v35_v4 = vld [vmem:[%s137_s2] sm:$0xff] }
   0x4   :  { %v68_v5 = vld [vmem:[%s138_s3] ss:$0 sm:$0xff]  ;;  %v69_v6 = vld [vmem:[%s138_s3 + $0x1] ss:$0 sm:$0xff] }
   0x5   :  { %v41_v7 = vmul.f32 %v68_v5, %v35_v4  ;;  %v48_v8 = vld [vmem:[%s139_s4] sm:$0xff]  ;;  %v34_v9 = vadd.f32 %v67_v2, %v28_v3 }
   0x7   :  { %v47_v10 = vadd.f32 %v69_v6, %v41_v7  ;;  %v49_v11 = vadd.f32 %v48_v8, %v34_v9 }
   0x9   :  { %v50_v12 = vadd.f32 %v49_v11, %v47_v10 }
   0xb   :  { %vm51_vm0 = vcmp.ge.f32.partialorder %v50_v12, 1.0 }
   0xc   :  { %v70_v14 = vsel %vm51_vm0, 1.0, %v72_v13  ;;  %v56_v15 = vsel %vm51_vm0, 0.0, %v50_v12 }
   0xd   :  { %v54_v16 = vpack.c.bf16 %v70_v14, %v70_v14  ;;  %57 = vst [vmem:[%s140_s6] sm:$0xff] %v56_v15 }
   0xf   :  { %55 = vst [vmem:[%s141_s5] sm:$0xf] %v54_v16 }

// kernel: closed_call.270
= control target key start
LH: loop header
LB: loop body
LE: loop exit
PB: predicated region body
PF: predicated region fallthrough
CT: control target
= control target key end

     0   :  { %vm134_vm0 = vcmask 1043456   ;;  %vm109_vm1 = vcmask 588800   ;;  %vm256_vm2 = vcmask 57344   ;;  %v471_v14 = vmov 0.0   ;;  %s688_s1 = inlined_call_operand.vmem [shape: bf16[72,8], index: 1, kind: input, shape index: {}]   ;;  %s689_s0 = inlined_call_operand.vmem [shape: bf16[128,72], index: 0, kind: input, shape index: {}]   ;;  %s690_s3 = inlined_call_operand.vmem [shape: f32[128,8], index: 3, kind: output, shape index: {0}]   ;;  %s691_s2 = inlined_call_operand.vmem [shape: f32[2,8], index: 2, kind: input, shape index: {}]   ;;  %s692_s4 = inlined_call_operand.vmem [shape: f32[2,8], index: 4, kind: output, shape index: {1}]  }
   0x1   :  { %v456_v0 = vld [vmem:[%s688_s1 + $0x20] ss:$0 sps:$4 sm:$0xff]   ;;  %v457_v1 = vld [vmem:[%s688_s1 + $0x18] sm:$0xff]   ;;  %v458_v3 = vld [vmem:[%s688_s1 + $0x10] sm:$0xff]   ;;  %257 = vst.msk [vmem:[#allocation2] sm:$0x1] %vm256_vm2, %v471_v14 }
   0x2   :  { %453 = vmatprep.subr.msk.bf16.mxu0 %vm134_vm0, %v456_v0  ;;  %v136_v2 = vsel %vm134_vm0, %v456_v0, 0  ;;  %454 = vmatprep.subr.msk.bf16.mxu1 %vm134_vm0, %v456_v0  ;;  %v461_v4 = vld [vmem:[%s689_s0] sm:$0xff]   ;;  %v459_v5 = vld [vmem:[%s688_s1 + $0x8] sm:$0xff]   ;;  %v463_v10 = vld [vmem:[%s689_s0 + $0x10] sm:$0xff]   ;;  %258 = vst.msk [vmem:[#allocation3] sm:$0x1] %vm256_vm2, %v471_v14 }
   0x3   :  { %418 = vmatpush3.bf16.msra.mxu0 %v136_v2  ;;  %448 = vmatpush3.bf16.msra.mxu1 %v136_v2  ;;  %v465_v6 = vld [vmem:[%s689_s0 + $0x20] sm:$0xff]   ;;  %v462_v8 = vld [vmem:[%s689_s0 + $0x8] sm:$0xff]   ;;  %v467_v11 = vld [vmem:[%s689_s0 + $0x30] sm:$0xff]   ;;  %vm235_vm3 = vcmask 64512  }
   0x4   :  { %419 = vmatprep.subr.bf16.mxu0 %v457_v1  ;;  %444 = vmatprep.subr.bf16.mxu1 %v457_v1  ;;  %v460_v7 = vld [vmem:[%s688_s1] sm:$0xff]   ;;  %v466_v9 = vld [vmem:[%s689_s0 + $0x28] sm:$0xff]   ;;  %v464_v12 = vld [vmem:[%s689_s0 + $0x18] sm:$0xff]  }
   0x5   :  { %427 = vmatprep.mubr.msk.bf16.mxu0 %vm109_vm1, %v461_v4  ;;  %435 = vmatprep.mubr.msk.bf16.mxu1 %vm109_vm1, %v465_v6  ;;  %v468_v13 = vld [vmem:[%s689_s0 + $0x38] sm:$0xff]  }
   0x7   :  { %420 = vmatpush3.bf16.msra.mxu0 %v457_v1  ;;  %449 = vmatpush3.bf16.msra.mxu1 %v457_v1 }
   0x8   :  { %421 = vmatprep.subr.bf16.mxu0 %v458_v3  ;;  %445 = vmatprep.subr.bf16.mxu1 %v458_v3 }
   0xb   :  { %422 = vmatpush3.bf16.msra.mxu0 %v458_v3  ;;  %450 = vmatpush3.bf16.msra.mxu1 %v458_v3 }
   0xc   :  { %423 = vmatprep.subr.bf16.mxu0 %v459_v5  ;;  %446 = vmatprep.subr.bf16.mxu1 %v459_v5 }
   0xf   :  { %424 = vmatpush3.bf16.msra.mxu0 %v459_v5  ;;  %451 = vmatpush3.bf16.msra.mxu1 %v459_v5 }
  0x10   :  { %425 = vmatprep.subr.bf16.mxu0 %v460_v7  ;;  %447 = vmatprep.subr.bf16.mxu1 %v460_v7 }
  0x13   :  { %426 = vmatpush3.bf16.msra.mxu0 %v460_v7  ;;  %452 = vmatpush3.bf16.msra.mxu1 %v460_v7 }
  0x16   :  { %428 = vmatmul.mubr.msk.bf16.vlgmr.msra.gmra.mxu0 %vm109_vm1, %v462_v8  ;;  %436 = vmatmul.mubr.msk.bf16.vlgmr.msra.gmra.mxu1 %vm109_vm1, %v466_v9 }
  0x17   :  { %431 = vmatprep.mubr.msk.bf16.mxu0 %vm109_vm1, %v463_v10  ;;  %439 = vmatprep.mubr.msk.bf16.mxu1 %vm109_vm1, %v467_v11 }
  0x1e   :  { %432 = vmatmul.mubr.msk.bf16.gmra.mxu0 %vm109_vm1, %v464_v12  ;;  %440 = vmatmul.mubr.msk.bf16.gmra.mxu1 %vm109_vm1, %v468_v13 }
  0xd6   :  { %v429_v15 = vpop.f32.mrf.mxu0  ;;  %v546_v16 = vpop.f32.mrf.mxu1 }
  0xd7   :  { %238 = vst.msk [vmem:[%s690_s3 + $0x10] sm:$0xff] %vm235_vm3, %v429_v15  ;;  %246 = vst.msk [vmem:[%s690_s3 + $0x50] sm:$0xff] %vm235_vm3, %v546_v16  ;;  %v303_v24 = vmul.f32 %v429_v15, %v429_v15  ;;  %v263_v31 = vsel %vm235_vm3, %v429_v15, 0.0  ;;  %v311_v9 = vmul.f32 %v546_v16, %v546_v16  ;;  %v279_v14 = vsel %vm235_vm3, %v546_v16, 0.0 }
  0xd8   :  { %v172_v17 = vpop.f32.mrf.mxu0  ;;  %v557_v18 = vpop.f32.mrf.mxu1 }
  0xd9   :  { %236 = vst.msk [vmem:[%s690_s3] sm:$0xff] %vm235_vm3, %v172_v17  ;;  %244 = vst.msk [vmem:[%s690_s3 + $0x40] sm:$0xff] %vm235_vm3, %v557_v18  ;;  %v301_v21 = vmul.f32 %v172_v17, %v172_v17  ;;  %v260_v25 = vsel %vm235_vm3, %v172_v17, 0.0  ;;  %v320_v39 = vsel %vm235_vm3, %v303_v24, 0.0  ;;  %v309_v1 = vmul.f32 %v557_v18, %v557_v18 }
  0xda   :  { %v430_v19 = vpop.f32.mrf.mxu0  ;;  %v568_v20 = vpop.f32.mrf.mxu1  ;;  %v275_v5 = vsel %vm235_vm3, %v557_v18, 0.0 }
  0xdb   :  { %239 = vst.msk [vmem:[%s690_s3 + $0x18] sm:$0xff] %vm235_vm3, %v430_v19  ;;  %247 = vst.msk [vmem:[%s690_s3 + $0x58] sm:$0xff] %vm235_vm3, %v568_v20  ;;  %v317_v32 = vsel %vm235_vm3, %v301_v21, 0.0  ;;  %v304_v33 = vmul.f32 %v430_v19, %v430_v19  ;;  %v265_v40 = vsel %vm235_vm3, %v430_v19, 0.0  ;;  %v332_v10 = vsel %vm235_vm3, %v309_v1, 0.0 }
  0xdc   :  { %v175_v22 = vpop.f32.mrf.mxu0  ;;  %v207_v23 = vpop.f32.mrf.mxu1  ;;  %v312_v15 = vmul.f32 %v568_v20, %v568_v20  ;;  %v336_v21 = vsel %vm235_vm3, %v311_v9, 0.0 }
  0xdd   :  { %237 = vst.msk [vmem:[%s690_s3 + $0x8] sm:$0xff] %vm235_vm3, %v175_v22  ;;  %v261_v26 = vsel %vm235_vm3, %v175_v22, 0.0  ;;  %v302_v27 = vmul.f32 %v175_v22, %v175_v22  ;;  %245 = vst.msk [vmem:[%s690_s3 + $0x48] sm:$0xff] %vm235_vm3, %v207_v23  ;;  %v322_v46 = vsel %vm235_vm3, %v304_v33, 0.0  ;;  %v310_v6 = vmul.f32 %v207_v23, %v207_v23 }
  0xde   :  { %v262_v28 = vadd.f32 %v261_v26, %v260_v25  ;;  %v433_v29 = vpop.f32.mrf.mxu0  ;;  %v589_v30 = vpop.f32.mrf.mxu1  ;;  %v277_v11 = vsel %vm235_vm3, %v207_v23, 0.0  ;;  %v281_v22 = vsel %vm235_vm3, %v568_v20, 0.0  ;;  %v338_v26 = vsel %vm235_vm3, %v312_v15, 0.0 }
  0xdf   :  { %v318_v34 = vsel %vm235_vm3, %v302_v27, 0.0  ;;  %242 = vst.msk [vmem:[%s690_s3 + $0x30] sm:$0xff] %vm235_vm3, %v433_v29  ;;  %250 = vst.msk [vmem:[%s690_s3 + $0x70] sm:$0xff] %vm235_vm3, %v589_v30  ;;  %v307_v52 = vmul.f32 %v433_v29, %v433_v29  ;;  %v271_v58 = vsel %vm235_vm3, %v433_v29, 0.0  ;;  %v334_v17 = vsel %vm235_vm3, %v310_v6, 0.0 }
  0xe0   :  { %v264_v35 = vadd.f32 %v263_v31, %v262_v28  ;;  %v319_v36 = vadd.f32 %v318_v34, %v317_v32  ;;  %v188_v37 = vpop.f32.mrf.mxu0  ;;  %v220_v38 = vpop.f32.mrf.mxu1  ;;  %v315_v31 = vmul.f32 %v589_v30, %v589_v30  ;;  %v287_v20 = vsel %vm235_vm3, %v589_v30, 0.0 }
  0xe1   :  { %240 = vst.msk [vmem:[%s690_s3 + $0x20] sm:$0xff] %vm235_vm3, %v188_v37  ;;  %v305_v41 = vmul.f32 %v188_v37, %v188_v37  ;;  %248 = vst.msk [vmem:[%s690_s3 + $0x60] sm:$0xff] %vm235_vm3, %v220_v38  ;;  %v267_v47 = vsel %vm235_vm3, %v188_v37, 0.0  ;;  %v328_v63 = vsel %vm235_vm3, %v307_v52, 0.0  ;;  %v313_v24 = vmul.f32 %v220_v38, %v220_v38 }
  0xe2   :  { %v321_v42 = vadd.f32 %v320_v39, %v319_v36  ;;  %v266_v43 = vadd.f32 %v265_v40, %v264_v35  ;;  %v434_v44 = vpop.f32.mrf.mxu0  ;;  %v613_v45 = vpop.f32.mrf.mxu1  ;;  %v283_v27 = vsel %vm235_vm3, %v220_v38, 0.0  ;;  %v344_v40 = vsel %vm235_vm3, %v315_v31, 0.0 }
  0xe3   :  { %243 = vst.msk [vmem:[%s690_s3 + $0x38] sm:$0xff] %vm235_vm3, %v434_v44  ;;  %251 = vst.msk [vmem:[%s690_s3 + $0x78] sm:$0xff] %vm235_vm3, %v613_v45  ;;  %v324_v53 = vsel %vm235_vm3, %v305_v41, 0.0  ;;  %v308_v59 = vmul.f32 %v434_v44, %v434_v44  ;;  %v273_v0 = vsel %vm235_vm3, %v434_v44, 0.0  ;;  %v340_v32 = vsel %vm235_vm3, %v313_v24, 0.0 }
  0xe4   :  { %v268_v48 = vadd.f32 %v267_v47, %v266_v43  ;;  %v323_v49 = vadd.f32 %v322_v46, %v321_v42  ;;  %v191_v50 = vpop.f32.mrf.mxu0  ;;  %v223_v51 = vpop.f32.mrf.mxu1  ;;  %v316_v36 = vmul.f32 %v613_v45, %v613_v45  ;;  %v289_v41 = vsel %vm235_vm3, %v613_v45, 0.0 }
  0xe5   :  { %241 = vst.msk [vmem:[%s690_s3 + $0x28] sm:$0xff] %vm235_vm3, %v191_v50  ;;  %v269_v54 = vsel %vm235_vm3, %v191_v50, 0.0  ;;  %v306_v55 = vmul.f32 %v191_v50, %v191_v50  ;;  %249 = vst.msk [vmem:[%s690_s3 + $0x68] sm:$0xff] %vm235_vm3, %v223_v51  ;;  %v330_v4 = vsel %vm235_vm3, %v308_v59, 0.0  ;;  %v314_v16 = vmul.f32 %v223_v51, %v223_v51 }
  0xe6   :  { %v325_v56 = vadd.f32 %v324_v53, %v323_v49  ;;  %v270_v57 = vadd.f32 %v269_v54, %v268_v48  ;;  %v285_v33 = vsel %vm235_vm3, %v223_v51, 0.0  ;;  %v346_v44 = vsel %vm235_vm3, %v316_v36, 0.0 }
  0xe7   :  { %v326_v60 = vsel %vm235_vm3, %v306_v55, 0.0  ;;  %v342_v37 = vsel %vm235_vm3, %v314_v16, 0.0  ;;  %v259_v55 = vld [vmem:[#allocation2] sm:$0x1] }
  0xe8   :  { %v272_v61 = vadd.f32 %v271_v58, %v270_v57  ;;  %v327_v62 = vadd.f32 %v326_v60, %v325_v56  ;;  %v300_v58 = vld [vmem:[#allocation3] sm:$0x1] }
  0xea   :  { %v274_v2 = vadd.f32 %v273_v0, %v272_v61  ;;  %v329_v3 = vadd.f32 %v328_v63, %v327_v62 }
  0xec   :  { %v331_v7 = vadd.f32 %v330_v4, %v329_v3  ;;  %v276_v8 = vadd.f32 %v275_v5, %v274_v2  ;;  %v366_v5 = vld [vmem:[%s691_s2] sm:$0x1] }
  0xee   :  { %v278_v12 = vadd.f32 %v277_v11, %v276_v8  ;;  %v333_v13 = vadd.f32 %v332_v10, %v331_v7  ;;  %v371_v8 = vld [vmem:[%s691_s2 + $0x1] sm:$0x1] }
  0xf0   :  { %v280_v18 = vadd.f32 %v279_v14, %v278_v12  ;;  %v335_v19 = vadd.f32 %v334_v17, %v333_v13 }
  0xf2   :  { %v337_v25 = vadd.f32 %v336_v21, %v335_v19  ;;  %v282_v23 = vadd.f32 %v281_v22, %v280_v18 }
  0xf4   :  { %v284_v28 = vadd.f32 %v283_v27, %v282_v23  ;;  %v339_v29 = vadd.f32 %v338_v26, %v337_v25 }
  0xf6   :  { %v341_v34 = vadd.f32 %v340_v32, %v339_v29  ;;  %v286_v35 = vadd.f32 %v285_v33, %v284_v28 }
  0xf8   :  { %v288_v38 = vadd.f32 %v287_v20, %v286_v35  ;;  %v343_v39 = vadd.f32 %v342_v37, %v341_v34 }
  0xfa   :  { %v290_v42 = vadd.f32 %v289_v41, %v288_v38  ;;  %v345_v43 = vadd.f32 %v344_v40, %v343_v39 }
  0xfc   :  { %v291_v46 = vrot.slane %v290_v42, 4  ;;  %v347_v47 = vadd.f32 %v346_v44, %v345_v43 }
  0xfe   :  { %v292_v48 = vadd.f32 %v291_v46, %v290_v42  ;;  %v348_v30 = vrot.slane %v347_v47, 4 }
 0x100   :  { %v293_v49 = vrot.slane %v292_v48, 2  ;;  %v349_v50 = vadd.f32 %v348_v30, %v347_v47 }
 0x102   :  { %v294_v51 = vadd.f32 %v293_v49, %v292_v48  ;;  %v350_v52 = vrot.slane %v349_v50, 2 }
 0x104   :  { %v295_v53 = vrot.slane %v294_v51, 1  ;;  %v351_v54 = vadd.f32 %v350_v52, %v349_v50 }
 0x106   :  { %v296_v56 = vadd.f32 %v295_v53, %v294_v51  ;;  %v352_v57 = vrot.slane %v351_v54, 1 }
 0x108   :  { %v297_v59 = vadd.f32 %v296_v56, %v259_v55  ;;  %v353_v45 = vadd.f32 %v352_v57, %v351_v54 }
 0x10a   :  { %299 = vst.msk [vmem:[#allocation2] sm:$0x1] %vm256_vm2, %v297_v59  ;;  %v354_v60 = vadd.f32 %v353_v45, %v300_v58 }
 0x10c   :  { %355 = vst.msk [vmem:[#allocation3] sm:$0x1] %vm256_vm2, %v354_v60 }
 0x111   :  { %v359_v61 = vld [vmem:[#allocation2] sm:$0x1] }
 0x112   :  { %v360_v62 = vmul.f32 0.0078125, %v359_v61 }
 0x113   :  { %v361_v63 = vld [vmem:[#allocation3] sm:$0x1] }
 0x114   :  { %v362_v0 = vmul.f32 0.0078125, %v361_v63  ;;  %v363_v1 = vmul.f32 %v360_v62, %v360_v62 }
 0x116   :  { %v364_v2 = vsub.f32 %v362_v0, %v363_v1 }
 0x118   :  { %v365_v3 = vmax.f32 %v364_v2, 0.0 }
 0x11a   :  { %v367_v4 = vadd.f32 1e-05, %v365_v3 }
 0x11c   :  { %469 = vrsqrt.f32 %v367_v4 }
 0x129   :  { %v470_v6 = vpop.eup %469 }
 0x12a   :  { %v369_v7 = vmul.f32 %v470_v6, %v366_v5 }
 0x12c   :  { %370 = vst.msk [vmem:[%s692_s4] sm:$0x1] %vm256_vm2, %v369_v7  ;;  %v372_v9 = vmul.f32 %v369_v7, %v360_v62 }
 0x12e   :  { %v373_v10 = vsub.f32 %v371_v8, %v372_v9 }
 0x130   :  { %374 = vst.msk [vmem:[%s692_s4 + $0x1] sm:$0x1] %vm256_vm2, %v373_v10 }

// kernel: tile.251
= control target key start
LH: loop header
LB: loop body
LE: loop exit
PB: predicated region body
PF: predicated region fallthrough
CT: control target
= control target key end

     0   :  { %s7_s6 = smov 3  ;;  %s21_s9 = smov 3  ;;  %vm4_vm0 = vcmask 130048   ;;  %vm11_vm1 = vcmask 1048448   ;;  %vm18_vm2 = vcmask 917248   ;;  %vm25_vm3 = vcmask 786048   ;;  %s121_s0 = inlined_call_operand.vmem [shape: f32[2,8,16], index: 0, kind: input, shape index: {}]   ;;  %s122_s1 = inlined_call_operand.vmem [shape: f32[2,128], index: 1, kind: output, shape index: {}]  }
   0x1   :  { %v63_v0 = vld [vmem:[%s121_s0 + $0x7] ss:$8 sm:%s7_s6]   ;;  %s77_s10 = smov 112   ;;  %v65_v1 = vld [vmem:[%s121_s0 + $0x5] ss:$8 sm:%s21_s9]   ;;  %s14_s13 = smov 3 }
   0x2   :  { %9 = vrot.lane.b32.xlu0 %v63_v0, %s77_s10  ;;  %s78_s14 = smov 80   ;;  %v64_v2 = vld [vmem:[%s121_s0 + $0x6] ss:$8 sm:%s14_s13]   ;;  %s28_s17 = smov 3  ;;  %vm32_vm4 = vcmask 654848   ;;  %vm39_vm5 = vcmask 523648  }
   0x3   :  { %23 = vrot.lane.b32.xlu1 %v65_v1, %s78_s14  ;;  %v66_v3 = vld [vmem:[%s121_s0 + $0x4] ss:$8 sm:%s28_s17]   ;;  %s35_s20 = smov 3  ;;  %s42_s21 = smov 3  ;;  %vm46_vm6 = vcmask 392448   ;;  %vm53_vm7 = vcmask 261248  }
   0x4   :  { %s79_s22 = smov 96   ;;  %s80_s23 = smov 64   ;;  %v67_v4 = vld [vmem:[%s121_s0 + $0x3] ss:$8 sm:%s35_s20]   ;;  %v68_v5 = vld [vmem:[%s121_s0 + $0x2] ss:$8 sm:%s42_s21]  }
   0x5   :  { %s2_s26 = smov 3  ;;  %s49_s29 = smov 3 }
   0x6   :  { %16 = vrot.lane.b32.xlu0 %v64_v2, %s79_s22  ;;  %v3_v6 = vld [vmem:[%s121_s0] ss:$8 sm:%s2_s26]   ;;  %s81_s3 = smov 48   ;;  %s82_s4 = smov 32  }
   0x7   :  { %30 = vrot.lane.b32.xlu1 %v66_v3, %s80_s23  ;;  %5 = vst.msk [vmem:[#allocation0] sm:$0x3] %vm4_vm0, %v3_v6   ;;  %v69_v7 = vld [vmem:[%s121_s0 + $0x1] ss:$8 sm:%s49_s29]   ;;  %s83_s0 = smov 16  }
   0xa   :  { %37 = vrot.lane.b32.xlu0 %v67_v4, %s81_s3 }
   0xb   :  { %44 = vrot.lane.b32.xlu1 %v68_v5, %s82_s4 }
   0xe   :  { %51 = vrot.lane.b32.xlu0 %v69_v7, %s83_s0 }
  0x74   :  { %v10_v8 = vpop.permute.xlu0 %9  }
  0x75   :  { %12 = vst.msk [vmem:[#allocation0] sm:$0x3] %vm11_vm1, %v10_v8   ;;  %v24_v9 = vpop.permute.xlu1 %23  }
  0x78   :  { %v17_v10 = vpop.permute.xlu0 %16  }
  0x79   :  { %19 = vst.msk [vmem:[#allocation0] sm:$0x3] %vm18_vm2, %v17_v10   ;;  %v31_v11 = vpop.permute.xlu1 %30  }
  0x7a   :  { %26 = vst.msk [vmem:[#allocation0] sm:$0x3] %vm25_vm3, %v24_v9  }
  0x7b   :  { %33 = vst.msk [vmem:[#allocation0] sm:$0x3] %vm32_vm4, %v31_v11  }
  0x7c   :  { %v38_v12 = vpop.permute.xlu0 %37  }
  0x7d   :  { %40 = vst.msk [vmem:[#allocation0] sm:$0x3] %vm39_vm5, %v38_v12   ;;  %v45_v13 = vpop.permute.xlu1 %44  }
  0x7e   :  { %47 = vst.msk [vmem:[#allocation0] sm:$0x3] %vm46_vm6, %v45_v13  }
  0x80   :  { %v52_v14 = vpop.permute.xlu0 %51  }
  0x81   :  { %54 = vst.msk [vmem:[#allocation0] sm:$0x3] %vm53_vm7, %v52_v14  }
  0x88   :  { %v59_v15 = vld [vmem:[#allocation0] sm:$0x3] }
  0x89   :  { %62 = vst [vmem:[%s122_s1] sm:$0x3] %v59_v15 }

// kernel: closed_call.275
= control target key start
LH: loop header
LB: loop body
LE: loop exit
PB: predicated region body
PF: predicated region fallthrough
CT: control target
= control target key end

     0   :  { %s86_s22 = smov 120   ;;  %vm72_vm0 = vcmask 58368   ;;  %s177_s0 = inlined_call_operand.vmem [shape: bf16[8,2,4,16], index: 0, kind: input, shape index: {}]   ;;  %s178_s1 = inlined_call_operand.vmem [shape: bf16[8,4,8], index: 1, kind: output, shape index: {}]  }
   0x1   :  { %v12_v0 = vld [vmem:[%s177_s0 + $0x8] sm:$0x3]  ;;  %v13_v1 = vld [vmem:[%s177_s0 + $0xa] sm:$0x3]  ;;  %v8_v2 = vld [vmem:[%s177_s0] sm:$0x3] }
   0x2   :  { %v26_v3 = vmax.bf16 %v13_v1, %v12_v0  ;;  %v9_v4 = vld [vmem:[%s177_s0 + $0x2] sm:$0x3]  ;;  %v14_v5 = vld [vmem:[%s177_s0 + $0xc] sm:$0x3]  ;;  %v15_v6 = vld [vmem:[%s177_s0 + $0xe] sm:$0x3] }
   0x3   :  { %v24_v7 = vmax.bf16 %v9_v4, %v8_v2  ;;  %v10_v8 = vld [vmem:[%s177_s0 + $0x4] sm:$0x3]  ;;  %v11_v9 = vld [vmem:[%s177_s0 + $0x6] sm:$0x3]  ;;  %v27_v10 = vmax.bf16 %v15_v6, %v14_v5  ;;  %v18_v12 = vld [vmem:[%s177_s0 + $0x14] sm:$0x3] }
   0x4   :  { %44 = vrot.lane.b32.xlu1 %v26_v3, %s86_s22  ;;  %v25_v11 = vmax.bf16 %v11_v9, %v10_v8  ;;  %v19_v13 = vld [vmem:[%s177_s0 + $0x16] sm:$0x3]  ;;  %v16_v14 = vld [vmem:[%s177_s0 + $0x10] sm:$0x3]  ;;  %v17_v15 = vld [vmem:[%s177_s0 + $0x12] sm:$0x3] }
   0x5   :  { %40 = vrot.lane.b32.xlu0 %v24_v7, %s86_s22  ;;  %v29_v16 = vmax.bf16 %v19_v13, %v18_v12  ;;  %v28_v17 = vmax.bf16 %v17_v15, %v16_v14  ;;  %v22_v18 = vld [vmem:[%s177_s0 + $0x1c] sm:$0x3]  ;;  %v23_v19 = vld [vmem:[%s177_s0 + $0x1e] sm:$0x3]  ;;  %v20_v20 = vld [vmem:[%s177_s0 + $0x18] sm:$0x3] }
   0x6   :  { %v21_v21 = vld [vmem:[%s177_s0 + $0x1a] sm:$0x3]  ;;  %v31_v22 = vmax.bf16 %v23_v19, %v22_v18 }
   0x7   :  { %v30_v23 = vmax.bf16 %v21_v21, %v20_v20 }
   0x8   :  { %46 = vrot.lane.b32.xlu1 %v27_v10, %s86_s22 }
   0x9   :  { %42 = vrot.lane.b32.xlu0 %v25_v11, %s86_s22 }
   0xc   :  { %50 = vrot.lane.b32.xlu1 %v29_v16, %s86_s22 }
   0xd   :  { %48 = vrot.lane.b32.xlu0 %v28_v17, %s86_s22 }
  0x10   :  { %54 = vrot.lane.b32.xlu1 %v31_v22, %s86_s22 }
  0x11   :  { %52 = vrot.lane.b32.xlu0 %v30_v23, %s86_s22 }
  0x76   :  { %v45_v24 = vpop.permute.xlu1 %44 }
  0x77   :  { %v66_v25 = vmax.bf16 %v45_v24, %v26_v3  ;;  %v41_v26 = vpop.permute.xlu0 %40 }
  0x78   :  { %v64_v27 = vmax.bf16 %v41_v26, %v24_v7 }
  0x79   :  { %75 = vst.msk [vmem:[%s178_s1 + $0x4] sm:$0x3] %vm72_vm0, %v66_v25 }
  0x7a   :  { %73 = vst.msk [vmem:[%s178_s1] sm:$0x3] %vm72_vm0, %v64_v27  ;;  %v47_v28 = vpop.permute.xlu1 %46 }
  0x7b   :  { %v67_v29 = vmax.bf16 %v47_v28, %v27_v10  ;;  %v43_v30 = vpop.permute.xlu0 %42 }
  0x7c   :  { %v65_v31 = vmax.bf16 %v43_v30, %v25_v11 }
  0x7d   :  { %76 = vst.msk [vmem:[%s178_s1 + $0x6] sm:$0x3] %vm72_vm0, %v67_v29 }
  0x7e   :  { %74 = vst.msk [vmem:[%s178_s1 + $0x2] sm:$0x3] %vm72_vm0, %v65_v31  ;;  %v51_v32 = vpop.permute.xlu1 %50 }
  0x7f   :  { %v69_v33 = vmax.bf16 %v51_v32, %v29_v16  ;;  %v49_v34 = vpop.permute.xlu0 %48 }
  0x80   :  { %v68_v35 = vmax.bf16 %v49_v34, %v28_v17 }
  0x81   :  { %78 = vst.msk [vmem:[%s178_s1 + $0xa] sm:$0x3] %vm72_vm0, %v69_v33 }
  0x82   :  { %77 = vst.msk [vmem:[%s178_s1 + $0x8] sm:$0x3] %vm72_vm0, %v68_v35  ;;  %v55_v36 = vpop.permute.xlu1 %54 }
  0x83   :  { %v71_v37 = vmax.bf16 %v55_v36, %v31_v22  ;;  %v53_v38 = vpop.permute.xlu0 %52 }
  0x84   :  { %v70_v39 = vmax.bf16 %v53_v38, %v30_v23 }
  0x85   :  { %80 = vst.msk [vmem:[%s178_s1 + $0xe] sm:$0x3] %vm72_vm0, %v71_v37 }
  0x86   :  { %79 = vst.msk [vmem:[%s178_s1 + $0xc] sm:$0x3] %vm72_vm0, %v70_v39 }

// kernel: closed_call.281
= control target key start
LH: loop header
LB: loop body
LE: loop exit
PB: predicated region body
PF: predicated region fallthrough
CT: control target
= control target key end

     0   :  { %vm39_vm0 = vcmask 1043456   ;;  %vm32_vm1 = vcmask 64512   ;;  %vm101_vm2 = vcmask 122880   ;;  %v187_v4 = vmov 0.0   ;;  %s264_s1 = inlined_call_operand.vmem [shape: bf16[8,16], index: 1, kind: input, shape index: {}]   ;;  %s265_s0 = inlined_call_operand.vmem [shape: bf16[32,8], index: 0, kind: input, shape index: {}]   ;;  %s266_s3 = inlined_call_operand.vmem [shape: f32[32,16], index: 3, kind: output, shape index: {0}]   ;;  %s267_s2 = inlined_call_operand.vmem [shape: f32[2,16], index: 2, kind: input, shape index: {}]   ;;  %s268_s4 = inlined_call_operand.vmem [shape: f32[2,16], index: 4, kind: output, shape index: {1}]  }
   0x1   :  { %v21_v0 = vld [vmem:[%s264_s1] sm:$0xf]  ;;  %v184_v3 = vld [vmem:[%s265_s0 + $0x8] sm:$0xff]   ;;  %102 = vst.msk [vmem:[#allocation2] sm:$0x1] %vm101_vm2, %v187_v4  ;;  %vm92_vm3 = vcmask 130048  }
   0x2   :  { %181 = vmatprep.subr.msk.bf16.mxu0 %vm39_vm0, %v21_v0  ;;  %v41_v1 = vsel %vm39_vm0, %v21_v0, 0  ;;  %v183_v2 = vld [vmem:[%s265_s0] sm:$0xff]   ;;  %103 = vst.msk [vmem:[#allocation3] sm:$0x1] %vm101_vm2, %v187_v4 }
   0x3   :  { %176 = vmatpush3.bf16.msra.mxu0 %v41_v1  ;;  %177 = vmatprep.mubr.msk.bf16.mxu0 %vm32_vm1, %v183_v2  ;;  %v151_v51 = vld [vmem:[%s267_s2] sm:$0x1]  ;;  %v156_v54 = vld [vmem:[%s267_s2 + $0x1] sm:$0x1] }
   0x6   :  { %178 = vmatmul.mubr.msk.bf16.vlgmr.msra.gmra.mxu0 %vm32_vm1, %v184_v3 }
   0x8   :  { %v104_v36 = vld [vmem:[#allocation2] sm:$0x1] }
   0x9   :  { %v121_v39 = vld [vmem:[#allocation3] sm:$0x1] }
  0xc6   :  { %v179_v5 = vpop.f32.mrf.mxu0 }
  0xc7   :  { %95 = vst.msk [vmem:[%s266_s3 + $0x10] sm:$0xff] %vm92_vm3, %v179_v5  ;;  %v124_v10 = vmul.f32 %v179_v5, %v179_v5  ;;  %v108_v15 = vsel %vm92_vm3, %v179_v5, 0.0 }
  0xc8   :  { %v77_v6 = vpop.f32.mrf.mxu0 }
  0xc9   :  { %93 = vst.msk [vmem:[%s266_s3] sm:$0xff] %vm92_vm3, %v77_v6  ;;  %v122_v8 = vmul.f32 %v77_v6, %v77_v6  ;;  %v105_v11 = vsel %vm92_vm3, %v77_v6, 0.0  ;;  %v129_v21 = vsel %vm92_vm3, %v124_v10, 0.0 }
  0xca   :  { %v180_v7 = vpop.f32.mrf.mxu0 }
  0xcb   :  { %96 = vst.msk [vmem:[%s266_s3 + $0x18] sm:$0xff] %vm92_vm3, %v180_v7  ;;  %v126_v16 = vsel %vm92_vm3, %v122_v8, 0.0  ;;  %v125_v17 = vmul.f32 %v180_v7, %v180_v7  ;;  %v110_v22 = vsel %vm92_vm3, %v180_v7, 0.0 }
  0xcc   :  { %v80_v9 = vpop.f32.mrf.mxu0 }
  0xcd   :  { %94 = vst.msk [vmem:[%s266_s3 + $0x8] sm:$0xff] %vm92_vm3, %v80_v9  ;;  %v106_v12 = vsel %vm92_vm3, %v80_v9, 0.0  ;;  %v123_v13 = vmul.f32 %v80_v9, %v80_v9  ;;  %v131_v25 = vsel %vm92_vm3, %v125_v17, 0.0 }
  0xce   :  { %v107_v14 = vadd.f32 %v106_v12, %v105_v11 }
  0xcf   :  { %v127_v18 = vsel %vm92_vm3, %v123_v13, 0.0 }
  0xd0   :  { %v109_v19 = vadd.f32 %v108_v15, %v107_v14  ;;  %v128_v20 = vadd.f32 %v127_v18, %v126_v16 }
  0xd2   :  { %v111_v23 = vadd.f32 %v110_v22, %v109_v19  ;;  %v130_v24 = vadd.f32 %v129_v21, %v128_v20 }
  0xd4   :  { %v112_v26 = vrot.slane %v111_v23, 4  ;;  %v132_v27 = vadd.f32 %v131_v25, %v130_v24 }
  0xd6   :  { %v113_v28 = vadd.f32 %v112_v26, %v111_v23  ;;  %v133_v29 = vrot.slane %v132_v27, 4 }
  0xd8   :  { %v114_v30 = vrot.slane %v113_v28, 2  ;;  %v134_v31 = vadd.f32 %v133_v29, %v132_v27 }
  0xda   :  { %v115_v32 = vadd.f32 %v114_v30, %v113_v28  ;;  %v135_v33 = vrot.slane %v134_v31, 2 }
  0xdc   :  { %v116_v34 = vrot.slane %v115_v32, 1  ;;  %v136_v35 = vadd.f32 %v135_v33, %v134_v31 }
  0xde   :  { %v117_v37 = vadd.f32 %v116_v34, %v115_v32  ;;  %v137_v38 = vrot.slane %v136_v35, 1 }
  0xe0   :  { %v118_v40 = vadd.f32 %v117_v37, %v104_v36  ;;  %v138_v41 = vadd.f32 %v137_v38, %v136_v35 }
  0xe2   :  { %120 = vst.msk [vmem:[#allocation2] sm:$0x1] %vm101_vm2, %v118_v40  ;;  %v139_v42 = vadd.f32 %v138_v41, %v121_v39 }
  0xe4   :  { %140 = vst.msk [vmem:[#allocation3] sm:$0x1] %vm101_vm2, %v139_v42 }
  0xe9   :  { %v144_v43 = vld [vmem:[#allocation2] sm:$0x1] }
  0xea   :  { %v145_v44 = vmul.f32 0.03125, %v144_v43 }
  0xeb   :  { %v146_v45 = vld [vmem:[#allocation3] sm:$0x1] }
  0xec   :  { %v147_v46 = vmul.f32 0.03125, %v146_v45  ;;  %v148_v47 = vmul.f32 %v145_v44, %v145_v44 }
  0xee   :  { %v149_v48 = vsub.f32 %v147_v46, %v148_v47 }
  0xf0   :  { %v150_v49 = vmax.f32 %v149_v48, 0.0 }
  0xf2   :  { %v152_v50 = vadd.f32 1e-05, %v150_v49 }
  0xf4   :  { %185 = vrsqrt.f32 %v152_v50 }
 0x101   :  { %v186_v52 = vpop.eup %185 }
 0x102   :  { %v154_v53 = vmul.f32 %v186_v52, %v151_v51 }
 0x104   :  { %155 = vst.msk [vmem:[%s268_s4] sm:$0x1] %vm101_vm2, %v154_v53  ;;  %v157_v55 = vmul.f32 %v154_v53, %v145_v44 }
 0x106   :  { %v158_v56 = vsub.f32 %v156_v54, %v157_v55 }
 0x108   :  { %159 = vst.msk [vmem:[%s268_s4 + $0x1] sm:$0x1] %vm101_vm2, %v158_v56 }

// kernel: closed_call.276
= control target key start
LH: loop header
LB: loop body
LE: loop exit
PB: predicated region body
PF: predicated region fallthrough
CT: control target
= control target key end

     0   :  { %vm74_vm0 = vcmask 1043456   ;;  %vm67_vm1 = vcmask 588800   ;;  %vm136_vm2 = vcmask 122880   ;;  %v244_v8 = vmov 0.0   ;;  %s333_s1 = inlined_call_operand.vmem [shape: bf16[72,16], index: 1, kind: input, shape index: {}]   ;;  %s334_s0 = inlined_call_operand.vmem [shape: bf16[32,72], index: 0, kind: input, shape index: {}]   ;;  %s335_s3 = inlined_call_operand.vmem [shape: f32[32,16], index: 3, kind: output, shape index: {0}]   ;;  %s336_s2 = inlined_call_operand.vmem [shape: f32[2,16], index: 2, kind: input, shape index: {}]   ;;  %s337_s4 = inlined_call_operand.vmem [shape: f32[2,16], index: 4, kind: output, shape index: {1}]  }
   0x1   :  { %v235_v0 = vld [vmem:[%s333_s1 + $0x20] ss:$0 sps:$4 sm:$0xff]   ;;  %v236_v1 = vld [vmem:[%s333_s1 + $0x18] sm:$0xff]   ;;  %v237_v3 = vld [vmem:[%s333_s1 + $0x10] sm:$0xff]   ;;  %137 = vst.msk [vmem:[#allocation2] sm:$0x1] %vm136_vm2, %v244_v8 }
   0x2   :  { %233 = vmatprep.subr.msk.bf16.mxu0 %vm74_vm0, %v235_v0  ;;  %v76_v2 = vsel %vm74_vm0, %v235_v0, 0  ;;  %v240_v4 = vld [vmem:[%s334_s0] sm:$0xff]   ;;  %v238_v5 = vld [vmem:[%s333_s1 + $0x8] sm:$0xff]   ;;  %138 = vst.msk [vmem:[#allocation3] sm:$0x1] %vm136_vm2, %v244_v8  ;;  %vm127_vm3 = vcmask 130048  }
   0x3   :  { %220 = vmatpush3.bf16.msra.mxu0 %v76_v2  ;;  %229 = vmatprep.mubr.msk.bf16.mxu0 %vm67_vm1, %v240_v4  ;;  %v239_v6 = vld [vmem:[%s333_s1] sm:$0xff]   ;;  %v241_v7 = vld [vmem:[%s334_s0 + $0x8] sm:$0xff]  }
   0x4   :  { %221 = vmatprep.subr.bf16.mxu0 %v236_v1  ;;  %v186_v55 = vld [vmem:[%s336_s2] sm:$0x1]  ;;  %v191_v58 = vld [vmem:[%s336_s2 + $0x1] sm:$0x1] }
   0x7   :  { %222 = vmatpush3.bf16.msra.mxu0 %v236_v1 }
   0x8   :  { %223 = vmatprep.subr.bf16.mxu0 %v237_v3  ;;  %v139_v40 = vld [vmem:[#allocation2] sm:$0x1] }
   0x9   :  { %v156_v43 = vld [vmem:[#allocation3] sm:$0x1] }
   0xb   :  { %224 = vmatpush3.bf16.msra.mxu0 %v237_v3 }
   0xc   :  { %225 = vmatprep.subr.bf16.mxu0 %v238_v5 }
   0xf   :  { %226 = vmatpush3.bf16.msra.mxu0 %v238_v5 }
  0x10   :  { %227 = vmatprep.subr.bf16.mxu0 %v239_v6 }
  0x13   :  { %228 = vmatpush3.bf16.msra.mxu0 %v239_v6 }
  0x16   :  { %230 = vmatmul.mubr.msk.bf16.vlgmr.msra.gmra.mxu0 %vm67_vm1, %v241_v7 }
  0xd6   :  { %v231_v9 = vpop.f32.mrf.mxu0 }
  0xd7   :  { %130 = vst.msk [vmem:[%s335_s3 + $0x10] sm:$0xff] %vm127_vm3, %v231_v9  ;;  %v159_v14 = vmul.f32 %v231_v9, %v231_v9  ;;  %v143_v19 = vsel %vm127_vm3, %v231_v9, 0.0 }
  0xd8   :  { %v112_v10 = vpop.f32.mrf.mxu0 }
  0xd9   :  { %128 = vst.msk [vmem:[%s335_s3] sm:$0xff] %vm127_vm3, %v112_v10  ;;  %v157_v12 = vmul.f32 %v112_v10, %v112_v10  ;;  %v140_v15 = vsel %vm127_vm3, %v112_v10, 0.0  ;;  %v164_v25 = vsel %vm127_vm3, %v159_v14, 0.0 }
  0xda   :  { %v232_v11 = vpop.f32.mrf.mxu0 }
  0xdb   :  { %131 = vst.msk [vmem:[%s335_s3 + $0x18] sm:$0xff] %vm127_vm3, %v232_v11  ;;  %v161_v20 = vsel %vm127_vm3, %v157_v12, 0.0  ;;  %v160_v21 = vmul.f32 %v232_v11, %v232_v11  ;;  %v145_v26 = vsel %vm127_vm3, %v232_v11, 0.0 }
  0xdc   :  { %v115_v13 = vpop.f32.mrf.mxu0 }
  0xdd   :  { %129 = vst.msk [vmem:[%s335_s3 + $0x8] sm:$0xff] %vm127_vm3, %v115_v13  ;;  %v141_v16 = vsel %vm127_vm3, %v115_v13, 0.0  ;;  %v158_v17 = vmul.f32 %v115_v13, %v115_v13  ;;  %v166_v29 = vsel %vm127_vm3, %v160_v21, 0.0 }
  0xde   :  { %v142_v18 = vadd.f32 %v141_v16, %v140_v15 }
  0xdf   :  { %v162_v22 = vsel %vm127_vm3, %v158_v17, 0.0 }
  0xe0   :  { %v144_v23 = vadd.f32 %v143_v19, %v142_v18  ;;  %v163_v24 = vadd.f32 %v162_v22, %v161_v20 }
  0xe2   :  { %v146_v27 = vadd.f32 %v145_v26, %v144_v23  ;;  %v165_v28 = vadd.f32 %v164_v25, %v163_v24 }
  0xe4   :  { %v147_v30 = vrot.slane %v146_v27, 4  ;;  %v167_v31 = vadd.f32 %v166_v29, %v165_v28 }
  0xe6   :  { %v148_v32 = vadd.f32 %v147_v30, %v146_v27  ;;  %v168_v33 = vrot.slane %v167_v31, 4 }
  0xe8   :  { %v149_v34 = vrot.slane %v148_v32, 2  ;;  %v169_v35 = vadd.f32 %v168_v33, %v167_v31 }
  0xea   :  { %v150_v36 = vadd.f32 %v149_v34, %v148_v32  ;;  %v170_v37 = vrot.slane %v169_v35, 2 }
  0xec   :  { %v151_v38 = vrot.slane %v150_v36, 1  ;;  %v171_v39 = vadd.f32 %v170_v37, %v169_v35 }
  0xee   :  { %v152_v41 = vadd.f32 %v151_v38, %v150_v36  ;;  %v172_v42 = vrot.slane %v171_v39, 1 }
  0xf0   :  { %v153_v44 = vadd.f32 %v152_v41, %v139_v40  ;;  %v173_v45 = vadd.f32 %v172_v42, %v171_v39 }
  0xf2   :  { %155 = vst.msk [vmem:[#allocation2] sm:$0x1] %vm136_vm2, %v153_v44  ;;  %v174_v46 = vadd.f32 %v173_v45, %v156_v43 }
  0xf4   :  { %175 = vst.msk [vmem:[#allocation3] sm:$0x1] %vm136_vm2, %v174_v46 }
  0xf9   :  { %v179_v47 = vld [vmem:[#allocation2] sm:$0x1] }
  0xfa   :  { %v180_v48 = vmul.f32 0.03125, %v179_v47 }
  0xfb   :  { %v181_v49 = vld [vmem:[#allocation3] sm:$0x1] }
  0xfc   :  { %v182_v50 = vmul.f32 0.03125, %v181_v49  ;;  %v183_v51 = vmul.f32 %v180_v48, %v180_v48 }
  0xfe   :  { %v184_v52 = vsub.f32 %v182_v50, %v183_v51 }
 0x100   :  { %v185_v53 = vmax.f32 %v184_v52, 0.0 }
 0x102   :  { %v187_v54 = vadd.f32 1e-05, %v185_v53 }
 0x104   :  { %242 = vrsqrt.f32 %v187_v54 }
 0x111   :  { %v243_v56 = vpop.eup %242 }
 0x112   :  { %v189_v57 = vmul.f32 %v243_v56, %v186_v55 }
 0x114   :  { %190 = vst.msk [vmem:[%s337_s4] sm:$0x1] %vm136_vm2, %v189_v57  ;;  %v192_v59 = vmul.f32 %v189_v57, %v180_v48 }
 0x116   :  { %v193_v60 = vsub.f32 %v191_v58, %v192_v59 }
 0x118   :  { %194 = vst.msk [vmem:[%s337_s4 + $0x1] sm:$0x1] %vm136_vm2, %v193_v60 }

// kernel: closed_call.277
= control target key start
LH: loop header
LB: loop body
LE: loop exit
PB: predicated region body
PF: predicated region fallthrough
CT: control target
= control target key end

     0   :  { %v50_v7 = vmov 0.0   ;;  %s94_s0 = inlined_call_operand.vmem [shape: f32[4,128], index: 0, kind: input, shape index: {}]   ;;  %s95_s1 = inlined_call_operand.vmem [shape: f32[2,128], index: 1, kind: input, shape index: {}]   ;;  %s96_s2 = inlined_call_operand.vmem [shape: f32[4,128], index: 2, kind: input, shape index: {}, may-alias: {2,4}]   ;;  %s97_s4 = inlined_call_operand.vmem [shape: f32[4,128], index: 4, kind: output, shape index: {1}, may-alias: {2,4}]   ;;  %s98_s3 = inlined_call_operand.vmem [shape: bf16[4,128], index: 3, kind: output, shape index: {0}]  }
   0x1   :  { %v16_v0 = vld [vmem:[%s96_s2] sm:$0xf] }
   0x2   :  { %v17_v1 = vld [vmem:[%s94_s0] sm:$0xf] }
   0x3   :  { %v46_v2 = vld [vmem:[%s95_s1] ss:$0 sm:$0xff]  ;;  %v47_v4 = vld [vmem:[%s95_s1 + $0x1] ss:$0 sm:$0xff] }
   0x4   :  { %v23_v3 = vmul.f32 %v46_v2, %v17_v1 }
   0x6   :  { %v24_v5 = vadd.f32 %v23_v3, %v16_v0 }
   0x8   :  { %v30_v6 = vadd.f32 %v47_v4, %v24_v5 }
   0xa   :  { %vm31_vm0 = vcmp.ge.f32.partialorder %v30_v6, 1.0 }
   0xb   :  { %v48_v8 = vsel %vm31_vm0, 1.0, %v50_v7  ;;  %v36_v9 = vsel %vm31_vm0, 0.0, %v30_v6 }
   0xc   :  { %v34_v10 = vpack.c.bf16 %v48_v8, %v48_v8  ;;  %37 = vst [vmem:[%s97_s4] sm:$0xf] %v36_v9 }
   0xe   :  { %35 = vst [vmem:[%s98_s3] sm:$0x3] %v34_v10 }

// kernel: closed_call.283
= control target key start
LH: loop header
LB: loop body
LE: loop exit
PB: predicated region body
PF: predicated region fallthrough
CT: control target
= control target key end

     0   :  { %s50_s22 = smov 112   ;;  %vm40_vm0 = vcmask 122880   ;;  %s97_s0 = inlined_call_operand.vmem [shape: bf16[4,2,2,32], index: 0, kind: input, shape index: {}]   ;;  %s98_s1 = inlined_call_operand.vmem [shape: bf16[4,2,16], index: 1, kind: output, shape index: {}]  }
   0x1   :  { %v12_v0 = vld [vmem:[%s97_s0 + $0x4] sm:$0x1]  ;;  %v13_v1 = vld [vmem:[%s97_s0 + $0x5] sm:$0x1]  ;;  %v8_v2 = vld [vmem:[%s97_s0] sm:$0x1] }
   0x2   :  { %v18_v3 = vmax.bf16 %v13_v1, %v12_v0  ;;  %v9_v4 = vld [vmem:[%s97_s0 + $0x1] sm:$0x1]  ;;  %v14_v5 = vld [vmem:[%s97_s0 + $0x6] sm:$0x1]  ;;  %v15_v6 = vld [vmem:[%s97_s0 + $0x7] sm:$0x1] }
   0x3   :  { %v16_v7 = vmax.bf16 %v9_v4, %v8_v2  ;;  %v10_v8 = vld [vmem:[%s97_s0 + $0x2] sm:$0x1]  ;;  %v11_v9 = vld [vmem:[%s97_s0 + $0x3] sm:$0x1]  ;;  %v19_v10 = vmax.bf16 %v15_v6, %v14_v5 }
   0x4   :  { %28 = vrot.lane.b32.xlu1 %v18_v3, %s50_s22  ;;  %v17_v11 = vmax.bf16 %v11_v9, %v10_v8 }
   0x5   :  { %24 = vrot.lane.b32.xlu0 %v16_v7, %s50_s22 }
   0x8   :  { %30 = vrot.lane.b32.xlu1 %v19_v10, %s50_s22 }
   0x9   :  { %26 = vrot.lane.b32.xlu0 %v17_v11, %s50_s22 }
  0x76   :  { %v29_v12 = vpop.permute.xlu1 %28 }
  0x77   :  { %v38_v13 = vmax.bf16 %v29_v12, %v18_v3  ;;  %v25_v14 = vpop.permute.xlu0 %24 }
  0x78   :  { %v36_v15 = vmax.bf16 %v25_v14, %v16_v7 }
  0x79   :  { %43 = vst.msk [vmem:[%s98_s1 + $0x2] sm:$0x1] %vm40_vm0, %v38_v13 }
  0x7a   :  { %41 = vst.msk [vmem:[%s98_s1] sm:$0x1] %vm40_vm0, %v36_v15  ;;  %v31_v16 = vpop.permute.xlu1 %30 }
  0x7b   :  { %v39_v17 = vmax.bf16 %v31_v16, %v19_v10  ;;  %v27_v18 = vpop.permute.xlu0 %26 }
  0x7c   :  { %v37_v19 = vmax.bf16 %v27_v18, %v17_v11 }
  0x7d   :  { %44 = vst.msk [vmem:[%s98_s1 + $0x3] sm:$0x1] %vm40_vm0, %v39_v17 }
  0x7e   :  { %42 = vst.msk [vmem:[%s98_s1 + $0x1] sm:$0x1] %vm40_vm0, %v37_v19 }

// kernel: closed_call.282
= control target key start
LH: loop header
LB: loop body
LE: loop exit
PB: predicated region body
PF: predicated region fallthrough
CT: control target
= control target key end

     0   :  { %v72_v13 = vmov 0.0   ;;  %s135_s0 = inlined_call_operand.vmem [shape: f32[4,128], index: 0, kind: input, shape index: {}]   ;;  %s136_s1 = inlined_call_operand.vmem [shape: f32[2,128], index: 1, kind: input, shape index: {}]   ;;  %s137_s2 = inlined_call_operand.vmem [shape: f32[4,128], index: 2, kind: input, shape index: {}]   ;;  %s138_s3 = inlined_call_operand.vmem [shape: f32[2,128], index: 3, kind: input, shape index: {}]   ;;  %s139_s4 = inlined_call_operand.vmem [shape: f32[4,128], index: 4, kind: input, shape index: {}, may-alias: {4,6}]   ;;  %s140_s6 = inlined_call_operand.vmem [shape: f32[4,128], index: 6, kind: output, shape index: {1}, may-alias: {4,6}]   ;;  %s141_s5 = inlined_call_operand.vmem [shape: bf16[4,128], index: 5, kind: output, shape index: {0}]  }
   0x1   :  { %v22_v0 = vld [vmem:[%s135_s0] sm:$0xf] }
   0x2   :  { %v66_v1 = vld [vmem:[%s136_s1] ss:$0 sm:$0xff]  ;;  %v67_v2 = vld [vmem:[%s136_s1 + $0x1] ss:$0 sm:$0xff] }
   0x3   :  { %v28_v3 = vmul.f32 %v66_v1, %v22_v0  ;;  %v35_v4 = vld [vmem:[%s137_s2] sm:$0xf] }
   0x4   :  { %v68_v5 = vld [vmem:[%s138_s3] ss:$0 sm:$0xff]  ;;  %v69_v6 = vld [vmem:[%s138_s3 + $0x1] ss:$0 sm:$0xff] }
   0x5   :  { %v41_v7 = vmul.f32 %v68_v5, %v35_v4  ;;  %v48_v8 = vld [vmem:[%s139_s4] sm:$0xf]  ;;  %v34_v9 = vadd.f32 %v67_v2, %v28_v3 }
   0x7   :  { %v47_v10 = vadd.f32 %v69_v6, %v41_v7  ;;  %v49_v11 = vadd.f32 %v48_v8, %v34_v9 }
   0x9   :  { %v50_v12 = vadd.f32 %v49_v11, %v47_v10 }
   0xb   :  { %vm51_vm0 = vcmp.ge.f32.partialorder %v50_v12, 1.0 }
   0xc   :  { %v70_v14 = vsel %vm51_vm0, 1.0, %v72_v13  ;;  %v56_v15 = vsel %vm51_vm0, 0.0, %v50_v12 }
   0xd   :  { %v54_v16 = vpack.c.bf16 %v70_v14, %v70_v14  ;;  %57 = vst [vmem:[%s140_s6] sm:$0xf] %v56_v15 }
   0xf   :  { %55 = vst [vmem:[%s141_s5] sm:$0x3] %v54_v16 }

// kernel: tile.255
= control target key start
LH: loop header
LB: loop body
LE: loop exit
PB: predicated region body
PF: predicated region fallthrough
CT: control target
= control target key end

     0   :  { %s30_s10 = smov 3  ;;  %s11_s11 = smov 3  ;;  %vm13_vm0 = vcmask 261120   ;;  %vm20_vm1 = vcmask 1048320   ;;  %vm27_vm2 = vcmask 785920   ;;  %vm34_vm3 = vcmask 523520   ;;  %s70_s0 = inlined_call_operand.vmem [shape: f32[2,4,32], index: 0, kind: input, shape index: {}]   ;;  %s71_s1 = inlined_call_operand.vmem [shape: f32[2,128], index: 1, kind: output, shape index: {}]  }
   0x1   :  { %v44_v0 = vld [vmem:[%s70_s0 + $0x4] sm:$0xf]  ;;  %v9_v1 = vld [vmem:[%s70_s0] sm:$0xf]  ;;  %s16_s0 = smov 3  ;;  %s23_s12 = smov 3 }
   0x2   :  { %8 = vst [vmem:[#allocation1 + $0x8] sm:$0xf] %v44_v0  ;;  %10 = vst [vmem:[#allocation1] sm:$0xf] %v9_v1  ;;  %s48_s13 = smov 96   ;;  %s49_s14 = smov 32  }
   0x3   :  { %s50_s15 = smov 64  }
   0x9   :  { %v17_v2 = vld [vmem:[#allocation1 + $0x3] ss:$8 sm:%s16_s0]   ;;  %v31_v3 = vld [vmem:[#allocation1 + $0x1] ss:$8 sm:%s30_s10]   ;;  %v12_v4 = vld [vmem:[#allocation1] ss:$8 sm:%s11_s11]  }
   0xa   :  { %18 = vrot.lane.b32.xlu0 %v17_v2, %s48_s13  ;;  %32 = vrot.lane.b32.xlu1 %v31_v3, %s49_s14  ;;  %v24_v5 = vld [vmem:[#allocation1 + $0x2] ss:$8 sm:%s23_s12]   ;;  %14 = vst.msk [vmem:[#allocation0] sm:$0x3] %vm13_vm0, %v12_v4  }
   0xe   :  { %25 = vrot.lane.b32.xlu0 %v24_v5, %s50_s15 }
  0x7c   :  { %v19_v6 = vpop.permute.xlu0 %18   ;;  %v33_v7 = vpop.permute.xlu1 %32  }
  0x7d   :  { %21 = vst.msk [vmem:[#allocation0] sm:$0x3] %vm20_vm1, %v19_v6  }
  0x80   :  { %v26_v8 = vpop.permute.xlu0 %25  }
  0x81   :  { %28 = vst.msk [vmem:[#allocation0] sm:$0x3] %vm27_vm2, %v26_v8  }
  0x82   :  { %35 = vst.msk [vmem:[#allocation0] sm:$0x3] %vm34_vm3, %v33_v7  }
  0x89   :  { %v40_v9 = vld [vmem:[#allocation0] sm:$0x3] }
  0x8a   :  { %43 = vst [vmem:[%s71_s1] sm:$0x3] %v40_v9 }

// kernel: closed_call.289
= control target key start
LH: loop header
LB: loop body
LE: loop exit
PB: predicated region body
PF: predicated region fallthrough
CT: control target
= control target key end

     0   :  { %vm76_vm0 = vcmask 253952   ;;  %v143_v0 = vmov 0.0   ;;  %vm144_vm1 = vmmov 0   ;;  %vm26_vm2 = vcmask 130048   ;;  %s197_s1 = inlined_call_operand.vmem [shape: bf16[16,32], index: 1, kind: input, shape index: {}]   ;;  %s198_s0 = inlined_call_operand.vmem [shape: bf16[8,16], index: 0, kind: input, shape index: {}]   ;;  %s199_s3 = inlined_call_operand.vmem [shape: f32[8,32], index: 3, kind: output, shape index: {0}]   ;;  %s200_s2 = inlined_call_operand.vmem [shape: f32[2,32], index: 2, kind: input, shape index: {}]   ;;  %s201_s4 = inlined_call_operand.vmem [shape: f32[2,32], index: 4, kind: output, shape index: {1}]  }
   0x1   :  { %132 = vmatprep.subr.bf16.mxu0 %v143_v0  ;;  %77 = vst.msk [vmem:[#allocation2] sm:$0x1] %vm76_vm0, %v143_v0  ;;  %78 = vst.msk [vmem:[#allocation3] sm:$0x1] %vm76_vm0, %v143_v0  ;;  %v140_v1 = vld [vmem:[%s197_s1] sm:$0xff]   ;;  %134 = vmatprep.mubr.msk.bf16.mxu0 %vm144_vm1, %v143_v0  ;;  %vm70_vm3 = vcmask 261120  }
   0x2   :  { %133 = vmatpush3.bf16.msra.mxu0 %v140_v1  ;;  %v17_v2 = vld [vmem:[%s198_s0] sm:$0xf] }
   0x3   :  { %v111_v34 = vld [vmem:[%s200_s2] sm:$0x1]  ;;  %v116_v37 = vld [vmem:[%s200_s2 + $0x1] sm:$0x1] }
   0x5   :  { %135 = vmatmul.mubr.msk.bf16.vlgmr.msra.gmra.mxu0 %vm26_vm2, %v17_v2 }
   0x8   :  { %v79_v19 = vld [vmem:[#allocation2] sm:$0x1]  ;;  %v90_v22 = vld [vmem:[#allocation3] sm:$0x1] }
  0xc5   :  { %v64_v3 = vpop.f32.mrf.mxu0 }
  0xc6   :  { %71 = vst.msk [vmem:[%s199_s3] sm:$0xff] %vm70_vm3, %v64_v3  ;;  %v80_v4 = vsel %vm70_vm3, %v64_v3, 0.0  ;;  %v91_v5 = vmul.f32 %v64_v3, %v64_v3 }
  0xc7   :  { %v81_v6 = vrot.slane %v80_v4, 4  ;;  %v136_v7 = vpop.f32.mrf.mxu0 }
  0xc8   :  { %v92_v8 = vsel %vm70_vm3, %v91_v5, 0.0 }
  0xc9   :  { %v82_v9 = vadd.f32 %v81_v6, %v80_v4  ;;  %v93_v10 = vrot.slane %v92_v8, 4  ;;  %v67_v11 = vpop.f32.mrf.mxu0 }
  0xcb   :  { %v83_v12 = vrot.slane %v82_v9, 2  ;;  %v94_v13 = vadd.f32 %v93_v10, %v92_v8  ;;  %v137_v14 = vpop.f32.mrf.mxu0 }
  0xcd   :  { %v84_v15 = vadd.f32 %v83_v12, %v82_v9  ;;  %v95_v16 = vrot.slane %v94_v13, 2 }
  0xcf   :  { %v85_v17 = vrot.slane %v84_v15, 1  ;;  %v96_v18 = vadd.f32 %v95_v16, %v94_v13 }
  0xd1   :  { %v86_v20 = vadd.f32 %v85_v17, %v84_v15  ;;  %v97_v21 = vrot.slane %v96_v18, 1 }
  0xd3   :  { %v87_v23 = vadd.f32 %v86_v20, %v79_v19  ;;  %v98_v24 = vadd.f32 %v97_v21, %v96_v18 }
  0xd5   :  { %89 = vst.msk [vmem:[#allocation2] sm:$0x1] %vm76_vm0, %v87_v23  ;;  %v99_v25 = vadd.f32 %v98_v24, %v90_v22 }
  0xd7   :  { %100 = vst.msk [vmem:[#allocation3] sm:$0x1] %vm76_vm0, %v99_v25 }
  0xdc   :  { %v104_v26 = vld [vmem:[#allocation2] sm:$0x1] }
  0xdd   :  { %v105_v27 = vmul.f32 0.125, %v104_v26 }
  0xde   :  { %v106_v28 = vld [vmem:[#allocation3] sm:$0x1] }
  0xdf   :  { %v107_v29 = vmul.f32 0.125, %v106_v28  ;;  %v108_v30 = vmul.f32 %v105_v27, %v105_v27 }
  0xe1   :  { %v109_v31 = vsub.f32 %v107_v29, %v108_v30 }
  0xe3   :  { %v110_v32 = vmax.f32 %v109_v31, 0.0 }
  0xe5   :  { %v112_v33 = vadd.f32 1e-05, %v110_v32 }
  0xe7   :  { %141 = vrsqrt.f32 %v112_v33 }
  0xf4   :  { %v142_v35 = vpop.eup %141 }
  0xf5   :  { %v114_v36 = vmul.f32 %v142_v35, %v111_v34 }
  0xf7   :  { %115 = vst.msk [vmem:[%s201_s4] sm:$0x1] %vm76_vm0, %v114_v36  ;;  %v117_v38 = vmul.f32 %v114_v36, %v105_v27 }
  0xf9   :  { %v118_v39 = vsub.f32 %v116_v37, %v117_v38 }
  0xfb   :  { %119 = vst.msk [vmem:[%s201_s4 + $0x1] sm:$0x1] %vm76_vm0, %v118_v39 }

// kernel: closed_call.278
= control target key start
LH: loop header
LB: loop body
LE: loop exit
PB: predicated region body
PF: predicated region fallthrough
CT: control target
= control target key end

     0   :  { %v294_v0 = vmov 0   ;;  %vm111_vm0 = vcmask 130048   ;;  %vm175_vm1 = vcmask 122880   ;;  %v295_v14 = vmov 0.0   ;;  %s404_s1 = inlined_call_operand.vmem [shape: bf16[144,16], index: 1, kind: input, shape index: {}]   ;;  %s405_s0 = inlined_call_operand.vmem [shape: bf16[32,144], index: 0, kind: input, shape index: {}]   ;;  %s406_s3 = inlined_call_operand.vmem [shape: f32[32,16], index: 3, kind: output, shape index: {0}]   ;;  %s407_s2 = inlined_call_operand.vmem [shape: f32[2,16], index: 2, kind: input, shape index: {}]   ;;  %s408_s4 = inlined_call_operand.vmem [shape: f32[2,16], index: 4, kind: output, shape index: {1}]  }
   0x1   :  { %118 = vmatprep.subr.bf16.mxu0 %v294_v0  ;;  %257 = vmatprep.subr.bf16.mxu1 %v294_v0  ;;  %v277_v1 = vld [vmem:[%s404_s1 + $0x38] sm:$0xff]   ;;  %v278_v2 = vld [vmem:[%s404_s1 + $0x30] sm:$0xff]   ;;  %v279_v3 = vld [vmem:[%s404_s1 + $0x28] sm:$0xff]   ;;  %176 = vst.msk [vmem:[#allocation2] sm:$0x1] %vm175_vm1, %v295_v14 }
   0x2   :  { %119 = vmatpush1.bf16.msra.mxu0 %v277_v1  ;;  %266 = vmatpush1.bf16.msra.mxu1 %v277_v1  ;;  %v280_v4 = vld [vmem:[%s404_s1 + $0x20] sm:$0xff]   ;;  %v291_v6 = vld [vmem:[%s405_s0 + $0x14] ss:$8 sps:$4 sm:$0xff]   ;;  %v283_v9 = vld [vmem:[%s404_s1 + $0x8] sm:$0xff]   ;;  %177 = vst.msk [vmem:[#allocation3] sm:$0x1] %vm175_vm1, %v295_v14 }
   0x3   :  { %120 = vmatprep.subr.bf16.mxu0 %v294_v0  ;;  %258 = vmatprep.subr.bf16.mxu1 %v294_v0  ;;  %v288_v5 = vld [vmem:[%s405_s0 + $0x4] ss:$8 sps:$4 sm:$0xff]   ;;  %v281_v7 = vld [vmem:[%s404_s1 + $0x18] sm:$0xff]   ;;  %v282_v8 = vld [vmem:[%s404_s1 + $0x10] sm:$0xff]  }
   0x4   :  { %255 = vmatprep.mubr.msk.bf16.mxu0 %vm111_vm0, %v288_v5  ;;  %256 = vmatprep.mubr.msk.bf16.mxu1 %vm111_vm0, %v291_v6  ;;  %v284_v10 = vld [vmem:[%s404_s1] sm:$0xff]   ;;  %v289_v13 = vld [vmem:[%s405_s0 + $0x10] ss:$8 sps:$4 sm:$0xff]  }
   0x5   :  { %v285_v11 = vld [vmem:[%s404_s1 + $0x40] sm:$0xff]  }
   0x6   :  { %121 = vmatpush1.bf16.msra.mxu0 %v278_v2  ;;  %267 = vmatpush1.bf16.msra.mxu1 %v278_v2  ;;  %v286_v12 = vld [vmem:[%s405_s0] ss:$8 sps:$4 sm:$0xff]  }
   0x7   :  { %122 = vmatprep.subr.bf16.mxu0 %v294_v0  ;;  %259 = vmatprep.subr.bf16.mxu1 %v294_v0  ;;  %v225_v1 = vld [vmem:[%s407_s2] sm:$0x1] }
   0x8   :  { %v178_v50 = vld [vmem:[#allocation2] sm:$0x1] }
   0x9   :  { %v195_v53 = vld [vmem:[#allocation3] sm:$0x1] }
   0xa   :  { %123 = vmatpush1.bf16.msra.mxu0 %v279_v3  ;;  %268 = vmatpush1.bf16.msra.mxu1 %v279_v3 }
   0xb   :  { %124 = vmatprep.subr.bf16.mxu0 %v294_v0  ;;  %260 = vmatprep.subr.bf16.mxu1 %v294_v0 }
   0xe   :  { %125 = vmatpush1.bf16.msra.mxu0 %v280_v4  ;;  %269 = vmatpush1.bf16.msra.mxu1 %v280_v4  ;;  %v230_v4 = vld [vmem:[%s407_s2 + $0x1] sm:$0x1] }
   0xf   :  { %126 = vmatprep.subr.bf16.mxu0 %v294_v0  ;;  %261 = vmatprep.subr.bf16.mxu1 %v294_v0 }
  0x12   :  { %127 = vmatpush1.bf16.msra.mxu0 %v281_v7  ;;  %270 = vmatpush1.bf16.msra.mxu1 %v281_v7 }
  0x13   :  { %128 = vmatprep.subr.bf16.mxu0 %v294_v0  ;;  %262 = vmatprep.subr.bf16.mxu1 %v294_v0 }
  0x16   :  { %129 = vmatpush1.bf16.msra.mxu0 %v282_v8  ;;  %271 = vmatpush1.bf16.msra.mxu1 %v282_v8 }
  0x17   :  { %130 = vmatprep.subr.bf16.mxu0 %v294_v0  ;;  %263 = vmatprep.subr.bf16.mxu1 %v294_v0 }
  0x1a   :  { %131 = vmatpush1.bf16.msra.mxu0 %v283_v9  ;;  %272 = vmatpush1.bf16.msra.mxu1 %v283_v9 }
  0x1b   :  { %132 = vmatprep.subr.bf16.mxu0 %v294_v0  ;;  %264 = vmatprep.subr.bf16.mxu1 %v294_v0 }
  0x1e   :  { %133 = vmatpush1.bf16.msra.mxu0 %v284_v10  ;;  %273 = vmatpush1.bf16.msra.mxu1 %v284_v10 }
  0x1f   :  { %148 = vmatprep.subr.bf16.mxu0 %v294_v0  ;;  %265 = vmatprep.subr.bf16.mxu1 %v294_v0 }
  0x22   :  { %149 = vmatpush2.bf16.msra.mxu0 %v285_v11  ;;  %274 = vmatpush2.bf16.msra.mxu1 %v285_v11 }
  0x25   :  { %151 = vmatmul.mubr.bf16.vlgmr.msra.gmra.mxu0 %v286_v12  ;;  %159 = vmatmul.mubr.bf16.vlgmr.msra.gmra.mxu1 %v289_v13 }
  0xe5   :  { %v152_v15 = vpop.f32.mrf.mxu0  ;;  %v160_v16 = vpop.f32.mrf.mxu1 }
  0xe6   :  { %167 = vst.msk [vmem:[%s406_s3] sm:$0xff] %vm111_vm0, %v152_v15  ;;  %169 = vst.msk [vmem:[%s406_s3 + $0x10] sm:$0xff] %vm111_vm0, %v160_v16  ;;  %v196_v19 = vmul.f32 %v152_v15, %v152_v15  ;;  %v179_v22 = vsel %vm111_vm0, %v152_v15, 0.0  ;;  %v198_v23 = vmul.f32 %v160_v16, %v160_v16  ;;  %v182_v30 = vsel %vm111_vm0, %v160_v16, 0.0 }
  0xe7   :  { %v154_v17 = vpop.f32.mrf.mxu0  ;;  %v162_v18 = vpop.f32.mrf.mxu1 }
  0xe8   :  { %v200_v29 = vsel %vm111_vm0, %v196_v19, 0.0  ;;  %v203_v35 = vsel %vm111_vm0, %v198_v23, 0.0 }
  0xe9   :  { %v155_v20 = vpop.f32.mrf.mxu0  ;;  %v163_v21 = vpop.f32.mrf.mxu1 }
  0xea   :  { %168 = vst.msk [vmem:[%s406_s3 + $0x8] sm:$0xff] %vm111_vm0, %v155_v20  ;;  %v180_v24 = vsel %vm111_vm0, %v155_v20, 0.0  ;;  %v197_v25 = vmul.f32 %v155_v20, %v155_v20  ;;  %170 = vst.msk [vmem:[%s406_s3 + $0x18] sm:$0xff] %vm111_vm0, %v163_v21  ;;  %v199_v32 = vmul.f32 %v163_v21, %v163_v21  ;;  %v184_v36 = vsel %vm111_vm0, %v163_v21, 0.0 }
  0xeb   :  { %v181_v26 = vadd.f32 %v180_v24, %v179_v22  ;;  %v157_v27 = vpop.f32.mrf.mxu0  ;;  %v165_v28 = vpop.f32.mrf.mxu1 }
  0xec   :  { %v201_v31 = vsel %vm111_vm0, %v197_v25, 0.0  ;;  %v205_v39 = vsel %vm111_vm0, %v199_v32, 0.0 }
  0xed   :  { %v202_v33 = vadd.f32 %v201_v31, %v200_v29  ;;  %v183_v34 = vadd.f32 %v182_v30, %v181_v26 }
  0xef   :  { %v185_v37 = vadd.f32 %v184_v36, %v183_v34  ;;  %v204_v38 = vadd.f32 %v203_v35, %v202_v33 }
  0xf1   :  { %v186_v40 = vrot.slane %v185_v37, 4  ;;  %v206_v41 = vadd.f32 %v205_v39, %v204_v38 }
  0xf3   :  { %v187_v42 = vadd.f32 %v186_v40, %v185_v37  ;;  %v207_v43 = vrot.slane %v206_v41, 4 }
  0xf5   :  { %v188_v44 = vrot.slane %v187_v42, 2  ;;  %v208_v45 = vadd.f32 %v207_v43, %v206_v41 }
  0xf7   :  { %v189_v46 = vadd.f32 %v188_v44, %v187_v42  ;;  %v209_v47 = vrot.slane %v208_v45, 2 }
  0xf9   :  { %v190_v48 = vrot.slane %v189_v46, 1  ;;  %v210_v49 = vadd.f32 %v209_v47, %v208_v45 }
  0xfb   :  { %v191_v51 = vadd.f32 %v190_v48, %v189_v46  ;;  %v211_v52 = vrot.slane %v210_v49, 1 }
  0xfd   :  { %v192_v54 = vadd.f32 %v191_v51, %v178_v50  ;;  %v212_v55 = vadd.f32 %v211_v52, %v210_v49 }
  0xff   :  { %194 = vst.msk [vmem:[#allocation2] sm:$0x1] %vm175_vm1, %v192_v54  ;;  %v213_v56 = vadd.f32 %v212_v55, %v195_v53 }
 0x101   :  { %214 = vst.msk [vmem:[#allocation3] sm:$0x1] %vm175_vm1, %v213_v56 }
 0x106   :  { %v218_v57 = vld [vmem:[#allocation2] sm:$0x1] }
 0x107   :  { %v219_v58 = vmul.f32 0.03125, %v218_v57 }
 0x108   :  { %v220_v59 = vld [vmem:[#allocation3] sm:$0x1] }
 0x109   :  { %v221_v60 = vmul.f32 0.03125, %v220_v59  ;;  %v222_v61 = vmul.f32 %v219_v58, %v219_v58 }
 0x10b   :  { %v223_v62 = vsub.f32 %v221_v60, %v222_v61 }
 0x10d   :  { %v224_v63 = vmax.f32 %v223_v62, 0.0 }
 0x10f   :  { %v226_v0 = vadd.f32 1e-05, %v224_v63 }
 0x111   :  { %292 = vrsqrt.f32 %v226_v0 }
 0x11e   :  { %v293_v2 = vpop.eup %292 }
 0x11f   :  { %v228_v3 = vmul.f32 %v293_v2, %v225_v1 }
 0x121   :  { %229 = vst.msk [vmem:[%s408_s4] sm:$0x1] %vm175_vm1, %v228_v3  ;;  %v231_v5 = vmul.f32 %v228_v3, %v219_v58 }
 0x123   :  { %v232_v6 = vsub.f32 %v230_v4, %v231_v5 }
 0x125   :  { %233 = vst.msk [vmem:[%s408_s4 + $0x1] sm:$0x1] %vm175_vm1, %v232_v6 }

// kernel: closed_call.285
= control target key start
LH: loop header
LB: loop body
LE: loop exit
PB: predicated region body
PF: predicated region fallthrough
CT: control target
= control target key end

     0   :  { %v50_v7 = vmov 0.0   ;;  %s94_s0 = inlined_call_operand.vmem [shape: f32[2,128], index: 0, kind: input, shape index: {}]   ;;  %s95_s1 = inlined_call_operand.vmem [shape: f32[2,128], index: 1, kind: input, shape index: {}]   ;;  %s96_s2 = inlined_call_operand.vmem [shape: f32[2,128], index: 2, kind: input, shape index: {}, may-alias: {2,4}]   ;;  %s97_s4 = inlined_call_operand.vmem [shape: f32[2,128], index: 4, kind: output, shape index: {1}, may-alias: {2,4}]   ;;  %s98_s3 = inlined_call_operand.vmem [shape: bf16[2,128], index: 3, kind: output, shape index: {0}]  }
   0x1   :  { %v16_v0 = vld [vmem:[%s96_s2] sm:$0x3] }
   0x2   :  { %v17_v1 = vld [vmem:[%s94_s0] sm:$0x3] }
   0x3   :  { %v46_v2 = vld [vmem:[%s95_s1] ss:$0 sm:$0xff]  ;;  %v47_v4 = vld [vmem:[%s95_s1 + $0x1] ss:$0 sm:$0xff] }
   0x4   :  { %v23_v3 = vmul.f32 %v46_v2, %v17_v1 }
   0x6   :  { %v24_v5 = vadd.f32 %v23_v3, %v16_v0 }
   0x8   :  { %v30_v6 = vadd.f32 %v47_v4, %v24_v5 }
   0xa   :  { %vm31_vm0 = vcmp.ge.f32.partialorder %v30_v6, 1.0 }
   0xb   :  { %v48_v8 = vsel %vm31_vm0, 1.0, %v50_v7  ;;  %v36_v9 = vsel %vm31_vm0, 0.0, %v30_v6 }
   0xc   :  { %v34_v10 = vpack.c.bf16 %v48_v8, %v48_v8  ;;  %37 = vst [vmem:[%s97_s4] sm:$0x3] %v36_v9 }
   0xe   :  { %35 = vst [vmem:[%s98_s3] sm:$0x1] %v34_v10 }

// kernel: closed_call.284
= control target key start
LH: loop header
LB: loop body
LE: loop exit
PB: predicated region body
PF: predicated region fallthrough
CT: control target
= control target key end

     0   :  { %v225_v0 = vmov 0   ;;  %vm96_vm0 = vcmask 130048   ;;  %vm146_vm1 = vcmask 253952   ;;  %v226_v13 = vmov 0.0   ;;  %s303_s1 = inlined_call_operand.vmem [shape: bf16[144,32], index: 1, kind: input, shape index: {}]   ;;  %s304_s0 = inlined_call_operand.vmem [shape: bf16[8,144], index: 0, kind: input, shape index: {}]   ;;  %s305_s3 = inlined_call_operand.vmem [shape: f32[8,32], index: 3, kind: output, shape index: {0}]   ;;  %s306_s2 = inlined_call_operand.vmem [shape: f32[2,32], index: 2, kind: input, shape index: {}]   ;;  %s307_s4 = inlined_call_operand.vmem [shape: f32[2,32], index: 4, kind: output, shape index: {1}]  }
   0x1   :  { %100 = vmatprep.subr.bf16.mxu0 %v225_v0  ;;  %v212_v1 = vld [vmem:[%s303_s1 + $0x38] sm:$0xff]   ;;  %v213_v2 = vld [vmem:[%s303_s1 + $0x30] sm:$0xff]   ;;  %v214_v3 = vld [vmem:[%s303_s1 + $0x28] sm:$0xff]   ;;  %147 = vst.msk [vmem:[#allocation2] sm:$0x1] %vm146_vm1, %v226_v13  ;;  %vm140_vm2 = vcmask 261120  }
   0x2   :  { %101 = vmatpush1.bf16.msra.mxu0 %v212_v1  ;;  %v17_v4 = vld [vmem:[%s304_s0] sm:$0xff]  ;;  %v216_v7 = vld [vmem:[%s303_s1 + $0x18] sm:$0xff]   ;;  %v217_v8 = vld [vmem:[%s303_s1 + $0x10] sm:$0xff]   ;;  %148 = vst.msk [vmem:[#allocation3] sm:$0x1] %vm146_vm1, %v226_v13 }
   0x3   :  { %102 = vmatprep.subr.bf16.mxu0 %v225_v0  ;;  %v215_v5 = vld [vmem:[%s303_s1 + $0x20] sm:$0xff]   ;;  %v199_v6 = vcombine.high %v17_v4, %v17_v4  ;;  %v218_v9 = vld [vmem:[%s303_s1 + $0x8] sm:$0xff]   ;;  %v198_v12 = vcombine.low %v17_v4, %v17_v4 }
   0x4   :  { %v219_v10 = vld [vmem:[%s303_s1] sm:$0xff]  }
   0x5   :  { %209 = vmatprep.mubr.msk.bf16.mxu0 %vm96_vm0, %v199_v6  ;;  %v220_v11 = vld [vmem:[%s303_s1 + $0x40] sm:$0xff]  }
   0x6   :  { %103 = vmatpush1.bf16.msra.mxu0 %v213_v2  ;;  %v181_v45 = vld [vmem:[%s306_s2] sm:$0x1]  ;;  %v186_v48 = vld [vmem:[%s306_s2 + $0x1] sm:$0x1] }
   0x7   :  { %104 = vmatprep.subr.bf16.mxu0 %v225_v0 }
   0x8   :  { %v149_v30 = vld [vmem:[#allocation2] sm:$0x1] }
   0x9   :  { %v160_v33 = vld [vmem:[#allocation3] sm:$0x1] }
   0xa   :  { %105 = vmatpush1.bf16.msra.mxu0 %v214_v3 }
   0xb   :  { %106 = vmatprep.subr.bf16.mxu0 %v225_v0 }
   0xe   :  { %107 = vmatpush1.bf16.msra.mxu0 %v215_v5 }
   0xf   :  { %108 = vmatprep.subr.bf16.mxu0 %v225_v0 }
  0x12   :  { %109 = vmatpush1.bf16.msra.mxu0 %v216_v7 }
  0x13   :  { %110 = vmatprep.subr.bf16.mxu0 %v225_v0 }
  0x16   :  { %111 = vmatpush1.bf16.msra.mxu0 %v217_v8 }
  0x17   :  { %112 = vmatprep.subr.bf16.mxu0 %v225_v0 }
  0x1a   :  { %113 = vmatpush1.bf16.msra.mxu0 %v218_v9 }
  0x1b   :  { %114 = vmatprep.subr.bf16.mxu0 %v225_v0 }
  0x1e   :  { %115 = vmatpush1.bf16.msra.mxu0 %v219_v10 }
  0x1f   :  { %130 = vmatprep.subr.bf16.mxu0 %v225_v0 }
  0x22   :  { %131 = vmatpush2.bf16.msra.mxu0 %v220_v11 }
  0x25   :  { %133 = vmatmul.mubr.bf16.vlgmr.msra.gmra.mxu0 %v198_v12 }
  0xe5   :  { %v134_v14 = vpop.f32.mrf.mxu0 }
  0xe6   :  { %141 = vst.msk [vmem:[%s305_s3] sm:$0xff] %vm140_vm2, %v134_v14  ;;  %v150_v15 = vsel %vm140_vm2, %v134_v14, 0.0  ;;  %v161_v16 = vmul.f32 %v134_v14, %v134_v14 }
  0xe7   :  { %v151_v17 = vrot.slane %v150_v15, 4  ;;  %v136_v18 = vpop.f32.mrf.mxu0 }
  0xe8   :  { %v162_v19 = vsel %vm140_vm2, %v161_v16, 0.0 }
  0xe9   :  { %v152_v20 = vadd.f32 %v151_v17, %v150_v15  ;;  %v163_v21 = vrot.slane %v162_v19, 4  ;;  %v137_v22 = vpop.f32.mrf.mxu0 }
  0xeb   :  { %v153_v23 = vrot.slane %v152_v20, 2  ;;  %v164_v24 = vadd.f32 %v163_v21, %v162_v19  ;;  %v138_v25 = vpop.f32.mrf.mxu0 }
  0xed   :  { %v154_v26 = vadd.f32 %v153_v23, %v152_v20  ;;  %v165_v27 = vrot.slane %v164_v24, 2 }
  0xef   :  { %v155_v28 = vrot.slane %v154_v26, 1  ;;  %v166_v29 = vadd.f32 %v165_v27, %v164_v24 }
  0xf1   :  { %v156_v31 = vadd.f32 %v155_v28, %v154_v26  ;;  %v167_v32 = vrot.slane %v166_v29, 1 }
  0xf3   :  { %v157_v34 = vadd.f32 %v156_v31, %v149_v30  ;;  %v168_v35 = vadd.f32 %v167_v32, %v166_v29 }
  0xf5   :  { %159 = vst.msk [vmem:[#allocation2] sm:$0x1] %vm146_vm1, %v157_v34  ;;  %v169_v36 = vadd.f32 %v168_v35, %v160_v33 }
  0xf7   :  { %170 = vst.msk [vmem:[#allocation3] sm:$0x1] %vm146_vm1, %v169_v36 }
  0xfc   :  { %v174_v37 = vld [vmem:[#allocation2] sm:$0x1] }
  0xfd   :  { %v175_v38 = vmul.f32 0.125, %v174_v37 }
  0xfe   :  { %v176_v39 = vld [vmem:[#allocation3] sm:$0x1] }
  0xff   :  { %v177_v40 = vmul.f32 0.125, %v176_v39  ;;  %v178_v41 = vmul.f32 %v175_v38, %v175_v38 }
 0x101   :  { %v179_v42 = vsub.f32 %v177_v40, %v178_v41 }
 0x103   :  { %v180_v43 = vmax.f32 %v179_v42, 0.0 }
 0x105   :  { %v182_v44 = vadd.f32 1e-05, %v180_v43 }
 0x107   :  { %223 = vrsqrt.f32 %v182_v44 }
 0x114   :  { %v224_v46 = vpop.eup %223 }
 0x115   :  { %v184_v47 = vmul.f32 %v224_v46, %v181_v45 }
 0x117   :  { %185 = vst.msk [vmem:[%s307_s4] sm:$0x1] %vm146_vm1, %v184_v47  ;;  %v187_v49 = vmul.f32 %v184_v47, %v175_v38 }
 0x119   :  { %v188_v50 = vsub.f32 %v186_v48, %v187_v49 }
 0x11b   :  { %189 = vst.msk [vmem:[%s307_s4 + $0x1] sm:$0x1] %vm146_vm1, %v188_v50 }

// kernel: closed_call.290
= control target key start
LH: loop header
LB: loop body
LE: loop exit
PB: predicated region body
PF: predicated region fallthrough
CT: control target
= control target key end

     0   :  { %v72_v13 = vmov 0.0   ;;  %s135_s0 = inlined_call_operand.vmem [shape: f32[2,128], index: 0, kind: input, shape index: {}]   ;;  %s136_s1 = inlined_call_operand.vmem [shape: f32[2,128], index: 1, kind: input, shape index: {}]   ;;  %s137_s2 = inlined_call_operand.vmem [shape: f32[2,128], index: 2, kind: input, shape index: {}]   ;;  %s138_s3 = inlined_call_operand.vmem [shape: f32[2,128], index: 3, kind: input, shape index: {}]   ;;  %s139_s4 = inlined_call_operand.vmem [shape: f32[2,128], index: 4, kind: input, shape index: {}, may-alias: {4,6}]   ;;  %s140_s6 = inlined_call_operand.vmem [shape: f32[2,128], index: 6, kind: output, shape index: {1}, may-alias: {4,6}]   ;;  %s141_s5 = inlined_call_operand.vmem [shape: bf16[2,128], index: 5, kind: output, shape index: {0}]  }
   0x1   :  { %v22_v0 = vld [vmem:[%s135_s0] sm:$0x3] }
   0x2   :  { %v66_v1 = vld [vmem:[%s136_s1] ss:$0 sm:$0xff]  ;;  %v67_v2 = vld [vmem:[%s136_s1 + $0x1] ss:$0 sm:$0xff] }
   0x3   :  { %v28_v3 = vmul.f32 %v66_v1, %v22_v0  ;;  %v35_v4 = vld [vmem:[%s137_s2] sm:$0x3] }
   0x4   :  { %v68_v5 = vld [vmem:[%s138_s3] ss:$0 sm:$0xff]  ;;  %v69_v6 = vld [vmem:[%s138_s3 + $0x1] ss:$0 sm:$0xff] }
   0x5   :  { %v41_v7 = vmul.f32 %v68_v5, %v35_v4  ;;  %v48_v8 = vld [vmem:[%s139_s4] sm:$0x3]  ;;  %v34_v9 = vadd.f32 %v67_v2, %v28_v3 }
   0x7   :  { %v47_v10 = vadd.f32 %v69_v6, %v41_v7  ;;  %v49_v11 = vadd.f32 %v48_v8, %v34_v9 }
   0x9   :  { %v50_v12 = vadd.f32 %v49_v11, %v47_v10 }
   0xb   :  { %vm51_vm0 = vcmp.ge.f32.partialorder %v50_v12, 1.0 }
   0xc   :  { %v70_v14 = vsel %vm51_vm0, 1.0, %v72_v13  ;;  %v56_v15 = vsel %vm51_vm0, 0.0, %v50_v12 }
   0xd   :  { %v54_v16 = vpack.c.bf16 %v70_v14, %v70_v14  ;;  %57 = vst [vmem:[%s140_s6] sm:$0x3] %v56_v15 }
   0xf   :  { %55 = vst [vmem:[%s141_s5] sm:$0x1] %v54_v16 }

// kernel: closed_call.286
= control target key start
LH: loop header
LB: loop body
LE: loop exit
PB: predicated region body
PF: predicated region fallthrough
CT: control target
= control target key end

     0   :  { %vm262_vm0 = vcmask 253952   ;;  %v394_v1 = vmov 0.0   ;;  %vm395_vm1 = vmmov 0   ;;  %vm173_vm2 = vcmask 261120   ;;  %s506_s1 = inlined_call_operand.vmem [shape: bf16[288,32], index: 1, kind: input, shape index: {}]   ;;  %s507_s0 = inlined_call_operand.vmem [shape: bf16[8,288], index: 0, kind: input, shape index: {}]   ;;  %s508_s3 = inlined_call_operand.vmem [shape: f32[8,32], index: 3, kind: output, shape index: {0}]   ;;  %s509_s2 = inlined_call_operand.vmem [shape: f32[2,32], index: 2, kind: input, shape index: {}]   ;;  %s510_s4 = inlined_call_operand.vmem [shape: f32[2,32], index: 4, kind: output, shape index: {1}]  }
   0x1   :  { %v371_v0 = vld [vmem:[%s506_s1 + $0x78] sm:$0xff]   ;;  %361 = vmatprep.subr.bf16.mxu1 %v394_v1  ;;  %263 = vst.msk [vmem:[#allocation2] sm:$0x1] %vm262_vm0, %v394_v1  ;;  %264 = vst.msk [vmem:[#allocation3] sm:$0x1] %vm262_vm0, %v394_v1  ;;  %365 = vmatprep.mubr.msk.bf16.mxu1 %vm395_vm1, %v394_v1  ;;  %v373_v3 = vld [vmem:[%s506_s1 + $0x70] sm:$0xff]  }
   0x2   :  { %v372_v2 = vld [vmem:[%s506_s1 + $0x38] sm:$0xff]   ;;  %336 = vmatprep.subr.bf16.mxu0 %v371_v0  ;;  %v374_v4 = vld [vmem:[%s506_s1 + $0x30] sm:$0xff]   ;;  %v375_v5 = vld [vmem:[%s506_s1 + $0x68] sm:$0xff]  }
   0x3   :  { %337 = vmatpush3.bf16.msra.mxu0 %v372_v2  ;;  %v376_v6 = vld [vmem:[%s506_s1 + $0x28] sm:$0xff]   ;;  %v377_v7 = vld [vmem:[%s506_s1 + $0x60] sm:$0xff]   ;;  %v379_v9 = vld [vmem:[%s506_s1 + $0x58] sm:$0xff]  }
   0x4   :  { %338 = vmatprep.subr.bf16.mxu0 %v373_v3  ;;  %v378_v8 = vld [vmem:[%s506_s1 + $0x20] sm:$0xff]   ;;  %v383_v10 = vld [vmem:[%s506_s1 + $0x88] sm:$0xff]   ;;  %v380_v11 = vld [vmem:[%s506_s1 + $0x18] sm:$0xff]  }
   0x5   :  { %362 = vmatpush3.bf16.msra.mxu1 %v383_v10  ;;  %v386_v12 = vld [vmem:[%s506_s1 + $0x80] sm:$0xff]   ;;  %v381_v13 = vld [vmem:[%s506_s1 + $0x50] sm:$0xff]   ;;  %v389_v14 = vld [vmem:[%s507_s0 + $0x8] ss:$0 sps:$4 sm:$0xff]  }
   0x6   :  { %363 = vmatprep.subr.bf16.mxu1 %v394_v1  ;;  %v17_v15 = vld [vmem:[%s507_s0] sm:$0xff]  ;;  %v382_v16 = vld [vmem:[%s506_s1 + $0x10] sm:$0xff]   ;;  %v384_v18 = vld [vmem:[%s506_s1 + $0x48] sm:$0xff]  }
   0x7   :  { %339 = vmatpush3.bf16.msra.mxu0 %v374_v4  ;;  %v315_v17 = vcombine.high %v17_v15, %v17_v15  ;;  %v385_v19 = vld [vmem:[%s506_s1 + $0x8] sm:$0xff]   ;;  %v387_v20 = vld [vmem:[%s506_s1 + $0x40] sm:$0xff]   ;;  %v314_v22 = vcombine.low %v17_v15, %v17_v15 }
   0x8   :  { %340 = vmatprep.subr.bf16.mxu0 %v375_v5  ;;  %v388_v21 = vld [vmem:[%s506_s1] sm:$0xff]  }
   0x9   :  { %364 = vmatpush3.bf16.msra.mxu1 %v386_v12  ;;  %209 = vmatprep.mubr.bf16.mxu0 %v315_v17  ;;  %v265_v45 = vld [vmem:[#allocation2] sm:$0x1]  ;;  %v276_v48 = vld [vmem:[#allocation3] sm:$0x1] }
   0xa   :  { %v297_v60 = vld [vmem:[%s509_s2] sm:$0x1]  ;;  %v302_v63 = vld [vmem:[%s509_s2 + $0x1] sm:$0x1] }
   0xb   :  { %341 = vmatpush3.bf16.msra.mxu0 %v376_v6 }
   0xc   :  { %342 = vmatprep.subr.bf16.mxu0 %v377_v7  ;;  %366 = vmatmul.mubr.msk.bf16.vlgmr.msra.gmra.mxu1 %vm173_vm2, %v389_v14 }
   0xf   :  { %343 = vmatpush3.bf16.msra.mxu0 %v378_v8 }
  0x10   :  { %344 = vmatprep.subr.bf16.mxu0 %v379_v9 }
  0x13   :  { %345 = vmatpush3.bf16.msra.mxu0 %v380_v11 }
  0x14   :  { %346 = vmatprep.subr.bf16.mxu0 %v381_v13 }
  0x17   :  { %347 = vmatpush3.bf16.msra.mxu0 %v382_v16 }
  0x18   :  { %348 = vmatprep.subr.bf16.mxu0 %v384_v18 }
  0x1b   :  { %349 = vmatpush3.bf16.msra.mxu0 %v385_v19 }
  0x1c   :  { %350 = vmatprep.subr.bf16.mxu0 %v387_v20 }
  0x1f   :  { %351 = vmatpush3.bf16.msra.mxu0 %v388_v21 }
  0x22   :  { %210 = vmatmul.mubr.bf16.vlgmr.msra.gmra.mxu0 %v314_v22 }
  0xcc   :  { %v251_v23 = vpop.f32.mrf.mxu1 }
  0xce   :  { %v367_v24 = vpop.f32.mrf.mxu1 }
  0xd0   :  { %v254_v25 = vpop.f32.mrf.mxu1 }
  0xd2   :  { %v368_v26 = vpop.f32.mrf.mxu1 }
  0xe2   :  { %v352_v27 = vpop.f32.mrf.mxu0 }
  0xe4   :  { %v353_v28 = vpop.f32.mrf.mxu0 }
  0xe5   :  { %v354_v29 = vadd.f32 %v353_v28, %v352_v27 }
  0xe6   :  { %v355_v30 = vpop.f32.mrf.mxu0 }
  0xe7   :  { %v252_v31 = vadd.f32 %v354_v29, %v251_v23 }
  0xe8   :  { %v356_v32 = vpop.f32.mrf.mxu0 }
  0xe9   :  { %257 = vst.msk [vmem:[%s508_s3] sm:$0xff] %vm173_vm2, %v252_v31  ;;  %v266_v33 = vsel %vm173_vm2, %v252_v31, 0.0  ;;  %v277_v34 = vmul.f32 %v252_v31, %v252_v31 }
  0xea   :  { %v267_v35 = vrot.slane %v266_v33, 4 }
  0xeb   :  { %v278_v36 = vsel %vm173_vm2, %v277_v34, 0.0 }
  0xec   :  { %v268_v37 = vadd.f32 %v267_v35, %v266_v33  ;;  %v279_v38 = vrot.slane %v278_v36, 4 }
  0xee   :  { %v269_v39 = vrot.slane %v268_v37, 2  ;;  %v280_v40 = vadd.f32 %v279_v38, %v278_v36 }
  0xf0   :  { %v270_v41 = vadd.f32 %v269_v39, %v268_v37  ;;  %v281_v42 = vrot.slane %v280_v40, 2 }
  0xf2   :  { %v271_v43 = vrot.slane %v270_v41, 1  ;;  %v282_v44 = vadd.f32 %v281_v42, %v280_v40 }
  0xf4   :  { %v272_v46 = vadd.f32 %v271_v43, %v270_v41  ;;  %v283_v47 = vrot.slane %v282_v44, 1 }
  0xf6   :  { %v273_v49 = vadd.f32 %v272_v46, %v265_v45  ;;  %v284_v50 = vadd.f32 %v283_v47, %v282_v44 }
  0xf8   :  { %275 = vst.msk [vmem:[#allocation2] sm:$0x1] %vm262_vm0, %v273_v49  ;;  %v285_v51 = vadd.f32 %v284_v50, %v276_v48 }
  0xfa   :  { %286 = vst.msk [vmem:[#allocation3] sm:$0x1] %vm262_vm0, %v285_v51 }
  0xff   :  { %v290_v52 = vld [vmem:[#allocation2] sm:$0x1] }
 0x100   :  { %v291_v53 = vmul.f32 0.125, %v290_v52 }
 0x101   :  { %v292_v54 = vld [vmem:[#allocation3] sm:$0x1] }
 0x102   :  { %v293_v55 = vmul.f32 0.125, %v292_v54  ;;  %v294_v56 = vmul.f32 %v291_v53, %v291_v53 }
 0x104   :  { %v295_v57 = vsub.f32 %v293_v55, %v294_v56 }
 0x106   :  { %v296_v58 = vmax.f32 %v295_v57, 0.0 }
 0x108   :  { %v298_v59 = vadd.f32 1e-05, %v296_v58 }
 0x10a   :  { %392 = vrsqrt.f32 %v298_v59 }
 0x117   :  { %v393_v61 = vpop.eup %392 }
 0x118   :  { %v300_v62 = vmul.f32 %v393_v61, %v297_v60 }
 0x11a   :  { %301 = vst.msk [vmem:[%s510_s4] sm:$0x1] %vm262_vm0, %v300_v62  ;;  %v303_v0 = vmul.f32 %v300_v62, %v291_v53 }
 0x11c   :  { %v304_v1 = vsub.f32 %v302_v63, %v303_v0 }
 0x11e   :  { %305 = vst.msk [vmem:[%s510_s4 + $0x1] sm:$0x1] %vm262_vm0, %v304_v1 }

// kernel: closed_call.291
= control target key start
LH: loop header
LB: loop body
LE: loop exit
PB: predicated region body
PF: predicated region fallthrough
CT: control target
= control target key end

     0   :  { %s38_s14 = smov 96   ;;  %vm24_vm0 = vcmask 253952   ;;  %vm25_vm1 = vsmask.f32 256  ;;  %s73_s0 = inlined_call_operand.vmem [shape: bf16[2,2,1,64], index: 0, kind: input, shape index: {}]   ;;  %s74_s1 = inlined_call_operand.vmem [shape: bf16[2,1,32], index: 1, kind: output, shape index: {}]  }
   0x1   :  { %v8_v0 = vld [vmem:[%s73_s0] sm:$0x1]  ;;  %v9_v1 = vld [vmem:[%s73_s0 + $0x1] sm:$0x1]  ;;  %v10_v2 = vld [vmem:[%s73_s0 + $0x2] sm:$0x1] }
   0x2   :  { %v12_v3 = vmax.bf16 %v9_v1, %v8_v0  ;;  %v11_v4 = vld [vmem:[%s73_s0 + $0x3] sm:$0x1]  ;;  %vm26_vm2 = vmand %vm24_vm0, %vm25_vm1  ;;  %v27_v6 = vld [vmem:[%s74_s1] sm:$0x1] }
   0x3   :  { %v13_v5 = vmax.bf16 %v11_v4, %v10_v2  ;;  %v30_v10 = vld [vmem:[%s74_s1 + $0x1] sm:$0x1] }
   0x4   :  { %16 = vrot.lane.b32.xlu0 %v12_v3, %s38_s14 }
   0x8   :  { %18 = vrot.lane.b32.xlu0 %v13_v5, %s38_s14 }
  0x76   :  { %v17_v7 = vpop.permute.xlu0 %16 }
  0x77   :  { %v22_v8 = vmax.bf16 %v17_v7, %v12_v3 }
  0x79   :  { %v28_v9 = vsel %vm26_vm2, %v22_v8, %v27_v6 }
  0x7a   :  { %29 = vst [vmem:[%s74_s1] sm:$0x1] %v28_v9  ;;  %v19_v11 = vpop.permute.xlu0 %18 }
  0x7b   :  { %v23_v12 = vmax.bf16 %v19_v11, %v13_v5 }
  0x7d   :  { %v31_v13 = vsel %vm26_vm2, %v23_v12, %v30_v10 }
  0x7e   :  { %32 = vst [vmem:[%s74_s1 + $0x1] sm:$0x1] %v31_v13 }

</bundles_post_ra>
